<compile_context>
chip_gen: v6e
topology: v6e:2x2x1
jax: 0.10.0
libtpu: 0.0.40
codegen_flags: <defaults>
</compile_context>

<pallas_src>
import functools

import numpy as np
import jax
import jax.numpy as jnp
from jax import lax
from jax.experimental import pallas as pl
from jax.experimental.pallas import tpu as pltpu


def _query_and_group_kernel(src_ref, nct8_ref, out_ref, *,
                            radius, nsample, group, use_xyz, has_features):
    src = src_ref[0]            # (CF_in, N) f32: rows 0..2 = x,y,z ; 3..7 zero ; 8.. = features
    nct8 = nct8_ref[0]          # (8, TP)   centroid tile, rows 3..7 zero pad
    N = src.shape[1]
    TP = nct8.shape[1]

    cent = nct8.T               # (TP, 8)  one small XLU transpose

    # --- pairwise squared distances (TP, N), coordinate by coordinate (VPU) ---
    d2 = jnp.zeros((TP, N), jnp.float32)
    for k in range(3):
        diff = cent[:, k:k + 1] - src[k:k + 1, :]              # (TP, N)
        d2 = d2 + diff * diff

    r2 = jnp.float32(radius * radius)
    found = d2 < r2                                            # strict '<' like the CUDA kernel
    found_f = found.astype(jnp.float32)

    # --- inclusive in-ball rank along N: per-128-lane-chunk MXU triangular matmul, ---
    # --- cross-chunk carries as a running (TP,1) column (counts exact in f32).     ---
    row = lax.broadcasted_iota(jnp.int32, (128, 128), 0)
    col = lax.broadcasted_iota(jnp.int32, (128, 128), 1)
    tri = (row <= col).astype(jnp.bfloat16)                    # T[k,i]=1 iff k<=i (inclusive prefix)
    nchunks = N // 128
    parts = []
    carry = jnp.zeros((TP, 1), jnp.float32)
    for c in range(nchunks):
        fc = found[:, c * 128:(c + 1) * 128].astype(jnp.bfloat16)
        incl_c = jnp.dot(fc, tri, preferred_element_type=jnp.float32) + carry
        carry = incl_c[:, 127:128]
        parts.append(incl_c)
    incl = parts[0] if nchunks == 1 else jnp.concatenate(parts, axis=1)   # (TP, N)
    order = incl - found_f                                     # exclusive in-ball rank (exact ints)
    total = carry                                              # (TP, 1) number of in-ball points

    n_iota = lax.broadcasted_iota(jnp.int32, (TP, N), 1)
    zero_fill = (total == 0.0) & (n_iota == 0)                 # nothing found -> index 0

    # --- gather source & hoisted 3-term bf16 decomposition (exact-to-~f32, done once) ---
    gsrc = src if use_xyz else src[8:, :]                      # (CF_out, N)
    g_hi = gsrc.astype(jnp.bfloat16)
    r1 = gsrc - g_hi.astype(jnp.float32)
    g_mid = r1.astype(jnp.bfloat16)
    r2_ = r1 - g_mid.astype(jnp.float32)
    g_lo = r2_.astype(jnp.bfloat16)
    # TODO(synk): if ~16-bit feature mantissa suffices, restrict the g_lo pass to the 8 xyz rows.

    G = group
    n_groups = nsample // G

    def group_body(gi, carry_unused):
        s0 = gi * G

        # G one-hot selectors (exactly one 1 per row), stacked to (G*TP, N) in bf16.
        ohs = []
        for g in range(G):
            s_f = (s0 + g).astype(jnp.float32)
            t_s = jnp.where(total > s_f, s_f, 0.0)             # rank s, or repeat the first in-ball point
            ohs.append(((found & (order == t_s)) | zero_fill).astype(jnp.bfloat16))
        onehot = ohs[0] if G == 1 else jnp.concatenate(ohs, axis=0)   # (G*TP, N)

        # Fused gather via MXU: 3 bf16 passes accumulated in f32 (one-hot exactly 0/1).
        gat = jnp.einsum('cn,qn->cq', g_hi, onehot, preferred_element_type=jnp.float32)
        gat = gat + jnp.einsum('cn,qn->cq', g_mid, onehot, preferred_element_type=jnp.float32)
        gat = gat + jnp.einsum('cn,qn->cq', g_lo, onehot, preferred_element_type=jnp.float32)
        # gat: (CF_out, G*TP)

        # Lane-dense, sublane-aligned stores.
        for g in range(G):
            s = s0 + g
            blk = gat[:, g * TP:(g + 1) * TP]
            if use_xyz:
                out_ref[0, s, 0:8, :] = blk[0:8, :] - nct8     # xyz - centroid (rows 3..7 are zero)
                if has_features:
                    out_ref[0, s, 8:, :] = blk[8:, :]
            else:
                out_ref[0, s, :, :] = blk
        return carry_unused

    # Wider unroll lets one-hot building (VPU) overlap the previous group's MXU passes.
    lax.fori_loop(0, n_groups, group_body, 0, unroll=min(4, n_groups))


def _default_vmem_limit_bytes():
    try:
        kind = jax.devices()[0].device_kind.lower()
    except Exception:
        kind = ""
    if "v5" in kind or "v6" in kind:
        return 100 * 1024 * 1024       # 128 MiB physical VMEM -> use most of it
    if "7" in kind:
        return 48 * 1024 * 1024        # v7x: 64 MiB physical per TensorCore
    return 32 * 1024 * 1024


def query_and_group(xyz, new_xyz, features=None, *, radius, nsample, use_xyz=True,
                    tile_p=128):
    if features is None:
        assert use_xyz, "Cannot have not features and not use xyz as a feature!"
    xyz = xyz.astype(jnp.float32)
    new_xyz = new_xyz.astype(jnp.float32)
    B, N, _ = xyz.shape
    P = new_xyz.shape[1]

    def _ceil_to(a, m):
        return -(-a // m) * m

    N_pad = _ceil_to(max(N, 1), 128)
    P_pad = _ceil_to(max(P, 1), tile_p)
    assert N_pad < (1 << 24), "in-ball ranks are carried exactly in f32 only for N < 2^24"

    # --- padding / layout glue (plain JAX, outside the kernel) ---
    xyz_t = jnp.transpose(xyz, (0, 2, 1))                               # (B, 3, N)
    xyz_t = jnp.pad(xyz_t, ((0, 0), (0, 0), (0, N_pad - N)),
                    constant_values=1e6)                                # pad points never in any ball
    xyz8_t = jnp.pad(xyz_t, ((0, 0), (0, 5), (0, 0)))                   # (B, 8, N_pad), rows 3..7 = 0

    nct8 = jnp.transpose(new_xyz, (0, 2, 1))                            # (B, 3, P)
    nct8 = jnp.pad(nct8, ((0, 0), (0, 5), (0, P_pad - P)))              # (B, 8, P_pad); pad centroids sliced off later

    if features is not None:
        feats = features.astype(jnp.float32)
        C = feats.shape[1]
        C_pad = _ceil_to(max(C, 1), 8)
        featp = jnp.pad(feats, ((0, 0), (0, C_pad - C), (0, N_pad - N)))
        src_hbm = jnp.concatenate([xyz8_t, featp], axis=1)              # fused (B, 8+Cp, N_pad) gather source
    else:
        C, C_pad = 0, 0
        src_hbm = xyz8_t                                                # (B, 8, N_pad)
    CF_in = src_hbm.shape[1]
    CF_out = CF_in if use_xyz else C_pad

    # Slot-group size: prefer 8 (fills the MXU streaming dim) while the (G*TP, N) bf16
    # one-hot stays bounded; fall back to 4/2/1.
    G = 1
    for g in (8, 4, 2):
        if nsample % g == 0 and g * tile_p * N_pad * 2 <= 8 * 1024 * 1024:
            G = g
            break

    kernel = functools.partial(_query_and_group_kernel,
                               radius=radius, nsample=nsample, group=G,
                               use_xyz=use_xyz, has_features=features is not None)

    # TODO(synk): for very large N (>=16K, esp. on v7x's 64 MiB VMEM) add an N-tiling inner
    # loop carrying the running in-ball count so the (TP, N) masks / bf16 terms stay bounded.
    def _call(single_buffer_resident):
        resident_kw = {"pipeline_mode": pl.Buffered(1)} if single_buffer_resident else {}
        grid_spec = pltpu.PrefetchScalarGridSpec(
            num_scalar_prefetch=0,
            grid=(B, P_pad // tile_p),
            in_specs=[
                # Resident along the inner P axis -> single-buffer to halve its VMEM cost.
                pl.BlockSpec((1, CF_in, N_pad), lambda b, pi: (b, 0, 0), **resident_kw),
                pl.BlockSpec((1, 8, tile_p), lambda b, pi: (b, 0, pi)),
            ],
            out_specs=pl.BlockSpec((1, nsample, CF_out, tile_p),
                                   lambda b, pi: (b, 0, 0, pi)),
        )
        return pl.pallas_call(
            kernel,
            out_shape=jax.ShapeDtypeStruct((B, nsample, CF_out, P_pad), jnp.float32),
            grid_spec=grid_spec,
            compiler_params=pltpu.CompilerParams(
                dimension_semantics=("parallel", "parallel"),
                vmem_limit_bytes=_default_vmem_limit_bytes()),
        )(src_hbm, nct8)

    try:
        out_int = _call(True)                 # with single-buffered resident source
    except Exception:
        out_int = _call(False)                # fallback if pipeline_mode=Buffered(1) unsupported

    # Slice padding / dead channel rows away BEFORE the transpose so the layout-fix
    # round-trip only moves real data.
    # TODO(synk): downstream consumers could take the (B, S, CF, P) layout directly and
    # skip this transpose entirely.
    if features is None:
        return jnp.transpose(out_int[:, :, 0:3, :P], (0, 2, 3, 1))      # (B, 3, P, S)
    if use_xyz:
        gx = jnp.transpose(out_int[:, :, 0:3, :P], (0, 2, 3, 1))        # (B, 3, P, S)
        gf = jnp.transpose(out_int[:, :, 8:8 + C, :P], (0, 2, 3, 1))    # (B, C, P, S)
        return jnp.concatenate([gx, gf], axis=1)
    return jnp.transpose(out_int[:, :, 0:C, :P], (0, 2, 3, 1))          # (B, C, P, S)


def _reference(xyz, new_xyz, features, radius, nsample):
    """NumPy re-implementation of BallQuery + GroupingOperation + QueryAndGroup.forward."""
    B, N, _ = xyz.shape
    P = new_xyz.shape[1]
    C = features.shape[1]
    r2 = np.float32(radius * radius)
    idx = np.zeros((B, P, nsample), dtype=np.int64)
    for b in range(B):
        for p in range(P):
            cnt = 0
            for n in range(N):
                d2 = np.float32(0.0)
                for k in range(3):
                    diff = new_xyz[b, p, k] - xyz[b, n, k]
                    d2 = d2 + diff * diff
                if d2 < r2:
                    if cnt == 0:
                        idx[b, p, :] = n
                    idx[b, p, cnt] = n
                    cnt += 1
                    if cnt >= nsample:
                        break
    out = np.zeros((B, 3 + C, P, nsample), np.float32)
    for b in range(B):
        for p in range(P):
            for s in range(nsample):
                j = idx[b, p, s]
                out[b, :3, p, s] = xyz[b, j] - new_xyz[b, p]
                out[b, 3:, p, s] = features[b, :, j]
    return out


if __name__ == "__main__":
    B, N, P, C, S = 2, 64, 16, 4, 8
    radius = 0.3

    key = jax.random.PRNGKey(0)
    k1, k2, k3 = jax.random.split(key, 3)
    xyz = jax.random.uniform(k1, (B, N, 3), dtype=jnp.float32)
    sel = jax.random.permutation(k2, N)[:P]          # centroids = subset of points (FPS stand-in)
    new_xyz = xyz[:, sel, :]
    features = jax.random.normal(k3, (B, C, N), dtype=jnp.float32)

    ref = _reference(np.asarray(xyz), np.asarray(new_xyz), np.asarray(features), radius, S)

    # use_xyz=True with features (full QueryAndGroup output)
    out = query_and_group(xyz, new_xyz, features, radius=radius, nsample=S, use_xyz=True)
    out = jax.block_until_ready(out)
    np.testing.assert_allclose(np.asarray(out), ref, rtol=1e-5, atol=1e-5)

    # features=None (grouped_xyz only)
    out_xyz = query_and_group(xyz, new_xyz, None, radius=radius, nsample=S, use_xyz=True)
    out_xyz = jax.block_until_ready(out_xyz)
    np.testing.assert_allclose(np.asarray(out_xyz), ref[:, :3], rtol=1e-5, atol=1e-5)

    # use_xyz=False (grouped features only)
    out_feat = query_and_group(xyz, new_xyz, features, radius=radius, nsample=S, use_xyz=False)
    out_feat = jax.block_until_ready(out_feat)
    np.testing.assert_allclose(np.asarray(out_feat), ref[:, 3:], rtol=1e-5, atol=1e-5)

    print("KERNEL_OK")
</pallas_src>

<mosaic_0001>
module attributes {stable_mosaic.version = 11 : i64} {
  func.func @_query_and_group_kernel(%arg0: i32, %arg1: i32, %arg2: memref<1x16x128xf32, #tpu.memory_space<vmem>>, %arg3: memref<1x8x128xf32, #tpu.memory_space<vmem>>, %arg4: memref<1x8x16x128xf32, #tpu.memory_space<vmem>>) attributes {dimension_semantics = [#tpu.dimension_semantics<parallel>, #tpu.dimension_semantics<parallel>], iteration_bounds = array<i64: 2, 1>, scalar_prefetch = 0 : i64, scratch_operands = 0 : i64, tpu.core_type = #tpu.core_type<tc>, window_params = [{pipeline_mode = #tpu.pipeline_mode<synchronous>, transform_indices = @transform_0, window_bounds = array<i64: 1, 16, 128>}, {transform_indices = @transform_1, window_bounds = array<i64: 1, 8, 128>}, {transform_indices = @transform_2, window_bounds = array<i64: 1, 8, 16, 128>}]} {
    %c0 = arith.constant 0 : index
    %c0_0 = arith.constant 0 : index
    %c0_1 = arith.constant 0 : index
    %0 = vector.load %arg2[%c0, %c0_0, %c0_1] : memref<1x16x128xf32, #tpu.memory_space<vmem>>, vector<1x16x128xf32>
    %1 = vector.shape_cast %0 : vector<1x16x128xf32> to vector<16x128xf32>
    %c0_2 = arith.constant 0 : index
    %c0_3 = arith.constant 0 : index
    %c0_4 = arith.constant 0 : index
    %2 = vector.load %arg3[%c0_2, %c0_3, %c0_4] : memref<1x8x128xf32, #tpu.memory_space<vmem>>, vector<1x8x128xf32>
    %3 = vector.shape_cast %2 : vector<1x8x128xf32> to vector<8x128xf32>
    %4 = tpu.transpose %3, [1, 0] : vector<8x128xf32> -> vector<128x8xf32>
    %cst = arith.constant 0.000000e+00 : f32
    %5 = vector.broadcast %cst : f32 to vector<128x128xf32>
    %6 = vector.extract_strided_slice %4 {offsets = [0, 0], sizes = [128, 1], strides = [1, 1]} : vector<128x8xf32> to vector<128x1xf32>
    %7 = vector.extract_strided_slice %1 {offsets = [0, 0], sizes = [1, 128], strides = [1, 1]} : vector<16x128xf32> to vector<1x128xf32>
    %8 = vector.broadcast %6 : vector<128x1xf32> to vector<128x128xf32>
    %9 = vector.broadcast %7 : vector<1x128xf32> to vector<128x128xf32>
    %10 = arith.subf %8, %9 : vector<128x128xf32>
    %11 = arith.mulf %10, %10 : vector<128x128xf32>
    %12 = arith.addf %5, %11 : vector<128x128xf32>
    %13 = vector.extract_strided_slice %4 {offsets = [0, 1], sizes = [128, 1], strides = [1, 1]} : vector<128x8xf32> to vector<128x1xf32>
    %14 = vector.extract_strided_slice %1 {offsets = [1, 0], sizes = [1, 128], strides = [1, 1]} : vector<16x128xf32> to vector<1x128xf32>
    %15 = vector.broadcast %13 : vector<128x1xf32> to vector<128x128xf32>
    %16 = vector.broadcast %14 : vector<1x128xf32> to vector<128x128xf32>
    %17 = arith.subf %15, %16 : vector<128x128xf32>
    %18 = arith.mulf %17, %17 : vector<128x128xf32>
    %19 = arith.addf %12, %18 : vector<128x128xf32>
    %20 = vector.extract_strided_slice %4 {offsets = [0, 2], sizes = [128, 1], strides = [1, 1]} : vector<128x8xf32> to vector<128x1xf32>
    %21 = vector.extract_strided_slice %1 {offsets = [2, 0], sizes = [1, 128], strides = [1, 1]} : vector<16x128xf32> to vector<1x128xf32>
    %22 = vector.broadcast %20 : vector<128x1xf32> to vector<128x128xf32>
    %23 = vector.broadcast %21 : vector<1x128xf32> to vector<128x128xf32>
    %24 = arith.subf %22, %23 : vector<128x128xf32>
    %25 = arith.mulf %24, %24 : vector<128x128xf32>
    %26 = arith.addf %19, %25 : vector<128x128xf32>
    %cst_5 = arith.constant 9.000000e-02 : f32
    %27 = vector.broadcast %cst_5 : f32 to vector<128x128xf32>
    %28 = arith.cmpf olt, %26, %27 : vector<128x128xf32>
    %29 = arith.extui %28 : vector<128x128xi1> to vector<128x128xi32>
    %30 = arith.sitofp %29 : vector<128x128xi32> to vector<128x128xf32>
    %31 = tpu.iota {dimensions = array<i32: 0>} : vector<128x128xi32>
    %32 = tpu.iota {dimensions = array<i32: 1>} : vector<128x128xi32>
    %33 = arith.cmpi sle, %31, %32 : vector<128x128xi32>
    %34 = arith.extui %33 : vector<128x128xi1> to vector<128x128xi32>
    %35 = arith.sitofp %34 : vector<128x128xi32> to vector<128x128xf32>
    %36 = arith.truncf %35 : vector<128x128xf32> to vector<128x128xbf16>
    %cst_6 = arith.constant 0.000000e+00 : f32
    %37 = vector.broadcast %cst_6 : f32 to vector<128x1xf32>
    %38 = arith.extui %28 : vector<128x128xi1> to vector<128x128xi32>
    %39 = arith.sitofp %38 : vector<128x128xi32> to vector<128x128xf32>
    %40 = arith.truncf %39 : vector<128x128xf32> to vector<128x128xbf16>
    %cst_7 = arith.constant dense<0.000000e+00> : vector<128x128xf32>
    %41 = tpu.matmul %40, %36, %cst_7 {dimension_numbers = #tpu.dot_dimension_numbers<[1], [0], [0], [1], [0, 0, 1, 1], [], []>} : vector<128x128xbf16>, vector<128x128xbf16>, vector<128x128xf32> -> vector<128x128xf32>
    %42 = vector.broadcast %37 : vector<128x1xf32> to vector<128x128xf32>
    %43 = arith.addf %41, %42 : vector<128x128xf32>
    %44 = vector.extract_strided_slice %43 {offsets = [0, 127], sizes = [128, 1], strides = [1, 1]} : vector<128x128xf32> to vector<128x1xf32>
    %45 = arith.subf %43, %30 : vector<128x128xf32>
    %46 = tpu.iota {dimensions = array<i32: 1>} : vector<128x128xi32>
    %cst_8 = arith.constant 0.000000e+00 : f32
    %47 = vector.broadcast %cst_8 : f32 to vector<128x1xf32>
    %48 = arith.cmpf oeq, %44, %47 : vector<128x1xf32>
    %c0_i32 = arith.constant 0 : i32
    %49 = vector.broadcast %c0_i32 : i32 to vector<128x128xi32>
    %50 = arith.cmpi eq, %46, %49 : vector<128x128xi32>
    %51 = vector.broadcast %48 : vector<128x1xi1> to vector<128x128xi1>
    %52 = arith.andi %51, %50 : vector<128x128xi1>
    %53 = arith.truncf %1 : vector<16x128xf32> to vector<16x128xbf16>
    %54 = arith.extf %53 : vector<16x128xbf16> to vector<16x128xf32>
    %55 = arith.subf %1, %54 : vector<16x128xf32>
    %56 = arith.truncf %55 : vector<16x128xf32> to vector<16x128xbf16>
    %57 = arith.extf %56 : vector<16x128xbf16> to vector<16x128xf32>
    %58 = arith.subf %55, %57 : vector<16x128xf32>
    %59 = arith.truncf %58 : vector<16x128xf32> to vector<16x128xbf16>
    %c0_i32_9 = arith.constant 0 : i32
    %c8_i32 = arith.constant 8 : i32
    %60 = arith.muli %c0_i32_9, %c8_i32 : i32
    %c0_i32_10 = arith.constant 0 : i32
    %61 = arith.addi %60, %c0_i32_10 : i32
    %62 = arith.sitofp %61 : i32 to f32
    %63 = vector.broadcast %62 : f32 to vector<128x1xf32>
    %64 = arith.cmpf ogt, %44, %63 : vector<128x1xf32>
    %cst_11 = arith.constant 0.000000e+00 : f32
    %65 = vector.broadcast %62 : f32 to vector<128x1xf32>
    %66 = vector.broadcast %cst_11 : f32 to vector<128x1xf32>
    %67 = arith.select %64, %65, %66 : vector<128x1xi1>, vector<128x1xf32>
    %68 = vector.broadcast %67 : vector<128x1xf32> to vector<128x128xf32>
    %69 = arith.cmpf oeq, %45, %68 : vector<128x128xf32>
    %70 = arith.andi %28, %69 : vector<128x128xi1>
    %71 = arith.ori %70, %52 : vector<128x128xi1>
    %72 = arith.extui %71 : vector<128x128xi1> to vector<128x128xi32>
    %73 = arith.sitofp %72 : vector<128x128xi32> to vector<128x128xf32>
    %74 = arith.truncf %73 : vector<128x128xf32> to vector<128x128xbf16>
    %c1_i32 = arith.constant 1 : i32
    %75 = arith.addi %60, %c1_i32 : i32
    %76 = arith.sitofp %75 : i32 to f32
    %77 = vector.broadcast %76 : f32 to vector<128x1xf32>
    %78 = arith.cmpf ogt, %44, %77 : vector<128x1xf32>
    %cst_12 = arith.constant 0.000000e+00 : f32
    %79 = vector.broadcast %76 : f32 to vector<128x1xf32>
    %80 = vector.broadcast %cst_12 : f32 to vector<128x1xf32>
    %81 = arith.select %78, %79, %80 : vector<128x1xi1>, vector<128x1xf32>
    %82 = vector.broadcast %81 : vector<128x1xf32> to vector<128x128xf32>
    %83 = arith.cmpf oeq, %45, %82 : vector<128x128xf32>
    %84 = arith.andi %28, %83 : vector<128x128xi1>
    %85 = arith.ori %84, %52 : vector<128x128xi1>
    %86 = arith.extui %85 : vector<128x128xi1> to vector<128x128xi32>
    %87 = arith.sitofp %86 : vector<128x128xi32> to vector<128x128xf32>
    %88 = arith.truncf %87 : vector<128x128xf32> to vector<128x128xbf16>
    %c2_i32 = arith.constant 2 : i32
    %89 = arith.addi %60, %c2_i32 : i32
    %90 = arith.sitofp %89 : i32 to f32
    %91 = vector.broadcast %90 : f32 to vector<128x1xf32>
    %92 = arith.cmpf ogt, %44, %91 : vector<128x1xf32>
    %cst_13 = arith.constant 0.000000e+00 : f32
    %93 = vector.broadcast %90 : f32 to vector<128x1xf32>
    %94 = vector.broadcast %cst_13 : f32 to vector<128x1xf32>
    %95 = arith.select %92, %93, %94 : vector<128x1xi1>, vector<128x1xf32>
    %96 = vector.broadcast %95 : vector<128x1xf32> to vector<128x128xf32>
    %97 = arith.cmpf oeq, %45, %96 : vector<128x128xf32>
    %98 = arith.andi %28, %97 : vector<128x128xi1>
    %99 = arith.ori %98, %52 : vector<128x128xi1>
    %100 = arith.extui %99 : vector<128x128xi1> to vector<128x128xi32>
    %101 = arith.sitofp %100 : vector<128x128xi32> to vector<128x128xf32>
    %102 = arith.truncf %101 : vector<128x128xf32> to vector<128x128xbf16>
    %c3_i32 = arith.constant 3 : i32
    %103 = arith.addi %60, %c3_i32 : i32
    %104 = arith.sitofp %103 : i32 to f32
    %105 = vector.broadcast %104 : f32 to vector<128x1xf32>
    %106 = arith.cmpf ogt, %44, %105 : vector<128x1xf32>
    %cst_14 = arith.constant 0.000000e+00 : f32
    %107 = vector.broadcast %104 : f32 to vector<128x1xf32>
    %108 = vector.broadcast %cst_14 : f32 to vector<128x1xf32>
    %109 = arith.select %106, %107, %108 : vector<128x1xi1>, vector<128x1xf32>
    %110 = vector.broadcast %109 : vector<128x1xf32> to vector<128x128xf32>
    %111 = arith.cmpf oeq, %45, %110 : vector<128x128xf32>
    %112 = arith.andi %28, %111 : vector<128x128xi1>
    %113 = arith.ori %112, %52 : vector<128x128xi1>
    %114 = arith.extui %113 : vector<128x128xi1> to vector<128x128xi32>
    %115 = arith.sitofp %114 : vector<128x128xi32> to vector<128x128xf32>
    %116 = arith.truncf %115 : vector<128x128xf32> to vector<128x128xbf16>
    %c4_i32 = arith.constant 4 : i32
    %117 = arith.addi %60, %c4_i32 : i32
    %118 = arith.sitofp %117 : i32 to f32
    %119 = vector.broadcast %118 : f32 to vector<128x1xf32>
    %120 = arith.cmpf ogt, %44, %119 : vector<128x1xf32>
    %cst_15 = arith.constant 0.000000e+00 : f32
    %121 = vector.broadcast %118 : f32 to vector<128x1xf32>
    %122 = vector.broadcast %cst_15 : f32 to vector<128x1xf32>
    %123 = arith.select %120, %121, %122 : vector<128x1xi1>, vector<128x1xf32>
    %124 = vector.broadcast %123 : vector<128x1xf32> to vector<128x128xf32>
    %125 = arith.cmpf oeq, %45, %124 : vector<128x128xf32>
    %126 = arith.andi %28, %125 : vector<128x128xi1>
    %127 = arith.ori %126, %52 : vector<128x128xi1>
    %128 = arith.extui %127 : vector<128x128xi1> to vector<128x128xi32>
    %129 = arith.sitofp %128 : vector<128x128xi32> to vector<128x128xf32>
    %130 = arith.truncf %129 : vector<128x128xf32> to vector<128x128xbf16>
    %c5_i32 = arith.constant 5 : i32
    %131 = arith.addi %60, %c5_i32 : i32
    %132 = arith.sitofp %131 : i32 to f32
    %133 = vector.broadcast %132 : f32 to vector<128x1xf32>
    %134 = arith.cmpf ogt, %44, %133 : vector<128x1xf32>
    %cst_16 = arith.constant 0.000000e+00 : f32
    %135 = vector.broadcast %132 : f32 to vector<128x1xf32>
    %136 = vector.broadcast %cst_16 : f32 to vector<128x1xf32>
    %137 = arith.select %134, %135, %136 : vector<128x1xi1>, vector<128x1xf32>
    %138 = vector.broadcast %137 : vector<128x1xf32> to vector<128x128xf32>
    %139 = arith.cmpf oeq, %45, %138 : vector<128x128xf32>
    %140 = arith.andi %28, %139 : vector<128x128xi1>
    %141 = arith.ori %140, %52 : vector<128x128xi1>
    %142 = arith.extui %141 : vector<128x128xi1> to vector<128x128xi32>
    %143 = arith.sitofp %142 : vector<128x128xi32> to vector<128x128xf32>
    %144 = arith.truncf %143 : vector<128x128xf32> to vector<128x128xbf16>
    %c6_i32 = arith.constant 6 : i32
    %145 = arith.addi %60, %c6_i32 : i32
    %146 = arith.sitofp %145 : i32 to f32
    %147 = vector.broadcast %146 : f32 to vector<128x1xf32>
    %148 = arith.cmpf ogt, %44, %147 : vector<128x1xf32>
    %cst_17 = arith.constant 0.000000e+00 : f32
    %149 = vector.broadcast %146 : f32 to vector<128x1xf32>
    %150 = vector.broadcast %cst_17 : f32 to vector<128x1xf32>
    %151 = arith.select %148, %149, %150 : vector<128x1xi1>, vector<128x1xf32>
    %152 = vector.broadcast %151 : vector<128x1xf32> to vector<128x128xf32>
    %153 = arith.cmpf oeq, %45, %152 : vector<128x128xf32>
    %154 = arith.andi %28, %153 : vector<128x128xi1>
    %155 = arith.ori %154, %52 : vector<128x128xi1>
    %156 = arith.extui %155 : vector<128x128xi1> to vector<128x128xi32>
    %157 = arith.sitofp %156 : vector<128x128xi32> to vector<128x128xf32>
    %158 = arith.truncf %157 : vector<128x128xf32> to vector<128x128xbf16>
    %c7_i32 = arith.constant 7 : i32
    %159 = arith.addi %60, %c7_i32 : i32
    %160 = arith.sitofp %159 : i32 to f32
    %161 = vector.broadcast %160 : f32 to vector<128x1xf32>
    %162 = arith.cmpf ogt, %44, %161 : vector<128x1xf32>
    %cst_18 = arith.constant 0.000000e+00 : f32
    %163 = vector.broadcast %160 : f32 to vector<128x1xf32>
    %164 = vector.broadcast %cst_18 : f32 to vector<128x1xf32>
    %165 = arith.select %162, %163, %164 : vector<128x1xi1>, vector<128x1xf32>
    %166 = vector.broadcast %165 : vector<128x1xf32> to vector<128x128xf32>
    %167 = arith.cmpf oeq, %45, %166 : vector<128x128xf32>
    %168 = arith.andi %28, %167 : vector<128x128xi1>
    %169 = arith.ori %168, %52 : vector<128x128xi1>
    %170 = arith.extui %169 : vector<128x128xi1> to vector<128x128xi32>
    %171 = arith.sitofp %170 : vector<128x128xi32> to vector<128x128xf32>
    %172 = arith.truncf %171 : vector<128x128xf32> to vector<128x128xbf16>
    %173 = tpu.concatenate %74, %88, %102, %116, %130, %144, %158, %172 in 0 : vector<128x128xbf16>, vector<128x128xbf16>, vector<128x128xbf16>, vector<128x128xbf16>, vector<128x128xbf16>, vector<128x128xbf16>, vector<128x128xbf16>, vector<128x128xbf16> -> vector<1024x128xbf16>
    "tpu.trace_start"() <{level = 10 : i32, message = "cn,qn->cq"}> : () -> ()
    %cst_19 = arith.constant dense<0.000000e+00> : vector<16x1024xf32>
    %174 = tpu.matmul %53, %173, %cst_19 {dimension_numbers = #tpu.dot_dimension_numbers<[1], [1], [0], [0], [0, 0, 1, 0], [], []>} : vector<16x128xbf16>, vector<1024x128xbf16>, vector<16x1024xf32> -> vector<16x1024xf32>
    %cst_20 = arith.constant dense<0.000000e+00> : vector<16x1024xf32>
    %175 = tpu.matmul %56, %173, %cst_20 {dimension_numbers = #tpu.dot_dimension_numbers<[1], [1], [0], [0], [0, 0, 1, 0], [], []>} : vector<16x128xbf16>, vector<1024x128xbf16>, vector<16x1024xf32> -> vector<16x1024xf32>
    "tpu.trace_stop"() : () -> ()
    %176 = arith.addf %174, %175 : vector<16x1024xf32>
    "tpu.trace_start"() <{level = 10 : i32, message = "cn,qn->cq"}> : () -> ()
    %cst_21 = arith.constant dense<0.000000e+00> : vector<16x1024xf32>
    %177 = tpu.matmul %59, %173, %cst_21 {dimension_numbers = #tpu.dot_dimension_numbers<[1], [1], [0], [0], [0, 0, 1, 0], [], []>} : vector<16x128xbf16>, vector<1024x128xbf16>, vector<16x1024xf32> -> vector<16x1024xf32>
    "tpu.trace_stop"() : () -> ()
    %178 = arith.addf %176, %177 : vector<16x1024xf32>
    %c0_i32_22 = arith.constant 0 : i32
    %179 = arith.addi %60, %c0_i32_22 : i32
    %180 = vector.extract_strided_slice %178 {offsets = [0, 0], sizes = [16, 128], strides = [1, 1]} : vector<16x1024xf32> to vector<16x128xf32>
    %181 = vector.extract_strided_slice %180 {offsets = [0, 0], sizes = [8, 128], strides = [1, 1]} : vector<16x128xf32> to vector<8x128xf32>
    %182 = arith.subf %181, %3 : vector<8x128xf32>
    %c0_23 = arith.constant 0 : index
    %183 = arith.index_cast %179 : i32 to index
    %c0_24 = arith.constant 0 : index
    %c0_25 = arith.constant 0 : index
    %184 = vector.load %arg4[%c0_23, %183, %c0_24, %c0_25] : memref<1x8x16x128xf32, #tpu.memory_space<vmem>>, vector<1x1x8x128xf32>
    %185 = vector.shape_cast %184 : vector<1x1x8x128xf32> to vector<8x128xf32>
    %186 = vector.shape_cast %182 : vector<8x128xf32> to vector<1x1x8x128xf32>
    tpu.vector_store %arg4[%c0_23, %183, %c0_24, %c0_25], %186 {strides = array<i32>} : memref<1x8x16x128xf32, #tpu.memory_space<vmem>>, vector<1x1x8x128xf32>,
    %187 = vector.extract_strided_slice %180 {offsets = [8, 0], sizes = [8, 128], strides = [1, 1]} : vector<16x128xf32> to vector<8x128xf32>
    %c0_26 = arith.constant 0 : index
    %188 = arith.index_cast %179 : i32 to index
    %c8 = arith.constant 8 : index
    %c0_27 = arith.constant 0 : index
    %189 = vector.load %arg4[%c0_26, %188, %c8, %c0_27] : memref<1x8x16x128xf32, #tpu.memory_space<vmem>>, vector<1x1x8x128xf32>
    %190 = vector.shape_cast %189 : vector<1x1x8x128xf32> to vector<8x128xf32>
    %191 = vector.shape_cast %187 : vector<8x128xf32> to vector<1x1x8x128xf32>
    tpu.vector_store %arg4[%c0_26, %188, %c8, %c0_27], %191 {strides = array<i32>} : memref<1x8x16x128xf32, #tpu.memory_space<vmem>>, vector<1x1x8x128xf32>,
    %c1_i32_28 = arith.constant 1 : i32
    %192 = arith.addi %60, %c1_i32_28 : i32
    %193 = vector.extract_strided_slice %178 {offsets = [0, 128], sizes = [16, 128], strides = [1, 1]} : vector<16x1024xf32> to vector<16x128xf32>
    %194 = vector.extract_strided_slice %193 {offsets = [0, 0], sizes = [8, 128], strides = [1, 1]} : vector<16x128xf32> to vector<8x128xf32>
    %195 = arith.subf %194, %3 : vector<8x128xf32>
    %c0_29 = arith.constant 0 : index
    %196 = arith.index_cast %192 : i32 to index
    %c0_30 = arith.constant 0 : index
    %c0_31 = arith.constant 0 : index
    %197 = vector.load %arg4[%c0_29, %196, %c0_30, %c0_31] : memref<1x8x16x128xf32, #tpu.memory_space<vmem>>, vector<1x1x8x128xf32>
    %198 = vector.shape_cast %197 : vector<1x1x8x128xf32> to vector<8x128xf32>
    %199 = vector.shape_cast %195 : vector<8x128xf32> to vector<1x1x8x128xf32>
    tpu.vector_store %arg4[%c0_29, %196, %c0_30, %c0_31], %199 {strides = array<i32>} : memref<1x8x16x128xf32, #tpu.memory_space<vmem>>, vector<1x1x8x128xf32>,
    %200 = vector.extract_strided_slice %193 {offsets = [8, 0], sizes = [8, 128], strides = [1, 1]} : vector<16x128xf32> to vector<8x128xf32>
    %c0_32 = arith.constant 0 : index
    %201 = arith.index_cast %192 : i32 to index
    %c8_33 = arith.constant 8 : index
    %c0_34 = arith.constant 0 : index
    %202 = vector.load %arg4[%c0_32, %201, %c8_33, %c0_34] : memref<1x8x16x128xf32, #tpu.memory_space<vmem>>, vector<1x1x8x128xf32>
    %203 = vector.shape_cast %202 : vector<1x1x8x128xf32> to vector<8x128xf32>
    %204 = vector.shape_cast %200 : vector<8x128xf32> to vector<1x1x8x128xf32>
    tpu.vector_store %arg4[%c0_32, %201, %c8_33, %c0_34], %204 {strides = array<i32>} : memref<1x8x16x128xf32, #tpu.memory_space<vmem>>, vector<1x1x8x128xf32>,
    %c2_i32_35 = arith.constant 2 : i32
    %205 = arith.addi %60, %c2_i32_35 : i32
    %206 = vector.extract_strided_slice %178 {offsets = [0, 256], sizes = [16, 128], strides = [1, 1]} : vector<16x1024xf32> to vector<16x128xf32>
    %207 = vector.extract_strided_slice %206 {offsets = [0, 0], sizes = [8, 128], strides = [1, 1]} : vector<16x128xf32> to vector<8x128xf32>
    %208 = arith.subf %207, %3 : vector<8x128xf32>
    %c0_36 = arith.constant 0 : index
    %209 = arith.index_cast %205 : i32 to index
    %c0_37 = arith.constant 0 : index
    %c0_38 = arith.constant 0 : index
    %210 = vector.load %arg4[%c0_36, %209, %c0_37, %c0_38] : memref<1x8x16x128xf32, #tpu.memory_space<vmem>>, vector<1x1x8x128xf32>
    %211 = vector.shape_cast %210 : vector<1x1x8x128xf32> to vector<8x128xf32>
    %212 = vector.shape_cast %208 : vector<8x128xf32> to vector<1x1x8x128xf32>
    tpu.vector_store %arg4[%c0_36, %209, %c0_37, %c0_38], %212 {strides = array<i32>} : memref<1x8x16x128xf32, #tpu.memory_space<vmem>>, vector<1x1x8x128xf32>,
    %213 = vector.extract_strided_slice %206 {offsets = [8, 0], sizes = [8, 128], strides = [1, 1]} : vector<16x128xf32> to vector<8x128xf32>
    %c0_39 = arith.constant 0 : index
    %214 = arith.index_cast %205 : i32 to index
    %c8_40 = arith.constant 8 : index
    %c0_41 = arith.constant 0 : index
    %215 = vector.load %arg4[%c0_39, %214, %c8_40, %c0_41] : memref<1x8x16x128xf32, #tpu.memory_space<vmem>>, vector<1x1x8x128xf32>
    %216 = vector.shape_cast %215 : vector<1x1x8x128xf32> to vector<8x128xf32>
    %217 = vector.shape_cast %213 : vector<8x128xf32> to vector<1x1x8x128xf32>
    tpu.vector_store %arg4[%c0_39, %214, %c8_40, %c0_41], %217 {strides = array<i32>} : memref<1x8x16x128xf32, #tpu.memory_space<vmem>>, vector<1x1x8x128xf32>,
    %c3_i32_42 = arith.constant 3 : i32
    %218 = arith.addi %60, %c3_i32_42 : i32
    %219 = vector.extract_strided_slice %178 {offsets = [0, 384], sizes = [16, 128], strides = [1, 1]} : vector<16x1024xf32> to vector<16x128xf32>
    %220 = vector.extract_strided_slice %219 {offsets = [0, 0], sizes = [8, 128], strides = [1, 1]} : vector<16x128xf32> to vector<8x128xf32>
    %221 = arith.subf %220, %3 : vector<8x128xf32>
    %c0_43 = arith.constant 0 : index
    %222 = arith.index_cast %218 : i32 to index
    %c0_44 = arith.constant 0 : index
    %c0_45 = arith.constant 0 : index
    %223 = vector.load %arg4[%c0_43, %222, %c0_44, %c0_45] : memref<1x8x16x128xf32, #tpu.memory_space<vmem>>, vector<1x1x8x128xf32>
    %224 = vector.shape_cast %223 : vector<1x1x8x128xf32> to vector<8x128xf32>
    %225 = vector.shape_cast %221 : vector<8x128xf32> to vector<1x1x8x128xf32>
    tpu.vector_store %arg4[%c0_43, %222, %c0_44, %c0_45], %225 {strides = array<i32>} : memref<1x8x16x128xf32, #tpu.memory_space<vmem>>, vector<1x1x8x128xf32>,
    %226 = vector.extract_strided_slice %219 {offsets = [8, 0], sizes = [8, 128], strides = [1, 1]} : vector<16x128xf32> to vector<8x128xf32>
    %c0_46 = arith.constant 0 : index
    %227 = arith.index_cast %218 : i32 to index
    %c8_47 = arith.constant 8 : index
    %c0_48 = arith.constant 0 : index
    %228 = vector.load %arg4[%c0_46, %227, %c8_47, %c0_48] : memref<1x8x16x128xf32, #tpu.memory_space<vmem>>, vector<1x1x8x128xf32>
    %229 = vector.shape_cast %228 : vector<1x1x8x128xf32> to vector<8x128xf32>
    %230 = vector.shape_cast %226 : vector<8x128xf32> to vector<1x1x8x128xf32>
    tpu.vector_store %arg4[%c0_46, %227, %c8_47, %c0_48], %230 {strides = array<i32>} : memref<1x8x16x128xf32, #tpu.memory_space<vmem>>, vector<1x1x8x128xf32>,
    %c4_i32_49 = arith.constant 4 : i32
    %231 = arith.addi %60, %c4_i32_49 : i32
    %232 = vector.extract_strided_slice %178 {offsets = [0, 512], sizes = [16, 128], strides = [1, 1]} : vector<16x1024xf32> to vector<16x128xf32>
    %233 = vector.extract_strided_slice %232 {offsets = [0, 0], sizes = [8, 128], strides = [1, 1]} : vector<16x128xf32> to vector<8x128xf32>
    %234 = arith.subf %233, %3 : vector<8x128xf32>
    %c0_50 = arith.constant 0 : index
    %235 = arith.index_cast %231 : i32 to index
    %c0_51 = arith.constant 0 : index
    %c0_52 = arith.constant 0 : index
    %236 = vector.load %arg4[%c0_50, %235, %c0_51, %c0_52] : memref<1x8x16x128xf32, #tpu.memory_space<vmem>>, vector<1x1x8x128xf32>
    %237 = vector.shape_cast %236 : vector<1x1x8x128xf32> to vector<8x128xf32>
    %238 = vector.shape_cast %234 : vector<8x128xf32> to vector<1x1x8x128xf32>
    tpu.vector_store %arg4[%c0_50, %235, %c0_51, %c0_52], %238 {strides = array<i32>} : memref<1x8x16x128xf32, #tpu.memory_space<vmem>>, vector<1x1x8x128xf32>,
    %239 = vector.extract_strided_slice %232 {offsets = [8, 0], sizes = [8, 128], strides = [1, 1]} : vector<16x128xf32> to vector<8x128xf32>
    %c0_53 = arith.constant 0 : index
    %240 = arith.index_cast %231 : i32 to index
    %c8_54 = arith.constant 8 : index
    %c0_55 = arith.constant 0 : index
    %241 = vector.load %arg4[%c0_53, %240, %c8_54, %c0_55] : memref<1x8x16x128xf32, #tpu.memory_space<vmem>>, vector<1x1x8x128xf32>
    %242 = vector.shape_cast %241 : vector<1x1x8x128xf32> to vector<8x128xf32>
    %243 = vector.shape_cast %239 : vector<8x128xf32> to vector<1x1x8x128xf32>
    tpu.vector_store %arg4[%c0_53, %240, %c8_54, %c0_55], %243 {strides = array<i32>} : memref<1x8x16x128xf32, #tpu.memory_space<vmem>>, vector<1x1x8x128xf32>,
    %c5_i32_56 = arith.constant 5 : i32
    %244 = arith.addi %60, %c5_i32_56 : i32
    %245 = vector.extract_strided_slice %178 {offsets = [0, 640], sizes = [16, 128], strides = [1, 1]} : vector<16x1024xf32> to vector<16x128xf32>
    %246 = vector.extract_strided_slice %245 {offsets = [0, 0], sizes = [8, 128], strides = [1, 1]} : vector<16x128xf32> to vector<8x128xf32>
    %247 = arith.subf %246, %3 : vector<8x128xf32>
    %c0_57 = arith.constant 0 : index
    %248 = arith.index_cast %244 : i32 to index
    %c0_58 = arith.constant 0 : index
    %c0_59 = arith.constant 0 : index
    %249 = vector.load %arg4[%c0_57, %248, %c0_58, %c0_59] : memref<1x8x16x128xf32, #tpu.memory_space<vmem>>, vector<1x1x8x128xf32>
    %250 = vector.shape_cast %249 : vector<1x1x8x128xf32> to vector<8x128xf32>
    %251 = vector.shape_cast %247 : vector<8x128xf32> to vector<1x1x8x128xf32>
    tpu.vector_store %arg4[%c0_57, %248, %c0_58, %c0_59], %251 {strides = array<i32>} : memref<1x8x16x128xf32, #tpu.memory_space<vmem>>, vector<1x1x8x128xf32>,
    %252 = vector.extract_strided_slice %245 {offsets = [8, 0], sizes = [8, 128], strides = [1, 1]} : vector<16x128xf32> to vector<8x128xf32>
    %c0_60 = arith.constant 0 : index
    %253 = arith.index_cast %244 : i32 to index
    %c8_61 = arith.constant 8 : index
    %c0_62 = arith.constant 0 : index
    %254 = vector.load %arg4[%c0_60, %253, %c8_61, %c0_62] : memref<1x8x16x128xf32, #tpu.memory_space<vmem>>, vector<1x1x8x128xf32>
    %255 = vector.shape_cast %254 : vector<1x1x8x128xf32> to vector<8x128xf32>
    %256 = vector.shape_cast %252 : vector<8x128xf32> to vector<1x1x8x128xf32>
    tpu.vector_store %arg4[%c0_60, %253, %c8_61, %c0_62], %256 {strides = array<i32>} : memref<1x8x16x128xf32, #tpu.memory_space<vmem>>, vector<1x1x8x128xf32>,
    %c6_i32_63 = arith.constant 6 : i32
    %257 = arith.addi %60, %c6_i32_63 : i32
    %258 = vector.extract_strided_slice %178 {offsets = [0, 768], sizes = [16, 128], strides = [1, 1]} : vector<16x1024xf32> to vector<16x128xf32>
    %259 = vector.extract_strided_slice %258 {offsets = [0, 0], sizes = [8, 128], strides = [1, 1]} : vector<16x128xf32> to vector<8x128xf32>
    %260 = arith.subf %259, %3 : vector<8x128xf32>
    %c0_64 = arith.constant 0 : index
    %261 = arith.index_cast %257 : i32 to index
    %c0_65 = arith.constant 0 : index
    %c0_66 = arith.constant 0 : index
    %262 = vector.load %arg4[%c0_64, %261, %c0_65, %c0_66] : memref<1x8x16x128xf32, #tpu.memory_space<vmem>>, vector<1x1x8x128xf32>
    %263 = vector.shape_cast %262 : vector<1x1x8x128xf32> to vector<8x128xf32>
    %264 = vector.shape_cast %260 : vector<8x128xf32> to vector<1x1x8x128xf32>
    tpu.vector_store %arg4[%c0_64, %261, %c0_65, %c0_66], %264 {strides = array<i32>} : memref<1x8x16x128xf32, #tpu.memory_space<vmem>>, vector<1x1x8x128xf32>,
    %265 = vector.extract_strided_slice %258 {offsets = [8, 0], sizes = [8, 128], strides = [1, 1]} : vector<16x128xf32> to vector<8x128xf32>
    %c0_67 = arith.constant 0 : index
    %266 = arith.index_cast %257 : i32 to index
    %c8_68 = arith.constant 8 : index
    %c0_69 = arith.constant 0 : index
    %267 = vector.load %arg4[%c0_67, %266, %c8_68, %c0_69] : memref<1x8x16x128xf32, #tpu.memory_space<vmem>>, vector<1x1x8x128xf32>
    %268 = vector.shape_cast %267 : vector<1x1x8x128xf32> to vector<8x128xf32>
    %269 = vector.shape_cast %265 : vector<8x128xf32> to vector<1x1x8x128xf32>
    tpu.vector_store %arg4[%c0_67, %266, %c8_68, %c0_69], %269 {strides = array<i32>} : memref<1x8x16x128xf32, #tpu.memory_space<vmem>>, vector<1x1x8x128xf32>,
    %c7_i32_70 = arith.constant 7 : i32
    %270 = arith.addi %60, %c7_i32_70 : i32
    %271 = vector.extract_strided_slice %178 {offsets = [0, 896], sizes = [16, 128], strides = [1, 1]} : vector<16x1024xf32> to vector<16x128xf32>
    %272 = vector.extract_strided_slice %271 {offsets = [0, 0], sizes = [8, 128], strides = [1, 1]} : vector<16x128xf32> to vector<8x128xf32>
    %273 = arith.subf %272, %3 : vector<8x128xf32>
    %c0_71 = arith.constant 0 : index
    %274 = arith.index_cast %270 : i32 to index
    %c0_72 = arith.constant 0 : index
    %c0_73 = arith.constant 0 : index
    %275 = vector.load %arg4[%c0_71, %274, %c0_72, %c0_73] : memref<1x8x16x128xf32, #tpu.memory_space<vmem>>, vector<1x1x8x128xf32>
    %276 = vector.shape_cast %275 : vector<1x1x8x128xf32> to vector<8x128xf32>
    %277 = vector.shape_cast %273 : vector<8x128xf32> to vector<1x1x8x128xf32>
    tpu.vector_store %arg4[%c0_71, %274, %c0_72, %c0_73], %277 {strides = array<i32>} : memref<1x8x16x128xf32, #tpu.memory_space<vmem>>, vector<1x1x8x128xf32>,
    %278 = vector.extract_strided_slice %271 {offsets = [8, 0], sizes = [8, 128], strides = [1, 1]} : vector<16x128xf32> to vector<8x128xf32>
    %c0_74 = arith.constant 0 : index
    %279 = arith.index_cast %270 : i32 to index
    %c8_75 = arith.constant 8 : index
    %c0_76 = arith.constant 0 : index
    %280 = vector.load %arg4[%c0_74, %279, %c8_75, %c0_76] : memref<1x8x16x128xf32, #tpu.memory_space<vmem>>, vector<1x1x8x128xf32>
    %281 = vector.shape_cast %280 : vector<1x1x8x128xf32> to vector<8x128xf32>
    %282 = vector.shape_cast %278 : vector<8x128xf32> to vector<1x1x8x128xf32>
    tpu.vector_store %arg4[%c0_74, %279, %c8_75, %c0_76], %282 {strides = array<i32>} : memref<1x8x16x128xf32, #tpu.memory_space<vmem>>, vector<1x1x8x128xf32>,
    %c1_i32_77 = arith.constant 1 : i32
    return
  }
  func.func @transform_0(%arg0: i32, %arg1: i32) -> (i32, i32, i32) {
    %c0_i32 = arith.constant 0 : i32
    %c0_i32_0 = arith.constant 0 : i32
    %c0_i32_1 = arith.constant 0 : i32
    return %arg0, %c0_i32, %c0_i32_0 : i32, i32, i32
  }
  func.func @transform_1(%arg0: i32, %arg1: i32) -> (i32, i32, i32) {
    %c0_i32 = arith.constant 0 : i32
    %c0_i32_0 = arith.constant 0 : i32
    return %arg0, %c0_i32, %arg1 : i32, i32, i32
  }
  func.func @transform_2(%arg0: i32, %arg1: i32) -> (i32, i32, i32, i32) {
    %c0_i32 = arith.constant 0 : i32
    %c0_i32_0 = arith.constant 0 : i32
    %c0_i32_1 = arith.constant 0 : i32
    return %arg0, %c0_i32, %c0_i32_0, %arg1 : i32, i32, i32, i32
  }
}

module attributes {stable_mosaic.version = 11 : i64} {
  func.func @_query_and_group_kernel(%arg0: i32, %arg1: i32, %arg2: memref<1x16x128xf32, #tpu.memory_space<vmem>>, %arg3: memref<1x8x128xf32, #tpu.memory_space<vmem>>, %arg4: memref<1x8x16x128xf32, #tpu.memory_space<vmem>>) attributes {dimension_semantics = [#tpu.dimension_semantics<parallel>, #tpu.dimension_semantics<parallel>], iteration_bounds = array<i64: 2, 1>, scalar_prefetch = 0 : i64, scratch_operands = 0 : i64, tpu.core_type = #tpu.core_type<tc>, window_params = [{transform_indices = @transform_0, window_bounds = array<i64: 1, 16, 128>}, {transform_indices = @transform_1, window_bounds = array<i64: 1, 8, 128>}, {transform_indices = @transform_2, window_bounds = array<i64: 1, 8, 16, 128>}]} {
    %c0 = arith.constant 0 : index
    %c0_0 = arith.constant 0 : index
    %c0_1 = arith.constant 0 : index
    %0 = vector.load %arg2[%c0, %c0_0, %c0_1] : memref<1x16x128xf32, #tpu.memory_space<vmem>>, vector<1x16x128xf32>
    %1 = vector.shape_cast %0 : vector<1x16x128xf32> to vector<16x128xf32>
    %c0_2 = arith.constant 0 : index
    %c0_3 = arith.constant 0 : index
    %c0_4 = arith.constant 0 : index
    %2 = vector.load %arg3[%c0_2, %c0_3, %c0_4] : memref<1x8x128xf32, #tpu.memory_space<vmem>>, vector<1x8x128xf32>
    %3 = vector.shape_cast %2 : vector<1x8x128xf32> to vector<8x128xf32>
    %4 = tpu.transpose %3, [1, 0] : vector<8x128xf32> -> vector<128x8xf32>
    %cst = arith.constant 0.000000e+00 : f32
    %5 = vector.broadcast %cst : f32 to vector<128x128xf32>
    %6 = vector.extract_strided_slice %4 {offsets = [0, 0], sizes = [128, 1], strides = [1, 1]} : vector<128x8xf32> to vector<128x1xf32>
    %7 = vector.extract_strided_slice %1 {offsets = [0, 0], sizes = [1, 128], strides = [1, 1]} : vector<16x128xf32> to vector<1x128xf32>
    %8 = vector.broadcast %6 : vector<128x1xf32> to vector<128x128xf32>
    %9 = vector.broadcast %7 : vector<1x128xf32> to vector<128x128xf32>
    %10 = arith.subf %8, %9 : vector<128x128xf32>
    %11 = arith.mulf %10, %10 : vector<128x128xf32>
    %12 = arith.addf %5, %11 : vector<128x128xf32>
    %13 = vector.extract_strided_slice %4 {offsets = [0, 1], sizes = [128, 1], strides = [1, 1]} : vector<128x8xf32> to vector<128x1xf32>
    %14 = vector.extract_strided_slice %1 {offsets = [1, 0], sizes = [1, 128], strides = [1, 1]} : vector<16x128xf32> to vector<1x128xf32>
    %15 = vector.broadcast %13 : vector<128x1xf32> to vector<128x128xf32>
    %16 = vector.broadcast %14 : vector<1x128xf32> to vector<128x128xf32>
    %17 = arith.subf %15, %16 : vector<128x128xf32>
    %18 = arith.mulf %17, %17 : vector<128x128xf32>
    %19 = arith.addf %12, %18 : vector<128x128xf32>
    %20 = vector.extract_strided_slice %4 {offsets = [0, 2], sizes = [128, 1], strides = [1, 1]} : vector<128x8xf32> to vector<128x1xf32>
    %21 = vector.extract_strided_slice %1 {offsets = [2, 0], sizes = [1, 128], strides = [1, 1]} : vector<16x128xf32> to vector<1x128xf32>
    %22 = vector.broadcast %20 : vector<128x1xf32> to vector<128x128xf32>
    %23 = vector.broadcast %21 : vector<1x128xf32> to vector<128x128xf32>
    %24 = arith.subf %22, %23 : vector<128x128xf32>
    %25 = arith.mulf %24, %24 : vector<128x128xf32>
    %26 = arith.addf %19, %25 : vector<128x128xf32>
    %cst_5 = arith.constant 9.000000e-02 : f32
    %27 = vector.broadcast %cst_5 : f32 to vector<128x128xf32>
    %28 = arith.cmpf olt, %26, %27 : vector<128x128xf32>
    %29 = arith.extui %28 : vector<128x128xi1> to vector<128x128xi32>
    %30 = arith.sitofp %29 : vector<128x128xi32> to vector<128x128xf32>
    %31 = tpu.iota {dimensions = array<i32: 0>} : vector<128x128xi32>
    %32 = tpu.iota {dimensions = array<i32: 1>} : vector<128x128xi32>
    %33 = arith.cmpi sle, %31, %32 : vector<128x128xi32>
    %34 = arith.extui %33 : vector<128x128xi1> to vector<128x128xi32>
    %35 = arith.sitofp %34 : vector<128x128xi32> to vector<128x128xf32>
    %36 = arith.truncf %35 : vector<128x128xf32> to vector<128x128xbf16>
    %cst_6 = arith.constant 0.000000e+00 : f32
    %37 = vector.broadcast %cst_6 : f32 to vector<128x1xf32>
    %38 = arith.extui %28 : vector<128x128xi1> to vector<128x128xi32>
    %39 = arith.sitofp %38 : vector<128x128xi32> to vector<128x128xf32>
    %40 = arith.truncf %39 : vector<128x128xf32> to vector<128x128xbf16>
    %cst_7 = arith.constant dense<0.000000e+00> : vector<128x128xf32>
    %41 = tpu.matmul %40, %36, %cst_7 {dimension_numbers = #tpu.dot_dimension_numbers<[1], [0], [0], [1], [0, 0, 1, 1], [], []>} : vector<128x128xbf16>, vector<128x128xbf16>, vector<128x128xf32> -> vector<128x128xf32>
    %42 = vector.broadcast %37 : vector<128x1xf32> to vector<128x128xf32>
    %43 = arith.addf %41, %42 : vector<128x128xf32>
    %44 = vector.extract_strided_slice %43 {offsets = [0, 127], sizes = [128, 1], strides = [1, 1]} : vector<128x128xf32> to vector<128x1xf32>
    %45 = arith.subf %43, %30 : vector<128x128xf32>
    %46 = tpu.iota {dimensions = array<i32: 1>} : vector<128x128xi32>
    %cst_8 = arith.constant 0.000000e+00 : f32
    %47 = vector.broadcast %cst_8 : f32 to vector<128x1xf32>
    %48 = arith.cmpf oeq, %44, %47 : vector<128x1xf32>
    %c0_i32 = arith.constant 0 : i32
    %49 = vector.broadcast %c0_i32 : i32 to vector<128x128xi32>
    %50 = arith.cmpi eq, %46, %49 : vector<128x128xi32>
    %51 = vector.broadcast %48 : vector<128x1xi1> to vector<128x128xi1>
    %52 = arith.andi %51, %50 : vector<128x128xi1>
    %53 = arith.truncf %1 : vector<16x128xf32> to vector<16x128xbf16>
    %54 = arith.extf %53 : vector<16x128xbf16> to vector<16x128xf32>
    %55 = arith.subf %1, %54 : vector<16x128xf32>
    %56 = arith.truncf %55 : vector<16x128xf32> to vector<16x128xbf16>
    %57 = arith.extf %56 : vector<16x128xbf16> to vector<16x128xf32>
    %58 = arith.subf %55, %57 : vector<16x128xf32>
    %59 = arith.truncf %58 : vector<16x128xf32> to vector<16x128xbf16>
    %c0_i32_9 = arith.constant 0 : i32
    %c8_i32 = arith.constant 8 : i32
    %60 = arith.muli %c0_i32_9, %c8_i32 : i32
    %c0_i32_10 = arith.constant 0 : i32
    %61 = arith.addi %60, %c0_i32_10 : i32
    %62 = arith.sitofp %61 : i32 to f32
    %63 = vector.broadcast %62 : f32 to vector<128x1xf32>
    %64 = arith.cmpf ogt, %44, %63 : vector<128x1xf32>
    %cst_11 = arith.constant 0.000000e+00 : f32
    %65 = vector.broadcast %62 : f32 to vector<128x1xf32>
    %66 = vector.broadcast %cst_11 : f32 to vector<128x1xf32>
    %67 = arith.select %64, %65, %66 : vector<128x1xi1>, vector<128x1xf32>
    %68 = vector.broadcast %67 : vector<128x1xf32> to vector<128x128xf32>
    %69 = arith.cmpf oeq, %45, %68 : vector<128x128xf32>
    %70 = arith.andi %28, %69 : vector<128x128xi1>
    %71 = arith.ori %70, %52 : vector<128x128xi1>
    %72 = arith.extui %71 : vector<128x128xi1> to vector<128x128xi32>
    %73 = arith.sitofp %72 : vector<128x128xi32> to vector<128x128xf32>
    %74 = arith.truncf %73 : vector<128x128xf32> to vector<128x128xbf16>
    %c1_i32 = arith.constant 1 : i32
    %75 = arith.addi %60, %c1_i32 : i32
    %76 = arith.sitofp %75 : i32 to f32
    %77 = vector.broadcast %76 : f32 to vector<128x1xf32>
    %78 = arith.cmpf ogt, %44, %77 : vector<128x1xf32>
    %cst_12 = arith.constant 0.000000e+00 : f32
    %79 = vector.broadcast %76 : f32 to vector<128x1xf32>
    %80 = vector.broadcast %cst_12 : f32 to vector<128x1xf32>
    %81 = arith.select %78, %79, %80 : vector<128x1xi1>, vector<128x1xf32>
    %82 = vector.broadcast %81 : vector<128x1xf32> to vector<128x128xf32>
    %83 = arith.cmpf oeq, %45, %82 : vector<128x128xf32>
    %84 = arith.andi %28, %83 : vector<128x128xi1>
    %85 = arith.ori %84, %52 : vector<128x128xi1>
    %86 = arith.extui %85 : vector<128x128xi1> to vector<128x128xi32>
    %87 = arith.sitofp %86 : vector<128x128xi32> to vector<128x128xf32>
    %88 = arith.truncf %87 : vector<128x128xf32> to vector<128x128xbf16>
    %c2_i32 = arith.constant 2 : i32
    %89 = arith.addi %60, %c2_i32 : i32
    %90 = arith.sitofp %89 : i32 to f32
    %91 = vector.broadcast %90 : f32 to vector<128x1xf32>
    %92 = arith.cmpf ogt, %44, %91 : vector<128x1xf32>
    %cst_13 = arith.constant 0.000000e+00 : f32
    %93 = vector.broadcast %90 : f32 to vector<128x1xf32>
    %94 = vector.broadcast %cst_13 : f32 to vector<128x1xf32>
    %95 = arith.select %92, %93, %94 : vector<128x1xi1>, vector<128x1xf32>
    %96 = vector.broadcast %95 : vector<128x1xf32> to vector<128x128xf32>
    %97 = arith.cmpf oeq, %45, %96 : vector<128x128xf32>
    %98 = arith.andi %28, %97 : vector<128x128xi1>
    %99 = arith.ori %98, %52 : vector<128x128xi1>
    %100 = arith.extui %99 : vector<128x128xi1> to vector<128x128xi32>
    %101 = arith.sitofp %100 : vector<128x128xi32> to vector<128x128xf32>
    %102 = arith.truncf %101 : vector<128x128xf32> to vector<128x128xbf16>
    %c3_i32 = arith.constant 3 : i32
    %103 = arith.addi %60, %c3_i32 : i32
    %104 = arith.sitofp %103 : i32 to f32
    %105 = vector.broadcast %104 : f32 to vector<128x1xf32>
    %106 = arith.cmpf ogt, %44, %105 : vector<128x1xf32>
    %cst_14 = arith.constant 0.000000e+00 : f32
    %107 = vector.broadcast %104 : f32 to vector<128x1xf32>
    %108 = vector.broadcast %cst_14 : f32 to vector<128x1xf32>
    %109 = arith.select %106, %107, %108 : vector<128x1xi1>, vector<128x1xf32>
    %110 = vector.broadcast %109 : vector<128x1xf32> to vector<128x128xf32>
    %111 = arith.cmpf oeq, %45, %110 : vector<128x128xf32>
    %112 = arith.andi %28, %111 : vector<128x128xi1>
    %113 = arith.ori %112, %52 : vector<128x128xi1>
    %114 = arith.extui %113 : vector<128x128xi1> to vector<128x128xi32>
    %115 = arith.sitofp %114 : vector<128x128xi32> to vector<128x128xf32>
    %116 = arith.truncf %115 : vector<128x128xf32> to vector<128x128xbf16>
    %c4_i32 = arith.constant 4 : i32
    %117 = arith.addi %60, %c4_i32 : i32
    %118 = arith.sitofp %117 : i32 to f32
    %119 = vector.broadcast %118 : f32 to vector<128x1xf32>
    %120 = arith.cmpf ogt, %44, %119 : vector<128x1xf32>
    %cst_15 = arith.constant 0.000000e+00 : f32
    %121 = vector.broadcast %118 : f32 to vector<128x1xf32>
    %122 = vector.broadcast %cst_15 : f32 to vector<128x1xf32>
    %123 = arith.select %120, %121, %122 : vector<128x1xi1>, vector<128x1xf32>
    %124 = vector.broadcast %123 : vector<128x1xf32> to vector<128x128xf32>
    %125 = arith.cmpf oeq, %45, %124 : vector<128x128xf32>
    %126 = arith.andi %28, %125 : vector<128x128xi1>
    %127 = arith.ori %126, %52 : vector<128x128xi1>
    %128 = arith.extui %127 : vector<128x128xi1> to vector<128x128xi32>
    %129 = arith.sitofp %128 : vector<128x128xi32> to vector<128x128xf32>
    %130 = arith.truncf %129 : vector<128x128xf32> to vector<128x128xbf16>
    %c5_i32 = arith.constant 5 : i32
    %131 = arith.addi %60, %c5_i32 : i32
    %132 = arith.sitofp %131 : i32 to f32
    %133 = vector.broadcast %132 : f32 to vector<128x1xf32>
    %134 = arith.cmpf ogt, %44, %133 : vector<128x1xf32>
    %cst_16 = arith.constant 0.000000e+00 : f32
    %135 = vector.broadcast %132 : f32 to vector<128x1xf32>
    %136 = vector.broadcast %cst_16 : f32 to vector<128x1xf32>
    %137 = arith.select %134, %135, %136 : vector<128x1xi1>, vector<128x1xf32>
    %138 = vector.broadcast %137 : vector<128x1xf32> to vector<128x128xf32>
    %139 = arith.cmpf oeq, %45, %138 : vector<128x128xf32>
    %140 = arith.andi %28, %139 : vector<128x128xi1>
    %141 = arith.ori %140, %52 : vector<128x128xi1>
    %142 = arith.extui %141 : vector<128x128xi1> to vector<128x128xi32>
    %143 = arith.sitofp %142 : vector<128x128xi32> to vector<128x128xf32>
    %144 = arith.truncf %143 : vector<128x128xf32> to vector<128x128xbf16>
    %c6_i32 = arith.constant 6 : i32
    %145 = arith.addi %60, %c6_i32 : i32
    %146 = arith.sitofp %145 : i32 to f32
    %147 = vector.broadcast %146 : f32 to vector<128x1xf32>
    %148 = arith.cmpf ogt, %44, %147 : vector<128x1xf32>
    %cst_17 = arith.constant 0.000000e+00 : f32
    %149 = vector.broadcast %146 : f32 to vector<128x1xf32>
    %150 = vector.broadcast %cst_17 : f32 to vector<128x1xf32>
    %151 = arith.select %148, %149, %150 : vector<128x1xi1>, vector<128x1xf32>
    %152 = vector.broadcast %151 : vector<128x1xf32> to vector<128x128xf32>
    %153 = arith.cmpf oeq, %45, %152 : vector<128x128xf32>
    %154 = arith.andi %28, %153 : vector<128x128xi1>
    %155 = arith.ori %154, %52 : vector<128x128xi1>
    %156 = arith.extui %155 : vector<128x128xi1> to vector<128x128xi32>
    %157 = arith.sitofp %156 : vector<128x128xi32> to vector<128x128xf32>
    %158 = arith.truncf %157 : vector<128x128xf32> to vector<128x128xbf16>
    %c7_i32 = arith.constant 7 : i32
    %159 = arith.addi %60, %c7_i32 : i32
    %160 = arith.sitofp %159 : i32 to f32
    %161 = vector.broadcast %160 : f32 to vector<128x1xf32>
    %162 = arith.cmpf ogt, %44, %161 : vector<128x1xf32>
    %cst_18 = arith.constant 0.000000e+00 : f32
    %163 = vector.broadcast %160 : f32 to vector<128x1xf32>
    %164 = vector.broadcast %cst_18 : f32 to vector<128x1xf32>
    %165 = arith.select %162, %163, %164 : vector<128x1xi1>, vector<128x1xf32>
    %166 = vector.broadcast %165 : vector<128x1xf32> to vector<128x128xf32>
    %167 = arith.cmpf oeq, %45, %166 : vector<128x128xf32>
    %168 = arith.andi %28, %167 : vector<128x128xi1>
    %169 = arith.ori %168, %52 : vector<128x128xi1>
    %170 = arith.extui %169 : vector<128x128xi1> to vector<128x128xi32>
    %171 = arith.sitofp %170 : vector<128x128xi32> to vector<128x128xf32>
    %172 = arith.truncf %171 : vector<128x128xf32> to vector<128x128xbf16>
    %173 = tpu.concatenate %74, %88, %102, %116, %130, %144, %158, %172 in 0 : vector<128x128xbf16>, vector<128x128xbf16>, vector<128x128xbf16>, vector<128x128xbf16>, vector<128x128xbf16>, vector<128x128xbf16>, vector<128x128xbf16>, vector<128x128xbf16> -> vector<1024x128xbf16>
    "tpu.trace_start"() <{level = 10 : i32, message = "cn,qn->cq"}> : () -> ()
    %cst_19 = arith.constant dense<0.000000e+00> : vector<16x1024xf32>
    %174 = tpu.matmul %53, %173, %cst_19 {dimension_numbers = #tpu.dot_dimension_numbers<[1], [1], [0], [0], [0, 0, 1, 0], [], []>} : vector<16x128xbf16>, vector<1024x128xbf16>, vector<16x1024xf32> -> vector<16x1024xf32>
    %cst_20 = arith.constant dense<0.000000e+00> : vector<16x1024xf32>
    %175 = tpu.matmul %56, %173, %cst_20 {dimension_numbers = #tpu.dot_dimension_numbers<[1], [1], [0], [0], [0, 0, 1, 0], [], []>} : vector<16x128xbf16>, vector<1024x128xbf16>, vector<16x1024xf32> -> vector<16x1024xf32>
    "tpu.trace_stop"() : () -> ()
    %176 = arith.addf %174, %175 : vector<16x1024xf32>
    "tpu.trace_start"() <{level = 10 : i32, message = "cn,qn->cq"}> : () -> ()
    %cst_21 = arith.constant dense<0.000000e+00> : vector<16x1024xf32>
    %177 = tpu.matmul %59, %173, %cst_21 {dimension_numbers = #tpu.dot_dimension_numbers<[1], [1], [0], [0], [0, 0, 1, 0], [], []>} : vector<16x128xbf16>, vector<1024x128xbf16>, vector<16x1024xf32> -> vector<16x1024xf32>
    "tpu.trace_stop"() : () -> ()
    %178 = arith.addf %176, %177 : vector<16x1024xf32>
    %c0_i32_22 = arith.constant 0 : i32
    %179 = arith.addi %60, %c0_i32_22 : i32
    %180 = vector.extract_strided_slice %178 {offsets = [0, 0], sizes = [16, 128], strides = [1, 1]} : vector<16x1024xf32> to vector<16x128xf32>
    %181 = vector.extract_strided_slice %180 {offsets = [0, 0], sizes = [8, 128], strides = [1, 1]} : vector<16x128xf32> to vector<8x128xf32>
    %182 = arith.subf %181, %3 : vector<8x128xf32>
    %c0_23 = arith.constant 0 : index
    %183 = arith.index_cast %179 : i32 to index
    %c0_24 = arith.constant 0 : index
    %c0_25 = arith.constant 0 : index
    %184 = vector.load %arg4[%c0_23, %183, %c0_24, %c0_25] : memref<1x8x16x128xf32, #tpu.memory_space<vmem>>, vector<1x1x8x128xf32>
    %185 = vector.shape_cast %184 : vector<1x1x8x128xf32> to vector<8x128xf32>
    %186 = vector.shape_cast %182 : vector<8x128xf32> to vector<1x1x8x128xf32>
    tpu.vector_store %arg4[%c0_23, %183, %c0_24, %c0_25], %186 {strides = array<i32>} : memref<1x8x16x128xf32, #tpu.memory_space<vmem>>, vector<1x1x8x128xf32>,
    %187 = vector.extract_strided_slice %180 {offsets = [8, 0], sizes = [8, 128], strides = [1, 1]} : vector<16x128xf32> to vector<8x128xf32>
    %c0_26 = arith.constant 0 : index
    %188 = arith.index_cast %179 : i32 to index
    %c8 = arith.constant 8 : index
    %c0_27 = arith.constant 0 : index
    %189 = vector.load %arg4[%c0_26, %188, %c8, %c0_27] : memref<1x8x16x128xf32, #tpu.memory_space<vmem>>, vector<1x1x8x128xf32>
    %190 = vector.shape_cast %189 : vector<1x1x8x128xf32> to vector<8x128xf32>
    %191 = vector.shape_cast %187 : vector<8x128xf32> to vector<1x1x8x128xf32>
    tpu.vector_store %arg4[%c0_26, %188, %c8, %c0_27], %191 {strides = array<i32>} : memref<1x8x16x128xf32, #tpu.memory_space<vmem>>, vector<1x1x8x128xf32>,
    %c1_i32_28 = arith.constant 1 : i32
    %192 = arith.addi %60, %c1_i32_28 : i32
    %193 = vector.extract_strided_slice %178 {offsets = [0, 128], sizes = [16, 128], strides = [1, 1]} : vector<16x1024xf32> to vector<16x128xf32>
    %194 = vector.extract_strided_slice %193 {offsets = [0, 0], sizes = [8, 128], strides = [1, 1]} : vector<16x128xf32> to vector<8x128xf32>
    %195 = arith.subf %194, %3 : vector<8x128xf32>
    %c0_29 = arith.constant 0 : index
    %196 = arith.index_cast %192 : i32 to index
    %c0_30 = arith.constant 0 : index
    %c0_31 = arith.constant 0 : index
    %197 = vector.load %arg4[%c0_29, %196, %c0_30, %c0_31] : memref<1x8x16x128xf32, #tpu.memory_space<vmem>>, vector<1x1x8x128xf32>
    %198 = vector.shape_cast %197 : vector<1x1x8x128xf32> to vector<8x128xf32>
    %199 = vector.shape_cast %195 : vector<8x128xf32> to vector<1x1x8x128xf32>
    tpu.vector_store %arg4[%c0_29, %196, %c0_30, %c0_31], %199 {strides = array<i32>} : memref<1x8x16x128xf32, #tpu.memory_space<vmem>>, vector<1x1x8x128xf32>,
    %200 = vector.extract_strided_slice %193 {offsets = [8, 0], sizes = [8, 128], strides = [1, 1]} : vector<16x128xf32> to vector<8x128xf32>
    %c0_32 = arith.constant 0 : index
    %201 = arith.index_cast %192 : i32 to index
    %c8_33 = arith.constant 8 : index
    %c0_34 = arith.constant 0 : index
    %202 = vector.load %arg4[%c0_32, %201, %c8_33, %c0_34] : memref<1x8x16x128xf32, #tpu.memory_space<vmem>>, vector<1x1x8x128xf32>
    %203 = vector.shape_cast %202 : vector<1x1x8x128xf32> to vector<8x128xf32>
    %204 = vector.shape_cast %200 : vector<8x128xf32> to vector<1x1x8x128xf32>
    tpu.vector_store %arg4[%c0_32, %201, %c8_33, %c0_34], %204 {strides = array<i32>} : memref<1x8x16x128xf32, #tpu.memory_space<vmem>>, vector<1x1x8x128xf32>,
    %c2_i32_35 = arith.constant 2 : i32
    %205 = arith.addi %60, %c2_i32_35 : i32
    %206 = vector.extract_strided_slice %178 {offsets = [0, 256], sizes = [16, 128], strides = [1, 1]} : vector<16x1024xf32> to vector<16x128xf32>
    %207 = vector.extract_strided_slice %206 {offsets = [0, 0], sizes = [8, 128], strides = [1, 1]} : vector<16x128xf32> to vector<8x128xf32>
    %208 = arith.subf %207, %3 : vector<8x128xf32>
    %c0_36 = arith.constant 0 : index
    %209 = arith.index_cast %205 : i32 to index
    %c0_37 = arith.constant 0 : index
    %c0_38 = arith.constant 0 : index
    %210 = vector.load %arg4[%c0_36, %209, %c0_37, %c0_38] : memref<1x8x16x128xf32, #tpu.memory_space<vmem>>, vector<1x1x8x128xf32>
    %211 = vector.shape_cast %210 : vector<1x1x8x128xf32> to vector<8x128xf32>
    %212 = vector.shape_cast %208 : vector<8x128xf32> to vector<1x1x8x128xf32>
    tpu.vector_store %arg4[%c0_36, %209, %c0_37, %c0_38], %212 {strides = array<i32>} : memref<1x8x16x128xf32, #tpu.memory_space<vmem>>, vector<1x1x8x128xf32>,
    %213 = vector.extract_strided_slice %206 {offsets = [8, 0], sizes = [8, 128], strides = [1, 1]} : vector<16x128xf32> to vector<8x128xf32>
    %c0_39 = arith.constant 0 : index
    %214 = arith.index_cast %205 : i32 to index
    %c8_40 = arith.constant 8 : index
    %c0_41 = arith.constant 0 : index
    %215 = vector.load %arg4[%c0_39, %214, %c8_40, %c0_41] : memref<1x8x16x128xf32, #tpu.memory_space<vmem>>, vector<1x1x8x128xf32>
    %216 = vector.shape_cast %215 : vector<1x1x8x128xf32> to vector<8x128xf32>
    %217 = vector.shape_cast %213 : vector<8x128xf32> to vector<1x1x8x128xf32>
    tpu.vector_store %arg4[%c0_39, %214, %c8_40, %c0_41], %217 {strides = array<i32>} : memref<1x8x16x128xf32, #tpu.memory_space<vmem>>, vector<1x1x8x128xf32>,
    %c3_i32_42 = arith.constant 3 : i32
    %218 = arith.addi %60, %c3_i32_42 : i32
    %219 = vector.extract_strided_slice %178 {offsets = [0, 384], sizes = [16, 128], strides = [1, 1]} : vector<16x1024xf32> to vector<16x128xf32>
    %220 = vector.extract_strided_slice %219 {offsets = [0, 0], sizes = [8, 128], strides = [1, 1]} : vector<16x128xf32> to vector<8x128xf32>
    %221 = arith.subf %220, %3 : vector<8x128xf32>
    %c0_43 = arith.constant 0 : index
    %222 = arith.index_cast %218 : i32 to index
    %c0_44 = arith.constant 0 : index
    %c0_45 = arith.constant 0 : index
    %223 = vector.load %arg4[%c0_43, %222, %c0_44, %c0_45] : memref<1x8x16x128xf32, #tpu.memory_space<vmem>>, vector<1x1x8x128xf32>
    %224 = vector.shape_cast %223 : vector<1x1x8x128xf32> to vector<8x128xf32>
    %225 = vector.shape_cast %221 : vector<8x128xf32> to vector<1x1x8x128xf32>
    tpu.vector_store %arg4[%c0_43, %222, %c0_44, %c0_45], %225 {strides = array<i32>} : memref<1x8x16x128xf32, #tpu.memory_space<vmem>>, vector<1x1x8x128xf32>,
    %226 = vector.extract_strided_slice %219 {offsets = [8, 0], sizes = [8, 128], strides = [1, 1]} : vector<16x128xf32> to vector<8x128xf32>
    %c0_46 = arith.constant 0 : index
    %227 = arith.index_cast %218 : i32 to index
    %c8_47 = arith.constant 8 : index
    %c0_48 = arith.constant 0 : index
    %228 = vector.load %arg4[%c0_46, %227, %c8_47, %c0_48] : memref<1x8x16x128xf32, #tpu.memory_space<vmem>>, vector<1x1x8x128xf32>
    %229 = vector.shape_cast %228 : vector<1x1x8x128xf32> to vector<8x128xf32>
    %230 = vector.shape_cast %226 : vector<8x128xf32> to vector<1x1x8x128xf32>
    tpu.vector_store %arg4[%c0_46, %227, %c8_47, %c0_48], %230 {strides = array<i32>} : memref<1x8x16x128xf32, #tpu.memory_space<vmem>>, vector<1x1x8x128xf32>,
    %c4_i32_49 = arith.constant 4 : i32
    %231 = arith.addi %60, %c4_i32_49 : i32
    %232 = vector.extract_strided_slice %178 {offsets = [0, 512], sizes = [16, 128], strides = [1, 1]} : vector<16x1024xf32> to vector<16x128xf32>
    %233 = vector.extract_strided_slice %232 {offsets = [0, 0], sizes = [8, 128], strides = [1, 1]} : vector<16x128xf32> to vector<8x128xf32>
    %234 = arith.subf %233, %3 : vector<8x128xf32>
    %c0_50 = arith.constant 0 : index
    %235 = arith.index_cast %231 : i32 to index
    %c0_51 = arith.constant 0 : index
    %c0_52 = arith.constant 0 : index
    %236 = vector.load %arg4[%c0_50, %235, %c0_51, %c0_52] : memref<1x8x16x128xf32, #tpu.memory_space<vmem>>, vector<1x1x8x128xf32>
    %237 = vector.shape_cast %236 : vector<1x1x8x128xf32> to vector<8x128xf32>
    %238 = vector.shape_cast %234 : vector<8x128xf32> to vector<1x1x8x128xf32>
    tpu.vector_store %arg4[%c0_50, %235, %c0_51, %c0_52], %238 {strides = array<i32>} : memref<1x8x16x128xf32, #tpu.memory_space<vmem>>, vector<1x1x8x128xf32>,
    %239 = vector.extract_strided_slice %232 {offsets = [8, 0], sizes = [8, 128], strides = [1, 1]} : vector<16x128xf32> to vector<8x128xf32>
    %c0_53 = arith.constant 0 : index
    %240 = arith.index_cast %231 : i32 to index
    %c8_54 = arith.constant 8 : index
    %c0_55 = arith.constant 0 : index
    %241 = vector.load %arg4[%c0_53, %240, %c8_54, %c0_55] : memref<1x8x16x128xf32, #tpu.memory_space<vmem>>, vector<1x1x8x128xf32>
    %242 = vector.shape_cast %241 : vector<1x1x8x128xf32> to vector<8x128xf32>
    %243 = vector.shape_cast %239 : vector<8x128xf32> to vector<1x1x8x128xf32>
    tpu.vector_store %arg4[%c0_53, %240, %c8_54, %c0_55], %243 {strides = array<i32>} : memref<1x8x16x128xf32, #tpu.memory_space<vmem>>, vector<1x1x8x128xf32>,
    %c5_i32_56 = arith.constant 5 : i32
    %244 = arith.addi %60, %c5_i32_56 : i32
    %245 = vector.extract_strided_slice %178 {offsets = [0, 640], sizes = [16, 128], strides = [1, 1]} : vector<16x1024xf32> to vector<16x128xf32>
    %246 = vector.extract_strided_slice %245 {offsets = [0, 0], sizes = [8, 128], strides = [1, 1]} : vector<16x128xf32> to vector<8x128xf32>
    %247 = arith.subf %246, %3 : vector<8x128xf32>
    %c0_57 = arith.constant 0 : index
    %248 = arith.index_cast %244 : i32 to index
    %c0_58 = arith.constant 0 : index
    %c0_59 = arith.constant 0 : index
    %249 = vector.load %arg4[%c0_57, %248, %c0_58, %c0_59] : memref<1x8x16x128xf32, #tpu.memory_space<vmem>>, vector<1x1x8x128xf32>
    %250 = vector.shape_cast %249 : vector<1x1x8x128xf32> to vector<8x128xf32>
    %251 = vector.shape_cast %247 : vector<8x128xf32> to vector<1x1x8x128xf32>
    tpu.vector_store %arg4[%c0_57, %248, %c0_58, %c0_59], %251 {strides = array<i32>} : memref<1x8x16x128xf32, #tpu.memory_space<vmem>>, vector<1x1x8x128xf32>,
    %252 = vector.extract_strided_slice %245 {offsets = [8, 0], sizes = [8, 128], strides = [1, 1]} : vector<16x128xf32> to vector<8x128xf32>
    %c0_60 = arith.constant 0 : index
    %253 = arith.index_cast %244 : i32 to index
    %c8_61 = arith.constant 8 : index
    %c0_62 = arith.constant 0 : index
    %254 = vector.load %arg4[%c0_60, %253, %c8_61, %c0_62] : memref<1x8x16x128xf32, #tpu.memory_space<vmem>>, vector<1x1x8x128xf32>
    %255 = vector.shape_cast %254 : vector<1x1x8x128xf32> to vector<8x128xf32>
    %256 = vector.shape_cast %252 : vector<8x128xf32> to vector<1x1x8x128xf32>
    tpu.vector_store %arg4[%c0_60, %253, %c8_61, %c0_62], %256 {strides = array<i32>} : memref<1x8x16x128xf32, #tpu.memory_space<vmem>>, vector<1x1x8x128xf32>,
    %c6_i32_63 = arith.constant 6 : i32
    %257 = arith.addi %60, %c6_i32_63 : i32
    %258 = vector.extract_strided_slice %178 {offsets = [0, 768], sizes = [16, 128], strides = [1, 1]} : vector<16x1024xf32> to vector<16x128xf32>
    %259 = vector.extract_strided_slice %258 {offsets = [0, 0], sizes = [8, 128], strides = [1, 1]} : vector<16x128xf32> to vector<8x128xf32>
    %260 = arith.subf %259, %3 : vector<8x128xf32>
    %c0_64 = arith.constant 0 : index
    %261 = arith.index_cast %257 : i32 to index
    %c0_65 = arith.constant 0 : index
    %c0_66 = arith.constant 0 : index
    %262 = vector.load %arg4[%c0_64, %261, %c0_65, %c0_66] : memref<1x8x16x128xf32, #tpu.memory_space<vmem>>, vector<1x1x8x128xf32>
    %263 = vector.shape_cast %262 : vector<1x1x8x128xf32> to vector<8x128xf32>
    %264 = vector.shape_cast %260 : vector<8x128xf32> to vector<1x1x8x128xf32>
    tpu.vector_store %arg4[%c0_64, %261, %c0_65, %c0_66], %264 {strides = array<i32>} : memref<1x8x16x128xf32, #tpu.memory_space<vmem>>, vector<1x1x8x128xf32>,
    %265 = vector.extract_strided_slice %258 {offsets = [8, 0], sizes = [8, 128], strides = [1, 1]} : vector<16x128xf32> to vector<8x128xf32>
    %c0_67 = arith.constant 0 : index
    %266 = arith.index_cast %257 : i32 to index
    %c8_68 = arith.constant 8 : index
    %c0_69 = arith.constant 0 : index
    %267 = vector.load %arg4[%c0_67, %266, %c8_68, %c0_69] : memref<1x8x16x128xf32, #tpu.memory_space<vmem>>, vector<1x1x8x128xf32>
    %268 = vector.shape_cast %267 : vector<1x1x8x128xf32> to vector<8x128xf32>
    %269 = vector.shape_cast %265 : vector<8x128xf32> to vector<1x1x8x128xf32>
    tpu.vector_store %arg4[%c0_67, %266, %c8_68, %c0_69], %269 {strides = array<i32>} : memref<1x8x16x128xf32, #tpu.memory_space<vmem>>, vector<1x1x8x128xf32>,
    %c7_i32_70 = arith.constant 7 : i32
    %270 = arith.addi %60, %c7_i32_70 : i32
    %271 = vector.extract_strided_slice %178 {offsets = [0, 896], sizes = [16, 128], strides = [1, 1]} : vector<16x1024xf32> to vector<16x128xf32>
    %272 = vector.extract_strided_slice %271 {offsets = [0, 0], sizes = [8, 128], strides = [1, 1]} : vector<16x128xf32> to vector<8x128xf32>
    %273 = arith.subf %272, %3 : vector<8x128xf32>
    %c0_71 = arith.constant 0 : index
    %274 = arith.index_cast %270 : i32 to index
    %c0_72 = arith.constant 0 : index
    %c0_73 = arith.constant 0 : index
    %275 = vector.load %arg4[%c0_71, %274, %c0_72, %c0_73] : memref<1x8x16x128xf32, #tpu.memory_space<vmem>>, vector<1x1x8x128xf32>
    %276 = vector.shape_cast %275 : vector<1x1x8x128xf32> to vector<8x128xf32>
    %277 = vector.shape_cast %273 : vector<8x128xf32> to vector<1x1x8x128xf32>
    tpu.vector_store %arg4[%c0_71, %274, %c0_72, %c0_73], %277 {strides = array<i32>} : memref<1x8x16x128xf32, #tpu.memory_space<vmem>>, vector<1x1x8x128xf32>,
    %278 = vector.extract_strided_slice %271 {offsets = [8, 0], sizes = [8, 128], strides = [1, 1]} : vector<16x128xf32> to vector<8x128xf32>
    %c0_74 = arith.constant 0 : index
    %279 = arith.index_cast %270 : i32 to index
    %c8_75 = arith.constant 8 : index
    %c0_76 = arith.constant 0 : index
    %280 = vector.load %arg4[%c0_74, %279, %c8_75, %c0_76] : memref<1x8x16x128xf32, #tpu.memory_space<vmem>>, vector<1x1x8x128xf32>
    %281 = vector.shape_cast %280 : vector<1x1x8x128xf32> to vector<8x128xf32>
    %282 = vector.shape_cast %278 : vector<8x128xf32> to vector<1x1x8x128xf32>
    tpu.vector_store %arg4[%c0_74, %279, %c8_75, %c0_76], %282 {strides = array<i32>} : memref<1x8x16x128xf32, #tpu.memory_space<vmem>>, vector<1x1x8x128xf32>,
    %c1_i32_77 = arith.constant 1 : i32
    return
  }
  func.func @transform_0(%arg0: i32, %arg1: i32) -> (i32, i32, i32) {
    %c0_i32 = arith.constant 0 : i32
    %c0_i32_0 = arith.constant 0 : i32
    %c0_i32_1 = arith.constant 0 : i32
    return %arg0, %c0_i32, %c0_i32_0 : i32, i32, i32
  }
  func.func @transform_1(%arg0: i32, %arg1: i32) -> (i32, i32, i32) {
    %c0_i32 = arith.constant 0 : i32
    %c0_i32_0 = arith.constant 0 : i32
    return %arg0, %c0_i32, %arg1 : i32, i32, i32
  }
  func.func @transform_2(%arg0: i32, %arg1: i32) -> (i32, i32, i32, i32) {
    %c0_i32 = arith.constant 0 : i32
    %c0_i32_0 = arith.constant 0 : i32
    %c0_i32_1 = arith.constant 0 : i32
    return %arg0, %c0_i32, %c0_i32_0, %arg1 : i32, i32, i32, i32
  }
}

</mosaic_0001>

<bundles_post_ra>
// kernel: tpu_custom_call.1
= control target key start
LH: loop header
LB: loop body
LE: loop exit
PB: predicated region body
PF: predicated region fallthrough
CT: control target
= control target key end

     0   :  { %7 = vsyncpa [#allocation3], 0  ;;  %s8389_s0 = inlined_call_operand.hbm [shape: f32[2,16,128], index: 0, kind: input, shape index: {}]   ;;  %s8390_s1 = inlined_call_operand.hbm [shape: f32[2,8,128], index: 1, kind: input, shape index: {}]   ;;  %s8391_s2 = inlined_call_operand.hbm [shape: f32[2,8,16,128], index: 2, kind: output, shape index: {}]  }
   0x1   :  { %8 = vsyncpa [#allocation6], 0 }
   0x2   :  { %10 = vsyncpa [#allocation6 + $0x1], 0 }
   0x3   :  { %11 = vsyncpa [#allocation4], 0 }
   0x4   :  { %13 = vsyncpa [#allocation4 + $0x1], 0  ;;  %s4577_s9 = smov 0   ;;  %s4579_s10 = smov 0  }
   0x5   :  { %s4581_s11 = smov 0   ;;  %s4583_s12 = smov 0  }
   0x6   :  { %s4585_s13 = smov 0   ;;  %s4587_s14 = smov 0  }
   0x7 LB: > { %s3131_s15 = sadd.s32 4294967295, %s4547_s14   ;;  %s3132_s16 = sadd.s32 4294967294, %s4547_s14   ;;  %s4547_s14 = sphi %s4587_s14, %s19_s14   ;;  %s4543_s13 = sphi %s4585_s13, %s9717_s13   ;;  %s4539_s12 = sphi %s4583_s12, %s9716_s12   ;;  %s4535_s11 = sphi %s4581_s11, %s9715_s11   ;;  %s4531_s10 = sphi %s4579_s10, %s9714_s10   ;;  %s4527_s9 = sphi %s4577_s9, %s9713_s9  }
   0x8   : > { %p51_p0 = scmp.ne.s32.totalorder %s4531_s10, %s4527_s9  ;;  %p52_p1 = scmp.eq.s32.totalorder %s3131_s15, 0 }
   0x9   : > { %p111_p2 = scmp.eq.s32.totalorder %s3132_s16, 1  ;;  %p3133_p3 = scmp.ge.s32.totalorder %s4547_s14, 1 }
   0xa   : > { %p4614_p4 = por %p52_p1, %p51_p0  ;;  %p118_p5 = scmp.lt.s32.totalorder %s4547_s14, 3 }
   0xb   : > { %p4619_p6 = por %p111_p2, %p51_p0  ;;  %s3737_s19 = sshll.u32 %s4539_s12, 8 }
   0xc   : > { %s8740_s17 = scalar_select %p4614_p4, 1, 0 }
   0xd   : > { %s8741_s18 = scalar_select %p4619_p6, 1, 0 }
   0xe   : > { %p4624_p7 = pnand %p3133_p3, %p118_p5  ;;  %s4631_s23 = scalar_lea.hbm %s8389_s0, %s3737_s19 }
   0xf   : > { %s4549_s24 = smov [#allocation2]   ;;  %s4407_s27 = scalar_lea.hbm %s4631_s23, 256 }
  0x10   : > { %s8742_s20 = scalar_select %p4624_p7, 1, 0 }
  0x11   : > { %p4009_p8 = pneg %p4624_p7  ;;  %s133_s25 = sshll.u32 %s4549_s24, 4  ;;  %s134_s25 = int_to_ptr.vmem [resolvable:$true] %s133_s25 }
  0x12   : > { %p4408_p11 = scmp.ne.s32.totalorder %s4631_s23, %s4407_s27  ;;  %s4412_s30 = scalar_lea.hbm %s8389_s0, 512 }
  0x13   : > { %p4637_p9 = pnand %p4009_p8, %p4614_p4  ;;  %p4413_p1 = scmp.lt.s32.totalorder %s4631_s23, %s8389_s0 }
  0x14   : > { %p4414_p2 = scmp.lt.s32.totalorder %s4412_s30, %s4407_s27 }
  0x15   : > { %p4409_p12 = pneg %p4637_p9 }
  0x16   : > { %p4415_p3 = por %p4414_p2, %p4413_p1 }
  0x17   : > { %p4410_p13 = pnand %p4409_p12, %p4408_p11 }
  0x19   : > { %p4411_p0 = pneg %p4410_p13 }
  0x1b   : > { %p4416_p5 = pnand %p4415_p3, %p4411_p0 }
  0x1d   : > { %4419 = shalt.err (!%p4416_p5)
}
  0x1e   : > { %s4420_s5 = scalar_lea.vmem %s134_s25, 256  ;;  %p4428_p4 = scmp.lt.s32.totalorder %s134_s25, %s134_s25 }
  0x1f   : > { %p4421_p8 = scmp.ne.s32.totalorder %s134_s25, %s4420_s5  ;;  %p4429_p7 = scmp.lt.s32.totalorder %s4420_s5, %s4420_s5 }
  0x21   : > { %p4423_p10 = pnand %p4421_p8, %p4409_p12  ;;  %p4430_p11 = por %p4429_p7, %p4428_p4 }
  0x23   : > { %p4424_p6 = pneg %p4423_p10 }
  0x25   : > { %p4431_p13 = pnand %p4430_p11, %p4424_p6 }
  0x27   : > { %4434 = shalt.err (!%p4431_p13)
}
  0x28   : > { %s4550_s6 = smov 128   ;;  %s4551_s7 = smov 8  }
  0x29   : > { %4012 = dma.hbm_to_vmem [thread:$0]  (!%p4637_p9), %s4631_s23, 256, %s134_s25, [#allocation3], %s4550_s6, %s4550_s6, %s4551_s7  }
  0x2a   : > { %s31_s8 = sadd.s32 1, %s4543_s13  ;;  %s38_s16 = sadd.s32 1, %s4535_s11 }
  0x2b   : > { %p33_p4 = scmp.ge.s32.totalorder %s31_s8, 2  ;;  %p73_p6 = scmp.ne.s32.totalorder %s4535_s11, %s4531_s10 }
  0x2c   : > { %p74_p7 = scmp.eq.s32.totalorder %s4547_s14, 0  ;;  %p105_p12 = scmp.eq.s32.totalorder %s3131_s15, 1 }
  0x2d   : > { %s9719_s8 = smov (%p33_p4, %s31_s8), 0  ;;  %p4021_p0 = scmp.lt.s32.totalorder %s4547_s14, 2 }
  0x2e   : > { %p4663_p10 = por %p74_p7, %p73_p6  ;;  %s35_s21 = ssub.s32 %s4543_s13, %s9719_s8 }
  0x2f   : > { %p36_p1 = scmp.eq.s32.totalorder %s35_s21, 0  ;;  %p4672_p2 = por %p105_p12, %p73_p6 }
  0x30   : > { %s147_s23 = sand.u32 1, %s4535_s11   ;;  %s3138_s24 = sshll.u32 %s4543_s13, 7 }
  0x31   : > { %s4679_s25 = scalar_select %p36_p1, %s4535_s11, %s38_s16  }
  0x32   : > { %s3137_s26 = sshll.u32 %s147_s23, 3  ;;  %s157_s29 = scalar_lea.hbm %s8390_s1, %s3138_s24 }
  0x33   : > { %s151_s30 = scalar_lea.vmem [#allocation5], %s3137_s26  ;;  %p4686_p9 = pnand %p4021_p0, %p4663_p10 }
  0x34   : > { %s159_s3 = sshll.u32 %s151_s30, 4  ;;  %s148_s4 = scalar_lea.sflag [#allocation6], %s147_s23  ;;  %s160_s3 = int_to_ptr.vmem [resolvable:$true] %s159_s3 }
  0x35   : > { %p4437_p3 = pneg %p4686_p9  ;;  %s4448_s5 = scalar_lea.vmem %s160_s3, 128 }
  0x36   : > { %p4449_p5 = scmp.ne.s32.totalorder %s160_s3, %s4448_s5  ;;  %s4552_s6 = smov [#allocation5]  }
  0x37   : > { %s4453_s7 = sshll.u32 %s4552_s6, 4  ;;  %s4454_s7 = int_to_ptr.vmem [resolvable:$false] %s4453_s7 }
  0x38   : > { %p4451_p8 = pnand %p4449_p5, %p4437_p3  ;;  %s4455_s16 = scalar_lea.vmem %s4454_s7, 256 }
  0x39   : > { %p4456_p13 = scmp.lt.s32.totalorder %s160_s3, %s4454_s7  ;;  %p4457_p4 = scmp.lt.s32.totalorder %s4455_s16, %s4448_s5 }
  0x3a   : > { %p4452_p11 = pneg %p4451_p8 }
  0x3b   : > { %p4458_p6 = por %p4457_p4, %p4456_p13 }
  0x3d   : > { %p4459_p7 = pnand %p4458_p6, %p4452_p11 }
  0x3f   : > { %4462 = shalt.err (!%p4459_p7)
}
  0x40   : > { %4016 = dma.hbm_to_vmem [thread:$0]  (!%p4686_p9), %s157_s29, 128, %s160_s3, %s148_s4  }
  0x41   : > { %p8747_p10 = scmp.ne.s32.totalorder %s8742_s20, 0 }
  0x43   : > { %168 = sbr.rel (%p8747_p10) target bundleno = 1698 (0x6a2), region = 28 }
  0x48   : > { %p8748_p12 = scmp.ne.s32.totalorder %s8740_s17, 0 }
  0x4a   : > { %4514 = dma.done.wait (%p8748_p12), [#allocation3], 256  }
  0x4b   : > { %4516 = vsyncadd (%p8748_p12), [#allocation3], 4294967040  ;;  %s4701_s19 = sand.u32 1, %s4531_s10  }
  0x4c   : > { %s3140_s21 = sshll.u32 %s4701_s19, 3  ;;  %s175_s23 = scalar_lea.sflag [#allocation6], %s4701_s19 }
  0x4d   : > { %s4705_s24 = scalar_lea.vmem [#allocation5], %s3140_s21 }
  0x4e   : > { %4518 = dma.done.wait (%p8748_p12), %s175_s23, 128  }
  0x4f   : > { %4520 = vsyncadd (%p8748_p12), %s175_s23, 4294967168  ;;  %v4553_v0 = vmov 1   ;;  %v202_v1 = vld [vmem:[%s4705_s24] sm:$0xff]  ;;  %v8403_v2 = vmov 0   ;;  %v4555_v5 = vmov 2   ;;  %v315_v8 = vlaneseq  ;;  %v200_v43 = vld [vmem:[#allocation2] sm:$0xff] }
  0x50   : > { %4083 = vset.pattern.permute.xlu1 %v4553_v0  ;;  %203 = vxpose.xlu0.b32.start.end [1/1] (short) %v202_v1, 128  ;;  %v8401_v15 = vmov 1.0|1.0   ;;  %s3141_s17 = sshll.u32 %s4701_s19, 7  ;;  %s3738_s26 = sshll.u32 %s4539_s12, 11 }
  0x51   : > { %v4722_v10 = vshrl.u32 %v315_v8, 7  ;;  %v4726_v13 = vand.u32 127, %v315_v8  ;;  %s8301_s20 = scalar_lea.vmem [#allocation7], %s3141_s17  ;;  %s8336_s30 = scalar_lea.hbm %s8391_s2, %s3738_s26 }
  0x52   : > { %s3033_s27 = sshll.u32 %s8301_s20, 4  ;;  %s3019_s12 = scalar_lea.sflag [#allocation4], %s4701_s19  ;;  %s8338_s27 = int_to_ptr.vmem [resolvable:$true] %s3033_s27 }
  0x53   : > { %v662_v11 = vadd.s32 112, %v4722_v10  ;;  %v663_v12 = vadd.s32 120, %v4722_v10  ;;  %8749 = vst [vmem:[#allocation11_spill] sm:$0xff] %v4726_v13  ;;  %v660_v16 = vadd.s32 96, %v4722_v10  ;;  %v661_v17 = vadd.s32 104, %v4722_v10  ;;  %s4463_s3 = scalar_lea.vmem %s8338_s27, 2048 }
  0x54   : > { %v658_v19 = vadd.s32 80, %v4722_v10  ;;  %v659_v20 = vadd.s32 88, %v4722_v10  ;;  %v656_v22 = vadd.s32 64, %v4722_v10  ;;  %v657_v23 = vadd.s32 72, %v4722_v10  ;;  %p4464_p0 = scmp.ne.s32.totalorder %s8338_s27, %s4463_s3  ;;  %s4559_s15 = smov [#allocation7]  }
  0x55   : > { %vm680_vm0 = vcmp.le.s32.totalorder %v662_v11, %v4726_v13  ;;  %vm681_vm1 = vcmp.le.s32.totalorder %v663_v12, %v4726_v13  ;;  %vm678_vm3 = vcmp.le.s32.totalorder %v660_v16, %v4726_v13  ;;  %vm679_vm4 = vcmp.le.s32.totalorder %v661_v17, %v4726_v13  ;;  %s4467_s4 = sshll.u32 %s4559_s15, 4  ;;  %s4468_s4 = int_to_ptr.vmem [resolvable:$false] %s4467_s4 }
  0x56   : > { %vm3174_vm2 = vmpackc.low %vm681_vm1, %vm680_vm0  ;;  %vm676_vm6 = vcmp.le.s32.totalorder %v658_v19, %v4726_v13  ;;  %vm677_vm7 = vcmp.le.s32.totalorder %v659_v20, %v4726_v13  ;;  %vm674_vm9 = vcmp.le.s32.totalorder %v656_v22, %v4726_v13  ;;  %vm675_vm10 = vcmp.le.s32.totalorder %v657_v23, %v4726_v13  ;;  %p4465_p1 = pnand %p4464_p0, %p4672_p2  ;;  %s4469_s5 = scalar_lea.vmem %s4468_s4, 4096 }
  0x57   : > { %3971 = vmatprep.subr.msk.bf16.mxu0 %vm3174_vm2, %v8401_v15  ;;  %vm3176_vm5 = vmpackc.low %vm679_vm4, %vm678_vm3  ;;  %v654_v25 = vadd.s32 48, %v4722_v10  ;;  %v655_v26 = vadd.s32 56, %v4722_v10  ;;  %v652_v28 = vadd.s32 32, %v4722_v10  ;;  %v653_v29 = vadd.s32 40, %v4722_v10  ;;  %p4470_p3 = scmp.lt.s32.totalorder %s8338_s27, %s4468_s4  ;;  %p4471_p5 = scmp.lt.s32.totalorder %s4469_s5, %s4463_s3 }
  0x58   : > { %3972 = vmatpush3.bf16.msk.msra.mxu0 %vm3174_vm2, %v8401_v15  ;;  %vm3178_vm8 = vmpackc.low %vm677_vm7, %vm676_vm6  ;;  %v650_v31 = vadd.s32 16, %v4722_v10  ;;  %v651_v32 = vadd.s32 24, %v4722_v10  ;;  %v649_v34 = vadd.s32 8, %v4722_v10  ;;  %v433_v40 = vsub.s32 1, %v4722_v10  ;;  %p4466_p9 = pneg %p4465_p1 }
  0x59   : > { %3973 = vmatprep.subr.msk.bf16.mxu0 %vm3176_vm5, %v8401_v15  ;;  %vm3180_vm11 = vmpackc.low %vm675_vm10, %vm674_vm9  ;;  %vm672_vm12 = vcmp.le.s32.totalorder %v654_v25, %v4726_v13  ;;  %vm673_vm13 = vcmp.le.s32.totalorder %v655_v26, %v4726_v13  ;;  %vm670_vm15 = vcmp.le.s32.totalorder %v652_v28, %v4726_v13  ;;  %vm671_vm0 = vcmp.le.s32.totalorder %v653_v29, %v4726_v13  ;;  %p4472_p8 = por %p4471_p5, %p4470_p3 }
  0x5a   : > { %vm3182_vm14 = vmpackc.low %vm673_vm13, %vm672_vm12  ;;  %vm668_vm2 = vcmp.le.s32.totalorder %v650_v31, %v4726_v13  ;;  %vm669_vm3 = vcmp.le.s32.totalorder %v651_v32, %v4726_v13  ;;  %vm667_vm6 = vcmp.le.s32.totalorder %v649_v34, %v4726_v13  ;;  %v317_v41 = vsub.s32 0, %v4722_v10 }
  0x5b   : > { %vm3184_vm1 = vmpackc.low %vm671_vm0, %vm670_vm15  ;;  %v549_v44 = vsub.s32 2, %v4722_v10  ;;  %v4852_v45 = vrot.slane %v200_v43, %v433_v40  ;;  %p4473_p11 = pnand %p4472_p8, %p4466_p9 }
  0x5c   : > { %3974 = vmatpush3.bf16.msk.msra.mxu0 %vm3176_vm5, %v8401_v15  ;;  %vm3186_vm4 = vmpackc.low %vm669_vm3, %vm668_vm2  ;;  %vm666_vm5 = vcmp.le.s32.totalorder %v4722_v10, %v4726_v13  ;;  %v4854_v46 = vrot.slane %v200_v43, %v317_v41 }
  0x5d   : > { %3975 = vmatprep.subr.msk.bf16.mxu0 %vm3178_vm8, %v8401_v15  ;;  %vm3188_vm7 = vmpackc.low %vm667_vm6, %vm666_vm5  ;;  %v4856_v49 = vrot.slane %v200_v43, %v549_v44 }
  0x60   : > { %3976 = vmatpush3.bf16.msk.msra.mxu0 %vm3178_vm8, %v8401_v15 }
  0x61   : > { %3977 = vmatprep.subr.msk.bf16.mxu0 %vm3180_vm11, %v8401_v15 }
  0x64   : > { %3978 = vmatpush3.bf16.msk.msra.mxu0 %vm3180_vm11, %v8401_v15 }
  0x65   : > { %3979 = vmatprep.subr.msk.bf16.mxu0 %vm3182_vm14, %v8401_v15 }
  0x68   : > { %3980 = vmatpush3.bf16.msk.msra.mxu0 %vm3182_vm14, %v8401_v15 }
  0x69   : > { %3981 = vmatprep.subr.msk.bf16.mxu0 %vm3184_vm1, %v8401_v15 }
  0x6c   : > { %3982 = vmatpush3.bf16.msk.msra.mxu0 %vm3184_vm1, %v8401_v15 }
  0x6d   : > { %3983 = vmatprep.subr.msk.bf16.mxu0 %vm3186_vm4, %v8401_v15 }
  0x70   : > { %3984 = vmatpush3.bf16.msk.msra.mxu0 %vm3186_vm4, %v8401_v15 }
  0x71   : > { %3985 = vmatprep.subr.msk.bf16.mxu0 %vm3188_vm7, %v8401_v15 }
  0x74   : > { %3986 = vmatpush3.bf16.msk.msra.mxu0 %vm3188_vm7, %v8401_v15 }
  0x79   : > { %4082 = vset.pattern.permute.xlu0 %v8403_v2 }
  0xcc   : > { %v219_v3 = vpop.trf.xlu0 }
  0xcd   : > { %368 = vperm.xlu1 %4083, %v219_v3   ;;  %237 = vperm.xlu0 %4082, %v219_v3  }
  0xd0   : > { %v220_v4 = vpop.trf.xlu0 }
  0xd1   : > { %4084 = vset.pattern.permute.xlu1 %v4555_v5  ;;  %4111 = vset.pattern.permute.xlu0 %v4555_v5 }
  0xd2   : > { %484 = vperm.xlu1 %4084, %v219_v3  }
  0xd4   : > { %v221_v6 = vpop.trf.xlu0 }
  0xd6   : > { %4085 = vset.pattern.permute.xlu1 %v8403_v2 }
  0xd7   : > { %242 = vperm.xlu1 %4085, %v220_v4  }
  0xd8   : > { %v4717_v7 = vpop.trf.xlu0 }
  0xdb   : > { %4086 = vset.pattern.permute.xlu1 %v4553_v0 }
  0xdc   : > { %372 = vperm.xlu1 %4086, %v220_v4   ;;  %v4720_v9 = vpop.trf.xlu0 }
  0xe0   : > { %4087 = vset.pattern.permute.xlu1 %v4555_v5  ;;  %v4729_v14 = vpop.trf.xlu0 }
  0xe1   : > { %488 = vperm.xlu1 %4087, %v220_v4  }
  0xe4   : > { %v4736_v18 = vpop.trf.xlu0 }
  0xe5   : > { %4088 = vset.pattern.permute.xlu1 %v8403_v2 }
  0xe6   : > { %247 = vperm.xlu1 %4088, %v221_v6  }
  0xe8   : > { %v4745_v21 = vpop.trf.xlu0 }
  0xea   : > { %4089 = vset.pattern.permute.xlu1 %v4553_v0 }
  0xeb   : > { %376 = vperm.xlu1 %4089, %v221_v6  }
  0xec   : > { %v4754_v24 = vpop.trf.xlu0 }
  0xef   : > { %4090 = vset.pattern.permute.xlu1 %v4555_v5 }
  0xf0   : > { %492 = vperm.xlu1 %4090, %v221_v6   ;;  %v4763_v27 = vpop.trf.xlu0 }
  0xf1   : > { %520 = vperm.xlu0 %4111, %v4763_v27  }
  0xf4   : > { %4091 = vset.pattern.permute.xlu1 %v8403_v2  ;;  %v4773_v30 = vpop.trf.xlu0 }
  0xf5   : > { %252 = vperm.xlu1 %4091, %v4717_v7   ;;  %4112 = vset.pattern.permute.xlu0 %v8403_v2 }
  0xf6   : > { %287 = vperm.xlu0 %4112, %v4773_v30  }
  0xf8   : > { %v4784_v33 = vpop.trf.xlu0 }
  0xf9   : > { %4092 = vset.pattern.permute.xlu1 %v4553_v0 }
  0xfa   : > { %380 = vperm.xlu1 %4092, %v4717_v7  }
  0xfc   : > { %v4793_v35 = vpop.trf.xlu0 }
  0xfd   : > { %297 = vperm.xlu0 %4112, %v4793_v35  }
  0xfe   : > { %4093 = vset.pattern.permute.xlu1 %v4555_v5 }
  0xff   : > { %496 = vperm.xlu1 %4093, %v4717_v7  }
 0x100   : > { %v4807_v36 = vpop.trf.xlu0 }
 0x101   : > { %4116 = vset.pattern.permute.xlu0 %v4553_v0 }
 0x102   : > { %408 = vperm.xlu0 %4116, %v4773_v30  }
 0x103   : > { %4094 = vset.pattern.permute.xlu1 %v8403_v2 }
 0x104   : > { %257 = vperm.xlu1 %4094, %v4720_v9   ;;  %v4813_v37 = vpop.trf.xlu0 }
 0x106   : > { %420 = vperm.xlu0 %4116, %v4807_v36  }
 0x108   : > { %4095 = vset.pattern.permute.xlu1 %v4553_v0  ;;  %v4821_v38 = vpop.trf.xlu0 }
 0x109   : > { %384 = vperm.xlu1 %4095, %v4720_v9  }
 0x10a   : > { %424 = vperm.xlu0 %4116, %v4813_v37  }
 0x10d   : > { %4096 = vset.pattern.permute.xlu1 %v4555_v5 }
 0x10e   : > { %500 = vperm.xlu1 %4096, %v4720_v9   ;;  %4121 = vset.pattern.permute.xlu0 %v4555_v5 }
 0x10f   : > { %532 = vperm.xlu0 %4121, %v4793_v35  }
 0x112   : > { %4097 = vset.pattern.permute.xlu1 %v8403_v2 }
 0x113   : > { %262 = vperm.xlu1 %4097, %v4729_v14   ;;  %544 = vperm.xlu0 %4121, %v4821_v38  }
 0x117   : > { %4098 = vset.pattern.permute.xlu1 %v4553_v0 }
 0x118   : > { %388 = vperm.xlu1 %4098, %v4729_v14  }
 0x11c   : > { %4099 = vset.pattern.permute.xlu1 %v4555_v5 }
 0x11d   : > { %504 = vperm.xlu1 %4099, %v4729_v14  }
 0x121   : > { %4100 = vset.pattern.permute.xlu1 %v8403_v2 }
 0x122   : > { %267 = vperm.xlu1 %4100, %v4736_v18  }
 0x126   : > { %4101 = vset.pattern.permute.xlu1 %v4553_v0 }
 0x127   : > { %392 = vperm.xlu1 %4101, %v4736_v18  }
 0x12b   : > { %4102 = vset.pattern.permute.xlu1 %v4555_v5 }
 0x12c   : > { %508 = vperm.xlu1 %4102, %v4736_v18  }
 0x130   : > { %4103 = vset.pattern.permute.xlu1 %v8403_v2 }
 0x131   : > { %272 = vperm.xlu1 %4103, %v4745_v21  }
 0x135   : > { %4104 = vset.pattern.permute.xlu1 %v4553_v0 }
 0x136   : > { %396 = vperm.xlu1 %4104, %v4745_v21  }
 0x13a   : > { %4105 = vset.pattern.permute.xlu1 %v4555_v5 }
 0x13b   : > { %512 = vperm.xlu1 %4105, %v4745_v21  }
 0x13f   : > { %4106 = vset.pattern.permute.xlu1 %v8403_v2 }
 0x140   : > { %277 = vperm.xlu1 %4106, %v4754_v24  }
 0x144   : > { %4107 = vset.pattern.permute.xlu1 %v4553_v0 }
 0x145   : > { %400 = vperm.xlu1 %4107, %v4754_v24  }
 0x148   : > { %v369_v39 = vpop.permute.xlu1 %368  ;;  %v238_v47 = vpop.permute.xlu0 %237 }
 0x149   : > { %4108 = vset.pattern.permute.xlu1 %v4555_v5  ;;  %v435_v50 = vsub.f32 %v369_v39, %v4852_v45  ;;  %v319_v51 = vsub.f32 %v238_v47, %v4854_v46 }
 0x14a   : > { %516 = vperm.xlu1 %4108, %v4754_v24  }
 0x14b   : > { %v451_v55 = vmul.f32 %v435_v50, %v435_v50  ;;  %v335_v56 = vmul.f32 %v319_v51, %v319_v51 }
 0x14d   : > { %v485_v42 = vpop.permute.xlu1 %484  ;;  %v467_v61 = vadd.f32 %v451_v55, %v335_v56 }
 0x14e   : > { %4109 = vset.pattern.permute.xlu1 %v8403_v2  ;;  %v551_v52 = vsub.f32 %v485_v42, %v4856_v49 }
 0x14f   : > { %282 = vperm.xlu1 %4109, %v4763_v27  }
 0x150   : > { %v567_v58 = vmul.f32 %v551_v52, %v551_v52 }
 0x152   : > { %v243_v48 = vpop.permute.xlu1 %242  ;;  %v4870_v1 = vadd.f32 %v567_v58, %v467_v61 }
 0x153   : > { %4110 = vset.pattern.permute.xlu1 %v4553_v0  ;;  %v320_v57 = vsub.f32 %v243_v48, %v4854_v46 }
 0x154   : > { %404 = vperm.xlu1 %4110, %v4763_v27   ;;  %8750 = vst [vmem:[#allocation12_spill] sm:$0xff] %v4870_v1  ;;  %vm8395_vm8 = vcmp.lt.f32.partialorder %v4870_v1, 0.09 }
 0x155   : > { %v336_v62 = vmul.f32 %v320_v57, %v320_v57 }
 0x157   : > { %v373_v53 = vpop.permute.xlu1 %372 }
 0x158   : > { %v436_v54 = vsub.f32 %v373_v53, %v4852_v45  ;;  %4113 = vset.pattern.permute.xlu1 %v8403_v2 }
 0x159   : > { %292 = vperm.xlu1 %4113, %v4784_v33  }
 0x15a   : > { %v452_v59 = vmul.f32 %v436_v54, %v436_v54 }
 0x15c   : > { %v489_v60 = vpop.permute.xlu1 %488  ;;  %v468_v3 = vadd.f32 %v452_v59, %v336_v62 }
 0x15d   : > { %v552_v63 = vsub.f32 %v489_v60, %v4856_v49  ;;  %4114 = vset.pattern.permute.xlu1 %v4553_v0 }
 0x15e   : > { %412 = vperm.xlu1 %4114, %v4784_v33  }
 0x15f   : > { %v568_v4 = vmul.f32 %v552_v63, %v552_v63 }
 0x161   : > { %v4872_v6 = vadd.f32 %v568_v4, %v468_v3  ;;  %v248_v7 = vpop.permute.xlu1 %247 }
 0x162   : > { %4115 = vset.pattern.permute.xlu1 %v4555_v5  ;;  %v321_v12 = vsub.f32 %v248_v7, %v4854_v46 }
 0x163   : > { %8751 = vst [vmem:[#allocation13_spill] sm:$0xff] %v4872_v6  ;;  %vm8396_vm9 = vcmp.lt.f32.partialorder %v4872_v6, 0.09  ;;  %524 = vperm.xlu1 %4115, %v4773_v30  }
 0x164   : > { %vm3190_vm10 = vmpackc.low %vm8396_vm9, %vm8395_vm8  ;;  %v337_v20 = vmul.f32 %v321_v12, %v321_v12 }
 0x165   : > { %3987 = vmatprep.mubr.msk.bf16.mxu0 %vm3190_vm10, %v8401_v15 }
 0x166   : > { %v377_v8 = vpop.permute.xlu1 %376 }
 0x167   : > { %528 = vperm.xlu1 %4115, %v4784_v33   ;;  %v437_v11 = vsub.f32 %v377_v8, %v4852_v45 }
 0x169   : > { %v453_v18 = vmul.f32 %v437_v11, %v437_v11 }
 0x16b   : > { %v493_v9 = vpop.permute.xlu1 %492  ;;  %4117 = vset.pattern.permute.xlu1 %v8403_v2  ;;  %v469_v24 = vadd.f32 %v453_v18, %v337_v20 }
 0x16c   : > { %302 = vperm.xlu1 %4117, %v4807_v36   ;;  %v553_v14 = vsub.f32 %v493_v9, %v4856_v49 }
 0x16e   : > { %v569_v21 = vmul.f32 %v553_v14, %v553_v14 }
 0x170   : > { %v253_v10 = vpop.permute.xlu1 %252  ;;  %4118 = vset.pattern.permute.xlu1 %v4553_v0  ;;  %v4897_v27 = vadd.f32 %v569_v21, %v469_v24 }
 0x171   : > { %416 = vperm.xlu1 %4118, %v4793_v35   ;;  %v322_v19 = vsub.f32 %v253_v10, %v4854_v46 }
 0x172   : > { %8752 = vst [vmem:[#allocation14_spill] sm:$0xff] %v4897_v27  ;;  %vm8397_vm11 = vcmp.lt.f32.partialorder %v4897_v27, 0.09 }
 0x173   : > { %v338_v25 = vmul.f32 %v322_v19, %v322_v19 }
 0x175   : > { %v381_v16 = vpop.permute.xlu1 %380  ;;  %4119 = vset.pattern.permute.xlu1 %v8403_v2 }
 0x176   : > { %v438_v17 = vsub.f32 %v381_v16, %v4852_v45  ;;  %307 = vperm.xlu1 %4119, %v4813_v37  }
 0x178   : > { %v454_v22 = vmul.f32 %v438_v17, %v438_v17 }
 0x17a   : > { %v497_v23 = vpop.permute.xlu1 %496  ;;  %312 = vperm.xlu1 %4119, %v4821_v38   ;;  %v470_v28 = vadd.f32 %v454_v22, %v338_v25  ;;  %v521_v22 = vpop.permute.xlu0 %520 }
 0x17b   : > { %v554_v26 = vsub.f32 %v497_v23, %v4856_v49 }
 0x17d   : > { %v570_v29 = vmul.f32 %v554_v26, %v554_v26 }
 0x17e   : > { %4120 = vset.pattern.permute.xlu1 %v4553_v0 }
 0x17f   : > { %v4900_v30 = vadd.f32 %v570_v29, %v470_v28  ;;  %v258_v31 = vpop.permute.xlu1 %257  ;;  %428 = vperm.xlu1 %4120, %v4821_v38   ;;  %v288_v28 = vpop.permute.xlu0 %287 }
 0x180   : > { %v323_v35 = vsub.f32 %v258_v31, %v4854_v46 }
 0x181   : > { %8753 = vst [vmem:[#allocation15_spill] sm:$0xff] %v4900_v30  ;;  %vm8398_vm12 = vcmp.lt.f32.partialorder %v4900_v30, 0.09 }
 0x182   : > { %vm3192_vm13 = vmpackc.low %vm8398_vm12, %vm8397_vm11  ;;  %v339_v42 = vmul.f32 %v323_v35, %v323_v35 }
 0x183   : > { %4122 = vset.pattern.permute.xlu1 %v4555_v5  ;;  %3988 = vmatmul.mubr.msk.bf16.vlgmr.msra.gmra.mxu0 %vm3192_vm13, %v8401_v15 }
 0x184   : > { %v385_v32 = vpop.permute.xlu1 %384  ;;  %536 = vperm.xlu1 %4122, %v4807_v36  }
 0x185   : > { %v439_v34 = vsub.f32 %v385_v32, %v4852_v45 }
 0x187   : > { %v455_v41 = vmul.f32 %v439_v34, %v439_v34 }
 0x188   : > { %540 = vperm.xlu1 %4122, %v4813_v37  }
 0x189   : > { %v501_v0 = vpop.permute.xlu1 %500  ;;  %v471_v47 = vadd.f32 %v455_v41, %v339_v42 }
 0x18a   : > { %v555_v38 = vsub.f32 %v501_v0, %v4856_v49 }
 0x18c   : > { %v571_v43 = vmul.f32 %v555_v38, %v555_v38 }
 0x18e   : > { %v263_v33 = vpop.permute.xlu1 %262  ;;  %v4919_v50 = vadd.f32 %v571_v43, %v471_v47 }
 0x18f   : > { %v324_v5 = vsub.f32 %v263_v33, %v4854_v46  ;;  %v560_v33 = vsub.f32 %v521_v22, %v4856_v49 }
 0x190   : > { %8754 = vst [vmem:[#allocation16_spill] sm:$0xff] %v4919_v50  ;;  %vm8399_vm14 = vcmp.lt.f32.partialorder %v4919_v50, 0.09 }
 0x191   : > { %v340_v37 = vmul.f32 %v324_v5, %v324_v5  ;;  %v576_v5 = vmul.f32 %v560_v33, %v560_v33 }
 0x193   : > { %v389_v39 = vpop.permute.xlu1 %388 }
 0x194   : > { %v440_v40 = vsub.f32 %v389_v39, %v4852_v45 }
 0x196   : > { %v456_v44 = vmul.f32 %v440_v40, %v440_v40  ;;  %v298_v40 = vpop.permute.xlu0 %297 }
 0x198   : > { %v505_v36 = vpop.permute.xlu1 %504  ;;  %v472_v51 = vadd.f32 %v456_v44, %v340_v37 }
 0x199   : > { %v556_v48 = vsub.f32 %v505_v36, %v4856_v49 }
 0x19a   : > { %v409_v47 = vpop.permute.xlu0 %408 }
 0x19b   : > { %v572_v52 = vmul.f32 %v556_v48, %v556_v48  ;;  %v329_v48 = vsub.f32 %v288_v28, %v4854_v46 }
 0x19d   : > { %v4921_v53 = vadd.f32 %v572_v52, %v472_v51  ;;  %v268_v54 = vpop.permute.xlu1 %267  ;;  %v445_v51 = vsub.f32 %v409_v47, %v4852_v45 }
 0x19e   : > { %v325_v59 = vsub.f32 %v268_v54, %v4854_v46 }
 0x19f   : > { %8755 = vst [vmem:[#allocation17_spill] sm:$0xff] %v4921_v53  ;;  %vm8400_vm15 = vcmp.lt.f32.partialorder %v4921_v53, 0.09 }
 0x1a0   : > { %vm3194_vm0 = vmpackc.low %vm8400_vm15, %vm8399_vm14  ;;  %v341_v4 = vmul.f32 %v325_v59, %v325_v59 }
 0x1a1   : > { %3991 = vmatprep.mubr.msk.bf16.mxu0 %vm3194_vm0, %v8401_v15 }
 0x1a2   : > { %v393_v55 = vpop.permute.xlu1 %392 }
 0x1a3   : > { %v441_v58 = vsub.f32 %v393_v55, %v4852_v45  ;;  %v345_v55 = vmul.f32 %v329_v48, %v329_v48 }
 0x1a5   : > { %v457_v63 = vmul.f32 %v441_v58, %v441_v58 }
 0x1a7   : > { %v509_v56 = vpop.permute.xlu1 %508  ;;  %v473_v10 = vadd.f32 %v457_v63, %v341_v4 }
 0x1a8   : > { %v557_v60 = vsub.f32 %v509_v56, %v4856_v49  ;;  %v461_v56 = vmul.f32 %v445_v51, %v445_v51 }
 0x1aa   : > { %v573_v7 = vmul.f32 %v557_v60, %v557_v60 }
 0x1ac   : > { %v273_v57 = vpop.permute.xlu1 %272  ;;  %v4936_v14 = vadd.f32 %v573_v7, %v473_v10 }
 0x1ad   : > { %v326_v3 = vsub.f32 %v273_v57, %v4854_v46 }
 0x1ae   : > { %8756 = vst [vmem:[#allocation18_spill] sm:$0xff] %v4936_v14  ;;  %vm8449_vm1 = vcmp.lt.f32.partialorder %v4936_v14, 0.09 }
 0x1af   : > { %v342_v11 = vmul.f32 %v326_v3, %v326_v3 }
 0x1b1   : > { %v397_v61 = vpop.permute.xlu1 %396 }
 0x1b2   : > { %v442_v62 = vsub.f32 %v397_v61, %v4852_v45 }
 0x1b4   : > { %v458_v8 = vmul.f32 %v442_v62, %v442_v62  ;;  %v477_v62 = vadd.f32 %v461_v56, %v345_v55 }
 0x1b6   : > { %v513_v9 = vpop.permute.xlu1 %512  ;;  %v474_v16 = vadd.f32 %v458_v8, %v342_v11  ;;  %v421_v11 = vpop.permute.xlu0 %420 }
 0x1b7   : > { %v558_v12 = vsub.f32 %v513_v9, %v4856_v49 }
 0x1b9   : > { %v574_v17 = vmul.f32 %v558_v12, %v558_v12 }
 0x1bb   : > { %v4938_v18 = vadd.f32 %v574_v17, %v474_v16  ;;  %v278_v19 = vpop.permute.xlu1 %277  ;;  %v425_v17 = vpop.permute.xlu0 %424 }
 0x1bc   : > { %v327_v25 = vsub.f32 %v278_v19, %v4854_v46 }
 0x1bd   : > { %8757 = vst [vmem:[#allocation19_spill] sm:$0xff] %v4938_v18  ;;  %vm8477_vm2 = vcmp.lt.f32.partialorder %v4938_v18, 0.09 }
 0x1be   : > { %vm3196_vm3 = vmpackc.low %vm8477_vm2, %vm8449_vm1  ;;  %v343_v0 = vmul.f32 %v327_v25, %v327_v25 }
 0x1bf   : > { %3992 = vmatmul.mubr.msk.bf16.gmra.mxu0 %vm3196_vm3, %v8401_v15  ;;  %v533_v22 = vpop.permute.xlu0 %532 }
 0x1c0   : > { %v401_v20 = vpop.permute.xlu1 %400 }
 0x1c1   : > { %v443_v23 = vsub.f32 %v401_v20, %v4852_v45 }
 0x1c3   : > { %v459_v29 = vmul.f32 %v443_v23, %v443_v23 }
 0x1c5   : > { %v517_v21 = vpop.permute.xlu1 %516  ;;  %v475_v38 = vadd.f32 %v459_v29, %v343_v0  ;;  %v563_v29 = vsub.f32 %v533_v22, %v4856_v49  ;;  %v449_v0 = vsub.f32 %v425_v17, %v4852_v45 }
 0x1c6   : > { %v559_v26 = vsub.f32 %v517_v21, %v4856_v49  ;;  %v331_v21 = vsub.f32 %v298_v40, %v4854_v46 }
 0x1c8   : > { %v575_v34 = vmul.f32 %v559_v26, %v559_v26  ;;  %v347_v28 = vmul.f32 %v331_v21, %v331_v21 }
 0x1ca   : > { %v283_v24 = vpop.permute.xlu1 %282  ;;  %v4953_v42 = vadd.f32 %v575_v34, %v475_v38  ;;  %v545_v34 = vpop.permute.xlu0 %544 }
 0x1cb   : > { %v328_v31 = vsub.f32 %v283_v24, %v4854_v46  ;;  %v448_v24 = vsub.f32 %v421_v11, %v4852_v45 }
 0x1cc   : > { %8758 = vst [vmem:[#allocation20_spill] sm:$0xff] %v4953_v42  ;;  %vm8478_vm4 = vcmp.lt.f32.partialorder %v4953_v42, 0.09 }
 0x1cd   : > { %v344_v39 = vmul.f32 %v328_v31, %v328_v31 }
 0x1cf   : > { %v405_v32 = vpop.permute.xlu1 %404 }
 0x1d0   : > { %v444_v35 = vsub.f32 %v405_v32, %v4852_v45 }
 0x1d2   : > { %v460_v41 = vmul.f32 %v444_v35, %v444_v35  ;;  %v464_v35 = vmul.f32 %v448_v24, %v448_v24 }
 0x1d4   : > { %v476_v43 = vadd.f32 %v460_v41, %v344_v39  ;;  %v293_v44 = vpop.permute.xlu1 %292  ;;  %v579_v41 = vmul.f32 %v563_v29, %v563_v29 }
 0x1d5   : > { %v330_v57 = vsub.f32 %v293_v44, %v4854_v46  ;;  %v566_v44 = vsub.f32 %v545_v34, %v4856_v49 }
 0x1d6   : > { %v4955_v36 = vadd.f32 %v576_v5, %v476_v43 }
 0x1d7   : > { %v346_v63 = vmul.f32 %v330_v57, %v330_v57  ;;  %v582_v56 = vmul.f32 %v566_v44, %v566_v44 }
 0x1d8   : > { %8759 = vst [vmem:[#allocation21_spill] sm:$0xff] %v4955_v36  ;;  %vm8486_vm5 = vcmp.lt.f32.partialorder %v4955_v36, 0.09 }
 0x1d9   : > { %v413_v37 = vpop.permute.xlu1 %412  ;;  %vm3198_vm6 = vmpackc.low %vm8486_vm5, %vm8478_vm4 }
 0x1da   : > { %3995 = vmatprep.mubr.msk.bf16.mxu0 %vm3198_vm6, %v8401_v15  ;;  %v446_v52 = vsub.f32 %v413_v37, %v4852_v45  ;;  %v465_v37 = vmul.f32 %v449_v0, %v449_v0 }
 0x1dc   : > { %v462_v59 = vmul.f32 %v446_v52, %v446_v52 }
 0x1de   : > { %v525_v54 = vpop.permute.xlu1 %524  ;;  %v478_v4 = vadd.f32 %v462_v59, %v346_v63 }
 0x1df   : > { %v561_v58 = vsub.f32 %v525_v54, %v4856_v49 }
 0x1e1   : > { %v577_v60 = vmul.f32 %v561_v58, %v561_v58 }
 0x1e2   : > { %v529_v61 = vpop.permute.xlu1 %528 }
 0x1e3   : > { %v562_v3 = vsub.f32 %v529_v61, %v4856_v49  ;;  %v4970_v7 = vadd.f32 %v577_v60, %v477_v62 }
 0x1e5   : > { %8760 = vst [vmem:[#allocation22_spill] sm:$0xff] %v4970_v7  ;;  %v578_v8 = vmul.f32 %v562_v3, %v562_v3  ;;  %vm8490_vm7 = vcmp.lt.f32.partialorder %v4970_v7, 0.09 }
 0x1e7   : > { %v4972_v9 = vadd.f32 %v578_v8, %v478_v4  ;;  %v303_v10 = vpop.permute.xlu1 %302  ;;  %v8467_v4 = vmov 0.0  }
 0x1e8   : > { %v332_v25 = vsub.f32 %v303_v10, %v4854_v46 }
 0x1e9   : > { %8761 = vst [vmem:[#allocation23_spill] sm:$0xff] %v4972_v9  ;;  %vm8491_vm10 = vcmp.lt.f32.partialorder %v4972_v9, 0.09 }
 0x1ea   : > { %vm3200_vm13 = vmpackc.low %vm8491_vm10, %vm8490_vm7  ;;  %v348_v38 = vmul.f32 %v332_v25, %v332_v25 }
 0x1eb   : > { %3996 = vmatmul.mubr.msk.bf16.gmra.mxu0 %vm3200_vm13, %v8401_v15 }
 0x1ec   : > { %v417_v12 = vpop.permute.xlu1 %416  ;;  %v480_v51 = vadd.f32 %v464_v35, %v348_v38 }
 0x1ed   : > { %v447_v19 = vsub.f32 %v417_v12, %v4852_v45 }
 0x1ef   : > { %v463_v23 = vmul.f32 %v447_v19, %v447_v19 }
 0x1f1   : > { %v308_v16 = vpop.permute.xlu1 %307  ;;  %v479_v33 = vadd.f32 %v463_v23, %v347_v28 }
 0x1f2   : > { %v333_v39 = vsub.f32 %v308_v16, %v4854_v46 }
 0x1f3   : > { %v4992_v48 = vadd.f32 %v579_v41, %v479_v33 }
 0x1f4   : > { %v349_v52 = vmul.f32 %v333_v39, %v333_v39 }
 0x1f5   : > { %v313_v20 = vpop.permute.xlu1 %312  ;;  %8762 = vst [vmem:[#allocation24_spill] sm:$0xff] %v4992_v48  ;;  %vm8489_vm0 = vcmp.lt.f32.partialorder %v4992_v48, 0.09 }
 0x1f6   : > { %v334_v32 = vsub.f32 %v313_v20, %v4854_v46  ;;  %v481_v58 = vadd.f32 %v465_v37, %v349_v52 }
 0x1f8   : > { %v350_v43 = vmul.f32 %v334_v32, %v334_v32 }
 0x1fa   : > { %v429_v26 = vpop.permute.xlu1 %428 }
 0x1fb   : > { %v450_v31 = vsub.f32 %v429_v26, %v4852_v45 }
 0x1fd   : > { %v466_v40 = vmul.f32 %v450_v31, %v450_v31 }
 0x1ff   : > { %v537_v5 = vpop.permute.xlu1 %536  ;;  %v482_v45 = vadd.f32 %v466_v40, %v350_v43 }
 0x200   : > { %v564_v47 = vsub.f32 %v537_v5, %v4856_v49 }
 0x201   : > { %v4998_v59 = vadd.f32 %v582_v56, %v482_v45 }
 0x202   : > { %v580_v54 = vmul.f32 %v564_v47, %v564_v47 }
 0x203   : > { %v541_v55 = vpop.permute.xlu1 %540  ;;  %8764 = vst [vmem:[#allocation26_spill] sm:$0xff] %v4998_v59  ;;  %vm8492_vm13 = vcmp.lt.f32.partialorder %v4998_v59, 0.09 }
 0x204   : > { %v4994_v57 = vadd.f32 %v580_v54, %v480_v51  ;;  %v565_v46 = vsub.f32 %v541_v55, %v4856_v49  ;;  %v4557_v49 = vmov 127  }
 0x205   : > { %4123 = vset.pattern.permute.xlu0 %v4557_v49  ;;  %4124 = vset.pattern.permute.xlu1 %v4557_v49 }
 0x206   : > { %8763 = vst [vmem:[#allocation25_spill] sm:$0xff] %v4994_v57  ;;  %vm8487_vm3 = vcmp.lt.f32.partialorder %v4994_v57, 0.09  ;;  %v581_v60 = vmul.f32 %v565_v46, %v565_v46 }
 0x207   : > { %vm3202_vm6 = vmpackc.low %vm8487_vm3, %vm8489_vm0 }
 0x208   : > { %v5005_v61 = vadd.f32 %v581_v60, %v481_v58  ;;  %3999 = vmatprep.mubr.msk.bf16.mxu0 %vm3202_vm6, %v8401_v15 }
 0x20a   : > { %8765 = vst [vmem:[#allocation27_spill] sm:$0xff] %v5005_v61  ;;  %vm8494_vm8 = vcmp.lt.f32.partialorder %v5005_v61, 0.09 }
 0x20b   : > { %vm3204_vm9 = vmpackc.low %vm8492_vm13, %vm8494_vm8 }
 0x20c   : > { %4000 = vmatmul.mubr.msk.bf16.gmra.mxu0 %vm3204_vm9, %v8401_v15 }
 0x243   : > { %v5015_v62 = vpop.f32.mrf.mxu0 }
 0x244   : > { %vm1057_vm11 = vcmp.gt.f32.partialorder %v5015_v62, 1.0  ;;  %vm1257_vm6 = vcmp.gt.f32.partialorder %v5015_v62, 2.0  ;;  %vm1457_vm12 = vcmp.gt.f32.partialorder %v5015_v62, 3.0 }
 0x245   : > { %v5019_v63 = vpop.f32.mrf.mxu0  ;;  %v5025_v8 = vsel %vm1057_vm11, 1.0, %v8467_v4  ;;  %v5028_v10 = vsel %vm1257_vm6, 2.0, %v8467_v4  ;;  %v5033_v11 = vsel %vm1457_vm12, 3.0, %v8467_v4 }
 0x246   : > { %vm1455_vm15 = vcmp.gt.f32.partialorder %v5019_v63, 3.0  ;;  %vm1055_vm6 = vcmp.gt.f32.partialorder %v5019_v63, 1.0  ;;  %vm1255_vm12 = vcmp.gt.f32.partialorder %v5019_v63, 2.0 }
 0x247   : > { %v5022_v3 = vpop.f32.mrf.mxu0  ;;  %v5059_v23 = vsel %vm1455_vm15, 3.0, %v8467_v4  ;;  %v5065_v25 = vsel %vm1055_vm6, 1.0, %v8467_v4  ;;  %v5076_v31 = vsel %vm1255_vm12, 2.0, %v8467_v4  ;;  %vm1857_vm15 = vcmp.gt.f32.partialorder %v5015_v62, 5.0 }
 0x248   : > { %vm1058_vm9 = vcmp.gt.f32.partialorder %v5022_v3, 1.0  ;;  %vm1258_vm14 = vcmp.gt.f32.partialorder %v5022_v3, 2.0  ;;  %vm1458_vm11 = vcmp.gt.f32.partialorder %v5022_v3, 3.0  ;;  %vm1858_vm6 = vcmp.gt.f32.partialorder %v5022_v3, 5.0 }
 0x249   : > { %v5036_v12 = vpop.f32.mrf.mxu0  ;;  %v5039_v16 = vsel %vm1058_vm9, 1.0, %v8467_v4  ;;  %v5042_v17 = vsel %vm1258_vm14, 2.0, %v8467_v4  ;;  %v5051_v21 = vsel %vm1458_vm11, 3.0, %v8467_v4  ;;  %v5087_v33 = vsel %vm1857_vm15, 5.0, %v8467_v4 }
 0x24a   : > { %vm1456_vm14 = vcmp.gt.f32.partialorder %v5036_v12, 3.0  ;;  %vm1056_vm9 = vcmp.gt.f32.partialorder %v5036_v12, 1.0  ;;  %vm1256_vm11 = vcmp.gt.f32.partialorder %v5036_v12, 2.0  ;;  %8766 = vst [vmem:[#allocation28_spill] sm:$0xff] %v5087_v33  ;;  %v5090_v34 = vsel %vm1858_vm6, 5.0, %v8467_v4 }
 0x24b   : > { %v5062_v24 = vsel %vm1456_vm14, 3.0, %v8467_v4  ;;  %v5068_v26 = vsel %vm1056_vm9, 1.0, %v8467_v4  ;;  %v5079_v32 = vsel %vm1256_vm11, 2.0, %v8467_v4  ;;  %vm1657_vm14 = vcmp.gt.f32.partialorder %v5015_v62, 4.0  ;;  %8767 = vst [vmem:[#allocation29_spill] sm:$0xff] %v5090_v34 }
 0x24c   : > { %vm1658_vm12 = vcmp.gt.f32.partialorder %v5022_v3, 4.0  ;;  %v5096_v38 = vsel %vm1657_vm14, 4.0, %v8467_v4  ;;  %vm2257_vm9 = vcmp.gt.f32.partialorder %v5015_v62, 7.0  ;;  %vm2258_vm11 = vcmp.gt.f32.partialorder %v5022_v3, 7.0 }
 0x24d   : > { %8768 = vst [vmem:[#allocation30_spill] sm:$0xff] %v5096_v38  ;;  %v5099_v39 = vsel %vm1658_vm12, 4.0, %v8467_v4  ;;  %v5106_v41 = vsel %vm2257_vm9, 7.0, %v8467_v4  ;;  %vm1855_vm15 = vcmp.gt.f32.partialorder %v5019_v63, 5.0  ;;  %v5110_v5 = vsel %vm2258_vm11, 7.0, %v8467_v4 }
 0x24e   : > { %8769 = vst [vmem:[#allocation31_spill] sm:$0xff] %v5099_v39  ;;  %8770 = vst [vmem:[#allocation32_spill] sm:$0xff] %v5106_v41  ;;  %vm1856_vm6 = vcmp.gt.f32.partialorder %v5036_v12, 5.0  ;;  %v5114_v43 = vsel %vm1855_vm15, 5.0, %v8467_v4  ;;  %vm2057_vm14 = vcmp.gt.f32.partialorder %v5015_v62, 6.0  ;;  %vm2058_vm12 = vcmp.gt.f32.partialorder %v5022_v3, 6.0 }
 0x24f   : > { %8771 = vst [vmem:[#allocation33_spill] sm:$0xff] %v5110_v5  ;;  %8772 = vst [vmem:[#allocation34_spill] sm:$0xff] %v5114_v43  ;;  %v5120_v47 = vsel %vm1856_vm6, 5.0, %v8467_v4  ;;  %v5124_v37 = vsel %vm2057_vm14, 6.0, %v8467_v4  ;;  %v5129_v52 = vsel %vm2058_vm12, 6.0, %v8467_v4  ;;  %vm1655_vm9 = vcmp.gt.f32.partialorder %v5019_v63, 4.0 }
 0x250   : > { %8773 = vst [vmem:[#allocation35_spill] sm:$0xff] %v5120_v47  ;;  %8774 = vst [vmem:[#allocation36_spill] sm:$0xff] %v5124_v37  ;;  %vm1656_vm11 = vcmp.gt.f32.partialorder %v5036_v12, 4.0  ;;  %v5136_v54 = vsel %vm1655_vm9, 4.0, %v8467_v4  ;;  %vm2255_vm15 = vcmp.gt.f32.partialorder %v5019_v63, 7.0  ;;  %vm2256_vm6 = vcmp.gt.f32.partialorder %v5036_v12, 7.0 }
 0x251   : > { %8775 = vst [vmem:[#allocation37_spill] sm:$0xff] %v5129_v52  ;;  %8776 = vst [vmem:[#allocation38_spill] sm:$0xff] %v5136_v54  ;;  %v5139_v55 = vsel %vm1656_vm11, 4.0, %v8467_v4  ;;  %vm2055_vm14 = vcmp.gt.f32.partialorder %v5019_v63, 6.0  ;;  %v5147_v46 = vsel %vm2255_vm15, 7.0, %v8467_v4  ;;  %v5150_v58 = vsel %vm2256_vm6, 7.0, %v8467_v4 }
 0x252   : > { %8777 = vst [vmem:[#allocation39_spill] sm:$0xff] %v5139_v55  ;;  %8778 = vst [vmem:[#allocation40_spill] sm:$0xff] %v5147_v46  ;;  %vm2056_vm12 = vcmp.gt.f32.partialorder %v5036_v12, 6.0  ;;  %v5156_v49 = vsel %vm2055_vm14, 6.0, %v8467_v4  ;;  %v8799_v52 = vmov 0  }
 0x253   : > { %8779 = vst [vmem:[#allocation41_spill] sm:$0xff] %v5150_v58  ;;  %8780 = vst [vmem:[#allocation42_spill] sm:$0xff] %v5156_v49  ;;  %v5159_v15 = vsel %vm2056_vm12, 6.0, %v8467_v4 }
 0x254   : > { %8781 = vst [vmem:[#allocation43_spill] sm:$0xff] %v5159_v15 }
 0x27f   : > { %v5163_v45 = vpop.f32.mrf.mxu0 }
 0x280   : > { %vm1061_vm9 = vcmp.gt.f32.partialorder %v5163_v45, 1.0  ;;  %vm1261_vm11 = vcmp.gt.f32.partialorder %v5163_v45, 2.0  ;;  %vm1461_vm15 = vcmp.gt.f32.partialorder %v5163_v45, 3.0 }
 0x281   : > { %v5167_v51 = vpop.f32.mrf.mxu0  ;;  %v5173_v44 = vsel %vm1061_vm9, 1.0, %v8467_v4  ;;  %v5176_v40 = vsel %vm1261_vm11, 2.0, %v8467_v4  ;;  %v5181_v56 = vsel %vm1461_vm15, 3.0, %v8467_v4 }
 0x282   : > { %vm1459_vm12 = vcmp.gt.f32.partialorder %v5167_v51, 3.0  ;;  %vm1059_vm11 = vcmp.gt.f32.partialorder %v5167_v51, 1.0  ;;  %vm1259_vm15 = vcmp.gt.f32.partialorder %v5167_v51, 2.0 }
 0x283   : > { %v5170_v60 = vpop.f32.mrf.mxu0  ;;  %v5207_v2 = vsel %vm1459_vm12, 3.0, %v8467_v4  ;;  %v5213_v22 = vsel %vm1059_vm11, 1.0, %v8467_v4  ;;  %v5224_v27 = vsel %vm1259_vm15, 2.0, %v8467_v4  ;;  %vm1861_vm12 = vcmp.gt.f32.partialorder %v5163_v45, 5.0 }
 0x284   : > { %vm1062_vm6 = vcmp.gt.f32.partialorder %v5170_v60, 1.0  ;;  %vm1262_vm14 = vcmp.gt.f32.partialorder %v5170_v60, 2.0  ;;  %vm1462_vm9 = vcmp.gt.f32.partialorder %v5170_v60, 3.0  ;;  %vm1862_vm11 = vcmp.gt.f32.partialorder %v5170_v60, 5.0 }
 0x285   : > { %v5184_v35 = vpop.f32.mrf.mxu0  ;;  %v5187_v0 = vsel %vm1062_vm6, 1.0, %v8467_v4  ;;  %v5190_v29 = vsel %vm1262_vm14, 2.0, %v8467_v4  ;;  %v5199_v20 = vsel %vm1462_vm9, 3.0, %v8467_v4  ;;  %v5235_v50 = vsel %vm1861_vm12, 5.0, %v8467_v4 }
 0x286   : > { %vm1460_vm6 = vcmp.gt.f32.partialorder %v5184_v35, 3.0  ;;  %vm1060_vm14 = vcmp.gt.f32.partialorder %v5184_v35, 1.0  ;;  %vm1260_vm9 = vcmp.gt.f32.partialorder %v5184_v35, 2.0  ;;  %8782 = vst [vmem:[#allocation44_spill] sm:$0xff] %v5235_v50  ;;  %v5238_v19 = vsel %vm1862_vm11, 5.0, %v8467_v4 }
 0x287   : > { %v5210_v28 = vsel %vm1460_vm6, 3.0, %v8467_v4  ;;  %v5216_v1 = vsel %vm1060_vm14, 1.0, %v8467_v4  ;;  %v5227_v30 = vsel %vm1260_vm9, 2.0, %v8467_v4  ;;  %vm1661_vm6 = vcmp.gt.f32.partialorder %v5163_v45, 4.0  ;;  %8783 = vst [vmem:[#allocation45_spill] sm:$0xff] %v5238_v19 }
 0x288   : > { %vm1662_vm15 = vcmp.gt.f32.partialorder %v5170_v60, 4.0  ;;  %v5244_v14 = vsel %vm1661_vm6, 4.0, %v8467_v4  ;;  %vm2261_vm14 = vcmp.gt.f32.partialorder %v5163_v45, 7.0  ;;  %vm2262_vm9 = vcmp.gt.f32.partialorder %v5170_v60, 7.0 }
 0x289   : > { %8784 = vst [vmem:[#allocation46_spill] sm:$0xff] %v5244_v14  ;;  %v5247_v18 = vsel %vm1662_vm15, 4.0, %v8467_v4  ;;  %v5254_v42 = vsel %vm2261_vm14, 7.0, %v8467_v4  ;;  %vm1859_vm12 = vcmp.gt.f32.partialorder %v5167_v51, 5.0  ;;  %v5258_v53 = vsel %vm2262_vm9, 7.0, %v8467_v4 }
 0x28a   : > { %8785 = vst [vmem:[#allocation47_spill] sm:$0xff] %v5247_v18  ;;  %8786 = vst [vmem:[#allocation48_spill] sm:$0xff] %v5254_v42  ;;  %vm1860_vm11 = vcmp.gt.f32.partialorder %v5184_v35, 5.0  ;;  %v5262_v36 = vsel %vm1859_vm12, 5.0, %v8467_v4  ;;  %vm2061_vm6 = vcmp.gt.f32.partialorder %v5163_v45, 6.0  ;;  %vm2062_vm15 = vcmp.gt.f32.partialorder %v5170_v60, 6.0 }
 0x28b   : > { %8787 = vst [vmem:[#allocation49_spill] sm:$0xff] %v5258_v53  ;;  %8788 = vst [vmem:[#allocation50_spill] sm:$0xff] %v5262_v36  ;;  %v5268_v57 = vsel %vm1860_vm11, 5.0, %v8467_v4  ;;  %v5272_v48 = vsel %vm2061_vm6, 6.0, %v8467_v4  ;;  %v5277_v7 = vsel %vm2062_vm15, 6.0, %v8467_v4  ;;  %vm1659_vm14 = vcmp.gt.f32.partialorder %v5167_v51, 4.0 }
 0x28c   : > { %8789 = vst [vmem:[#allocation51_spill] sm:$0xff] %v5268_v57  ;;  %8790 = vst [vmem:[#allocation52_spill] sm:$0xff] %v5272_v48  ;;  %vm1660_vm9 = vcmp.gt.f32.partialorder %v5184_v35, 4.0  ;;  %v5284_v49 = vsel %vm1659_vm14, 4.0, %v8467_v4  ;;  %vm2259_vm12 = vcmp.gt.f32.partialorder %v5167_v51, 7.0  ;;  %vm2260_vm11 = vcmp.gt.f32.partialorder %v5184_v35, 7.0 }
 0x28d   : > { %8791 = vst [vmem:[#allocation53_spill] sm:$0xff] %v5277_v7  ;;  %8792 = vst [vmem:[#allocation54_spill] sm:$0xff] %v5284_v49  ;;  %v5287_v15 = vsel %vm1660_vm9, 4.0, %v8467_v4  ;;  %vm2059_vm6 = vcmp.gt.f32.partialorder %v5167_v51, 6.0  ;;  %v5295_v13 = vsel %vm2259_vm12, 7.0, %v8467_v4  ;;  %v5298_v6 = vsel %vm2260_vm11, 7.0, %v8467_v4 }
 0x28e   : > { %8793 = vst [vmem:[#allocation55_spill] sm:$0xff] %v5287_v15  ;;  %8794 = vst [vmem:[#allocation56_spill] sm:$0xff] %v5295_v13  ;;  %vm2060_vm15 = vcmp.gt.f32.partialorder %v5184_v35, 6.0  ;;  %v5304_v58 = vsel %vm2059_vm6, 6.0, %v8467_v4  ;;  %v8809_v57 = vmov 0.0  }
 0x28f   : > { %8795 = vst [vmem:[#allocation57_spill] sm:$0xff] %v5298_v6  ;;  %8796 = vst [vmem:[#allocation58_spill] sm:$0xff] %v5304_v58  ;;  %v5307_v9 = vsel %vm2060_vm15, 6.0, %v8467_v4 }
 0x290   : > { %8797 = vst [vmem:[#allocation59_spill] sm:$0xff] %v5307_v9 }
 0x2ab   : > { %v5311_v55 = vpop.f32.mrf.mxu0 }
 0x2ac   : > { %8798 = vst [vmem:[#allocation60_spill] sm:$0xff] %v5311_v55  ;;  %vm853_vm14 = vcmp.eq.f32.partialorder %v5311_v55, 0.0  ;;  %vm1065_vm9 = vcmp.gt.f32.partialorder %v5311_v55, 1.0  ;;  %vm1465_vm12 = vcmp.gt.f32.partialorder %v5311_v55, 3.0  ;;  %vm1265_vm1 = vcmp.gt.f32.partialorder %v5311_v55, 2.0 }
 0x2ad   : > { %v5314_v37 = vpop.f32.mrf.mxu0  ;;  %v870_v59 = vsel %vm853_vm14, 1, %v8799_v52  ;;  %v1081_v54 = vsel %vm1065_vm9, 1.0, %v8467_v4  ;;  %v1481_v41 = vsel %vm1465_vm12, 3.0, %v8467_v4  ;;  %v1281_v39 = vsel %vm1265_vm1, 2.0, %v8467_v4 }
 0x2ae   : > { %907 = vperm.xlu0 %4123, %v870_v59   ;;  %vm1865_vm9 = vcmp.gt.f32.partialorder %v5311_v55, 5.0  ;;  %vm2265_vm1 = vcmp.gt.f32.partialorder %v5311_v55, 7.0 }
 0x2af   : > { %v5318_v46 = vpop.f32.mrf.mxu0 }
 0x2b0   : > { %8800 = vst [vmem:[#allocation61_spill] sm:$0xff] %v5318_v46  ;;  %vm854_vm11 = vcmp.eq.f32.partialorder %v5318_v46, 0.0  ;;  %vm1066_vm6 = vcmp.gt.f32.partialorder %v5318_v46, 1.0  ;;  %vm1466_vm15 = vcmp.gt.f32.partialorder %v5318_v46, 3.0  ;;  %vm1266_vm14 = vcmp.gt.f32.partialorder %v5318_v46, 2.0 }
 0x2b1   : > { %v871_v61 = vsel %vm854_vm11, 1, %v8799_v52  ;;  %v1082_v43 = vsel %vm1066_vm6, 1.0, %v8467_v4  ;;  %v1482_v47 = vsel %vm1466_vm15, 3.0, %v8467_v4  ;;  %v1282_v5 = vsel %vm1266_vm14, 2.0, %v8467_v4 }
 0x2b2   : > { %910 = vperm.xlu1 %4124, %v871_v61   ;;  %v4125_v59 = vpack.i.bf16 %v1082_v43, %v1081_v54  ;;  %v4130_v38 = vpack.i.bf16 %v1482_v47, %v1481_v41  ;;  %v4135_v58 = vpack.i.bf16 %v1282_v5, %v1281_v39  ;;  %vm1866_vm11 = vcmp.gt.f32.partialorder %v5318_v46, 5.0  ;;  %v5336_v61 = vpop.f32.mrf.mxu0 }
 0x2b3   : > { %vm1665_vm6 = vcmp.gt.f32.partialorder %v5311_v55, 4.0  ;;  %v5339_v43 = vsel %vm1865_vm9, 5.0, %v8467_v4  ;;  %v5342_v54 = vsel %vm1866_vm11, 5.0, %v8467_v4  ;;  %vm1666_vm12 = vcmp.gt.f32.partialorder %v5318_v46, 4.0 }
 0x2b4   : > { %4126 = vperm.xlu0 %4123, %v4125_v59   ;;  %v5348_v39 = vsel %vm1665_vm6, 4.0, %v8467_v4  ;;  %v5351_v41 = vsel %vm1666_vm12, 4.0, %v8467_v4  ;;  %vm2266_vm15 = vcmp.gt.f32.partialorder %v5318_v46, 7.0  ;;  %v5358_v47 = vsel %vm2265_vm1, 7.0, %v8467_v4 }
 0x2b5   : > { %vm1863_vm14 = vcmp.gt.f32.partialorder %v5314_v37, 5.0  ;;  %vm1864_vm9 = vcmp.gt.f32.partialorder %v5336_v61, 5.0  ;;  %vm2065_vm11 = vcmp.gt.f32.partialorder %v5311_v55, 6.0  ;;  %vm2066_vm6 = vcmp.gt.f32.partialorder %v5318_v46, 6.0 }
 0x2b6   : > { %4131 = vperm.xlu1 %4124, %v4130_v38   ;;  %v5366_v59 = vsel %vm1863_vm14, 5.0, %v8467_v4  ;;  %v5372_v38 = vsel %vm1864_vm9, 5.0, %v8467_v4  ;;  %v5376_v9 = vsel %vm2065_vm11, 6.0, %v8467_v4  ;;  %v5381_v34 = vsel %vm2066_vm6, 6.0, %v8467_v4 }
 0x2b7   : > { %8801 = vst [vmem:[#allocation62_spill] sm:$0xff] %v5376_v9  ;;  %8802 = vst [vmem:[#allocation63_spill] sm:$0xff] %v5381_v34  ;;  %vm1663_vm12 = vcmp.gt.f32.partialorder %v5314_v37, 4.0  ;;  %vm1664_vm1 = vcmp.gt.f32.partialorder %v5336_v61, 4.0  ;;  %vm2264_vm14 = vcmp.gt.f32.partialorder %v5336_v61, 7.0  ;;  %vm2063_vm9 = vcmp.gt.f32.partialorder %v5314_v37, 6.0 }
 0x2b8   : > { %4136 = vperm.xlu0 %4123, %v4135_v58   ;;  %v5362_v58 = vsel %vm2266_vm15, 7.0, %v8467_v4  ;;  %v5388_v55 = vsel %vm1663_vm12, 4.0, %v8467_v4  ;;  %v5391_v46 = vsel %vm1664_vm1, 4.0, %v8467_v4  ;;  %vm2263_vm15 = vcmp.gt.f32.partialorder %v5314_v37, 7.0 }
 0x2b9   : > { %8803 = vst [vmem:[#allocation64_spill] sm:$0xff] %v5388_v55  ;;  %8804 = vst [vmem:[#allocation65_spill] sm:$0xff] %v5391_v46  ;;  %v5399_v13 = vsel %vm2263_vm15, 7.0, %v8467_v4  ;;  %v5402_v5 = vsel %vm2264_vm14, 7.0, %v8467_v4  ;;  %vm2064_vm11 = vcmp.gt.f32.partialorder %v5336_v61, 6.0  ;;  %v5408_v49 = vsel %vm2063_vm9, 6.0, %v8467_v4 }
 0x2ba   : > { %8805 = vst [vmem:[#allocation66_spill] sm:$0xff] %v5399_v13  ;;  %8806 = vst [vmem:[#allocation67_spill] sm:$0xff] %v5402_v5  ;;  %v5411_v33 = vsel %vm2064_vm11, 6.0, %v8467_v4 }
 0x2bb   : > { %8807 = vst [vmem:[#allocation68_spill] sm:$0xff] %v5408_v49  ;;  %8808 = vst [vmem:[#allocation69_spill] sm:$0xff] %v5411_v33 }
 0x2cc   : > { %v5415_v48 = vpop.f32.mrf.mxu0 }
 0x2cd   : > { %vm857_vm6 = vcmp.eq.f32.partialorder %v5415_v48, 0.0  ;;  %vm1069_vm1 = vcmp.gt.f32.partialorder %v5415_v48, 1.0  ;;  %vm1269_vm9 = vcmp.gt.f32.partialorder %v5415_v48, 2.0 }
 0x2ce   : > { %v5418_v7 = vpop.f32.mrf.mxu0  ;;  %v874_v36 = vsel %vm857_vm6, 1, %v8799_v52  ;;  %v1085_v14 = vsel %vm1069_vm1, 1.0, %v8809_v57  ;;  %v1285_v18 = vsel %vm1269_vm9, 2.0, %v8809_v57  ;;  %vm851_vm1 = vcmp.eq.f32.partialorder %v5314_v37, 0.0 }
 0x2cf   : > { %919 = vperm.xlu1 %4124, %v874_v36   ;;  %vm855_vm12 = vcmp.eq.f32.partialorder %v5418_v7, 0.0  ;;  %vm1467_vm9 = vcmp.gt.f32.partialorder %v5418_v7, 3.0  ;;  %v868_v13 = vsel %vm851_vm1, 1, %v8799_v52  ;;  %vm1463_vm1 = vcmp.gt.f32.partialorder %v5314_v37, 3.0 }
 0x2d0   : > { %v5422_v6 = vpop.f32.mrf.mxu0  ;;  %v872_v15 = vsel %vm855_vm12, 1, %v8799_v52  ;;  %vm1469_vm12 = vcmp.gt.f32.partialorder %v5415_v48, 3.0 }
 0x2d1   : > { %vm858_vm15 = vcmp.eq.f32.partialorder %v5422_v6, 0.0  ;;  %vm1070_vm14 = vcmp.gt.f32.partialorder %v5422_v6, 1.0  ;;  %vm1270_vm11 = vcmp.gt.f32.partialorder %v5422_v6, 2.0  ;;  %vm1470_vm6 = vcmp.gt.f32.partialorder %v5422_v6, 3.0 }
 0x2d2   : > { %v875_v4 = vsel %vm858_vm15, 1, %v8799_v52  ;;  %v1086_v36 = vsel %vm1070_vm14, 1.0, %v8809_v57  ;;  %v1286_v42 = vsel %vm1270_vm11, 2.0, %v8809_v57  ;;  %v5434_v53 = vpop.f32.mrf.mxu0  ;;  %v1486_v50 = vsel %vm1470_vm6, 3.0, %v8809_v57 }
 0x2d3   : > { %913 = vperm.xlu1 %4124, %v872_v15   ;;  %922 = vperm.xlu0 %4123, %v875_v4   ;;  %v4140_v49 = vpack.i.bf16 %v1086_v36, %v1085_v14  ;;  %v4150_v33 = vpack.i.bf16 %v1286_v42, %v1285_v18  ;;  %vm856_vm15 = vcmp.eq.f32.partialorder %v5434_v53, 0.0  ;;  %vm1468_vm14 = vcmp.gt.f32.partialorder %v5434_v53, 3.0 }
 0x2d4   : > { %vm1669_vm11 = vcmp.gt.f32.partialorder %v5415_v48, 4.0  ;;  %v1485_v15 = vsel %vm1469_vm12, 3.0, %v8809_v57  ;;  %vm1670_vm2 = vcmp.gt.f32.partialorder %v5422_v6, 4.0  ;;  %vm2269_vm6 = vcmp.gt.f32.partialorder %v5415_v48, 7.0 }
 0x2d5   : > { %v4145_v14 = vpack.i.bf16 %v1486_v50, %v1485_v15  ;;  %v5448_v18 = vsel %vm1669_vm11, 4.0, %v8809_v57  ;;  %v5451_v42 = vsel %vm1670_vm2, 4.0, %v8809_v57  ;;  %v873_v4 = vsel %vm856_vm15, 1, %v8799_v52 }
 0x2d6   : > { %vm2270_vm12 = vcmp.gt.f32.partialorder %v5422_v6, 7.0  ;;  %vm1068_vm4 = vcmp.gt.f32.partialorder %v5434_v53, 1.0  ;;  %v5461_v50 = vsel %vm2269_vm6, 7.0, %v8809_v57  ;;  %vm2069_vm2 = vcmp.gt.f32.partialorder %v5415_v48, 6.0 }
 0x2d7   : > { %4141 = vperm.xlu1 %4124, %v4140_v49   ;;  %4151 = vperm.xlu0 %4123, %v4150_v33   ;;  %v1484_v33 = vsel %vm1468_vm14, 3.0, %v8809_v57  ;;  %v5464_v36 = vsel %vm2270_vm12, 7.0, %v8809_v57  ;;  %v1483_v15 = vsel %vm1467_vm9, 3.0, %v8809_v57  ;;  %vm2070_vm15 = vcmp.gt.f32.partialorder %v5422_v6, 6.0 }
 0x2d8   : > { %vm1067_vm14 = vcmp.gt.f32.partialorder %v5418_v7, 1.0  ;;  %v5478_v19 = vsel %vm2070_vm15, 6.0, %v8809_v57  ;;  %v1084_v5 = vsel %vm1068_vm4, 1.0, %v8809_v57  ;;  %vm852_vm11 = vcmp.eq.f32.partialorder %v5336_v61, 0.0 }
 0x2d9   : > { %vm1268_vm9 = vcmp.gt.f32.partialorder %v5434_v53, 2.0  ;;  %vm1464_vm6 = vcmp.gt.f32.partialorder %v5336_v61, 3.0  ;;  %vm1267_vm12 = vcmp.gt.f32.partialorder %v5418_v7, 2.0  ;;  %v869_v55 = vsel %vm852_vm11, 1, %v8799_v52 }
 0x2da   : > { %v1284_v46 = vsel %vm1268_vm9, 2.0, %v8809_v57  ;;  %vm1064_vm4 = vcmp.gt.f32.partialorder %v5336_v61, 1.0  ;;  %v1479_v49 = vsel %vm1463_vm1, 3.0, %v8809_v57  ;;  %vm849_vm15 = vcmp.eq.f32.partialorder %v5163_v45, 0.0 }
 0x2db   : > { %4146 = vperm.xlu1 %4124, %v4145_v14   ;;  %916 = vperm.xlu0 %4123, %v873_v4   ;;  %v4160_v14 = vpack.i.bf16 %v1484_v33, %v1483_v15  ;;  %v5475_v4 = vsel %vm2069_vm2, 6.0, %v8809_v57  ;;  %v1083_v33 = vsel %vm1067_vm14, 1.0, %v8809_v57  ;;  %vm1063_vm2 = vcmp.gt.f32.partialorder %v5314_v37, 1.0 }
 0x2dc   : > { %v4155_v15 = vpack.i.bf16 %v1084_v5, %v1083_v33  ;;  %v1080_v33 = vsel %vm1064_vm4, 1.0, %v8809_v57  ;;  %vm1264_vm14 = vcmp.gt.f32.partialorder %v5336_v61, 2.0  ;;  %vm1263_vm11 = vcmp.gt.f32.partialorder %v5314_v37, 2.0 }
 0x2dd   : > { %v866_v34 = vsel %vm849_vm15, 1, %v8799_v52  ;;  %vm850_vm9 = vcmp.eq.f32.partialorder %v5170_v60, 0.0  ;;  %vm845_vm1 = vcmp.eq.f32.partialorder %v5015_v62, 0.0  ;;  %vm846_vm4 = vcmp.eq.f32.partialorder %v5022_v3, 0.0 }
 0x2de   : > { %vm843_vm15 = vcmp.eq.f32.partialorder %v5019_v63, 0.0 }
 0x2df   : > { %901 = vperm.xlu1 %4124, %v868_v13   ;;  %4161 = vperm.xlu0 %4123, %v4160_v14   ;;  %v1480_v13 = vsel %vm1464_vm6, 3.0, %v8809_v57  ;;  %v1283_v14 = vsel %vm1267_vm12, 2.0, %v8809_v57  ;;  %vm848_vm6 = vcmp.eq.f32.partialorder %v5184_v35, 0.0  ;;  %vm847_vm12 = vcmp.eq.f32.partialorder %v5167_v51, 0.0 }
 0x2e0   : > { %v4165_v9 = vpack.i.bf16 %v1284_v46, %v1283_v14  ;;  %v4175_v5 = vpack.i.bf16 %v1480_v13, %v1479_v49  ;;  %v1280_v46 = vsel %vm1264_vm14, 2.0, %v8809_v57  ;;  %v1279_v49 = vsel %vm1263_vm11, 2.0, %v8809_v57 }
 0x2e1   : > { %v4180_v13 = vpack.i.bf16 %v1280_v46, %v1279_v49  ;;  %v867_v14 = vsel %vm850_vm9, 1, %v8799_v52  ;;  %vm1870_vm14 = vcmp.gt.f32.partialorder %v5422_v6, 5.0  ;;  %vm1869_vm11 = vcmp.gt.f32.partialorder %v5415_v48, 5.0 }
 0x2e2   : > { %vm1868_vm9 = vcmp.gt.f32.partialorder %v5434_v53, 5.0 }
 0x2e3   : > { %4156 = vperm.xlu1 %4124, %v4155_v15   ;;  %904 = vperm.xlu0 %4123, %v869_v55   ;;  %v1079_v55 = vsel %vm1063_vm2, 1.0, %v8809_v57  ;;  %vm844_vm2 = vcmp.eq.f32.partialorder %v5036_v12, 0.0 }
 0x2e4   : > { %v4170_v15 = vpack.i.bf16 %v1080_v33, %v1079_v55  ;;  %v8812_v33 = vpack.i.bf16 %v5199_v20, %v5181_v56  ;;  %v8815_v20 = vpack.i.bf16 %v5227_v30, %v5224_v27  ;;  %v8816_v56 = vpack.i.bf16 %v5039_v16, %v5025_v8 }
 0x2e5   : > { %v8818_v27 = vpack.i.bf16 %v5051_v21, %v5033_v11  ;;  %v860_v30 = vsel %vm843_vm15, 1, %v8799_v52  ;;  %v1886_v8 = vsel %vm1870_vm14, 5.0, %v8809_v57  ;;  %v1885_v16 = vsel %vm1869_vm11, 5.0, %v8809_v57 }
 0x2e6   : > { %v4245_v11 = vpack.i.bf16 %v1886_v8, %v1885_v16  ;;  %v1884_v21 = vsel %vm1868_vm9, 5.0, %v8809_v57  ;;  %vm2068_vm15 = vcmp.gt.f32.partialorder %v5434_v53, 6.0  ;;  %vm2067_vm14 = vcmp.gt.f32.partialorder %v5418_v7, 6.0  ;;  %v8853_v8 = vld [vmem:[#allocation53_spill] sm:$0xff] }
 0x2e7   : > { %4166 = vperm.xlu1 %4124, %v4165_v9   ;;  %4176 = vperm.xlu0 %4123, %v4175_v5   ;;  %v8810_v9 = vpack.i.bf16 %v5187_v0, %v5173_v44  ;;  %v8811_v5 = vpack.i.bf16 %v5190_v29, %v5176_v40  ;;  %v864_v0 = vsel %vm847_vm12, 1, %v8799_v52  ;;  %v8813_v44 = vpack.i.bf16 %v5210_v28, %v5207_v2 }
 0x2e8   : > { %v862_v29 = vsel %vm845_vm1, 1, %v8799_v52  ;;  %v8814_v40 = vpack.i.bf16 %v5216_v1, %v5213_v22  ;;  %v863_v2 = vsel %vm846_vm4, 1, %v8799_v52  ;;  %v8817_v28 = vpack.i.bf16 %v5042_v17, %v5028_v10 }
 0x2e9   : > { %v861_v1 = vsel %vm844_vm2, 1, %v8799_v52  ;;  %v8819_v10 = vpack.i.bf16 %v5062_v24, %v5059_v23  ;;  %v8820_v17 = vpack.i.bf16 %v5068_v26, %v5065_v25  ;;  %v8821_v22 = vpack.i.bf16 %v5079_v32, %v5076_v31 }
 0x2ea   : > { %v8822_v23 = vpack.i.bf16 %v5451_v42, %v5448_v18  ;;  %vm1668_vm12 = vcmp.gt.f32.partialorder %v5434_v53, 4.0  ;;  %vm1667_vm1 = vcmp.gt.f32.partialorder %v5418_v7, 4.0  ;;  %vm2268_vm4 = vcmp.gt.f32.partialorder %v5434_v53, 7.0 }
 0x2eb   : > { %4171 = vperm.xlu1 %4124, %v4170_v15   ;;  %895 = vperm.xlu0 %4123, %v866_v34   ;;  %v865_v34 = vsel %vm848_vm6, 1, %v8799_v52  ;;  %vm1867_vm6 = vcmp.gt.f32.partialorder %v5418_v7, 5.0  ;;  %v1684_v26 = vsel %vm1668_vm12, 4.0, %v8809_v57  ;;  %v8823_v52 = vpack.i.bf16 %v5464_v36, %v5461_v50 }
 0x2ec   : > { %v1883_v24 = vsel %vm1867_vm6, 5.0, %v8809_v57  ;;  %v1683_v31 = vsel %vm1667_vm1, 4.0, %v8809_v57  ;;  %vm2267_vm2 = vcmp.gt.f32.partialorder %v5418_v7, 7.0  ;;  %v2284_v18 = vsel %vm2268_vm4, 7.0, %v8809_v57 }
 0x2ed   : > { %v4265_v25 = vpack.i.bf16 %v1884_v21, %v1883_v24  ;;  %v4275_v32 = vpack.i.bf16 %v1684_v26, %v1683_v31  ;;  %v8824_v42 = vpack.i.bf16 %v5478_v19, %v5475_v4  ;;  %v2283_v50 = vsel %vm2267_vm2, 7.0, %v8809_v57  ;;  %v8859_v24 = vld [vmem:[#allocation57_spill] sm:$0xff]  ;;  %v8863_v31 = vld [vmem:[#allocation28_spill] sm:$0xff] }
 0x2ee   : > { %v4270_v36 = vpack.i.bf16 %v2284_v18, %v2283_v50  ;;  %v2084_v55 = vsel %vm2068_vm15, 6.0, %v8809_v57  ;;  %v8825_v15 = vpack.i.bf16 %v5342_v54, %v5339_v43  ;;  %v2083_v46 = vsel %vm2067_vm14, 6.0, %v8809_v57  ;;  %v8832_v54 = vld [vmem:[#allocation65_spill] sm:$0xff]  ;;  %v8865_v50 = vld [vmem:[#allocation59_spill] sm:$0xff] }
 0x2ef   : > { %4181 = vperm.xlu1 %4124, %v4180_v13   ;;  %4186 = vperm.xlu0 %4123, %v8810_v9   ;;  %v4285_v49 = vpack.i.bf16 %v2084_v55, %v2083_v46  ;;  %v8826_v19 = vpack.i.bf16 %v5351_v41, %v5348_v39  ;;  %v8827_v4 = vpack.i.bf16 %v5362_v58, %v5358_v47  ;;  %v8829_v9 = vld [vmem:[#allocation63_spill] sm:$0xff]  ;;  %v8838_v41 = vld [vmem:[#allocation45_spill] sm:$0xff]  ;;  %v8869_v46 = vld [vmem:[#allocation30_spill] sm:$0xff] }
 0x2f0   : > { %v8828_v13 = vpack.i.bf16 %v5372_v38, %v5366_v59  ;;  %v8841_v58 = vld [vmem:[#allocation69_spill] sm:$0xff]  ;;  %v8844_v59 = vld [vmem:[#allocation47_spill] sm:$0xff] }
 0x2f3   : > { %898 = vperm.xlu1 %4124, %v867_v14   ;;  %4196 = vperm.xlu0 %4123, %v8811_v5   ;;  %v8830_v14 = vld [vmem:[#allocation62_spill] sm:$0xff]  ;;  %v8833_v5 = vld [vmem:[#allocation64_spill] sm:$0xff] }
 0x2f4   : > { %v8831_v43 = vpack.i.bf16 %v8829_v9, %v8830_v14  ;;  %v8872_v9 = vld [vmem:[#allocation32_spill] sm:$0xff] }
 0x2f7   : > { %4191 = vperm.xlu1 %4124, %v8812_v33   ;;  %892 = vperm.xlu0 %4123, %v865_v34   ;;  %v8834_v34 = vpack.i.bf16 %v8832_v54, %v8833_v5  ;;  %v8835_v33 = vld [vmem:[#allocation67_spill] sm:$0xff]  ;;  %v8875_v54 = vld [vmem:[#allocation34_spill] sm:$0xff] }
 0x2fb   : > { %889 = vperm.xlu1 %4124, %v864_v0   ;;  %4206 = vperm.xlu0 %4123, %v8813_v44   ;;  %v8836_v0 = vld [vmem:[#allocation66_spill] sm:$0xff]  ;;  %v8839_v44 = vld [vmem:[#allocation44_spill] sm:$0xff] }
 0x2fc   : > { %v8837_v39 = vpack.i.bf16 %v8835_v33, %v8836_v0  ;;  %v8840_v47 = vpack.i.bf16 %v8838_v41, %v8839_v44  ;;  %v3156_v33 = vsel %vm8494_vm8, 1.0, %v8809_v57  ;;  %v8878_v44 = vld [vmem:[#allocation26_spill] sm:$0xff] }
 0x2fd   : > { %v5660_v0 = vsub.f32 %v5415_v48, %v3156_v33  ;;  %v3153_v33 = vsel %vm8491_vm10, 1.0, %v8809_v57 }
 0x2ff   : > { %4201 = vperm.xlu1 %4124, %v8814_v40   ;;  %883 = vperm.xlu0 %4123, %v862_v29   ;;  %v8842_v29 = vld [vmem:[#allocation68_spill] sm:$0xff]  ;;  %v8845_v40 = vld [vmem:[#allocation46_spill] sm:$0xff]  ;;  %vm981_vm11 = vcmp.eq.f32.partialorder %v5660_v0, 0.0 }
 0x300   : > { %v8843_v38 = vpack.i.bf16 %v8841_v58, %v8842_v29  ;;  %v8879_v58 = vld [vmem:[#allocation37_spill] sm:$0xff]  ;;  %v8880_v29 = vld [vmem:[#allocation36_spill] sm:$0xff]  ;;  %vm5682_vm4 = vmand %vm8494_vm8, %vm981_vm11 }
 0x303   : > { %4211 = vperm.xlu1 %4124, %v8815_v20   ;;  %4216 = vperm.xlu0 %4123, %v8816_v56   ;;  %v8846_v20 = vpack.i.bf16 %v8844_v59, %v8845_v40  ;;  %v8847_v56 = vld [vmem:[#allocation49_spill] sm:$0xff]  ;;  %v8882_v59 = vld [vmem:[#allocation39_spill] sm:$0xff]  ;;  %v8883_v40 = vld [vmem:[#allocation38_spill] sm:$0xff] }
 0x307   : > { %886 = vperm.xlu1 %4124, %v863_v2   ;;  %4226 = vperm.xlu0 %4123, %v8817_v28   ;;  %v8848_v2 = vld [vmem:[#allocation48_spill] sm:$0xff] }
 0x308   : > { %v8849_v28 = vpack.i.bf16 %v8847_v56, %v8848_v2 }
 0x30b   : > { %4221 = vperm.xlu1 %4124, %v8818_v27   ;;  %880 = vperm.xlu0 %4123, %v861_v1   ;;  %v8850_v1 = vld [vmem:[#allocation51_spill] sm:$0xff]  ;;  %v8851_v27 = vld [vmem:[#allocation50_spill] sm:$0xff] }
 0x30f   : > { %877 = vperm.xlu1 %4124, %v860_v30   ;;  %4236 = vperm.xlu0 %4123, %v8819_v10   ;;  %v8852_v30 = vpack.i.bf16 %v8850_v1, %v8851_v27  ;;  %v8854_v10 = vld [vmem:[#allocation52_spill] sm:$0xff]  ;;  %v8885_v1 = vld [vmem:[#allocation41_spill] sm:$0xff] }
 0x310   : > { %v8855_v16 = vpack.i.bf16 %v8853_v8, %v8854_v10  ;;  %v8886_v27 = vld [vmem:[#allocation40_spill] sm:$0xff]  ;;  %v8888_v8 = vld [vmem:[#allocation11_spill] sm:$0xff]  ;;  %v8891_v10 = vmov 0 }
 0x311   : > { %vm8488_vm12 = vcmp.eq.s32.totalorder %v8888_v8, 0 }
 0x313   : > { %4231 = vperm.xlu1 %4124, %v8820_v17   ;;  %4246 = vperm.xlu0 %4123, %v4245_v11   ;;  %v8856_v11 = vld [vmem:[#allocation55_spill] sm:$0xff]  ;;  %v8857_v17 = vld [vmem:[#allocation54_spill] sm:$0xff] }
 0x314   : > { %v8858_v21 = vpack.i.bf16 %v8856_v11, %v8857_v17  ;;  %v8893_v11 = vmov 0 }
 0x317   : > { %4241 = vperm.xlu1 %4124, %v8821_v22   ;;  %4256 = vperm.xlu0 %4123, %v8822_v23  }
 0x31b   : > { %4251 = vperm.xlu1 %4124, %v8823_v52   ;;  %4266 = vperm.xlu0 %4123, %v4265_v25   ;;  %v8860_v25 = vld [vmem:[#allocation56_spill] sm:$0xff]  ;;  %v8862_v52 = vld [vmem:[#allocation29_spill] sm:$0xff] }
 0x31c   : > { %v8861_v26 = vpack.i.bf16 %v8859_v24, %v8860_v25  ;;  %v8895_v25 = vld [vmem:[#allocation43_spill] sm:$0xff] }
 0x31f   : > { %4261 = vperm.xlu1 %4124, %v8824_v42   ;;  %4276 = vperm.xlu0 %4123, %v4275_v32   ;;  %v8864_v32 = vpack.i.bf16 %v8862_v52, %v8863_v31 }
 0x323   : > { %4271 = vperm.xlu1 %4124, %v4270_v36   ;;  %4281 = vperm.xlu0 %4123, %v8825_v15   ;;  %v8866_v36 = vld [vmem:[#allocation58_spill] sm:$0xff]  ;;  %v8868_v15 = vld [vmem:[#allocation31_spill] sm:$0xff] }
 0x324   : > { %v8867_v55 = vpack.i.bf16 %v8865_v50, %v8866_v36  ;;  %v8900_v36 = vmov 0 }
 0x327   : > { %4286 = vperm.xlu1 %4124, %v4285_v49   ;;  %4296 = vperm.xlu0 %4123, %v8826_v19   ;;  %v8870_v49 = vpack.i.bf16 %v8868_v15, %v8869_v46 }
 0x329   : > { %v5628_v22 = vpop.permute.xlu0 %907 }
 0x32b   : > { %4291 = vperm.xlu1 %4124, %v8827_v4   ;;  %4306 = vperm.xlu0 %4123, %v8828_v13   ;;  %v8871_v13 = vld [vmem:[#allocation33_spill] sm:$0xff] }
 0x32c   : > { %v8873_v14 = vpack.i.bf16 %v8871_v13, %v8872_v9  ;;  %v8907_v13 = vld [vmem:[#allocation22_spill] sm:$0xff]  ;;  %v3152_v9 = vsel %vm8490_vm7, 1.0, %v8809_v57 }
 0x32d   : > { %v5630_v23 = vpop.permute.xlu1 %910 }
 0x32f   : > { %4301 = vperm.xlu1 %4124, %v8831_v43   ;;  %4316 = vperm.xlu0 %4123, %v8834_v34   ;;  %v5638_v18 = vpop.permute.xlu0 %4126  ;;  %v8874_v43 = vld [vmem:[#allocation35_spill] sm:$0xff] }
 0x330   : > { %v8876_v5 = vpack.i.bf16 %v8874_v43, %v8875_v54  ;;  %v8877_v34 = vld [vmem:[#allocation27_spill] sm:$0xff]  ;;  %v4128_v46 = vunpack.i.l.bf16 %v5638_v18  ;;  %v8908_v43 = vld [vmem:[#allocation60_spill] sm:$0xff] }
 0x331   : > { %v5640_v42 = vpop.permute.xlu1 %4131  ;;  %v5751_v54 = vsub.f32 %v8908_v43, %v3152_v9  ;;  %v8970_v9 = vmov 0  ;;  %v201_v43 = vld [vmem:[#allocation2 + $0x8] sm:$0xff] }
 0x333   : > { %4311 = vperm.xlu1 %4124, %v8837_v39   ;;  %4326 = vperm.xlu0 %4123, %v8840_v47   ;;  %v5648_v19 = vpop.permute.xlu0 %4136  ;;  %v3157_v47 = vsel %vm8492_vm13, 1.0, %v8809_v57  ;;  %vm5768_vm7 = vcmp.eq.f32.partialorder %v5751_v54, %v4128_v46  ;;  %v8967_v46 = vmov 0 }
 0x334   : > { %v5672_v56 = vsub.f32 %v5422_v6, %v3157_v47  ;;  %v8910_v47 = vld [vmem:[#allocation61_spill] sm:$0xff] }
 0x336   : > { %vm982_vm1 = vcmp.eq.f32.partialorder %v5672_v56, 0.0 }
 0x337   : > { %4321 = vperm.xlu1 %4124, %v8843_v38   ;;  %4336 = vperm.xlu0 %4123, %v8846_v20   ;;  %v8881_v38 = vpack.i.bf16 %v8879_v58, %v8880_v29  ;;  %v8884_v20 = vpack.i.bf16 %v8882_v59, %v8883_v40  ;;  %vm998_vm11 = vmand %vm8492_vm13, %vm982_vm1  ;;  %v4134_v29 = vunpack.i.h.bf16 %v5640_v42  ;;  %v8913_v59 = vmov 0 }
 0x338   : > { %v8976_v58 = vmov 0 }
 0x33b   : > { %4331 = vperm.xlu1 %4124, %v8849_v28   ;;  %4346 = vperm.xlu0 %4123, %v8852_v30   ;;  %v8887_v30 = vpack.i.bf16 %v8885_v1, %v8886_v27  ;;  %v8992_v1 = vmov 0 }
 0x33f   : > { %4341 = vperm.xlu1 %4124, %v8855_v16   ;;  %4356 = vperm.xlu0 %4123, %v8858_v21  }
 0x343   : > { %4351 = vperm.xlu1 %4124, %v8861_v26   ;;  %4366 = vperm.xlu0 %4123, %v8864_v32   ;;  %v8896_v26 = vld [vmem:[#allocation42_spill] sm:$0xff]  ;;  %v8898_v32 = vmov 0 }
 0x344   : > { %v8897_v52 = vpack.i.bf16 %v8895_v25, %v8896_v26  ;;  %v8942_v25 = vmov 0  ;;  %v8948_v26 = vmov 0 }
 0x347   : > { %4361 = vperm.xlu1 %4124, %v8867_v55   ;;  %4376 = vperm.xlu0 %4123, %v8870_v49   ;;  %v8903_v55 = vmov 0 }
 0x34a   : > { %v920_v4 = vpop.permute.xlu1 %919 }
 0x34b   : > { %4371 = vperm.xlu1 %4124, %v8873_v14   ;;  %4386 = vperm.xlu0 %4123, %v8876_v5   ;;  %vm938_vm6 = vcmp.eq.s32.totalorder %v920_v4, 1  ;;  %v4129_v14 = vunpack.i.h.bf16 %v5638_v18  ;;  %v8909_v5 = vld [vmem:[#allocation23_spill] sm:$0xff]  ;;  %v5762_v18 = vsub.f32 %v8910_v47, %v3153_v33  ;;  %v4139_v33 = vunpack.i.h.bf16 %v5648_v19 }
 0x34c   : > { %vm5694_vm15 = vmand %vm938_vm6, %vm8488_vm12  ;;  %v8974_v47 = vmov 0 }
 0x34d   : > { %v8894_v11 = vsel %vm5694_vm15, 4294967295, %v8893_v11  ;;  %vm1013_vm5 = vmor %vm5682_vm4, %vm5694_vm15  ;;  %vm5779_vm10 = vcmp.eq.f32.partialorder %v5762_v18, %v4129_v14 }
 0x34e   : > { %v914_v39 = vpop.permute.xlu1 %913  ;;  %v923_v41 = vpop.permute.xlu0 %922 }
 0x34f   : > { %4381 = vperm.xlu1 %4124, %v8881_v38   ;;  %4396 = vperm.xlu0 %4123, %v8884_v20   ;;  %vm939_vm9 = vcmp.eq.s32.totalorder %v923_v41, 1  ;;  %v4133_v38 = vunpack.i.l.bf16 %v5640_v42  ;;  %v8920_v20 = vmov 1.0|1.0  }
 0x350   : > { %vm5688_vm2 = vmand %vm939_vm9, %vm8488_vm12 }
 0x351   : > { %v8892_v10 = vsel %vm5688_vm2, 4294967295, %v8891_v10  ;;  %vm1014_vm9 = vmor %vm998_vm11, %vm5688_vm2 }
 0x352   : > { %v4142_v48 = vpop.permute.xlu1 %4141  ;;  %v4152_v2 = vpop.permute.xlu0 %4151  ;;  %vm5721_vm11 = vmpackc.low %vm1014_vm9, %vm1013_vm5 }
 0x353   : > { %v4153_v28 = vunpack.i.l.bf16 %v4152_v2  ;;  %4391 = vperm.xlu1 %4124, %v8887_v30   ;;  %v4154_v16 = vunpack.i.h.bf16 %v4152_v2  ;;  %v4143_v17 = vunpack.i.l.bf16 %v4142_v48  ;;  %v4144_v21 = vunpack.i.h.bf16 %v4142_v48  ;;  %v8921_v48 = vld [vmem:[#allocation24_spill] sm:$0xff] }
 0x354   : > { %v8901_v36 = vsel %vm5721_vm11, 4294967295, %v8900_v36 }
 0x355   : > { %vm1381_vm14 = vcmp.eq.f32.partialorder %v5660_v0, %v4153_v28  ;;  %vm1382_vm6 = vcmp.eq.f32.partialorder %v5672_v56, %v4154_v16  ;;  %vm1181_vm3 = vcmp.eq.f32.partialorder %v5660_v0, %v4143_v17  ;;  %vm1182_vm1 = vcmp.eq.f32.partialorder %v5672_v56, %v4144_v21  ;;  %8902 = vst [vmem:[#allocation63_spill] sm:$0xff] %v8901_v36  ;;  %v8929_v16 = vld [vmem:[#allocation25_spill] sm:$0xff] }
 0x356   : > { %v4147_v24 = vpop.permute.xlu1 %4146  ;;  %v5707_v31 = vpop.permute.xlu0 %916  ;;  %vm5716_vm12 = vmand %vm8494_vm8, %vm1381_vm14  ;;  %v8924_v28 = vmov 0  ;;  %v8932_v21 = vmov 0 }
 0x357   : > { %4401 = vperm.xlu1 %4124, %v8897_v52   ;;  %v8899_v32 = vsel %vm5716_vm12, 4294967295, %v8898_v32  ;;  %v4148_v50 = vunpack.i.l.bf16 %v4147_v24  ;;  %vm5727_vm0 = vmand %vm8492_vm13, %vm1382_vm6  ;;  %v4149_v15 = vunpack.i.h.bf16 %v4147_v24  ;;  %vm936_vm6 = vcmp.eq.s32.totalorder %v914_v39, 1 }
 0x358   : > { %v8904_v55 = vsel %vm5727_vm0, 4294967295, %v8903_v55  ;;  %vm5738_vm5 = vmand %vm8494_vm8, %vm1181_vm3  ;;  %v4138_v24 = vunpack.i.l.bf16 %v5648_v19  ;;  %v8951_v52 = vmov 0 }
 0x359   : > { %vm1198_vm14 = vmand %vm8492_vm13, %vm1182_vm1  ;;  %vm1581_vm3 = vcmp.eq.f32.partialorder %v5660_v0, %v4148_v50  ;;  %vm1582_vm1 = vcmp.eq.f32.partialorder %v5672_v56, %v4149_v15  ;;  %vm8923_vm13 = vcmp.eq.s32.totalorder %v8888_v8, 0  ;;  %v8957_v50 = vmov 0 }
 0x35a   : > { %v5742_v4 = vpop.permute.xlu1 %901  ;;  %vm1213_vm9 = vmor %vm5738_vm5, %vm5694_vm15  ;;  %v4162_v41 = vpop.permute.xlu0 %4161 }
 0x35b   : > { %vm1214_vm4 = vmor %vm1198_vm14, %vm5688_vm2  ;;  %v4163_v42 = vunpack.i.l.bf16 %v4162_v41  ;;  %v4164_v27 = vunpack.i.h.bf16 %v4162_v41 }
 0x35c   : > { %vm5774_vm5 = vmpackc.low %vm1214_vm4, %vm1213_vm9  ;;  %vm8922_vm4 = vcmp.lt.f32.partialorder %v8921_v48, 0.09 }
 0x35d   : > { %v8914_v59 = vsel %vm5774_vm5, 4294967295, %v8913_v59  ;;  %vm5785_vm14 = vmand %vm8494_vm8, %vm1581_vm3  ;;  %3755 = vmatprep.subr.msk.bf16.mxu1 %vm5774_vm5, %v8920_v20  ;;  %v3154_v2 = vsel %vm8922_vm4, 1.0, %v8809_v57  ;;  %vm8926_vm3 = vcmp.lt.f32.partialorder %v8878_v44, 0.09  ;;  %vm8938_vm5 = vcmp.eq.s32.totalorder %v5628_v22, 1 }
 0x35e   : > { %8915 = vst [vmem:[#allocation62_spill] sm:$0xff] %v8914_v59  ;;  %vm5798_vm12 = vmand %vm936_vm6, %vm8923_vm13  ;;  %3756 = vmatpush3.bf16.xpose.msk.msra.mxu1 %vm5721_vm11, %v8920_v20  ;;  %v4157_v30 = vpop.permute.xlu1 %4156  ;;  %v5812_v6 = vsub.f32 %v5418_v7, %v3154_v2  ;;  %vm8930_vm13 = vcmp.lt.f32.partialorder %v8929_v16, 0.09  ;;  %vm935_vm6 = vcmp.eq.s32.totalorder %v5630_v23, 1  ;;  %v8935_v23 = vmov 0 }
 0x35f   : > { %v8925_v28 = vsel %vm5798_vm12, 4294967295, %v8924_v28  ;;  %vm5804_vm8 = vmand %vm8926_vm3, %vm1582_vm1  ;;  %v3155_v17 = vsel %vm8930_vm13, 1.0, %v8809_v57  ;;  %vm8931_vm1 = vcmp.lt.f32.partialorder %v8907_v13, 0.09  ;;  %vm8934_vm13 = vcmp.lt.f32.partialorder %v8909_v5, 0.09 }
 0x360   : > { %vm5822_vm4 = vmand %vm8931_vm1, %vm5768_vm7  ;;  %v5831_v7 = vsub.f32 %v5434_v53, %v3155_v17  ;;  %vm1577_vm7 = vcmp.eq.f32.partialorder %v5751_v54, %v4133_v38  ;;  %vm1578_vm1 = vcmp.eq.f32.partialorder %v5762_v18, %v4134_v29  ;;  %vm8937_vm11 = vcmp.eq.s32.totalorder %v8888_v8, 0  ;;  %v4405_v29 = vld [vmem:[#allocation2] sm:$0xff] }
 0x361   : > { %v8933_v21 = vsel %vm5822_vm4, 4294967295, %v8932_v21  ;;  %vm5837_vm9 = vmand %vm8934_vm13, %vm5779_vm10  ;;  %v8939_v53 = vmov 0  ;;  %vm1579_vm10 = vcmp.eq.f32.partialorder %v5812_v6, %v4163_v42  ;;  %v8944_v22 = vmov 0 }
 0x362   : > { %v8936_v23 = vsel %vm5837_vm9, 4294967295, %v8935_v23  ;;  %vm1613_vm3 = vmor %vm5785_vm14, %vm5694_vm15  ;;  %vm1580_vm14 = vcmp.eq.f32.partialorder %v5831_v7, %v4164_v27  ;;  %v4158_v15 = vunpack.i.l.bf16 %v4157_v30  ;;  %v4159_v49 = vunpack.i.h.bf16 %v4157_v30 }
 0x363   : > { %vm5852_vm4 = vmand %vm8938_vm5, %vm8937_vm11  ;;  %v5952_v19 = vpack.c.bf16 %v201_v43, %v4405_v29  ;;  %v8981_v38 = vmov 0  ;;  %v8997_v17 = vmov 0 }
 0x364   : > { %v8940_v53 = vsel %vm5852_vm4, 4294967295, %v8939_v53  ;;  %vm1614_vm13 = vmor %vm5804_vm8, %vm5688_vm2  ;;  %vm8950_vm8 = vcmp.lt.f32.partialorder %v8909_v5, 0.09 }
 0x365   : > { %vm8941_vm9 = vmmov %vm8937_vm11  ;;  %vm8947_vm11 = vcmp.lt.f32.partialorder %v8907_v13, 0.09  ;;  %8979 = vst [vmem:[#allocation66_spill] sm:$0xff] %v5952_v19  ;;  %v957_v39 = vunpack.c.l.bf16 %v5952_v19  ;;  %v958_v40 = vunpack.c.h.bf16 %v5952_v19  ;;  %v9228_v19 = vld [vmem:[#allocation12_spill] sm:$0xff] }
 0x366   : > { %vm5863_vm12 = vmand %vm935_vm6, %vm8941_vm9  ;;  %vm937_vm9 = vcmp.eq.s32.totalorder %v5707_v31, 1  ;;  %vm8953_vm6 = vnez %v8899_v32  ;;  %v4167_v32 = vpop.permute.xlu1 %4166 }
 0x367   : > { %v8943_v25 = vsel %vm5863_vm12, 4294967295, %v8942_v25  ;;  %vm5868_vm0 = vmpackc.low %vm1614_vm13, %vm1613_vm3  ;;  %v4168_v14 = vunpack.i.l.bf16 %v4167_v32  ;;  %v4169_v41 = vunpack.i.h.bf16 %v4167_v32  ;;  %v5996_v27 = vsub.f32 %v4405_v29, %v957_v39 }
 0x368   : > { %v8945_v22 = vsel %vm5868_vm0, 4294967295, %v8944_v22  ;;  %vm5874_vm5 = vmand %vm8947_vm11, %vm1577_vm7  ;;  %3773 = vmatprep.subr.msk.bf16.mxu0 %vm5868_vm0, %v8920_v20  ;;  %vm8955_vm7 = vnez %v8904_v55  ;;  %vm1377_vm11 = vcmp.eq.f32.partialorder %v5751_v54, %v4138_v24  ;;  %vm979_vm0 = vcmp.eq.f32.partialorder %v5812_v6, 0.0  ;;  %v905_v55 = vpop.permute.xlu0 %904 }
 0x369   : > { %8946 = vst [vmem:[#allocation65_spill] sm:$0xff] %v8945_v22  ;;  %v8949_v26 = vsel %vm5874_vm5, 4294967295, %v8948_v26  ;;  %vm5880_vm4 = vmand %vm8950_vm8, %vm1578_vm1  ;;  %vm8960_vm8 = vcmp.lt.f32.partialorder %v8921_v48, 0.09  ;;  %v5998_v30 = vsub.f32 %v201_v43, %v958_v40  ;;  %v9001_v24 = vmov 0 }
 0x36a   : > { %v8952_v52 = vsel %vm5880_vm4, 4294967295, %v8951_v52  ;;  %vm8954_vm3 = vmor %vm8953_vm6, %vm5694_vm15  ;;  %vm8963_vm6 = vcmp.lt.f32.partialorder %v8929_v16, 0.09  ;;  %vm1380_vm15 = vcmp.eq.f32.partialorder %v5831_v7, %v4169_v41  ;;  %8994 = vst [vmem:[#allocation45_spill] sm:$0xff] %v5996_v27  ;;  %v9025_v43 = vmov 0 }
 0x36b   : > { %vm8956_vm13 = vmor %vm8955_vm7, %vm5688_vm2  ;;  %vm1180_vm2 = vcmp.eq.f32.partialorder %v5831_v7, %v4159_v49  ;;  %8995 = vst [vmem:[#allocation44_spill] sm:$0xff] %v5998_v30  ;;  %v6029_v32 = vpack.c.bf16 %v5998_v30, %v5996_v27  ;;  %v9035_v29 = vmov 0 }
 0x36c   : > { %vm5898_vm1 = vmpackc.low %vm8956_vm13, %vm8954_vm3  ;;  %vm978_vm3 = vcmp.eq.f32.partialorder %v5762_v18, 0.0  ;;  %vm8966_vm13 = vcmp.eq.s32.totalorder %v8888_v8, 0  ;;  %v4177_v49 = vpop.permute.xlu0 %4176 }
 0x36d   : > { %v8958_v50 = vsel %vm5898_vm1, 4294967295, %v8957_v50  ;;  %vm5905_vm4 = vmand %vm8960_vm8, %vm1579_vm10  ;;  %3774 = vmatpush3.bf16.xpose.msk.msra.mxu0 %vm5898_vm1, %v8920_v20  ;;  %vm8969_vm8 = vcmp.lt.f32.partialorder %v8907_v13, 0.09  ;;  %3771 = vmatprep.mubr.bf16.mxu1 %v6029_v32  ;;  %v4179_v41 = vunpack.i.h.bf16 %v4177_v49 }
 0x36e   : > { %8959 = vst [vmem:[#allocation64_spill] sm:$0xff] %v8958_v50  ;;  %vm5914_vm7 = vmand %vm8963_vm6, %vm1580_vm14  ;;  %vm8972_vm14 = vnez %v8925_v28  ;;  %3789 = vmatprep.mubr.bf16.mxu0 %v6029_v32  ;;  %v9201_v50 = vmov 0 }
 0x36f   : > { %vm5921_vm10 = vmand %vm937_vm9, %vm8966_vm13 }
 0x370   : > { %v8968_v46 = vsel %vm5921_vm10, 4294967295, %v8967_v46  ;;  %vm5927_vm1 = vmand %vm8969_vm8, %vm1377_vm11  ;;  %vm8973_vm11 = vcmp.lt.f32.partialorder %v8909_v5, 0.09 }
 0x371   : > { %v8971_v9 = vsel %vm5927_vm1, 4294967295, %v8970_v9  ;;  %vm1611_vm6 = vmor %vm5905_vm4, %vm8972_vm14  ;;  %vm1179_vm4 = vcmp.eq.f32.partialorder %v5812_v6, %v4158_v15  ;;  %vm1379_vm1 = vcmp.eq.f32.partialorder %v5812_v6, %v4168_v14  ;;  %v9010_v15 = vmov 0  ;;  %v4172_v14 = vpop.permute.xlu1 %4171 }
 0x372   : > { %vm1612_vm9 = vmor %vm5914_vm7, %vm5921_vm10  ;;  %vm980_vm7 = vcmp.eq.f32.partialorder %v5831_v7, 0.0  ;;  %vm8988_vm10 = vcmp.lt.f32.partialorder %v8929_v16, 0.09  ;;  %v4174_v2 = vunpack.i.h.bf16 %v4172_v14 }
 0x373   : > { %vm5943_vm13 = vmand %vm8973_vm11, %vm978_vm3  ;;  %vm8980_vm3 = vcmp.lt.f32.partialorder %v8921_v48, 0.09 }
 0x374   : > { %v8975_v47 = vsel %vm5943_vm13, 4294967295, %v8974_v47  ;;  %vm5948_vm8 = vmpackc.low %vm1612_vm9, %vm1611_vm6  ;;  %vm8983_vm6 = vnez %v8940_v53 }
 0x375   : > { %v8977_v58 = vsel %vm5948_vm8, 4294967295, %v8976_v58  ;;  %3775 = vmatprep.subr.msk.bf16.mxu0 %vm5948_vm8, %v8920_v20  ;;  %vm5961_vm11 = vmand %vm8980_vm3, %vm979_vm0  ;;  %vm1378_vm0 = vcmp.eq.f32.partialorder %v5762_v18, %v4139_v33  ;;  %v9028_v33 = vmov 0  ;;  %v4182_v31 = vpop.permute.xlu1 %4181 }
 0x376   : > { %8978 = vst [vmem:[#allocation67_spill] sm:$0xff] %v8977_v58  ;;  %v8982_v38 = vsel %vm5961_vm11, 4294967295, %v8981_v38  ;;  %vm5979_vm11 = vmand %vm8980_vm3, %vm1179_vm4 }
 0x377   : > { %vm5986_vm9 = vmand %vm8988_vm10, %vm1180_vm2  ;;  %vm9022_vm5 = vnez %v8982_v38  ;;  %v9038_v38 = vld [vmem:[#allocation21_spill] sm:$0xff] }
 0x378   : > { %vm8991_vm8 = vmmov %vm8988_vm10 }
 0x379   : > { %vm5992_vm13 = vmand %vm8991_vm8, %vm980_vm7  ;;  %vm9000_vm7 = vcmp.lt.f32.partialorder %v8909_v5, 0.09 }
 0x37a   : > { %v8993_v1 = vsel %vm5992_vm13, 4294967295, %v8992_v1  ;;  %vm8996_vm4 = vmmov %vm8980_vm3 }
 0x37b   : > { %vm6002_vm3 = vmand %vm8996_vm4, %vm1379_vm1 }
 0x37c   : > { %v8998_v17 = vsel %vm6002_vm3, 4294967295, %v8997_v17  ;;  %vm6016_vm13 = vmand %vm9000_vm7, %vm1378_vm0  ;;  %vm977_vm3 = vcmp.eq.f32.partialorder %v5751_v54, 0.0  ;;  %vm9006_vm7 = vnez %v8933_v21  ;;  %v9016_v21 = vmov 0 }
 0x37d   : > { %v9002_v24 = vsel %vm6016_vm13, 4294967295, %v9001_v24  ;;  %vm9003_vm1 = vmmov %vm8991_vm8  ;;  %vm9013_vm13 = vnez %v8968_v46 }
 0x37e   : > { %vm6022_vm4 = vmand %vm9003_vm1, %vm1380_vm15  ;;  %vm9008_vm1 = vnez %v8936_v23  ;;  %v4183_v23 = vunpack.i.l.bf16 %v4182_v31 }
 0x37f   : > { %vm1211_vm0 = vmor %vm5979_vm11, %vm8972_vm14 }
 0x380   : > { %vm9007_vm15 = vmor %vm9006_vm7, %vm8983_vm6 }
 0x381   : > { %vm9009_vm8 = vmor %vm9008_vm1, %vm5863_vm12 }
 0x382   : > { %vm6045_vm2 = vmpackc.low %vm9009_vm8, %vm9007_vm15  ;;  %vm9015_vm8 = vnez %v8971_v9  ;;  %v9057_v9 = vmov 0 }
 0x383   : > { %v9011_v15 = vsel %vm6045_vm2, 4294967295, %v9010_v15  ;;  %vm1212_vm10 = vmor %vm5986_vm9, %vm9013_vm13  ;;  %vm9019_vm9 = vcmp.lt.f32.partialorder %v8907_v13, 0.09 }
 0x384   : > { %9012 = vst [vmem:[#allocation69_spill] sm:$0xff] %v9011_v15  ;;  %vm6063_vm15 = vmpackc.low %vm1212_vm10, %vm1211_vm0  ;;  %vm9023_vm10 = vnez %v8998_v17  ;;  %v4178_v17 = vunpack.i.l.bf16 %v4177_v49 }
 0x385   : > { %v9017_v21 = vsel %vm6063_vm15, 4294967295, %v9016_v21  ;;  %vm6069_vm1 = vmand %vm9019_vm9, %vm977_vm3  ;;  %3757 = vmatprep.subr.msk.bf16.mxu1 %vm6063_vm15, %v8920_v20  ;;  %vm9024_vm9 = vnez %v8993_v1 }
 0x386   : > { %9018 = vst [vmem:[#allocation68_spill] sm:$0xff] %v9017_v21  ;;  %vm1011_vm11 = vmor %vm9022_vm5, %vm8972_vm14  ;;  %v9197_v21 = vmov 0 }
 0x387   : > { %vm1411_vm0 = vmor %vm9023_vm10, %vm8972_vm14 }
 0x388   : > { %vm1412_vm3 = vmor %vm6022_vm4, %vm9013_vm13  ;;  %vm9031_vm4 = vnez %v8949_v26  ;;  %v4173_v26 = vunpack.i.l.bf16 %v4172_v14 }
 0x389   : > { %vm1012_vm7 = vmor %vm9024_vm9, %vm9013_vm13  ;;  %vm9040_vm9 = vnez %v9002_v24  ;;  %v9127_v24 = vld [vmem:[#allocation17_spill] sm:$0xff] }
 0x38a   : > { %vm6092_vm15 = vmpackc.low %vm1012_vm7, %vm1011_vm11  ;;  %vm9033_vm7 = vnez %v8952_v52  ;;  %v9041_v52 = vld [vmem:[#allocation20_spill] sm:$0xff] }
 0x38b   : > { %v9026_v43 = vsel %vm6092_vm15, 4294967295, %v9025_v43  ;;  %3758 = vmatpush3.bf16.xpose.msk.msra.mxu1 %vm6092_vm15, %v8920_v20  ;;  %vm6099_vm5 = vmpackc.low %vm1412_vm3, %vm1411_vm0  ;;  %vm9039_vm3 = vcmp.lt.f32.partialorder %v9038_v38, 0.09 }
 0x38c   : > { %9027 = vst [vmem:[#allocation47_spill] sm:$0xff] %v9026_v43  ;;  %v9029_v33 = vsel %vm6099_vm5, 4294967295, %v9028_v33  ;;  %3759 = vmatprep.subr.msk.bf16.mxu1 %vm6045_vm2, %v8920_v20  ;;  %3776 = vmatpush3.bf16.xpose.msk.msra.mxu0 %vm6099_vm5, %v8920_v20  ;;  %vm9032_vm11 = vmor %vm9031_vm4, %vm8983_vm6  ;;  %v3151_v39 = vsel %vm9039_vm3, 1.0, %v8809_v57  ;;  %vm9042_vm4 = vcmp.lt.f32.partialorder %v9041_v52, 0.09  ;;  %vm9043_vm3 = vnez %v8975_v47 }
 0x38d   : > { %9030 = vst [vmem:[#allocation46_spill] sm:$0xff] %v9029_v33  ;;  %vm9034_vm10 = vmor %vm9033_vm7, %vm5863_vm12  ;;  %v3150_v40 = vsel %vm9042_vm4, 1.0, %v8809_v57  ;;  %v6137_v42 = vsub.f32 %v5336_v61, %v3151_v39  ;;  %v9045_v61 = vmov 0  ;;  %v9054_v47 = vmov 0 }
 0x38e   : > { %vm6119_vm0 = vmpackc.low %vm9034_vm10, %vm9032_vm11  ;;  %vm932_vm11 = vcmp.eq.s32.totalorder %v5742_v4, 1  ;;  %v6145_v1 = vsub.f32 %v5314_v37, %v3150_v40  ;;  %vm933_vm10 = vcmp.eq.s32.totalorder %v905_v55, 1  ;;  %v896_v4 = vpop.permute.xlu0 %895  ;;  %v9050_v37 = vmov 0  ;;  %v9070_v40 = vld [vmem:[#allocation19_spill] sm:$0xff] }
 0x38f   : > { %v9036_v29 = vsel %vm6119_vm0, 4294967295, %v9035_v29  ;;  %3777 = vmatprep.subr.msk.bf16.mxu0 %vm6119_vm0, %v8920_v20  ;;  %vm1009_vm7 = vmor %vm6069_vm1, %vm8983_vm6  ;;  %vm1576_vm0 = vcmp.eq.f32.partialorder %v6137_v42, %v4179_v41  ;;  %v4184_v55 = vunpack.i.h.bf16 %v4182_v31  ;;  %v899_v41 = vpop.permute.xlu1 %898  ;;  %v9131_v33 = vmov 0 }
 0x390   : > { %9037 = vst [vmem:[#allocation49_spill] sm:$0xff] %v9036_v29  ;;  %vm9044_vm4 = vmor %vm9043_vm3, %vm5863_vm12  ;;  %v9101_v29 = vmov 0  ;;  %v9149_v43 = vmov 0 }
 0x391   : > { %vm6152_vm5 = vmpackc.low %vm9044_vm4, %vm1009_vm7  ;;  %vm9053_vm7 = vcmp.eq.s32.totalorder %v8888_v8, 0  ;;  %vm1175_vm4 = vcmp.eq.f32.partialorder %v6145_v1, %v4173_v26  ;;  %v9067_v26 = vmov 0 }
 0x392   : > { %v9046_v61 = vsel %vm6152_vm5, 4294967295, %v9045_v61  ;;  %vm9048_vm1 = vmor %vm9015_vm8, %vm8983_vm6  ;;  %v4187_v14 = vpop.permute.xlu0 %4186  ;;  %vm1375_vm6 = vcmp.eq.f32.partialorder %v6145_v1, %v4183_v23  ;;  %v9078_v23 = vld [vmem:[#allocation18_spill] sm:$0xff] }
 0x393   : > { %9047 = vst [vmem:[#allocation48_spill] sm:$0xff] %v9046_v61  ;;  %vm9049_vm2 = vmor %vm9040_vm9, %vm5863_vm12  ;;  %vm1176_vm9 = vcmp.eq.f32.partialorder %v6137_v42, %v4174_v2  ;;  %3760 = vmatpush3.bf16.xpose.msk.msra.mxu1 %vm6152_vm5, %v8920_v20  ;;  %vm1376_vm5 = vcmp.eq.f32.partialorder %v6137_v42, %v4184_v55  ;;  %v4189_v39 = vunpack.i.h.bf16 %v4187_v14  ;;  %v4188_v31 = vunpack.i.l.bf16 %v4187_v14 }
 0x394   : > { %vm6167_vm15 = vmpackc.low %vm9049_vm2, %vm9048_vm1  ;;  %vm9059_vm2 = vcmp.lt.f32.partialorder %v9038_v38, 0.09  ;;  %v9081_v14 = vmov 0  ;;  %v9114_v55 = vmov 0 }
 0x395   : > { %v9051_v37 = vsel %vm6167_vm15, 4294967295, %v9050_v37  ;;  %vm6173_vm3 = vmand %vm932_vm11, %vm9053_vm7  ;;  %vm1575_vm11 = vcmp.eq.f32.partialorder %v6145_v1, %v4178_v17  ;;  %3778 = vmatpush3.bf16.xpose.msk.msra.mxu0 %vm6167_vm15, %v8920_v20  ;;  %vm9072_vm15 = vcmp.lt.f32.partialorder %v9038_v38, 0.09  ;;  %v9073_v17 = vmov 0 }
 0x396   : > { %9052 = vst [vmem:[#allocation51_spill] sm:$0xff] %v9051_v37  ;;  %v9055_v47 = vsel %vm6173_vm3, 4294967295, %v9054_v47  ;;  %vm9056_vm13 = vmmov %vm9053_vm7  ;;  %v4197_v37 = vpop.permute.xlu0 %4196 }
 0x397   : > { %vm6180_vm8 = vmand %vm933_vm10, %vm9056_vm13  ;;  %vm9062_vm13 = vcmp.lt.f32.partialorder %v9041_v52, 0.09  ;;  %v4199_v49 = vunpack.i.h.bf16 %v4197_v37  ;;  %v4198_v61 = vunpack.i.l.bf16 %v4197_v37  ;;  %v9107_v37 = vmov 0 }
 0x398   : > { %v9058_v9 = vsel %vm6180_vm8, 4294967295, %v9057_v9  ;;  %vm6187_vm1 = vmand %vm9059_vm2, %vm1576_vm0 }
 0x399   : > { %vm1191_vm10 = vmand %vm9062_vm13, %vm1175_vm4 }
 0x39a   : > { %vm9063_vm0 = vmmov %vm9059_vm2 }
 0x39b   : > { %vm1192_vm7 = vmand %vm9063_vm0, %vm1176_vm9 }
 0x39c   : > { %vm9064_vm2 = vmmov %vm9062_vm13  ;;  %vm975_vm13 = vcmp.eq.f32.partialorder %v6145_v1, 0.0 }
 0x39d   : > { %vm6204_vm12 = vmand %vm9064_vm2, %vm1575_vm11  ;;  %vm976_vm11 = vcmp.eq.f32.partialorder %v6137_v42, 0.0  ;;  %vm9071_vm2 = vcmp.lt.f32.partialorder %v9070_v40, 0.09 }
 0x39e   : > { %vm1207_vm4 = vmor %vm1191_vm10, %vm6173_vm3  ;;  %v3149_v2 = vsel %vm9071_vm2, 1.0, %v8809_v57  ;;  %vm930_vm10 = vcmp.eq.s32.totalorder %v896_v4, 1 }
 0x39f   : > { %vm1208_vm9 = vmor %vm1192_vm7, %vm6180_vm8  ;;  %vm9075_vm7 = vcmp.lt.f32.partialorder %v9041_v52, 0.09  ;;  %v6242_v30 = vsub.f32 %v5170_v60, %v3149_v2  ;;  %v9087_v60 = vmov 0  ;;  %v9152_v2 = vmov 0 }
 0x3a0   : > { %vm6215_vm0 = vmpackc.low %vm1208_vm9, %vm1207_vm4  ;;  %vm9079_vm9 = vcmp.lt.f32.partialorder %v9078_v23, 0.09 }
 0x3a1   : > { %v9068_v26 = vsel %vm6215_vm0, 4294967295, %v9067_v26  ;;  %vm6225_vm14 = vmand %vm9072_vm15, %vm1376_vm5  ;;  %3761 = vmatprep.subr.msk.bf16.mxu1 %vm6215_vm0, %v8920_v20  ;;  %v3148_v4 = vsel %vm9079_vm9, 1.0, %v8809_v57  ;;  %vm931_vm0 = vcmp.eq.s32.totalorder %v899_v41, 1  ;;  %v9099_v41 = vmov 0 }
 0x3a2   : > { %9069 = vst [vmem:[#allocation50_spill] sm:$0xff] %v9068_v26  ;;  %v9074_v17 = vsel %vm6225_vm14, 4294967295, %v9073_v17  ;;  %vm6234_vm4 = vmand %vm9075_vm7, %vm975_vm13  ;;  %v6251_v27 = vsub.f32 %v5163_v45, %v3148_v4  ;;  %vm9083_vm13 = vcmp.lt.f32.partialorder %v9038_v38, 0.09  ;;  %v4192_v45 = vpop.permute.xlu1 %4191  ;;  %v893_v26 = vpop.permute.xlu0 %892 }
 0x3a3   : > { %vm9080_vm15 = vmmov %vm9075_vm7  ;;  %vm9086_vm7 = vcmp.eq.s32.totalorder %v8888_v8, 0  ;;  %v4194_v4 = vunpack.i.h.bf16 %v4192_v45 }
 0x3a4   : > { %vm6246_vm5 = vmand %vm9080_vm15, %vm1375_vm6  ;;  %vm1174_vm6 = vcmp.eq.f32.partialorder %v6242_v30, %v4189_v39  ;;  %v9089_v39 = vmov 0 }
 0x3a5   : > { %v9082_v14 = vsel %vm6246_vm5, 4294967295, %v9081_v14  ;;  %vm6255_vm2 = vmand %vm9083_vm13, %vm976_vm11  ;;  %vm1173_vm13 = vcmp.eq.f32.partialorder %v6251_v27, %v4188_v31  ;;  %vm9092_vm11 = vcmp.lt.f32.partialorder %v9070_v40, 0.09  ;;  %v4193_v31 = vunpack.i.l.bf16 %v4192_v45 }
 0x3a6   : > { %vm6261_vm9 = vmand %vm930_vm10, %vm9086_vm7  ;;  %vm9095_vm10 = vcmp.lt.f32.partialorder %v9078_v23, 0.09 }
 0x3a7   : > { %v9088_v60 = vsel %vm6261_vm9, 4294967295, %v9087_v60  ;;  %vm1607_vm15 = vmor %vm6204_vm12, %vm6173_vm3 }
 0x3a8   : > { %vm1608_vm7 = vmor %vm6187_vm1, %vm6180_vm8  ;;  %vm9098_vm1 = vcmp.eq.s32.totalorder %v8888_v8, 0 }
 0x3a9   : > { %vm6283_vm12 = vmpackc.low %vm1608_vm7, %vm1607_vm15 }
 0x3aa   : > { %v9090_v39 = vsel %vm6283_vm12, 4294967295, %v9089_v39  ;;  %vm6289_vm5 = vmand %vm9092_vm11, %vm1174_vm6  ;;  %3779 = vmatprep.subr.msk.bf16.mxu0 %vm6283_vm12, %v8920_v20  ;;  %vm1374_vm6 = vcmp.eq.f32.partialorder %v6242_v30, %v4199_v49  ;;  %v9105_v49 = vmov 0 }
 0x3ab   : > { %9091 = vst [vmem:[#allocation53_spill] sm:$0xff] %v9090_v39  ;;  %vm6298_vm14 = vmand %vm9095_vm10, %vm1173_vm13  ;;  %v890_v39 = vpop.permute.xlu1 %889  ;;  %vm9104_vm13 = vcmp.lt.f32.partialorder %v9070_v40, 0.09 }
 0x3ac   : > { %vm6304_vm15 = vmand %vm931_vm0, %vm9098_vm1 }
 0x3ad   : > { %v9100_v41 = vsel %vm6304_vm15, 4294967295, %v9099_v41  ;;  %vm1007_vm11 = vmor %vm6234_vm4, %vm6173_vm3 }
 0x3ae   : > { %vm1008_vm10 = vmor %vm6255_vm2, %vm6180_vm8  ;;  %vm1573_vm2 = vcmp.eq.f32.partialorder %v6251_v27, %v4193_v31 }
 0x3af   : > { %vm6317_vm0 = vmpackc.low %vm1008_vm10, %vm1007_vm11  ;;  %vm1373_vm10 = vcmp.eq.f32.partialorder %v6251_v27, %v4198_v61 }
 0x3b0   : > { %v9102_v29 = vsel %vm6317_vm0, 4294967295, %v9101_v29  ;;  %vm6323_vm7 = vmand %vm9104_vm13, %vm1374_vm6  ;;  %3762 = vmatpush3.bf16.xpose.msk.msra.mxu1 %vm6317_vm0, %v8920_v20  ;;  %vm1574_vm6 = vcmp.eq.f32.partialorder %v6242_v30, %v4194_v4  ;;  %vm9117_vm0 = vcmp.lt.f32.partialorder %v9078_v23, 0.09 }
 0x3b1   : > { %9103 = vst [vmem:[#allocation52_spill] sm:$0xff] %v9102_v29  ;;  %v9106_v49 = vsel %vm6323_vm7, 4294967295, %v9105_v49  ;;  %vm1205_vm4 = vmor %vm6298_vm14, %vm6261_vm9  ;;  %vm9110_vm14 = vnez %v9082_v14  ;;  %v4202_v14 = vpop.permute.xlu1 %4201  ;;  %v4207_v29 = vpop.permute.xlu0 %4206 }
 0x3b2   : > { %vm1206_vm1 = vmor %vm6289_vm5, %vm6304_vm15  ;;  %vm9112_vm5 = vnez %v9074_v17  ;;  %v4204_v45 = vunpack.i.h.bf16 %v4202_v14  ;;  %v4203_v4 = vunpack.i.l.bf16 %v4202_v14  ;;  %v9158_v14 = vmov 0 }
 0x3b3   : > { %vm6340_vm11 = vmpackc.low %vm1206_vm1, %vm1205_vm4 }
 0x3b4   : > { %v9108_v37 = vsel %vm6340_vm11, 4294967295, %v9107_v37  ;;  %3763 = vmatprep.subr.msk.bf16.mxu1 %vm6340_vm11, %v8920_v20  ;;  %vm9111_vm13 = vmor %vm9110_vm14, %vm6173_vm3  ;;  %vm973_vm14 = vcmp.eq.f32.partialorder %v6251_v27, 0.0  ;;  %vm9120_vm11 = vcmp.lt.f32.partialorder %v9070_v40, 0.09 }
 0x3b5   : > { %9109 = vst [vmem:[#allocation55_spill] sm:$0xff] %v9108_v37  ;;  %vm9113_vm4 = vmor %vm9112_vm5, %vm6180_vm8 }
 0x3b6   : > { %vm6358_vm1 = vmpackc.low %vm9113_vm4, %vm9111_vm13 }
 0x3b7   : > { %v9115_v55 = vsel %vm6358_vm1, 4294967295, %v9114_v55  ;;  %vm6364_vm12 = vmand %vm9117_vm0, %vm1573_vm2  ;;  %3780 = vmatpush3.bf16.xpose.msk.msra.mxu0 %vm6358_vm1, %v8920_v20  ;;  %vm974_vm2 = vcmp.eq.f32.partialorder %v6242_v30, 0.0 }
 0x3b8   : > { %9116 = vst [vmem:[#allocation54_spill] sm:$0xff] %v9115_v55  ;;  %vm1590_vm5 = vmand %vm9120_vm11, %vm1574_vm6  ;;  %vm9128_vm6 = vcmp.lt.f32.partialorder %v9127_v24, 0.09  ;;  %v9129_v55 = vld [vmem:[#allocation16_spill] sm:$0xff] }
 0x3b9   : > { %vm9121_vm13 = vmmov %vm9117_vm0  ;;  %v3147_v31 = vsel %vm9128_vm6, 1.0, %v8809_v57 }
 0x3ba   : > { %vm6376_vm4 = vmand %vm9121_vm13, %vm1373_vm10  ;;  %vm9130_vm10 = vcmp.lt.f32.partialorder %v9129_v55, 0.09  ;;  %v6400_v37 = vsub.f32 %v5184_v35, %v3147_v31  ;;  %v9138_v35 = vmov 0  ;;  %v4212_v31 = vpop.permute.xlu1 %4211 }
 0x3bb   : > { %vm1605_vm0 = vmor %vm6364_vm12, %vm6261_vm9  ;;  %v3146_v61 = vsel %vm9130_vm10, 1.0, %v8809_v57  ;;  %vm929_vm12 = vcmp.eq.s32.totalorder %v893_v26, 1  ;;  %vm9137_vm10 = vcmp.eq.s32.totalorder %v8888_v8, 0  ;;  %v4213_v58 = vunpack.i.l.bf16 %v4212_v31 }
 0x3bc   : > { %vm9124_vm1 = vmmov %vm9121_vm13  ;;  %v6407_v15 = vsub.f32 %v5167_v51, %v3146_v61  ;;  %v9141_v51 = vmov 0  ;;  %v4208_v61 = vunpack.i.l.bf16 %v4207_v29 }
 0x3bd   : > { %vm6387_vm8 = vmand %vm9124_vm1, %vm973_vm14  ;;  %vm928_vm14 = vcmp.eq.s32.totalorder %v890_v39, 1  ;;  %v9167_v39 = vld [vmem:[#allocation15_spill] sm:$0xff] }
 0x3be   : > { %vm1606_vm11 = vmor %vm1590_vm5, %vm6304_vm15  ;;  %vm9134_vm5 = vcmp.lt.f32.partialorder %v9070_v40, 0.09 }
 0x3bf   : > { %vm6402_vm1 = vmpackc.low %vm1606_vm11, %vm1605_vm0  ;;  %vm1172_vm11 = vcmp.eq.f32.partialorder %v6400_v37, %v4204_v45  ;;  %v884_v45 = vpop.permute.xlu0 %883 }
 0x3c0   : > { %v9132_v33 = vsel %vm6402_vm1, 4294967295, %v9131_v33  ;;  %3781 = vmatprep.subr.msk.bf16.mxu0 %vm6402_vm1, %v8920_v20  ;;  %vm6414_vm13 = vmand %vm9134_vm5, %vm974_vm2  ;;  %vm1171_vm2 = vcmp.eq.f32.partialorder %v6407_v15, %v4203_v4  ;;  %v4209_v4 = vunpack.i.h.bf16 %v4207_v29 }
 0x3c1   : > { %9133 = vst [vmem:[#allocation57_spill] sm:$0xff] %v9132_v33  ;;  %vm6429_vm1 = vmand %vm929_vm12, %vm9137_vm10  ;;  %v4214_v33 = vunpack.i.h.bf16 %v4212_v31 }
 0x3c2   : > { %v9139_v35 = vsel %vm6429_vm1, 4294967295, %v9138_v35  ;;  %vm9140_vm5 = vmmov %vm9137_vm10  ;;  %vm1571_vm10 = vcmp.eq.f32.partialorder %v6407_v15, %v4208_v61 }
 0x3c3   : > { %vm6436_vm3 = vmand %vm928_vm14, %vm9140_vm5  ;;  %v4217_v29 = vpop.permute.xlu0 %4216  ;;  %vm1372_vm5 = vcmp.eq.f32.partialorder %v6400_v37, %v4214_v33  ;;  %v9219_v33 = vmov 0 }
 0x3c4   : > { %v9142_v51 = vsel %vm6436_vm3, 4294967295, %v9141_v51  ;;  %vm9143_vm0 = vmmov %vm9128_vm6  ;;  %vm9146_vm6 = vcmp.lt.f32.partialorder %v9129_v55, 0.09  ;;  %v4219_v17 = vunpack.i.h.bf16 %v4217_v29  ;;  %v4218_v31 = vunpack.i.l.bf16 %v4217_v29 }
 0x3c5   : > { %vm6442_vm7 = vmand %vm9143_vm0, %vm1172_vm11 }
 0x3c6   : > { %vm6448_vm12 = vmand %vm9146_vm6, %vm1171_vm2  ;;  %vm1572_vm6 = vcmp.eq.f32.partialorder %v6400_v37, %v4209_v4  ;;  %v887_v4 = vpop.permute.xlu1 %886 }
 0x3c7   : > { %vm1005_vm14 = vmor %vm6387_vm8, %vm6261_vm9 }
 0x3c8   : > { %vm1006_vm0 = vmor %vm6414_vm13, %vm6304_vm15 }
 0x3c9   : > { %vm6460_vm11 = vmpackc.low %vm1006_vm0, %vm1005_vm14 }
 0x3ca   : > { %v9150_v43 = vsel %vm6460_vm11, 4294967295, %v9149_v43  ;;  %3764 = vmatpush3.bf16.xpose.msk.msra.mxu1 %vm6460_vm11, %v8920_v20  ;;  %vm1203_vm8 = vmor %vm6448_vm12, %vm6436_vm3 }
 0x3cb   : > { %9151 = vst [vmem:[#allocation56_spill] sm:$0xff] %v9150_v43  ;;  %vm1204_vm13 = vmor %vm6442_vm7, %vm6429_vm1  ;;  %vm9156_vm7 = vnez %v9106_v49  ;;  %v4222_v49 = vpop.permute.xlu1 %4221 }
 0x3cc   : > { %vm6477_vm2 = vmpackc.low %vm1204_vm13, %vm1203_vm8  ;;  %vm971_vm8 = vcmp.eq.f32.partialorder %v6407_v15, 0.0  ;;  %vm9161_vm13 = vcmp.lt.f32.partialorder %v9127_v24, 0.09 }
 0x3cd   : > { %v9153_v2 = vsel %vm6477_vm2, 4294967295, %v9152_v2  ;;  %3765 = vmatprep.subr.msk.bf16.mxu1 %vm6477_vm2, %v8920_v20  ;;  %vm9155_vm12 = vmor %vm6376_vm4, %vm6261_vm9  ;;  %vm1371_vm2 = vcmp.eq.f32.partialorder %v6407_v15, %v4213_v58  ;;  %vm9164_vm4 = vcmp.lt.f32.partialorder %v9129_v55, 0.09  ;;  %v9169_v58 = vmov 0 }
 0x3ce   : > { %9154 = vst [vmem:[#allocation29_spill] sm:$0xff] %v9153_v2  ;;  %vm9157_vm14 = vmor %vm9156_vm7, %vm6304_vm15  ;;  %vm972_vm7 = vcmp.eq.f32.partialorder %v6400_v37, 0.0  ;;  %vm927_vm9 = vcmp.eq.s32.totalorder %v887_v4, 1  ;;  %v4224_v4 = vunpack.i.h.bf16 %v4222_v49 }
 0x3cf   : > { %vm6495_vm0 = vmpackc.low %vm9157_vm14, %vm9155_vm12  ;;  %vm926_vm14 = vcmp.eq.s32.totalorder %v884_v45, 1 }
 0x3d0   : > { %v9159_v14 = vsel %vm6495_vm0, 4294967295, %v9158_v14  ;;  %vm6502_vm11 = vmand %vm9161_vm13, %vm1572_vm6  ;;  %3782 = vmatpush3.bf16.xpose.msk.msra.mxu0 %vm6495_vm0, %v8920_v20  ;;  %vm9168_vm6 = vcmp.lt.f32.partialorder %v9167_v39, 0.09 }
 0x3d1   : > { %9160 = vst [vmem:[#allocation28_spill] sm:$0xff] %v9159_v14  ;;  %vm6512_vm12 = vmand %vm9164_vm4, %vm1571_vm10  ;;  %v3145_v26 = vsel %vm9168_vm6, 1.0, %v8809_v57  ;;  %v9174_v14 = vld [vmem:[#allocation14_spill] sm:$0xff] }
 0x3d2   : > { %vm6522_vm15 = vmand %vm9161_vm13, %vm1372_vm5  ;;  %vm9175_vm0 = vcmp.lt.f32.partialorder %v9174_v14, 0.09  ;;  %v6536_v45 = vsub.f32 %v5022_v3, %v3145_v26  ;;  %v9183_v3 = vmov 0  ;;  %v4227_v26 = vpop.permute.xlu0 %4226 }
 0x3d3   : > { %v9170_v58 = vsel %vm6522_vm15, 4294967295, %v9169_v58  ;;  %vm9171_vm10 = vmmov %vm9164_vm4  ;;  %v3144_v2 = vsel %vm9175_vm0, 1.0, %v8809_v57  ;;  %vm9182_vm0 = vcmp.eq.s32.totalorder %v8888_v8, 0  ;;  %v4228_v61 = vunpack.i.l.bf16 %v4227_v26 }
 0x3d4   : > { %vm6528_vm4 = vmand %vm9171_vm10, %vm971_vm8  ;;  %v6545_v29 = vsub.f32 %v5015_v62, %v3144_v2  ;;  %v9185_v62 = vmov 0  ;;  %v9207_v2 = vmov 0 }
 0x3d5   : > { %vm9176_vm5 = vmmov %vm9171_vm10 }
 0x3d6   : > { %vm6540_vm6 = vmand %vm9176_vm5, %vm1371_vm2  ;;  %vm1170_vm2 = vcmp.eq.f32.partialorder %v6536_v45, %v4219_v17  ;;  %v9195_v17 = vmov 0  ;;  %v881_v43 = vpop.permute.xlu0 %880 }
 0x3d7   : > { %vm9179_vm8 = vmmov %vm9161_vm13 }
 0x3d8   : > { %vm6549_vm13 = vmand %vm9179_vm8, %vm972_vm7  ;;  %vm1169_vm8 = vcmp.eq.f32.partialorder %v6545_v29, %v4218_v31  ;;  %v4223_v31 = vunpack.i.l.bf16 %v4222_v49 }
 0x3d9   : > { %vm6555_vm10 = vmand %vm926_vm14, %vm9182_vm0  ;;  %vm9191_vm14 = vcmp.lt.f32.partialorder %v9174_v14, 0.09 }
 0x3da   : > { %v9184_v3 = vsel %vm6555_vm10, 4294967295, %v9183_v3  ;;  %vm1603_vm5 = vmor %vm6512_vm12, %vm6436_vm3  ;;  %vm9188_vm12 = vcmp.lt.f32.partialorder %v9167_v39, 0.09 }
 0x3db   : > { %vm1604_vm0 = vmor %vm6502_vm11, %vm6429_vm1  ;;  %vm9194_vm11 = vcmp.eq.s32.totalorder %v8888_v8, 0 }
 0x3dc   : > { %vm6577_vm10 = vmpackc.low %vm1604_vm0, %vm1603_vm5  ;;  %vm1569_vm0 = vcmp.eq.f32.partialorder %v6545_v29, %v4223_v31 }
 0x3dd   : > { %v9186_v62 = vsel %vm6577_vm10, 4294967295, %v9185_v62  ;;  %vm6583_vm7 = vmand %vm9188_vm12, %vm1170_vm2  ;;  %3783 = vmatprep.subr.msk.bf16.mxu0 %vm6577_vm10, %v8920_v20  ;;  %vm1570_vm12 = vcmp.eq.f32.partialorder %v6536_v45, %v4224_v4  ;;  %v4237_v4 = vpop.permute.xlu0 %4236 }
 0x3de   : > { %9187 = vst [vmem:[#allocation59_spill] sm:$0xff] %v9186_v62  ;;  %vm6592_vm15 = vmand %vm9191_vm14, %vm1169_vm8  ;;  %v4229_v62 = vunpack.i.h.bf16 %v4227_v26 }
 0x3df   : > { %vm6598_vm5 = vmand %vm927_vm9, %vm9194_vm11  ;;  %vm9200_vm9 = vnez %v9184_v3 }
 0x3e0   : > { %v9196_v17 = vsel %vm6598_vm5, 4294967295, %v9195_v17  ;;  %vm1003_vm2 = vmor %vm6528_vm4, %vm6436_vm3 }
 0x3e1   : > { %vm1004_vm14 = vmor %vm6549_vm13, %vm6429_vm1 }
 0x3e2   : > { %vm6610_vm8 = vmpackc.low %vm1004_vm14, %vm1003_vm2  ;;  %vm969_vm2 = vcmp.eq.f32.partialorder %v6545_v29, 0.0  ;;  %vm1370_vm14 = vcmp.eq.f32.partialorder %v6536_v45, %v4229_v62  ;;  %v878_v62 = vpop.permute.xlu1 %877 }
 0x3e3   : > { %v9198_v21 = vsel %vm6610_vm8, 4294967295, %v9197_v21  ;;  %3766 = vmatpush3.bf16.xpose.msk.msra.mxu1 %vm6610_vm8, %v8920_v20  ;;  %vm1201_vm4 = vmor %vm6592_vm15, %vm9200_vm9  ;;  %vm9210_vm8 = vcmp.lt.f32.partialorder %v9174_v14, 0.09 }
 0x3e4   : > { %9199 = vst [vmem:[#allocation58_spill] sm:$0xff] %v9198_v21  ;;  %vm1202_vm13 = vmor %vm6583_vm7, %vm6598_vm5  ;;  %vm9205_vm7 = vnez %v9170_v58  ;;  %v9230_v58 = vmov 0 }
 0x3e5   : > { %vm6627_vm11 = vmpackc.low %vm1202_vm13, %vm1201_vm4 }
 0x3e6   : > { %v9202_v50 = vsel %vm6627_vm11, 4294967295, %v9201_v50  ;;  %3767 = vmatprep.subr.msk.bf16.mxu1 %vm6627_vm11, %v8920_v20  ;;  %vm9204_vm15 = vmor %vm6540_vm6, %vm6436_vm3  ;;  %vm9211_vm11 = vcmp.lt.f32.partialorder %v9167_v39, 0.09  ;;  %v4232_v26 = vpop.permute.xlu1 %4231 }
 0x3e7   : > { %9203 = vst [vmem:[#allocation31_spill] sm:$0xff] %v9202_v50  ;;  %vm9206_vm4 = vmor %vm9205_vm7, %vm6429_vm1  ;;  %v4238_v50 = vunpack.i.l.bf16 %v4237_v4  ;;  %v4234_v59 = vunpack.i.h.bf16 %v4232_v26 }
 0x3e8   : > { %vm6646_vm13 = vmpackc.low %vm9206_vm4, %vm9204_vm15  ;;  %vm970_vm4 = vcmp.eq.f32.partialorder %v6536_v45, 0.0 }
 0x3e9   : > { %v9208_v2 = vsel %vm6646_vm13, 4294967295, %v9207_v2  ;;  %vm1585_vm10 = vmand %vm9210_vm8, %vm1569_vm0  ;;  %3784 = vmatpush3.bf16.xpose.msk.msra.mxu0 %vm6646_vm13, %v8920_v20 }
 0x3ea   : > { %9209 = vst [vmem:[#allocation30_spill] sm:$0xff] %v9208_v2  ;;  %vm1586_vm6 = vmand %vm9211_vm11, %vm1570_vm12  ;;  %vm9218_vm12 = vnez %v9196_v17  ;;  %v4242_v21 = vpop.permute.xlu1 %4241 }
 0x3eb   : > { %vm9212_vm3 = vmmov %vm9210_vm8  ;;  %vm1369_vm8 = vcmp.eq.f32.partialorder %v6545_v29, %v4228_v61  ;;  %v4239_v61 = vunpack.i.h.bf16 %v4237_v4  ;;  %v4233_v4 = vunpack.i.l.bf16 %v4232_v26  ;;  %v4244_v49 = vunpack.i.h.bf16 %v4242_v21 }
 0x3ec   : > { %vm6659_vm5 = vmand %vm9212_vm3, %vm969_vm2  ;;  %vm9222_vm2 = vcmp.lt.f32.partialorder %v9174_v14, 0.09  ;;  %v9255_v26 = vmov 0 }
 0x3ed   : > { %vm9215_vm15 = vmmov %vm9211_vm11 }
 0x3ee   : > { %vm6665_vm7 = vmand %vm9215_vm15, %vm1370_vm14 }
 0x3ef   : > { %vm1601_vm0 = vmor %vm1585_vm10, %vm9200_vm9 }
 0x3f0   : > { %vm1602_vm11 = vmor %vm1586_vm6, %vm9218_vm12 }
 0x3f1   : > { %vm6675_vm3 = vmpackc.low %vm1602_vm11, %vm1601_vm0 }
 0x3f2   : > { %v9220_v33 = vsel %vm6675_vm3, 4294967295, %v9219_v33  ;;  %vm6681_vm14 = vmand %vm9222_vm2, %vm1369_vm8  ;;  %3785 = vmatprep.subr.msk.bf16.mxu0 %vm6675_vm3, %v8920_v20  ;;  %vm9229_vm2 = vcmp.lt.f32.partialorder %v9228_v19, 0.09 }
 0x3f3   : > { %9221 = vst [vmem:[#allocation33_spill] sm:$0xff] %v9220_v33  ;;  %vm9225_vm10 = vmmov %vm9215_vm15  ;;  %v9226_v33 = vld [vmem:[#allocation13_spill] sm:$0xff]  ;;  %v3142_v36 = vsel %vm9229_vm2, 1.0, %v8809_v57 }
 0x3f4   : > { %vm986_vm6 = vmand %vm9225_vm10, %vm970_vm4  ;;  %vm9227_vm11 = vcmp.lt.f32.partialorder %v9226_v33, 0.09  ;;  %vm925_vm10 = vcmp.eq.s32.totalorder %v881_v43, 1  ;;  %v6718_v14 = vsub.f32 %v5019_v63, %v3142_v36  ;;  %v4243_v63 = vunpack.i.l.bf16 %v4242_v21  ;;  %v4247_v36 = vpop.permute.xlu0 %4246 }
 0x3f5   : > { %vm1401_vm8 = vmor %vm6681_vm14, %vm9200_vm9  ;;  %v3143_v2 = vsel %vm9227_vm11, 1.0, %v8809_v57  ;;  %v9233_v57 = vmov 0  ;;  %v4248_v31 = vunpack.i.l.bf16 %v4247_v36  ;;  %vm9263_vm1 = vcmp.lt.f32.partialorder %v9226_v33, 0.09 }
 0x3f6   : > { %vm1001_vm0 = vmor %vm6659_vm5, %vm9200_vm9  ;;  %v6711_v22 = vsub.f32 %v5036_v12, %v3143_v2  ;;  %vm924_vm5 = vcmp.eq.s32.totalorder %v878_v62, 1  ;;  %v9237_v12 = vmov 0  ;;  %vm1567_vm14 = vcmp.eq.f32.partialorder %v6718_v14, %v4238_v50 }
 0x3f7   : > { %vm1002_vm4 = vmor %vm986_vm6, %vm9218_vm12  ;;  %v9240_v2 = vmov 0 }
 0x3f8   : > { %vm6713_vm15 = vmpackc.low %vm1002_vm4, %vm1001_vm0  ;;  %vm1568_vm11 = vcmp.eq.f32.partialorder %v6711_v22, %v4239_v61  ;;  %vm9236_vm4 = vcmp.eq.s32.totalorder %v8888_v8, 0  ;;  %v4249_v8 = vunpack.i.h.bf16 %v4247_v36  ;;  %v9260_v61 = vmov 0 }
 0x3f9   : > { %v9231_v58 = vsel %vm6713_vm15, 4294967295, %v9230_v58  ;;  %3768 = vmatpush3.bf16.xpose.msk.msra.mxu1 %vm6713_vm15, %v8920_v20  ;;  %vm9232_vm6 = vmor %vm6665_vm7, %vm9218_vm12  ;;  %v9270_v36 = vmov 0 }
 0x3fa   : > { %vm6733_vm0 = vmpackc.low %vm9232_vm6, %vm1401_vm8  ;;  %vm1168_vm6 = vcmp.eq.f32.partialorder %v6711_v22, %v4234_v59  ;;  %v9249_v59 = vmov 0 }
 0x3fb   : > { %v9234_v57 = vsel %vm6733_vm0, 4294967295, %v9233_v57  ;;  %3786 = vmatpush3.bf16.xpose.msk.msra.mxu0 %vm6733_vm0, %v8920_v20  ;;  %vm6743_vm2 = vmand %vm925_vm10, %vm9236_vm4  ;;  %vm9242_vm0 = vcmp.lt.f32.partialorder %v9226_v33, 0.09  ;;  %vm1167_vm10 = vcmp.eq.f32.partialorder %v6718_v14, %v4233_v4 }
 0x3fc   : > { %9235 = vst [vmem:[#allocation32_spill] sm:$0xff] %v9234_v57  ;;  %v9238_v12 = vsel %vm6743_vm2, 4294967295, %v9237_v12  ;;  %vm9239_vm7 = vmmov %vm9236_vm4  ;;  %vm9245_vm4 = vcmp.lt.f32.partialorder %v9228_v19, 0.09 }
 0x3fd   : > { %vm6750_vm8 = vmand %vm924_vm5, %vm9239_vm7  ;;  %vm1367_vm5 = vcmp.eq.f32.partialorder %v6718_v14, %v4243_v63  ;;  %v9288_v63 = vmov 0 }
 0x3fe   : > { %v9241_v2 = vsel %vm6750_vm8, 4294967295, %v9240_v2  ;;  %vm6757_vm15 = vmand %vm9242_vm0, %vm1568_vm11 }
 0x3ff   : > { %vm6764_vm3 = vmand %vm9245_vm4, %vm1567_vm14  ;;  %vm967_vm14 = vcmp.eq.f32.partialorder %v6718_v14, 0.0 }
 0x400   : > { %vm9248_vm7 = vmmov %vm9242_vm0 }
 0x401   : > { %vm6771_vm13 = vmand %vm9248_vm7, %vm1168_vm6  ;;  %vm968_vm6 = vcmp.eq.f32.partialorder %v6711_v22, 0.0  ;;  %vm1982_vm7 = vcmp.eq.f32.partialorder %v5672_v56, %v4249_v8  ;;  %v4257_v8 = vpop.permute.xlu0 %4256 }
 0x402   : > { %v9250_v59 = vsel %vm6771_vm13, 4294967295, %v9249_v59  ;;  %vm9251_vm0 = vmmov %vm9245_vm4  ;;  %v4259_v43 = vunpack.i.h.bf16 %v4257_v8 }
 0x403   : > { %vm6777_vm11 = vmand %vm9251_vm0, %vm1167_vm10 }
 0x404   : > { %vm9254_vm4 = vmmov %vm9251_vm0 }
 0x405   : > { %vm6784_vm12 = vmand %vm9254_vm4, %vm1367_vm5 }
 0x406   : > { %v9256_v26 = vsel %vm6784_vm12, 4294967295, %v9255_v26  ;;  %vm1599_vm10 = vmor %vm6764_vm3, %vm6750_vm8  ;;  %vm9266_vm3 = vcmp.lt.f32.partialorder %v8878_v44, 0.09 }
 0x407   : > { %vm1600_vm0 = vmor %vm6757_vm15, %vm6743_vm2  ;;  %vm1368_vm15 = vcmp.eq.f32.partialorder %v6711_v22, %v4244_v49  ;;  %v4258_v49 = vunpack.i.l.bf16 %v4257_v8 }
 0x408   : > { %vm9257_vm5 = vmmov %vm9254_vm4 }
 0x409   : > { %vm6800_vm4 = vmand %vm9257_vm5, %vm967_vm14  ;;  %vm1981_vm14 = vcmp.eq.f32.partialorder %v5660_v0, %v4248_v31  ;;  %v9279_v31 = vmov 0 }
 0x40a   : > { %vm6804_vm9 = vmpackc.low %vm1600_vm0, %vm1599_vm10  ;;  %vm9272_vm0 = vcmp.lt.f32.partialorder %v9226_v33, 0.09 }
 0x40b   : > { %v9261_v61 = vsel %vm6804_vm9, 4294967295, %v9260_v61  ;;  %vm6810_vm12 = vmand %vm9263_vm1, %vm968_vm6  ;;  %3787 = vmatprep.subr.msk.bf16.mxu0 %vm6804_vm9, %v8920_v20  ;;  %vm9269_vm6 = vnez %v9250_v59  ;;  %v4252_v59 = vpop.permute.xlu1 %4251  ;;  %vm9298_vm9 = vcmp.lt.f32.partialorder %v8877_v34, 0.09 }
 0x40c   : > { %9262 = vst [vmem:[#allocation35_spill] sm:$0xff] %v9261_v61  ;;  %vm6816_vm13 = vmand %vm9266_vm3, %vm1982_vm7  ;;  %v4267_v61 = vpop.permute.xlu0 %4266  ;;  %v4254_v21 = vunpack.i.h.bf16 %v4252_v59  ;;  %v4253_v8 = vunpack.i.l.bf16 %v4252_v59 }
 0x40d   : > { %vm1199_vm1 = vmor %vm6777_vm11, %vm6750_vm8  ;;  %vm9275_vm11 = vcmp.lt.f32.partialorder %v8877_v34, 0.09  ;;  %v4268_v57 = vunpack.i.l.bf16 %v4267_v61 }
 0x40e   : > { %vm1200_vm7 = vmor %vm9269_vm6, %vm6743_vm2  ;;  %vm9283_vm6 = vnez %v8892_v10  ;;  %v9352_v10 = vmov 0 }
 0x40f   : > { %vm6833_vm10 = vmpackc.low %vm1200_vm7, %vm1199_vm1  ;;  %vm9278_vm1 = vnez %v9256_v26  ;;  %v4262_v4 = vpop.permute.xlu1 %4261 }
 0x410   : > { %v9271_v36 = vsel %vm6833_vm10, 4294967295, %v9270_v36  ;;  %vm6839_vm5 = vmand %vm9272_vm0, %vm1368_vm15  ;;  %3769 = vmatprep.subr.msk.bf16.mxu1 %vm6833_vm10, %v8920_v20  ;;  %vm1782_vm15 = vcmp.eq.f32.partialorder %v5672_v56, %v4259_v43  ;;  %v4264_v26 = vunpack.i.h.bf16 %v4262_v4  ;;  %v4269_v43 = vunpack.i.h.bf16 %v4267_v61 }
 0x411   : > { %vm6848_vm3 = vmand %vm9275_vm11, %vm1981_vm14  ;;  %vm9282_vm11 = vnez %v8894_v11 }
 0x412   : > { %vm999_vm14 = vmor %vm6800_vm4, %vm6750_vm8 }
 0x413   : > { %vm1000_vm7 = vmor %vm6810_vm12, %vm6743_vm2  ;;  %v4272_v61 = vpop.permute.xlu1 %4271 }
 0x414   : > { %vm6868_vm0 = vmpackc.low %vm1000_vm7, %vm999_vm14  ;;  %vm1781_vm14 = vcmp.eq.f32.partialorder %v5660_v0, %v4258_v49  ;;  %v4273_v50 = vunpack.i.l.bf16 %v4272_v61  ;;  %v9322_v49 = vmov 0 }
 0x415   : > { %v9280_v31 = vsel %vm6868_vm0, 4294967295, %v9279_v31  ;;  %3770 = vmatpush3.bf16.xpose.msk.msra.mxu1 %vm6868_vm0, %v8920_v20  ;;  %vm2013_vm4 = vmor %vm6848_vm3, %vm9282_vm11 }
 0x416   : > { %9281 = vst [vmem:[#allocation34_spill] sm:$0xff] %v9280_v31  ;;  %vm2014_vm12 = vmor %vm6816_vm13, %vm9283_vm6  ;;  %v9284_v31 = vmov 0 }
 0x417   : > { %vm6885_vm7 = vmpackc.low %vm2014_vm12, %vm2013_vm4  ;;  %vm9290_vm4 = vcmp.lt.f32.partialorder %v8878_v44, 0.09  ;;  %v4277_v44 = vpop.permute.xlu0 %4276  ;;  %v4287_v62 = vpop.permute.xlu1 %4286 }
 0x418   : > { %v9285_v31 = vsel %vm6885_vm7, 4294967295, %v9284_v31  ;;  %3791 = vmatprep.subr.msk.bf16.mxu1 %vm6885_vm7, %v8920_v20  ;;  %vm9286_vm3 = vmor %vm9278_vm1, %vm6750_vm8  ;;  %vm9293_vm1 = vcmp.lt.f32.partialorder %v8877_v34, 0.09  ;;  %v4288_v11 = vunpack.i.l.bf16 %v4287_v62 }
 0x419   : > { %vm9287_vm13 = vmor %vm6839_vm5, %vm6743_vm2  ;;  %vm2382_vm5 = vcmp.eq.f32.partialorder %v5672_v56, %v4254_v21  ;;  %v4289_v21 = vunpack.i.h.bf16 %v4287_v62  ;;  %v9348_v62 = vmov 0 }
 0x41a   : > { %vm6902_vm0 = vmpackc.low %vm9287_vm13, %vm9286_vm3  ;;  %vm2381_vm3 = vcmp.eq.f32.partialorder %v5660_v0, %v4253_v8  ;;  %vm9299_vm13 = vcmp.lt.f32.partialorder %v8921_v48, 0.09  ;;  %v4279_v8 = vunpack.i.h.bf16 %v4277_v44 }
 0x41b   : > { %v9289_v63 = vsel %vm6902_vm0, 4294967295, %v9288_v63  ;;  %vm6908_vm12 = vmand %vm9290_vm4, %vm1782_vm15  ;;  %3788 = vmatpush3.bf16.xpose.msk.msra.mxu0 %vm6902_vm0, %v8920_v20  ;;  %vm1979_vm15 = vcmp.eq.f32.partialorder %v5812_v6, %v4268_v57  ;;  %vm2182_vm0 = vcmp.eq.f32.partialorder %v5672_v56, %v4264_v26  ;;  %v4263_v57 = vunpack.i.l.bf16 %v4262_v4  ;;  %v4282_v59 = vpop.permute.xlu0 %4281 }
 0x41c   : > { %vm6917_vm7 = vmand %vm9293_vm1, %vm1781_vm14  ;;  %3772 = vmatmul.mubr.bf16.vlgmr.msra.gmra.mxu1 %v6029_v32  ;;  %v9305_v56 = vmov 0  ;;  %v9315_v26 = vmov 0  ;;  %v9358_v4 = vmov 0 }
 0x41d   : > { %vm6935_vm1 = vmand %vm9290_vm4, %vm2382_vm5  ;;  %3807 = vmatprep.mubr.bf16.mxu1 %v6029_v32  ;;  %vm2181_vm14 = vcmp.eq.f32.partialorder %v5660_v0, %v4263_v57  ;;  %v4274_v57 = vunpack.i.h.bf16 %v4272_v61  ;;  %v9325_v61 = vmov 0  ;;  %v4283_v0 = vunpack.i.l.bf16 %v4282_v59 }
 0x41e   : > { %vm2397_vm10 = vmand %vm9298_vm9, %vm2381_vm3  ;;  %vm1980_vm3 = vcmp.eq.f32.partialorder %v5831_v7, %v4269_v43  ;;  %v9319_v43 = vmov 0 }
 0x41f   : > { %vm6945_vm8 = vmand %vm9299_vm13, %vm1979_vm15  ;;  %vm9307_vm13 = vcmp.lt.f32.partialorder %v8877_v34, 0.09  ;;  %v4278_v34 = vunpack.i.l.bf16 %v4277_v44  ;;  %v4284_v44 = vunpack.i.h.bf16 %v4282_v59  ;;  %v9371_v59 = vmov 0 }
 0x420   : > { %vm9302_vm5 = vmmov %vm9290_vm4 }
 0x421   : > { %vm6951_vm4 = vmand %vm9302_vm5, %vm2182_vm0 }
 0x422   : > { %3790 = vmatmul.mubr.bf16.vlgmr.msra.gmra.mxu0 %v6029_v32  ;;  %vm2413_vm9 = vmor %vm2397_vm10, %vm9282_vm11  ;;  %vm9310_vm10 = vcmp.lt.f32.partialorder %v8929_v16, 0.09 }
 0x423   : > { %3825 = vmatprep.mubr.bf16.mxu0 %v6029_v32  ;;  %vm2414_vm15 = vmor %vm6935_vm1, %vm9283_vm6  ;;  %vm9318_vm1 = vnez %v8968_v46  ;;  %v9388_v46 = vmov 0 }
 0x424   : > { %vm6965_vm0 = vmpackc.low %vm2414_vm15, %vm2413_vm9 }
 0x425   : > { %v9306_v56 = vsel %vm6965_vm0, 4294967295, %v9305_v56  ;;  %vm6971_vm5 = vmand %vm9307_vm13, %vm2181_vm14  ;;  %3809 = vmatprep.subr.msk.bf16.mxu0 %vm6965_vm0, %v8920_v20  ;;  %vm9317_vm13 = vnez %v8925_v28 }
 0x426   : > { %vm6980_vm2 = vmand %vm9310_vm10, %vm1980_vm3 }
 0x427   : > { %vm2213_vm14 = vmor %vm6971_vm5, %vm9282_vm11 }
 0x428   : > { %vm9313_vm9 = vmor %vm6917_vm7, %vm9282_vm11  ;;  %vm1779_vm7 = vcmp.eq.f32.partialorder %v5812_v6, %v4278_v34  ;;  %vm9327_vm11 = vcmp.lt.f32.partialorder %v8929_v16, 0.09 }
 0x429   : > { %vm9314_vm3 = vmor %vm6908_vm12, %vm9283_vm6 }
 0x42a   : > { %vm7002_vm15 = vmpackc.low %vm9314_vm3, %vm9313_vm9  ;;  %vm1780_vm9 = vcmp.eq.f32.partialorder %v5831_v7, %v4279_v8  ;;  %v9338_v8 = vmov 0 }
 0x42b   : > { %v9316_v26 = vsel %vm7002_vm15, 4294967295, %v9315_v26  ;;  %3792 = vmatpush3.bf16.xpose.msk.msra.mxu1 %vm7002_vm15, %v8920_v20  ;;  %vm2011_vm10 = vmor %vm6945_vm8, %vm9317_vm13  ;;  %vm9332_vm15 = vcmp.lt.f32.partialorder %v8909_v5, 0.09 }
 0x42c   : > { %vm2012_vm12 = vmor %vm6980_vm2, %vm9318_vm1 }
 0x42d   : > { %vm7019_vm3 = vmpackc.low %vm2012_vm12, %vm2011_vm10  ;;  %vm9324_vm10 = vcmp.lt.f32.partialorder %v8921_v48, 0.09 }
 0x42e   : > { %v9320_v43 = vsel %vm7019_vm3, 4294967295, %v9319_v43  ;;  %3793 = vmatprep.subr.msk.bf16.mxu1 %vm7019_vm3, %v8920_v20  ;;  %vm9321_vm2 = vmor %vm6951_vm4, %vm9283_vm6  ;;  %vm2379_vm6 = vcmp.eq.f32.partialorder %v5812_v6, %v4273_v50  ;;  %vm2380_vm4 = vcmp.eq.f32.partialorder %v5831_v7, %v4274_v57 }
 0x42f   : > { %vm7036_vm8 = vmpackc.low %vm9321_vm2, %vm2213_vm14  ;;  %vm1978_vm14 = vcmp.eq.f32.partialorder %v5762_v18, %v4284_v44 }
 0x430   : > { %v9323_v49 = vsel %vm7036_vm8, 4294967295, %v9322_v49  ;;  %vm7042_vm12 = vmand %vm9324_vm10, %vm1779_vm7  ;;  %3810 = vmatpush3.bf16.xpose.msk.msra.mxu0 %vm7036_vm8, %v8920_v20  ;;  %vm9331_vm8 = vcmp.lt.f32.partialorder %v8929_v16, 0.09 }
 0x431   : > { %v9326_v61 = vsel %vm7042_vm12, 4294967295, %v9325_v61  ;;  %vm7051_vm5 = vmand %vm9327_vm11, %vm1780_vm9  ;;  %vm2179_vm11 = vcmp.eq.f32.partialorder %v5812_v6, %v4288_v11  ;;  %v4297_v6 = vpop.permute.xlu0 %4296 }
 0x432   : > { %vm1812_vm2 = vmor %vm7051_vm5, %vm9318_vm1  ;;  %v4298_v50 = vunpack.i.l.bf16 %v4297_v6 }
 0x433   : > { %vm9330_vm9 = vmmov %vm9324_vm10 }
 0x434   : > { %vm2395_vm10 = vmand %vm9330_vm9, %vm2379_vm6  ;;  %vm2180_vm6 = vcmp.eq.f32.partialorder %v5831_v7, %v4289_v21  ;;  %v4292_v7 = vpop.permute.xlu1 %4291 }
 0x435   : > { %vm2396_vm3 = vmand %vm9331_vm8, %vm2380_vm4  ;;  %vm1977_vm8 = vcmp.eq.f32.partialorder %v5751_v54, %v4283_v0  ;;  %v4307_v57 = vpop.permute.xlu0 %4306  ;;  %v4294_v44 = vunpack.i.h.bf16 %v4292_v7  ;;  %v4293_v11 = vunpack.i.l.bf16 %v4292_v7  ;;  %v9355_v0 = vmov 0 }
 0x436   : > { %vm7073_vm0 = vmand %vm9332_vm15, %vm1978_vm14  ;;  %vm9340_vm14 = vcmp.lt.f32.partialorder %v8929_v16, 0.09  ;;  %v4299_v16 = vunpack.i.h.bf16 %v4297_v6  ;;  %v4309_v21 = vunpack.i.h.bf16 %v4307_v57  ;;  %v4308_v6 = vunpack.i.l.bf16 %v4307_v57 }
 0x437   : > { %vm9335_vm7 = vmmov %vm9330_vm9  ;;  %v9381_v57 = vmov 0 }
 0x438   : > { %vm7079_vm12 = vmand %vm9335_vm7, %vm2179_vm11 }
 0x439   : > { %vm2411_vm9 = vmor %vm2395_vm10, %vm9317_vm13  ;;  %vm9343_vm10 = vcmp.lt.f32.partialorder %v8907_v13, 0.09 }
 0x43a   : > { %vm2412_vm4 = vmor %vm2396_vm3, %vm9318_vm1 }
 0x43b   : > { %vm7089_vm15 = vmpackc.low %vm2412_vm4, %vm2411_vm9  ;;  %vm9346_vm9 = vnez %v9326_v61  ;;  %v4302_v61 = vpop.permute.xlu1 %4301 }
 0x43c   : > { %v9339_v8 = vsel %vm7089_vm15, 4294967295, %v9338_v8  ;;  %vm7095_vm7 = vmand %vm9340_vm14, %vm2180_vm6  ;;  %3811 = vmatprep.subr.msk.bf16.mxu0 %vm7089_vm15, %v8920_v20  ;;  %vm9350_vm14 = vnez %v8940_v53  ;;  %vm9351_vm6 = vnez %v8943_v25  ;;  %v4304_v28 = vunpack.i.h.bf16 %v4302_v61 }
 0x43d   : > { %vm7104_vm11 = vmand %vm9343_vm10, %vm1977_vm8  ;;  %v4303_v34 = vunpack.i.l.bf16 %v4302_v61 }
 0x43e   : > { %vm2211_vm3 = vmor %vm7079_vm12, %vm9317_vm13 }
 0x43f   : > { %vm9347_vm8 = vmor %vm9346_vm9, %vm9317_vm13  ;;  %vm1778_vm9 = vcmp.eq.f32.partialorder %v5762_v18, %v4299_v16  ;;  %vm9360_vm13 = vcmp.lt.f32.partialorder %v8907_v13, 0.09 }
 0x440   : > { %vm7126_vm4 = vmpackc.low %vm1812_vm2, %vm9347_vm8  ;;  %vm1777_vm2 = vcmp.eq.f32.partialorder %v5751_v54, %v4298_v50 }
 0x441   : > { %v9349_v62 = vsel %vm7126_vm4, 4294967295, %v9348_v62  ;;  %3794 = vmatpush3.bf16.xpose.msk.msra.mxu1 %vm7126_vm4, %v8920_v20  ;;  %vm2009_vm10 = vmor %vm7104_vm11, %vm9350_vm14  ;;  %vm9365_vm4 = vcmp.lt.f32.partialorder %v9038_v38, 0.09 }
 0x442   : > { %vm2010_vm5 = vmor %vm7073_vm0, %vm9351_vm6 }
 0x443   : > { %vm7143_vm8 = vmpackc.low %vm2010_vm5, %vm2009_vm10  ;;  %vm9357_vm10 = vcmp.lt.f32.partialorder %v8909_v5, 0.09  ;;  %v9404_v5 = vmov 0 }
 0x444   : > { %v9353_v10 = vsel %vm7143_vm8, 4294967295, %v9352_v10  ;;  %3795 = vmatprep.subr.msk.bf16.mxu1 %vm7143_vm8, %v8920_v20  ;;  %vm9354_vm0 = vmor %vm7095_vm7, %vm9318_vm1  ;;  %vm2378_vm1 = vcmp.eq.f32.partialorder %v5762_v18, %v4294_v44  ;;  %vm2377_vm7 = vcmp.eq.f32.partialorder %v5751_v54, %v4293_v11 }
 0x445   : > { %vm7160_vm11 = vmpackc.low %vm9354_vm0, %vm2211_vm3  ;;  %vm1976_vm3 = vcmp.eq.f32.partialorder %v6137_v42, %v4309_v21 }
 0x446   : > { %v9356_v0 = vsel %vm7160_vm11, 4294967295, %v9355_v0  ;;  %vm7166_vm5 = vmand %vm9357_vm10, %vm1778_vm9  ;;  %3812 = vmatpush3.bf16.xpose.msk.msra.mxu0 %vm7160_vm11, %v8920_v20  ;;  %vm9364_vm11 = vcmp.lt.f32.partialorder %v8907_v13, 0.09 }
 0x447   : > { %v9359_v4 = vsel %vm7166_vm5, 4294967295, %v9358_v4  ;;  %vm7175_vm12 = vmand %vm9360_vm13, %vm1777_vm2  ;;  %vm2178_vm13 = vcmp.eq.f32.partialorder %v5762_v18, %v4304_v28  ;;  %v4317_v18 = vpop.permute.xlu0 %4316 }
 0x448   : > { %vm1809_vm0 = vmor %vm7175_vm12, %vm9350_vm14  ;;  %v4318_v50 = vunpack.i.l.bf16 %v4317_v18 }
 0x449   : > { %vm9363_vm2 = vmmov %vm9357_vm10 }
 0x44a   : > { %vm2394_vm10 = vmand %vm9363_vm2, %vm2378_vm1  ;;  %vm2177_vm1 = vcmp.eq.f32.partialorder %v5751_v54, %v4303_v34  ;;  %v4312_v54 = vpop.permute.xlu1 %4311  ;;  %v9391_v34 = vmov 0 }
 0x44b   : > { %vm2393_vm8 = vmand %vm9364_vm11, %vm2377_vm7  ;;  %vm1975_vm11 = vcmp.eq.f32.partialorder %v6145_v1, %v4308_v6  ;;  %v4327_v44 = vpop.permute.xlu0 %4326  ;;  %v4314_v61 = vunpack.i.h.bf16 %v4312_v54  ;;  %v4313_v21 = vunpack.i.l.bf16 %v4312_v54 }
 0x44c   : > { %vm7197_vm15 = vmand %vm9365_vm4, %vm1976_vm3  ;;  %vm9373_vm3 = vcmp.lt.f32.partialorder %v8907_v13, 0.09  ;;  %v4319_v13 = vunpack.i.h.bf16 %v4317_v18  ;;  %v4329_v28 = vunpack.i.h.bf16 %v4327_v44  ;;  %v4328_v48 = vunpack.i.l.bf16 %v4327_v44 }
 0x44d   : > { %vm9368_vm9 = vmmov %vm9363_vm2  ;;  %v9437_v18 = vmov 0 }
 0x44e   : > { %vm7203_vm5 = vmand %vm9368_vm9, %vm2178_vm13  ;;  %vm1776_vm12 = vcmp.eq.f32.partialorder %v6137_v42, %v4319_v13  ;;  %v4322_v11 = vpop.permute.xlu1 %4321  ;;  %v9414_v13 = vmov 0 }
 0x44f   : > { %vm2409_vm2 = vmor %vm2393_vm8, %vm9350_vm14  ;;  %vm9376_vm8 = vcmp.lt.f32.partialorder %v9041_v52, 0.09  ;;  %v4323_v53 = vunpack.i.l.bf16 %v4322_v11  ;;  %v4324_v6 = vunpack.i.h.bf16 %v4322_v11 }
 0x450   : > { %vm2410_vm7 = vmor %vm2394_vm10, %vm9351_vm6  ;;  %vm9384_vm10 = vnez %v9058_v9 }
 0x451   : > { %vm7213_vm4 = vmpackc.low %vm2410_vm7, %vm2409_vm2  ;;  %vm9379_vm2 = vnez %v9359_v4  ;;  %v9385_v4 = vmov 0 }
 0x452   : > { %v9372_v59 = vsel %vm7213_vm4, 4294967295, %v9371_v59  ;;  %vm7219_vm9 = vmand %vm9373_vm3, %vm2177_vm1  ;;  %3813 = vmatprep.subr.msk.bf16.mxu0 %vm7213_vm4, %v8920_v20  ;;  %vm9383_vm3 = vnez %v9055_v47 }
 0x453   : > { %vm7228_vm13 = vmand %vm9376_vm8, %vm1975_vm11 }
 0x454   : > { %vm2209_vm1 = vmor %vm7219_vm9, %vm9350_vm14  ;;  %vm9393_vm14 = vcmp.lt.f32.partialorder %v9041_v52, 0.09 }
 0x455   : > { %vm9380_vm11 = vmor %vm9379_vm2, %vm9351_vm6  ;;  %vm1775_vm2 = vcmp.eq.f32.partialorder %v6145_v1, %v4318_v50 }
 0x456   : > { %vm7250_vm7 = vmpackc.low %vm9380_vm11, %vm1809_vm0 }
 0x457   : > { %v9382_v57 = vsel %vm7250_vm7, 4294967295, %v9381_v57  ;;  %3796 = vmatpush3.bf16.xpose.msk.msra.mxu1 %vm7250_vm7, %v8920_v20  ;;  %vm2007_vm8 = vmor %vm7228_vm13, %vm9383_vm3  ;;  %vm9398_vm7 = vcmp.lt.f32.partialorder %v9070_v40, 0.09 }
 0x458   : > { %vm2008_vm0 = vmor %vm7197_vm15, %vm9384_vm10 }
 0x459   : > { %vm7267_vm11 = vmpackc.low %vm2008_vm0, %vm2007_vm8  ;;  %vm9390_vm8 = vcmp.lt.f32.partialorder %v9038_v38, 0.09 }
 0x45a   : > { %v9386_v4 = vsel %vm7267_vm11, 4294967295, %v9385_v4  ;;  %3797 = vmatprep.subr.msk.bf16.mxu1 %vm7267_vm11, %v8920_v20  ;;  %vm9387_vm15 = vmor %vm7203_vm5, %vm9351_vm6  ;;  %vm2376_vm6 = vcmp.eq.f32.partialorder %v6137_v42, %v4314_v61  ;;  %vm2375_vm5 = vcmp.eq.f32.partialorder %v6145_v1, %v4313_v21  ;;  %v9418_v21 = vmov 0 }
 0x45b   : > { %vm7284_vm13 = vmpackc.low %vm9387_vm15, %vm2209_vm1  ;;  %vm1974_vm1 = vcmp.eq.f32.partialorder %v6242_v30, %v4329_v28 }
 0x45c   : > { %v9389_v46 = vsel %vm7284_vm13, 4294967295, %v9388_v46  ;;  %vm7290_vm0 = vmand %vm9390_vm8, %vm1776_vm12  ;;  %3814 = vmatpush3.bf16.xpose.msk.msra.mxu0 %vm7284_vm13, %v8920_v20  ;;  %vm9397_vm13 = vcmp.lt.f32.partialorder %v9041_v52, 0.09 }
 0x45d   : > { %v9392_v34 = vsel %vm7290_vm0, 4294967295, %v9391_v34  ;;  %vm7299_vm9 = vmand %vm9393_vm14, %vm1775_vm2  ;;  %vm2175_vm14 = vcmp.eq.f32.partialorder %v6145_v1, %v4323_v53  ;;  %v4337_v1 = vpop.permute.xlu0 %4336  ;;  %v9424_v53 = vmov 0 }
 0x45e   : > { %vm1807_vm15 = vmor %vm7299_vm9, %vm9383_vm3  ;;  %v4338_v16 = vunpack.i.l.bf16 %v4337_v1 }
 0x45f   : > { %vm9396_vm2 = vmmov %vm9390_vm8 }
 0x460   : > { %vm2392_vm8 = vmand %vm9396_vm2, %vm2376_vm6  ;;  %vm2176_vm6 = vcmp.eq.f32.partialorder %v6137_v42, %v4324_v6  ;;  %v4332_v42 = vpop.permute.xlu1 %4331 }
 0x461   : > { %vm2391_vm11 = vmand %vm9397_vm13, %vm2375_vm5  ;;  %v4347_v50 = vpop.permute.xlu0 %4346  ;;  %v4334_v44 = vunpack.i.h.bf16 %v4332_v42  ;;  %v4333_v11 = vunpack.i.l.bf16 %v4332_v42  ;;  %v9447_v42 = vmov 0 }
 0x462   : > { %vm7321_vm4 = vmand %vm9398_vm7, %vm1974_vm1  ;;  %vm9406_vm1 = vcmp.lt.f32.partialorder %v9038_v38, 0.09  ;;  %v4339_v38 = vunpack.i.h.bf16 %v4337_v1  ;;  %v4349_v28 = vunpack.i.h.bf16 %v4347_v50  ;;  %v4348_v6 = vunpack.i.l.bf16 %v4347_v50 }
 0x463   : > { %vm9401_vm12 = vmmov %vm9397_vm13  ;;  %vm1973_vm13 = vcmp.eq.f32.partialorder %v6251_v27, %v4328_v48 }
 0x464   : > { %vm7327_vm0 = vmand %vm9401_vm12, %vm2175_vm14  ;;  %vm1774_vm9 = vcmp.eq.f32.partialorder %v6242_v30, %v4339_v38  ;;  %v4342_v61 = vpop.permute.xlu1 %4341 }
 0x465   : > { %vm2407_vm2 = vmor %vm2391_vm11, %vm9383_vm3  ;;  %vm9409_vm11 = vcmp.lt.f32.partialorder %v9078_v23, 0.09  ;;  %v4344_v47 = vunpack.i.h.bf16 %v4342_v61  ;;  %v4343_v25 = vunpack.i.l.bf16 %v4342_v61 }
 0x466   : > { %vm2408_vm5 = vmor %vm2392_vm8, %vm9384_vm10 }
 0x467   : > { %vm7337_vm7 = vmpackc.low %vm2408_vm5, %vm2407_vm2  ;;  %vm9412_vm2 = vnez %v9392_v34  ;;  %v9421_v34 = vmov 0 }
 0x468   : > { %v9405_v5 = vsel %vm7337_vm7, 4294967295, %v9404_v5  ;;  %vm7343_vm12 = vmand %vm9406_vm1, %vm2176_vm6  ;;  %3815 = vmatprep.subr.msk.bf16.mxu0 %vm7337_vm7, %v8920_v20  ;;  %vm9416_vm1 = vnez %v9088_v60  ;;  %vm9417_vm6 = vnez %v9100_v41  ;;  %v9494_v41 = vmov 0 }
 0x469   : > { %vm7352_vm14 = vmand %vm9409_vm11, %vm1973_vm13 }
 0x46a   : > { %vm2207_vm8 = vmor %vm7327_vm0, %vm9383_vm3  ;;  %vm9426_vm3 = vcmp.lt.f32.partialorder %v9078_v23, 0.09 }
 0x46b   : > { %vm9413_vm13 = vmor %vm9412_vm2, %vm9384_vm10  ;;  %vm1773_vm2 = vcmp.eq.f32.partialorder %v6251_v27, %v4338_v16 }
 0x46c   : > { %vm7374_vm5 = vmpackc.low %vm9413_vm13, %vm1807_vm15 }
 0x46d   : > { %v9415_v13 = vsel %vm7374_vm5, 4294967295, %v9414_v13  ;;  %3798 = vmatpush3.bf16.xpose.msk.msra.mxu1 %vm7374_vm5, %v8920_v20  ;;  %vm2005_vm11 = vmor %vm7352_vm14, %vm9416_vm1  ;;  %vm9431_vm5 = vcmp.lt.f32.partialorder %v9127_v24, 0.09 }
 0x46e   : > { %vm2006_vm15 = vmor %vm7321_vm4, %vm9417_vm6 }
 0x46f   : > { %vm7391_vm13 = vmpackc.low %vm2006_vm15, %vm2005_vm11  ;;  %vm9423_vm11 = vcmp.lt.f32.partialorder %v9070_v40, 0.09  ;;  %v4352_v40 = vpop.permute.xlu1 %4351 }
 0x470   : > { %v9419_v21 = vsel %vm7391_vm13, 4294967295, %v9418_v21  ;;  %3799 = vmatprep.subr.msk.bf16.mxu1 %vm7391_vm13, %v8920_v20  ;;  %vm9420_vm4 = vmor %vm7343_vm12, %vm9384_vm10  ;;  %vm2374_vm10 = vcmp.eq.f32.partialorder %v6242_v30, %v4334_v44  ;;  %vm2373_vm12 = vcmp.eq.f32.partialorder %v6251_v27, %v4333_v11  ;;  %v4354_v16 = vunpack.i.h.bf16 %v4352_v40 }
 0x471   : > { %vm7408_vm14 = vmpackc.low %vm9420_vm4, %vm2207_vm8  ;;  %vm1972_vm8 = vcmp.eq.f32.partialorder %v6400_v37, %v4349_v28  ;;  %v4353_v50 = vunpack.i.l.bf16 %v4352_v40  ;;  %v9451_v44 = vmov 0  ;;  %v9454_v11 = vmov 0 }
 0x472   : > { %v9422_v34 = vsel %vm7408_vm14, 4294967295, %v9421_v34  ;;  %vm7414_vm15 = vmand %vm9423_vm11, %vm1774_vm9  ;;  %3816 = vmatpush3.bf16.xpose.msk.msra.mxu0 %vm7408_vm14, %v8920_v20  ;;  %vm9430_vm14 = vcmp.lt.f32.partialorder %v9078_v23, 0.09 }
 0x473   : > { %v9425_v53 = vsel %vm7414_vm15, 4294967295, %v9424_v53  ;;  %vm7423_vm0 = vmand %vm9426_vm3, %vm1773_vm2  ;;  %vm2174_vm3 = vcmp.eq.f32.partialorder %v6242_v30, %v4344_v47  ;;  %v4357_v30 = vpop.permute.xlu0 %4356  ;;  %v4362_v38 = vpop.permute.xlu1 %4361 }
 0x474   : > { %vm1805_vm4 = vmor %vm7423_vm0, %vm9416_vm1  ;;  %v4358_v52 = vunpack.i.l.bf16 %v4357_v30  ;;  %v4364_v28 = vunpack.i.h.bf16 %v4362_v38  ;;  %v4363_v60 = vunpack.i.l.bf16 %v4362_v38  ;;  %v9484_v38 = vmov 0 }
 0x475   : > { %vm9429_vm2 = vmmov %vm9423_vm11 }
 0x476   : > { %vm2390_vm11 = vmand %vm9429_vm2, %vm2374_vm10  ;;  %vm2173_vm10 = vcmp.eq.f32.partialorder %v6251_v27, %v4343_v25  ;;  %v9480_v27 = vmov 0  ;;  %v9593_v25 = vld [vmem:[#allocation55_spill] sm:$0xff] }
 0x477   : > { %vm2389_vm13 = vmand %vm9430_vm14, %vm2373_vm12  ;;  %vm1971_vm14 = vcmp.eq.f32.partialorder %v6407_v15, %v4348_v6  ;;  %v4367_v54 = vpop.permute.xlu0 %4366  ;;  %v4372_v48 = vpop.permute.xlu1 %4371  ;;  %v9597_v6 = vld [vmem:[#allocation57_spill] sm:$0xff] }
 0x478   : > { %vm7445_vm7 = vmand %vm9431_vm5, %vm1972_vm8  ;;  %vm9439_vm8 = vcmp.lt.f32.partialorder %v9078_v23, 0.09  ;;  %v4359_v23 = vunpack.i.h.bf16 %v4357_v30  ;;  %v4369_v61 = vunpack.i.h.bf16 %v4367_v54  ;;  %v4368_v9 = vunpack.i.l.bf16 %v4367_v54 }
 0x479   : > { %vm9434_vm9 = vmmov %vm9429_vm2  ;;  %v4373_v54 = vunpack.i.l.bf16 %v4372_v48  ;;  %v9526_v30 = vmov 0 }
 0x47a   : > { %vm7451_vm15 = vmand %vm9434_vm9, %vm2174_vm3  ;;  %vm1772_vm0 = vcmp.eq.f32.partialorder %v6400_v37, %v4359_v23  ;;  %v4374_v23 = vunpack.i.h.bf16 %v4372_v48 }
 0x47b   : > { %vm2405_vm2 = vmor %vm2389_vm13, %vm9416_vm1  ;;  %vm9442_vm13 = vcmp.lt.f32.partialorder %v9129_v55, 0.09  ;;  %v4377_v47 = vpop.permute.xlu0 %4376  ;;  %v4382_v1 = vpop.permute.xlu1 %4381 }
 0x47c   : > { %vm2406_vm12 = vmor %vm2390_vm11, %vm9417_vm6  ;;  %v4378_v40 = vunpack.i.l.bf16 %v4377_v47 }
 0x47d   : > { %vm7461_vm5 = vmpackc.low %vm2406_vm12, %vm2405_vm2  ;;  %vm9445_vm2 = vnez %v9425_v53  ;;  %v9457_v53 = vmov 0 }
 0x47e   : > { %v9438_v18 = vsel %vm7461_vm5, 4294967295, %v9437_v18  ;;  %vm7467_vm9 = vmand %vm9439_vm8, %vm2173_vm10  ;;  %3817 = vmatprep.subr.msk.bf16.mxu0 %vm7461_vm5, %v8920_v20  ;;  %vm9449_vm8 = vnez %v9142_v51  ;;  %vm9463_vm5 = vcmp.lt.f32.partialorder %v9167_v39, 0.09  ;;  %v9503_v51 = vmov 0 }
 0x47f   : > { %vm7476_vm3 = vmand %vm9442_vm13, %vm1971_vm14  ;;  %v4387_v7 = vpop.permute.xlu0 %4386 }
 0x480   : > { %vm2205_vm10 = vmor %vm7467_vm9, %vm9416_vm1  ;;  %vm9459_vm1 = vcmp.lt.f32.partialorder %v9129_v55, 0.09 }
 0x481   : > { %vm9446_vm14 = vmor %vm9445_vm2, %vm9417_vm6  ;;  %vm9450_vm2 = vnez %v9139_v35 }
 0x482   : > { %vm7498_vm12 = vmpackc.low %vm9446_vm14, %vm1805_vm4  ;;  %vm1771_vm14 = vcmp.eq.f32.partialorder %v6407_v15, %v4358_v52 }
 0x483   : > { %v9448_v42 = vsel %vm7498_vm12, 4294967295, %v9447_v42  ;;  %3800 = vmatpush3.bf16.xpose.msk.msra.mxu1 %vm7498_vm12, %v8920_v20  ;;  %vm2003_vm13 = vmor %vm7476_vm3, %vm9449_vm8  ;;  %v4397_v52 = vpop.permute.xlu0 %4396 }
 0x484   : > { %vm2004_vm4 = vmor %vm7445_vm7, %vm9450_vm2 }
 0x485   : > { %vm7515_vm11 = vmpackc.low %vm2004_vm4, %vm2003_vm13  ;;  %vm9456_vm13 = vcmp.lt.f32.partialorder %v9127_v24, 0.09  ;;  %v9473_v24 = vmov 0 }
 0x486   : > { %v9452_v44 = vsel %vm7515_vm11, 4294967295, %v9451_v44  ;;  %3801 = vmatprep.subr.msk.bf16.mxu1 %vm7515_vm11, %v8920_v20  ;;  %vm9453_vm7 = vmor %vm7451_vm15, %vm9417_vm6  ;;  %vm2372_vm6 = vcmp.eq.f32.partialorder %v6400_v37, %v4354_v16  ;;  %vm2371_vm15 = vcmp.eq.f32.partialorder %v6407_v15, %v4353_v50  ;;  %vm9462_vm11 = vcmp.lt.f32.partialorder %v9129_v55, 0.09  ;;  %v9475_v55 = vld [vmem:[#allocation14_spill] sm:$0xff] }
 0x487   : > { %vm7532_vm3 = vmpackc.low %vm9453_vm7, %vm2205_vm10  ;;  %vm1970_vm10 = vcmp.eq.f32.partialorder %v6536_v45, %v4369_v61  ;;  %v4384_v16 = vunpack.i.h.bf16 %v4382_v1  ;;  %v4388_v50 = vunpack.i.l.bf16 %v4387_v7  ;;  %v4399_v61 = vunpack.i.h.bf16 %v4397_v52 }
 0x488   : > { %v9455_v11 = vsel %vm7532_vm3, 4294967295, %v9454_v11  ;;  %vm7538_vm4 = vmand %vm9456_vm13, %vm1772_vm0  ;;  %3818 = vmatpush3.bf16.xpose.msk.msra.mxu0 %vm7532_vm3, %v8920_v20  ;;  %vm2172_vm0 = vcmp.eq.f32.partialorder %v6400_v37, %v4364_v28  ;;  %vm2171_vm3 = vcmp.eq.f32.partialorder %v6407_v15, %v4363_v60  ;;  %v4379_v15 = vunpack.i.h.bf16 %v4377_v47  ;;  %v4392_v37 = vpop.permute.xlu1 %4391 }
 0x489   : > { %v9458_v53 = vsel %vm7538_vm4, 4294967295, %v9457_v53  ;;  %vm7547_vm9 = vmand %vm9459_vm1, %vm1771_vm14  ;;  %v4389_v28 = vunpack.i.h.bf16 %v4387_v7  ;;  %v4383_v60 = vunpack.i.l.bf16 %v4382_v1  ;;  %v4398_v47 = vunpack.i.l.bf16 %v4397_v52 }
 0x48a   : > { %vm1803_vm14 = vmor %vm7547_vm9, %vm9449_vm8  ;;  %vm1769_vm9 = vcmp.eq.f32.partialorder %v6545_v29, %v4378_v40  ;;  %v4393_v48 = vunpack.i.l.bf16 %v4392_v37  ;;  %v4394_v7 = vunpack.i.h.bf16 %v4392_v37  ;;  %v9530_v1 = vmov 0  ;;  %v9589_v37 = vld [vmem:[#allocation53_spill] sm:$0xff] }
 0x48b   : > { %vm2388_vm1 = vmand %vm9456_vm13, %vm2372_vm6 }
 0x48c   : > { %vm2387_vm12 = vmand %vm9462_vm11, %vm2371_vm15  ;;  %vm9472_vm15 = vnez %v9139_v35  ;;  %v9501_v35 = vmov 0 }
 0x48d   : > { %vm7570_vm2 = vmand %vm9463_vm5, %vm1970_vm10 }
 0x48e   : > { %vm9466_vm7 = vmmov %vm9456_vm13 }
 0x48f   : > { %vm7576_vm4 = vmand %vm9466_vm7, %vm2172_vm0 }
 0x490   : > { %vm9469_vm6 = vmmov %vm9462_vm11  ;;  %vm1969_vm11 = vcmp.eq.f32.partialorder %v6545_v29, %v4368_v9  ;;  %v9498_v9 = vmov 0 }
 0x491   : > { %vm7582_vm13 = vmand %vm9469_vm6, %vm2171_vm3  ;;  %vm9476_vm3 = vcmp.lt.f32.partialorder %v9475_v55, 0.09  ;;  %vm1770_vm6 = vcmp.eq.f32.partialorder %v6536_v45, %v4379_v15  ;;  %v9599_v15 = vld [vmem:[#allocation56_spill] sm:$0xff] }
 0x492   : > { %vm2403_vm5 = vmor %vm2387_vm12, %vm9449_vm8  ;;  %vm9488_vm12 = vnez %v9196_v17  ;;  %v9564_v17 = vld [vmem:[#allocation65_spill] sm:$0xff] }
 0x493   : > { %vm2404_vm10 = vmor %vm2388_vm1, %vm9472_vm15 }
 0x494   : > { %vm7591_vm0 = vmpackc.low %vm2404_vm10, %vm2403_vm5  ;;  %vm9482_vm10 = vnez %v9458_v53  ;;  %v9489_v53 = vmov 0 }
 0x495   : > { %v9474_v24 = vsel %vm7591_vm0, 4294967295, %v9473_v24  ;;  %vm7597_vm7 = vmand %vm9476_vm3, %vm1969_vm11  ;;  %3819 = vmatprep.subr.msk.bf16.mxu0 %vm7591_vm0, %v8920_v20  ;;  %vm9479_vm11 = vcmp.lt.f32.partialorder %v9167_v39, 0.09 }
 0x496   : > { %vm7615_vm5 = vmand %vm9479_vm11, %vm1770_vm6  ;;  %vm9487_vm6 = vnez %v9184_v3 }
 0x497   : > { %v9481_v27 = vsel %vm7615_vm5, 4294967295, %v9480_v27  ;;  %vm9483_vm3 = vmor %vm9482_vm10, %vm9472_vm15  ;;  %vm2370_vm10 = vcmp.eq.f32.partialorder %v6536_v45, %v4374_v23 }
 0x498   : > { %vm7629_vm1 = vmpackc.low %vm9483_vm3, %vm1803_vm14 }
 0x499   : > { %v9485_v38 = vsel %vm7629_vm1, 4294967295, %v9484_v38  ;;  %3802 = vmatpush3.bf16.xpose.msk.msra.mxu1 %vm7629_vm1, %v8920_v20  ;;  %vm2001_vm11 = vmor %vm7597_vm7, %vm9487_vm6  ;;  %vm2369_vm7 = vcmp.eq.f32.partialorder %v6545_v29, %v4373_v54  ;;  %vm9497_vm1 = vcmp.lt.f32.partialorder %v9475_v55, 0.09  ;;  %v9535_v54 = vmov 0 }
 0x49a   : > { %9486 = vst [vmem:[#allocation27_spill] sm:$0xff] %v9485_v38  ;;  %vm2002_vm14 = vmor %vm7570_vm2, %vm9488_vm12 }
 0x49b   : > { %vm7646_vm3 = vmpackc.low %vm2002_vm14, %vm2001_vm11 }
 0x49c   : > { %v9490_v53 = vsel %vm7646_vm3, 4294967295, %v9489_v53  ;;  %3803 = vmatprep.subr.msk.bf16.mxu1 %vm7646_vm3, %v8920_v20  ;;  %vm9492_vm2 = vmor %vm7582_vm13, %vm9449_vm8  ;;  %vm2170_vm8 = vcmp.eq.f32.partialorder %v6536_v45, %v4384_v16  ;;  %vm9500_vm13 = vcmp.lt.f32.partialorder %v9167_v39, 0.09  ;;  %v9506_v45 = vmov 0 }
 0x49d   : > { %9491 = vst [vmem:[#allocation26_spill] sm:$0xff] %v9490_v53  ;;  %vm9493_vm11 = vmor %vm7576_vm4, %vm9472_vm15  ;;  %vm1967_vm15 = vcmp.eq.f32.partialorder %v6718_v14, %v4388_v50  ;;  %v9515_v39 = vmov 0  ;;  %v9541_v16 = vmov 0  ;;  %v9571_v50 = vld [vmem:[#allocation64_spill] sm:$0xff] }
 0x49e   : > { %vm7664_vm14 = vmpackc.low %vm9493_vm11, %vm9492_vm2  ;;  %vm1768_vm2 = vcmp.eq.f32.partialorder %v6711_v22, %v4399_v61  ;;  %vm1968_vm11 = vcmp.eq.f32.partialorder %v6711_v22, %v4389_v28  ;;  %v9573_v61 = vld [vmem:[#allocation67_spill] sm:$0xff] }
 0x49f   : > { %v9495_v41 = vsel %vm7664_vm14, 4294967295, %v9494_v41  ;;  %vm7670_vm0 = vmand %vm9497_vm1, %vm1769_vm9  ;;  %3820 = vmatpush3.bf16.xpose.msk.msra.mxu0 %vm7664_vm14, %v8920_v20  ;;  %vm2169_vm14 = vcmp.eq.f32.partialorder %v6545_v29, %v4383_v60  ;;  %v9575_v28 = vld [vmem:[#allocation47_spill] sm:$0xff]  ;;  %v9577_v60 = vld [vmem:[#allocation69_spill] sm:$0xff] }
 0x4a0   : > { %9496 = vst [vmem:[#allocation37_spill] sm:$0xff] %v9495_v41  ;;  %v9499_v9 = vsel %vm7670_vm0, 4294967295, %v9498_v9  ;;  %vm7680_vm4 = vmand %vm9500_vm13, %vm2370_vm10  ;;  %vm9511_vm10 = vcmp.lt.f32.partialorder %v9226_v33, 0.09  ;;  %v9591_v29 = vld [vmem:[#allocation52_spill] sm:$0xff] }
 0x4a1   : > { %v9502_v35 = vsel %vm7680_vm4, 4294967295, %v9501_v35  ;;  %vm7688_vm9 = vmand %vm9497_vm1, %vm2369_vm7  ;;  %vm1767_vm1 = vcmp.eq.f32.partialorder %v6718_v14, %v4398_v47  ;;  %vm9508_vm4 = vcmp.lt.f32.partialorder %v9228_v19, 0.09  ;;  %v9579_v47 = vld [vmem:[#allocation46_spill] sm:$0xff] }
 0x4a2   : > { %v9504_v51 = vsel %vm7688_vm9, 4294967295, %v9503_v51  ;;  %vm9505_vm3 = vmmov %vm9500_vm13  ;;  %vm9517_vm13 = vcmp.lt.f32.partialorder %v9475_v55, 0.09  ;;  %v4402_v55 = vpop.permute.xlu1 %4401 }
 0x4a3   : > { %vm7704_vm7 = vmand %vm9505_vm3, %vm2170_vm8  ;;  %v4404_v40 = vunpack.i.h.bf16 %v4402_v55  ;;  %v4403_v23 = vunpack.i.l.bf16 %v4402_v55  ;;  %v9605_v55 = vld [vmem:[#allocation59_spill] sm:$0xff] }
 0x4a4   : > { %v9507_v45 = vsel %vm7704_vm7, 4294967295, %v9506_v45  ;;  %vm7711_vm9 = vmand %vm9508_vm4, %vm1967_vm15  ;;  %vm2367_vm7 = vcmp.eq.f32.partialorder %v6718_v14, %v4393_v48  ;;  %v9601_v48 = vld [vmem:[#allocation29_spill] sm:$0xff] }
 0x4a5   : > { %vm7717_vm5 = vmand %vm9511_vm10, %vm1768_vm2 }
 0x4a6   : > { %vm9514_vm3 = vmmov %vm9511_vm10  ;;  %vm9523_vm10 = vnez %v9241_v2  ;;  %v9569_v2 = vld [vmem:[#allocation68_spill] sm:$0xff] }
 0x4a7   : > { %vm7723_vm8 = vmand %vm9514_vm3, %vm1968_vm11  ;;  %vm9522_vm11 = vnez %v9238_v12 }
 0x4a8   : > { %v9516_v39 = vsel %vm7723_vm8, 4294967295, %v9515_v39  ;;  %vm7729_vm0 = vmand %vm9517_vm13, %vm2169_vm14  ;;  %vm2368_vm8 = vcmp.eq.f32.partialorder %v6711_v22, %v4394_v7  ;;  %v9603_v7 = vld [vmem:[#allocation28_spill] sm:$0xff] }
 0x4a9   : > { %vm7735_vm15 = vmand %vm9508_vm4, %vm1767_vm1  ;;  %vm9524_vm1 = vnez %v9504_v51  ;;  %vm9525_vm4 = vnez %v9502_v35  ;;  %v9583_v35 = vld [vmem:[#allocation48_spill] sm:$0xff]  ;;  %v9585_v51 = vld [vmem:[#allocation50_spill] sm:$0xff] }
 0x4aa   : > { %vm1800_vm14 = vmor %vm7717_vm5, %vm9522_vm11 }
 0x4ab   : > { %vm1799_vm13 = vmor %vm7735_vm15, %vm9523_vm10  ;;  %vm9537_vm15 = vnez %v9499_v9  ;;  %v9581_v9 = vld [vmem:[#allocation49_spill] sm:$0xff] }
 0x4ac   : > { %vm2401_vm3 = vmor %vm9524_vm1, %vm9487_vm6  ;;  %vm9529_vm1 = vcmp.lt.f32.partialorder %v9228_v19, 0.09 }
 0x4ad   : > { %vm2402_vm2 = vmor %vm9525_vm4, %vm9488_vm12 }
 0x4ae   : > { %vm7760_vm5 = vmpackc.low %vm2402_vm2, %vm2401_vm3  ;;  %vm9534_vm3 = vcmp.lt.f32.partialorder %v9226_v33, 0.09 }
 0x4af   : > { %v9527_v30 = vsel %vm7760_vm5, 4294967295, %v9526_v30  ;;  %3821 = vmatprep.subr.msk.bf16.mxu0 %vm7760_vm5, %v8920_v20  ;;  %vm7774_vm4 = vmand %vm9529_vm1, %vm2367_vm7  ;;  %vm9539_vm7 = vnez %v9481_v27  ;;  %v9546_v27 = vmov 0 }
 0x4b0   : > { %9528 = vst [vmem:[#allocation36_spill] sm:$0xff] %v9527_v30  ;;  %v9531_v1 = vsel %vm7774_vm4, 4294967295, %v9530_v1  ;;  %vm7778_vm2 = vmpackc.low %vm1800_vm14, %vm1799_vm13  ;;  %vm9544_vm13 = vnez %v9238_v12  ;;  %v9568_v12 = vld [vmem:[#allocation66_spill] sm:$0xff] }
 0x4b1   : > { %vm7784_vm11 = vmand %vm9534_vm3, %vm2368_vm8 }
 0x4b2   : > { %v9536_v54 = vsel %vm7784_vm11, 4294967295, %v9535_v54  ;;  %vm9538_vm5 = vmor %vm9537_vm15, %vm9487_vm6  ;;  %vm9545_vm15 = vnez %v9516_v39  ;;  %vm9555_vm11 = vcmp.lt.f32.partialorder %v9228_v19, 0.09  ;;  %v9559_v19 = vld [vmem:[#allocation62_spill] sm:$0xff] }
 0x4b3   : > { %vm9540_vm1 = vmor %vm9539_vm7, %vm9488_vm12  ;;  %vm2168_vm7 = vcmp.eq.f32.partialorder %v6711_v22, %v4404_v40  ;;  %v9595_v39 = vld [vmem:[#allocation54_spill] sm:$0xff] }
 0x4b4   : > { %vm7798_vm14 = vmpackc.low %vm9540_vm1, %vm9538_vm5  ;;  %vm2167_vm1 = vcmp.eq.f32.partialorder %v6718_v14, %v4403_v23  ;;  %v9607_v40 = vld [vmem:[#allocation58_spill] sm:$0xff] }
 0x4b5   : > { %v9542_v16 = vsel %vm7798_vm14, 4294967295, %v9541_v16  ;;  %3804 = vmatpush3.bf16.xpose.msk.msra.mxu1 %vm7798_vm14, %v8920_v20  ;;  %vm1999_vm8 = vmor %vm7711_vm9, %vm9523_vm10  ;;  %vm9550_vm14 = vnez %v9507_v45  ;;  %v9587_v45 = vld [vmem:[#allocation51_spill] sm:$0xff]  ;;  %v9611_v23 = vld [vmem:[#allocation30_spill] sm:$0xff] }
 0x4b6   : > { %9543 = vst [vmem:[#allocation39_spill] sm:$0xff] %v9542_v16  ;;  %vm2000_vm3 = vmor %vm9545_vm15, %vm9544_vm13 }
 0x4b7   : > { %vm7814_vm5 = vmpackc.low %vm2000_vm3, %vm1999_vm8  ;;  %vm9554_vm3 = vcmp.lt.f32.partialorder %v9226_v33, 0.09  ;;  %v9566_v33 = vld [vmem:[#allocation63_spill] sm:$0xff] }
 0x4b8   : > { %v9547_v27 = vsel %vm7814_vm5, 4294967295, %v9546_v27  ;;  %3805 = vmatprep.subr.msk.bf16.mxu1 %vm7814_vm5, %v8920_v20  ;;  %vm9549_vm9 = vmor %vm7729_vm0, %vm9487_vm6 }
 0x4b9   : > { %9548 = vst [vmem:[#allocation38_spill] sm:$0xff] %v9547_v27  ;;  %vm9551_vm15 = vmor %vm9550_vm14, %vm9488_vm12  ;;  %vm9558_vm14 = vnez %v9531_v1  ;;  %v9609_v1 = vld [vmem:[#allocation31_spill] sm:$0xff] }
 0x4ba   : > { %vm7832_vm8 = vmpackc.low %vm9551_vm15, %vm9549_vm9  ;;  %vm9570_vm9 = vnez %v9569_v2  ;;  %vm9572_vm15 = vnez %v9571_v50 }
 0x4bb   : > { %3822 = vmatpush3.bf16.xpose.msk.msra.mxu0 %vm7832_vm8, %v8920_v20  ;;  %vm2184_vm5 = vmand %vm9554_vm3, %vm2168_vm7  ;;  %vm9574_vm3 = vnez %v9573_v61 }
 0x4bc   : > { %vm2183_vm4 = vmand %vm9555_vm11, %vm2167_vm1  ;;  %vm9560_vm11 = vnez %v9559_v19 }
 0x4bd   : > { %vm2199_vm0 = vmor %vm2183_vm4, %vm9523_vm10  ;;  %3806 = vmatpush3.bf16.xpose.msk.msra.mxu1 %vm7778_vm2, %v8920_v20  ;;  %vm9561_vm4 = vnez %v9536_v54  ;;  %v9613_v54 = vld [vmem:[#allocation33_spill] sm:$0xff] }
 0x4be   : > { %vm2200_vm12 = vmor %vm2184_vm5, %vm9544_vm13  ;;  %3827 = vmatprep.subr.msk.bf16.mxu1 %vm9560_vm11, %v8920_v20 }
 0x4bf   : > { %vm7847_vm6 = vmpackc.low %vm2200_vm12, %vm2199_vm0  ;;  %vm9576_vm0 = vnez %v9575_v28  ;;  %vm9578_vm12 = vnez %v9577_v60 }
 0x4c0   : > { %vm2399_vm7 = vmor %vm9558_vm14, %vm9523_vm10  ;;  %vm9565_vm10 = vnez %v9564_v17  ;;  %vm9580_vm14 = vnez %v9579_v47 }
 0x4c1   : > { %vm2400_vm5 = vmor %vm9561_vm4, %vm9544_vm13  ;;  %vm9567_vm13 = vnez %v9566_v33  ;;  %vm9584_vm4 = vnez %v9583_v35 }
 0x4c2   : > { %vm7865_vm1 = vmpackc.low %vm2400_vm5, %vm2399_vm7  ;;  %vm9582_vm7 = vnez %v9581_v9  ;;  %vm9586_vm5 = vnez %v9585_v51 }
 0x4c3   : > { %3823 = vmatprep.subr.msk.bf16.mxu0 %vm7865_vm1, %v8920_v20 }
 0x4c4   : > { %3824 = vmatpush3.bf16.xpose.msk.msra.mxu0 %vm7847_vm6, %v8920_v20  ;;  %3808 = vmatmul.mubr.bf16.vlgmr.msra.gmra.mxu1 %v6029_v32 }
 0x4c5   : > { %3845 = vmatprep.subr.msk.bf16.mxu0 %vm9565_vm10, %v8920_v20  ;;  %3828 = vmatpush3.bf16.xpose.msk.msra.mxu1 %vm9567_vm13, %v8920_v20 }
 0x4c6   : > { %3843 = vmatprep.mubr.bf16.mxu1 %v9568_v12  ;;  %3829 = vmatprep.subr.msk.bf16.mxu1 %vm9570_vm9, %v8920_v20 }
 0x4cb   : > { %3826 = vmatmul.mubr.bf16.vlgmr.msra.gmra.mxu0 %v6029_v32 }
 0x4cc   : > { %3846 = vmatpush3.bf16.xpose.msk.msra.mxu0 %vm9572_vm15, %v8920_v20  ;;  %3861 = vmatprep.mubr.bf16.mxu0 %v9568_v12 }
 0x4cd   : > { %3847 = vmatprep.subr.msk.bf16.mxu0 %vm9574_vm3, %v8920_v20  ;;  %3830 = vmatpush3.bf16.xpose.msk.msra.mxu1 %vm9576_vm0, %v8920_v20  ;;  %vm9588_vm0 = vnez %v9587_v45 }
 0x4ce   : > { %3831 = vmatprep.subr.msk.bf16.mxu1 %vm9578_vm12, %v8920_v20  ;;  %vm9590_vm12 = vnez %v9589_v37 }
 0x4d4   : > { %3848 = vmatpush3.bf16.xpose.msk.msra.mxu0 %vm9580_vm14, %v8920_v20  ;;  %vm9592_vm14 = vnez %v9591_v29 }
 0x4d5   : > { %3849 = vmatprep.subr.msk.bf16.mxu0 %vm9582_vm7, %v8920_v20  ;;  %3832 = vmatpush3.bf16.xpose.msk.msra.mxu1 %vm9584_vm4, %v8920_v20  ;;  %vm9594_vm7 = vnez %v9593_v25  ;;  %vm9596_vm4 = vnez %v9595_v39 }
 0x4d6   : > { %3833 = vmatprep.subr.msk.bf16.mxu1 %vm9586_vm5, %v8920_v20  ;;  %vm9598_vm5 = vnez %v9597_v6 }
 0x4dc   : > { %3850 = vmatpush3.bf16.xpose.msk.msra.mxu0 %vm9588_vm0, %v8920_v20  ;;  %vm9600_vm0 = vnez %v9599_v15 }
 0x4dd   : > { %3851 = vmatprep.subr.msk.bf16.mxu0 %vm9590_vm12, %v8920_v20  ;;  %3834 = vmatpush3.bf16.xpose.msk.msra.mxu1 %vm9592_vm14, %v8920_v20  ;;  %vm9602_vm12 = vnez %v9601_v48  ;;  %vm9604_vm14 = vnez %v9603_v7 }
 0x4de   : > { %3835 = vmatprep.subr.msk.bf16.mxu1 %vm9594_vm7, %v8920_v20  ;;  %vm9606_vm7 = vnez %v9605_v55 }
 0x4e4   : > { %3852 = vmatpush3.bf16.xpose.msk.msra.mxu0 %vm9596_vm4, %v8920_v20  ;;  %vm9608_vm4 = vnez %v9607_v40  ;;  %v9617_v40 = vld [vmem:[#allocation32_spill] sm:$0xff] }
 0x4e5   : > { %3853 = vmatprep.subr.msk.bf16.mxu0 %vm9598_vm5, %v8920_v20  ;;  %3836 = vmatpush3.bf16.xpose.msk.msra.mxu1 %vm9600_vm0, %v8920_v20  ;;  %vm9610_vm5 = vnez %v9609_v1  ;;  %vm9612_vm0 = vnez %v9611_v23  ;;  %v9619_v1 = vld [vmem:[#allocation35_spill] sm:$0xff]  ;;  %v9621_v23 = vld [vmem:[#allocation34_spill] sm:$0xff] }
 0x4e6   : > { %3837 = vmatprep.subr.msk.bf16.mxu1 %vm9602_vm12, %v8920_v20  ;;  %vm9614_vm12 = vnez %v9613_v54 }
 0x4ec   : > { %3854 = vmatpush3.bf16.xpose.msk.msra.mxu0 %vm9604_vm14, %v8920_v20  ;;  %vm9615_vm14 = vnez %v9231_v58 }
 0x4ed   : > { %3855 = vmatprep.subr.msk.bf16.mxu0 %vm9606_vm7, %v8920_v20  ;;  %3838 = vmatpush3.bf16.xpose.msk.msra.mxu1 %vm9608_vm4, %v8920_v20  ;;  %vm9616_vm7 = vnez %v9271_v36  ;;  %vm9618_vm4 = vnez %v9617_v40 }
 0x4ee   : > { %3839 = vmatprep.subr.msk.bf16.mxu1 %vm9610_vm5, %v8920_v20  ;;  %vm9620_vm5 = vnez %v9619_v1 }
 0x4f4   : > { %3856 = vmatpush3.bf16.xpose.msk.msra.mxu0 %vm9612_vm0, %v8920_v20  ;;  %vm9622_vm0 = vnez %v9621_v23 }
 0x4f5   : > { %3857 = vmatprep.subr.msk.bf16.mxu0 %vm9614_vm12, %v8920_v20  ;;  %3840 = vmatpush3.bf16.xpose.msk.msra.mxu1 %vm9615_vm14, %v8920_v20  ;;  %vm9623_vm12 = vnez %v9285_v31  ;;  %vm9624_vm14 = vnez %v9289_v63 }
 0x4f6   : > { %3841 = vmatprep.subr.msk.bf16.mxu1 %vm9616_vm7, %v8920_v20  ;;  %vm9625_vm7 = vnez %v9306_v56 }
 0x4fc   : > { %3858 = vmatpush3.bf16.xpose.msk.msra.mxu0 %vm9618_vm4, %v8920_v20  ;;  %vm9634_vm4 = vnez %v9382_v57 }
 0x4fd   : > { %3859 = vmatprep.subr.msk.bf16.mxu0 %vm9620_vm5, %v8920_v20  ;;  %3842 = vmatpush3.bf16.xpose.msk.msra.mxu1 %vm9622_vm0, %v8920_v20  ;;  %vm9626_vm5 = vnez %v9316_v26  ;;  %vm9627_vm0 = vnez %v9320_v43 }
 0x4fe   : > { %3863 = vmatprep.subr.msk.bf16.mxu1 %vm9623_vm12, %v8920_v20  ;;  %vm9631_vm12 = vnez %v9353_v10 }
 0x504   : > { %3860 = vmatpush3.bf16.xpose.msk.msra.mxu0 %vm9624_vm14, %v8920_v20  ;;  %3844 = vmatmul.mubr.bf16.vlgmr.msra.gmra.mxu1 %v9568_v12  ;;  %vm9628_vm14 = vnez %v9323_v49 }
 0x505   : > { %3881 = vmatprep.subr.msk.bf16.mxu0 %vm9625_vm7, %v8920_v20  ;;  %3864 = vmatpush3.bf16.xpose.msk.msra.mxu1 %vm9626_vm5, %v8920_v20  ;;  %vm9629_vm7 = vnez %v9339_v8  ;;  %vm9630_vm5 = vnez %v9349_v62 }
 0x506   : > { %3879 = vmatprep.mubr.bf16.mxu1 %v9568_v12  ;;  %3865 = vmatprep.subr.msk.bf16.mxu1 %vm9627_vm0, %v8920_v20  ;;  %vm9632_vm0 = vnez %v9356_v0 }
 0x50b   : > { %3862 = vmatmul.mubr.bf16.vlgmr.msra.gmra.mxu0 %v9568_v12 }
 0x50c   : > { %3882 = vmatpush3.bf16.xpose.msk.msra.mxu0 %vm9628_vm14, %v8920_v20  ;;  %3897 = vmatprep.mubr.bf16.mxu0 %v9568_v12  ;;  %vm9633_vm14 = vnez %v9372_v59 }
 0x50d   : > { %3883 = vmatprep.subr.msk.bf16.mxu0 %vm9629_vm7, %v8920_v20  ;;  %3866 = vmatpush3.bf16.xpose.msk.msra.mxu1 %vm9630_vm5, %v8920_v20  ;;  %vm9635_vm7 = vnez %v9386_v4  ;;  %vm9636_vm5 = vnez %v9389_v46 }
 0x50e   : > { %3867 = vmatprep.subr.msk.bf16.mxu1 %vm9631_vm12, %v8920_v20  ;;  %vm9637_vm12 = vnez %v9405_v5 }
 0x514   : > { %3884 = vmatpush3.bf16.xpose.msk.msra.mxu0 %vm9632_vm0, %v8920_v20  ;;  %vm9638_vm0 = vnez %v9415_v13 }
 0x515   : > { %3885 = vmatprep.subr.msk.bf16.mxu0 %vm9633_vm14, %v8920_v20  ;;  %3868 = vmatpush3.bf16.xpose.msk.msra.mxu1 %vm9634_vm4, %v8920_v20  ;;  %vm9639_vm14 = vnez %v9419_v21  ;;  %vm9640_vm4 = vnez %v9422_v34 }
 0x516   : > { %3869 = vmatprep.subr.msk.bf16.mxu1 %vm9635_vm7, %v8920_v20  ;;  %vm9641_vm7 = vnez %v9438_v18 }
 0x51c   : > { %3886 = vmatpush3.bf16.xpose.msk.msra.mxu0 %vm9636_vm5, %v8920_v20  ;;  %vm9642_vm5 = vnez %v9448_v42 }
 0x51d   : > { %3887 = vmatprep.subr.msk.bf16.mxu0 %vm9637_vm12, %v8920_v20  ;;  %3870 = vmatpush3.bf16.xpose.msk.msra.mxu1 %vm9638_vm0, %v8920_v20  ;;  %vm9643_vm12 = vnez %v9452_v44  ;;  %vm9644_vm0 = vnez %v9455_v11 }
 0x51e   : > { %3871 = vmatprep.subr.msk.bf16.mxu1 %vm9639_vm14, %v8920_v20  ;;  %vm9645_vm14 = vnez %v9474_v24 }
 0x524   : > { %3888 = vmatpush3.bf16.xpose.msk.msra.mxu0 %vm9640_vm4, %v8920_v20  ;;  %vm9646_vm4 = vnez %v9485_v38  ;;  %v962_v38 = vunpack.c.l.bf16 %v6029_v32 }
 0x525   : > { %3889 = vmatprep.subr.msk.bf16.mxu0 %vm9641_vm7, %v8920_v20  ;;  %3872 = vmatpush3.bf16.xpose.msk.msra.mxu1 %vm9642_vm5, %v8920_v20  ;;  %vm9647_vm7 = vnez %v9490_v53  ;;  %vm9648_vm5 = vnez %v9495_v41  ;;  %v963_v53 = vunpack.c.h.bf16 %v6029_v32 }
 0x526   : > { %3873 = vmatprep.subr.msk.bf16.mxu1 %vm9643_vm12, %v8920_v20  ;;  %vm9649_vm12 = vnez %v9527_v30 }
 0x52c   : > { %3890 = vmatpush3.bf16.xpose.msk.msra.mxu0 %vm9644_vm0, %v8920_v20  ;;  %vm9650_vm0 = vnez %v9542_v16  ;;  %v9652_v16 = vld [vmem:[#allocation45_spill] sm:$0xff] }
 0x52d   : > { %3891 = vmatprep.subr.msk.bf16.mxu0 %vm9645_vm14, %v8920_v20  ;;  %3874 = vmatpush3.bf16.xpose.msk.msra.mxu1 %vm9646_vm4, %v8920_v20  ;;  %vm9651_vm14 = vnez %v9547_v27  ;;  %v964_v30 = vsub.f32 %v9652_v16, %v962_v38  ;;  %v9653_v27 = vld [vmem:[#allocation44_spill] sm:$0xff]  ;;  %v9670_v38 = vld [vmem:[#allocation58_spill] sm:$0xff] }
 0x52e   : > { %3875 = vmatprep.subr.msk.bf16.mxu1 %vm9647_vm7, %v8920_v20  ;;  %v965_v41 = vsub.f32 %v9653_v27, %v963_v53  ;;  %v9672_v53 = vld [vmem:[#allocation31_spill] sm:$0xff] }
 0x530   : > { %v8076_v32 = vpack.c.bf16 %v965_v41, %v964_v30  ;;  %v9674_v41 = vld [vmem:[#allocation30_spill] sm:$0xff] }
 0x534   : > { %3892 = vmatpush3.bf16.xpose.msk.msra.mxu0 %vm9648_vm5, %v8920_v20 }
 0x535   : > { %3893 = vmatprep.subr.msk.bf16.mxu0 %vm9649_vm12, %v8920_v20  ;;  %3876 = vmatpush3.bf16.xpose.msk.msra.mxu1 %vm9650_vm0, %v8920_v20 }
 0x536   : > { %3877 = vmatprep.subr.msk.bf16.mxu1 %vm9651_vm14, %v8920_v20 }
 0x53c   : > { %3894 = vmatpush3.bf16.xpose.msk.msra.mxu0 %vm7832_vm8, %v8920_v20 }
 0x53d   : > { %3895 = vmatprep.subr.msk.bf16.mxu0 %vm7865_vm1, %v8920_v20  ;;  %3878 = vmatpush3.bf16.xpose.msk.msra.mxu1 %vm7778_vm2, %v8920_v20 }
 0x53e   : > { %3899 = vmatprep.subr.msk.bf16.mxu1 %vm9560_vm11, %v8920_v20  ;;  %vm9654_vm11 = vnez %v9575_v28 }
 0x544   : > { %3896 = vmatpush3.bf16.xpose.msk.msra.mxu0 %vm7847_vm6, %v8920_v20  ;;  %3880 = vmatmul.mubr.bf16.vlgmr.msra.gmra.mxu1 %v9568_v12 }
 0x545   : > { %3917 = vmatprep.subr.msk.bf16.mxu0 %vm9565_vm10, %v8920_v20  ;;  %3900 = vmatpush3.bf16.xpose.msk.msra.mxu1 %vm9567_vm13, %v8920_v20  ;;  %vm9655_vm10 = vnez %v9577_v60  ;;  %vm9656_vm13 = vnez %v9579_v47 }
 0x546   : > { %3915 = vmatprep.mubr.bf16.mxu1 %v8076_v32  ;;  %3901 = vmatprep.subr.msk.bf16.mxu1 %vm9570_vm9, %v8920_v20  ;;  %vm9657_vm9 = vnez %v9581_v9 }
 0x54b   : > { %3898 = vmatmul.mubr.bf16.vlgmr.msra.gmra.mxu0 %v9568_v12 }
 0x54c   : > { %3918 = vmatpush3.bf16.xpose.msk.msra.mxu0 %vm9572_vm15, %v8920_v20  ;;  %3933 = vmatprep.mubr.bf16.mxu0 %v8076_v32  ;;  %vm9658_vm15 = vnez %v9583_v35  ;;  %v8298_v35 = vld [vmem:[%s4705_s24] sm:$0xff] }
 0x54d   : > { %3919 = vmatprep.subr.msk.bf16.mxu0 %vm9574_vm3, %v8920_v20  ;;  %3902 = vmatpush3.bf16.xpose.msk.msra.mxu1 %vm9654_vm11, %v8920_v20  ;;  %vm9659_vm3 = vnez %v9585_v51  ;;  %vm9660_vm11 = vnez %v9587_v45 }
 0x54e   : > { %3903 = vmatprep.subr.msk.bf16.mxu1 %vm9655_vm10, %v8920_v20  ;;  %vm9661_vm10 = vnez %v9589_v37 }
 0x554   : > { %3920 = vmatpush3.bf16.xpose.msk.msra.mxu0 %vm9656_vm13, %v8920_v20  ;;  %vm9662_vm13 = vnez %v9591_v29 }
 0x555   : > { %3921 = vmatprep.subr.msk.bf16.mxu0 %vm9657_vm9, %v8920_v20  ;;  %3904 = vmatpush3.bf16.xpose.msk.msra.mxu1 %vm9658_vm15, %v8920_v20  ;;  %vm9663_vm9 = vnez %v9593_v25  ;;  %vm9664_vm15 = vnez %v9595_v39 }
 0x556   : > { %3905 = vmatprep.subr.msk.bf16.mxu1 %vm9659_vm3, %v8920_v20  ;;  %vm9665_vm3 = vnez %v9597_v6 }
 0x55c   : > { %3922 = vmatpush3.bf16.xpose.msk.msra.mxu0 %vm9660_vm11, %v8920_v20  ;;  %vm9666_vm11 = vnez %v9599_v15 }
 0x55d   : > { %3923 = vmatprep.subr.msk.bf16.mxu0 %vm9661_vm10, %v8920_v20  ;;  %3906 = vmatpush3.bf16.xpose.msk.msra.mxu1 %vm9662_vm13, %v8920_v20  ;;  %vm9667_vm10 = vnez %v9601_v48  ;;  %vm9668_vm13 = vnez %v9603_v7 }
 0x55e   : > { %3907 = vmatprep.subr.msk.bf16.mxu1 %vm9663_vm9, %v8920_v20  ;;  %vm9669_vm9 = vnez %v9605_v55 }
 0x564   : > { %3924 = vmatpush3.bf16.xpose.msk.msra.mxu0 %vm9664_vm15, %v8920_v20  ;;  %vm9671_vm15 = vnez %v9670_v38 }
 0x565   : > { %3925 = vmatprep.subr.msk.bf16.mxu0 %vm9665_vm3, %v8920_v20  ;;  %3908 = vmatpush3.bf16.xpose.msk.msra.mxu1 %vm9666_vm11, %v8920_v20  ;;  %vm9673_vm3 = vnez %v9672_v53  ;;  %vm9675_vm11 = vnez %v9674_v41 }
 0x566   : > { %3909 = vmatprep.subr.msk.bf16.mxu1 %vm9667_vm10, %v8920_v20  ;;  %vm9676_vm10 = vnez %v9613_v54 }
 0x56c   : > { %3926 = vmatpush3.bf16.xpose.msk.msra.mxu0 %vm9668_vm13, %v8920_v20  ;;  %vm9677_vm13 = vnez %v9231_v58 }
 0x56d   : > { %3927 = vmatprep.subr.msk.bf16.mxu0 %vm9669_vm9, %v8920_v20  ;;  %3910 = vmatpush3.bf16.xpose.msk.msra.mxu1 %vm9671_vm15, %v8920_v20  ;;  %vm9678_vm9 = vnez %v9271_v36  ;;  %vm9679_vm15 = vnez %v9617_v40 }
 0x56e   : > { %3911 = vmatprep.subr.msk.bf16.mxu1 %vm9673_vm3, %v8920_v20  ;;  %vm9680_vm3 = vnez %v9619_v1 }
 0x574   : > { %3928 = vmatpush3.bf16.xpose.msk.msra.mxu0 %vm9675_vm11, %v8920_v20  ;;  %vm9681_vm11 = vnez %v9621_v23 }
 0x575   : > { %3929 = vmatprep.subr.msk.bf16.mxu0 %vm9676_vm10, %v8920_v20  ;;  %3912 = vmatpush3.bf16.xpose.msk.msra.mxu1 %vm9677_vm13, %v8920_v20  ;;  %vm9682_vm10 = vnez %v9285_v31  ;;  %vm9683_vm13 = vnez %v9289_v63 }
 0x576   : > { %3913 = vmatprep.subr.msk.bf16.mxu1 %vm9678_vm9, %v8920_v20  ;;  %vm9684_vm9 = vnez %v9306_v56 }
 0x57c   : > { %3930 = vmatpush3.bf16.xpose.msk.msra.mxu0 %vm9679_vm15, %v8920_v20  ;;  %vm9685_vm15 = vnez %v9316_v26 }
 0x57d   : > { %3931 = vmatprep.subr.msk.bf16.mxu0 %vm9680_vm3, %v8920_v20  ;;  %3914 = vmatpush3.bf16.xpose.msk.msra.mxu1 %vm9681_vm11, %v8920_v20  ;;  %vm9686_vm3 = vnez %v9320_v43  ;;  %vm9687_vm11 = vnez %v9323_v49  ;;  %v2489_v43 = vpop.f32.mrf.mxu1 }
 0x57e   : > { %3935 = vmatprep.subr.msk.bf16.mxu1 %vm9682_vm10, %v8920_v20  ;;  %vm9688_vm10 = vnez %v9339_v8  ;;  %v2532_v8 = vpop.f32.mrf.mxu0 }
 0x57f   : > { %v2491_v49 = vpop.f32.mrf.mxu1 }
 0x584   : > { %3932 = vmatpush3.bf16.xpose.msk.msra.mxu0 %vm9683_vm13, %v8920_v20  ;;  %3916 = vmatmul.mubr.bf16.vlgmr.msra.gmra.mxu1 %v8076_v32  ;;  %vm9689_vm13 = vnez %v9349_v62  ;;  %v2493_v62 = vpop.f32.mrf.mxu1 }
 0x585   : > { %3953 = vmatprep.subr.msk.bf16.mxu0 %vm9684_vm9, %v8920_v20  ;;  %3936 = vmatpush3.bf16.xpose.msk.msra.mxu1 %vm9685_vm15, %v8920_v20  ;;  %vm9690_vm9 = vnez %v9353_v10  ;;  %vm9691_vm15 = vnez %v9356_v0  ;;  %v2534_v10 = vpop.f32.mrf.mxu0 }
 0x586   : > { %3951 = vmatprep.mubr.bf16.mxu1 %v8076_v32  ;;  %3937 = vmatprep.subr.msk.bf16.mxu1 %vm9686_vm3, %v8920_v20  ;;  %vm9692_vm3 = vnez %v9372_v59  ;;  %v2495_v0 = vpop.f32.mrf.mxu1 }
 0x587   : > { %v2536_v59 = vpop.f32.mrf.mxu0 }
 0x58b   : > { %3934 = vmatmul.mubr.bf16.vlgmr.msra.gmra.mxu0 %v8076_v32 }
 0x58c   : > { %3954 = vmatpush3.bf16.xpose.msk.msra.mxu0 %vm9687_vm11, %v8920_v20  ;;  %3969 = vmatprep.mubr.bf16.mxu0 %v8076_v32  ;;  %vm9693_vm11 = vnez %v9382_v57  ;;  %v8280_v57 = vpop.f32.mrf.mxu1 }
 0x58d   : > { %3955 = vmatprep.subr.msk.bf16.mxu0 %vm9688_vm10, %v8920_v20  ;;  %3938 = vmatpush3.bf16.xpose.msk.msra.mxu1 %vm9689_vm13, %v8920_v20  ;;  %vm9694_vm10 = vnez %v9386_v4  ;;  %vm9695_vm13 = vnez %v9389_v46  ;;  %v2538_v4 = vpop.f32.mrf.mxu0 }
 0x58e   : > { %3939 = vmatprep.subr.msk.bf16.mxu1 %vm9690_vm9, %v8920_v20  ;;  %vm9696_vm9 = vnez %v9405_v5  ;;  %v8282_v46 = vpop.f32.mrf.mxu1 }
 0x58f   : > { %v8284_v5 = vpop.f32.mrf.mxu0 }
 0x594   : > { %3956 = vmatpush3.bf16.xpose.msk.msra.mxu0 %vm9691_vm15, %v8920_v20  ;;  %vm9697_vm15 = vnez %v9415_v13  ;;  %v8286_v13 = vpop.f32.mrf.mxu1 }
 0x595   : > { %3957 = vmatprep.subr.msk.bf16.mxu0 %vm9692_vm3, %v8920_v20  ;;  %3940 = vmatpush3.bf16.xpose.msk.msra.mxu1 %vm9693_vm11, %v8920_v20  ;;  %vm9698_vm3 = vnez %v9419_v21  ;;  %vm9699_vm11 = vnez %v9422_v34 }
 0x596   : > { %3941 = vmatprep.subr.msk.bf16.mxu1 %vm9694_vm10, %v8920_v20  ;;  %vm9700_vm10 = vnez %v9438_v18  ;;  %v8290_v21 = vpop.f32.mrf.mxu1 }
 0x59c   : > { %3958 = vmatpush3.bf16.xpose.msk.msra.mxu0 %vm9695_vm13, %v8920_v20  ;;  %vm9701_vm13 = vnez %v9448_v42 }
 0x59d   : > { %3959 = vmatprep.subr.msk.bf16.mxu0 %vm9696_vm9, %v8920_v20  ;;  %3942 = vmatpush3.bf16.xpose.msk.msra.mxu1 %vm9697_vm15, %v8920_v20  ;;  %vm9702_vm9 = vnez %v9452_v44  ;;  %vm9703_vm15 = vnez %v9455_v11 }
 0x59e   : > { %3943 = vmatprep.subr.msk.bf16.mxu1 %vm9698_vm3, %v8920_v20  ;;  %vm9704_vm3 = vnez %v9474_v24 }
 0x5a4   : > { %3960 = vmatpush3.bf16.xpose.msk.msra.mxu0 %vm9699_vm11, %v8920_v20 }
 0x5a5   : > { %3961 = vmatprep.subr.msk.bf16.mxu0 %vm9700_vm10, %v8920_v20  ;;  %3944 = vmatpush3.bf16.xpose.msk.msra.mxu1 %vm9701_vm13, %v8920_v20 }
 0x5a6   : > { %3945 = vmatprep.subr.msk.bf16.mxu1 %vm9702_vm9, %v8920_v20 }
 0x5ac   : > { %3962 = vmatpush3.bf16.xpose.msk.msra.mxu0 %vm9703_vm15, %v8920_v20 }
 0x5ad   : > { %3963 = vmatprep.subr.msk.bf16.mxu0 %vm9704_vm3, %v8920_v20  ;;  %3946 = vmatpush3.bf16.xpose.msk.msra.mxu1 %vm9646_vm4, %v8920_v20 }
 0x5ae   : > { %3947 = vmatprep.subr.msk.bf16.mxu1 %vm9647_vm7, %v8920_v20 }
 0x5b4   : > { %3964 = vmatpush3.bf16.xpose.msk.msra.mxu0 %vm9648_vm5, %v8920_v20 }
 0x5b5   : > { %3965 = vmatprep.subr.msk.bf16.mxu0 %vm9649_vm12, %v8920_v20  ;;  %3948 = vmatpush3.bf16.xpose.msk.msra.mxu1 %vm9650_vm0, %v8920_v20 }
 0x5b6   : > { %3949 = vmatprep.subr.msk.bf16.mxu1 %vm9651_vm14, %v8920_v20 }
 0x5bc   : > { %3966 = vmatpush3.bf16.xpose.msk.msra.mxu0 %vm7832_vm8, %v8920_v20 }
 0x5bd   : > { %3967 = vmatprep.subr.msk.bf16.mxu0 %vm7865_vm1, %v8920_v20  ;;  %3950 = vmatpush3.bf16.xpose.msk.msra.mxu1 %vm7778_vm2, %v8920_v20 }
 0x5c4   : > { %3968 = vmatpush3.bf16.xpose.msk.msra.mxu0 %vm7847_vm6, %v8920_v20  ;;  %3952 = vmatmul.mubr.bf16.vlgmr.msra.gmra.mxu1 %v8076_v32  ;;  %v8288_v20 = vpop.f32.mrf.mxu0  ;;  %v2661_v18 = vpop.f32.mrf.mxu1 }
 0x5c5   : > { %v2662_v12 = vadd.f32 %v2661_v18, %v2489_v43 }
 0x5c6   : > { %v8292_v34 = vpop.f32.mrf.mxu0  ;;  %v2663_v44 = vpop.f32.mrf.mxu1 }
 0x5c7   : > { %v2664_v61 = vadd.f32 %v2663_v44, %v2491_v49 }
 0x5c8   : > { %v8294_v42 = vpop.f32.mrf.mxu0  ;;  %v2665_v24 = vpop.f32.mrf.mxu1 }
 0x5c9   : > { %v2666_v47 = vadd.f32 %v2665_v24, %v2493_v62 }
 0x5ca   : > { %v2667_v52 = vpop.f32.mrf.mxu1 }
 0x5cb   : > { %3970 = vmatmul.mubr.bf16.vlgmr.msra.gmra.mxu0 %v8076_v32  ;;  %v2704_v11 = vpop.f32.mrf.mxu0  ;;  %v2668_v25 = vadd.f32 %v2667_v52, %v2495_v0 }
 0x5cc   : > { %v2705_v37 = vadd.f32 %v2704_v11, %v2532_v8 }
 0x5cd   : > { %v2706_v30 = vpop.f32.mrf.mxu0 }
 0x5ce   : > { %v2707_v48 = vadd.f32 %v2706_v30, %v2534_v10 }
 0x5cf   : > { %v2708_v16 = vpop.f32.mrf.mxu0 }
 0x5d0   : > { %v2709_v23 = vadd.f32 %v2708_v16, %v2536_v59 }
 0x5d1   : > { %v2710_v22 = vpop.f32.mrf.mxu0 }
 0x5d2   : > { %v2711_v53 = vadd.f32 %v2710_v22, %v2538_v4 }
 0x604   : > { %v2747_v27 = vpop.f32.mrf.mxu1 }
 0x605   : > { %v2748_v63 = vadd.f32 %v2747_v27, %v8280_v57 }
 0x606   : > { %v2749_v14 = vpop.f32.mrf.mxu1 }
 0x607   : > { %v2750_v26 = vadd.f32 %v2749_v14, %v8282_v46 }
 0x608   : > { %v2751_v3 = vpop.f32.mrf.mxu1 }
 0x609   : > { %v2752_v8 = vadd.f32 %v2751_v3, %v8286_v13 }
 0x60a   : > { %v2753_v33 = vpop.f32.mrf.mxu1 }
 0x60b   : > { %v2790_v19 = vpop.f32.mrf.mxu0  ;;  %v2754_v4 = vadd.f32 %v2753_v33, %v8290_v21 }
 0x60c   : > { %v2791_v0 = vadd.f32 %v2790_v19, %v8284_v5 }
 0x60d   : > { %v2792_v17 = vpop.f32.mrf.mxu0 }
 0x60e   : > { %v2793_v44 = vadd.f32 %v2792_v17, %v8288_v20 }
 0x60f   : > { %v2794_v2 = vpop.f32.mrf.mxu0 }
 0x610   : > { %v2795_v21 = vadd.f32 %v2794_v2, %v8292_v34 }
 0x611   : > { %v2796_v9 = vpop.f32.mrf.mxu0 }
 0x612   : > { %v2797_v16 = vadd.f32 %v2796_v9, %v8294_v42 }
 0x644   : > { %v2833_v50 = vpop.f32.mrf.mxu1 }
 0x645   : > { %v2971_v28 = vadd.f32 %v2833_v50, %v2662_v12 }
 0x646   : > { %v2835_v60 = vpop.f32.mrf.mxu1 }
 0x647   : > { %v2987_v51 = vsub.f32 %v2971_v28, %v8298_v35  ;;  %v2972_v45 = vadd.f32 %v2835_v60, %v2664_v61 }
 0x648   : > { %v2837_v29 = vpop.f32.mrf.mxu1 }
 0x649   : > { %2988 = vst [vmem:[%s8301_s20] sm:$0xff] %v2987_v51  ;;  %v2990_v39 = vsub.f32 %v2972_v45, %v8298_v35  ;;  %v2979_v15 = vadd.f32 %v2837_v29, %v2666_v47 }
 0x64a   : > { %v2839_v55 = vpop.f32.mrf.mxu1 }
 0x64b   : > { %v2876_v6 = vpop.f32.mrf.mxu0  ;;  %3718 = vst [vmem:[%s8301_s20 + $0x10] sm:$0xff] %v2990_v39  ;;  %2989 = vst [vmem:[%s8301_s20 + $0x8] sm:$0xff] %v2979_v15  ;;  %v2980_v1 = vadd.f32 %v2839_v55, %v2668_v25 }
 0x64c   : > { %v2973_v7 = vadd.f32 %v2876_v6, %v2705_v37 }
 0x64d   : > { %v2878_v40 = vpop.f32.mrf.mxu0  ;;  %3719 = vst [vmem:[%s8301_s20 + $0x18] sm:$0xff] %v2980_v1 }
 0x64e   : > { %v2994_v54 = vsub.f32 %v2973_v7, %v8298_v35  ;;  %v2974_v32 = vadd.f32 %v2878_v40, %v2707_v48 }
 0x64f   : > { %v2880_v38 = vpop.f32.mrf.mxu0 }
 0x650   : > { %3720 = vst [vmem:[%s8301_s20 + $0x20] sm:$0xff] %v2994_v54  ;;  %v2998_v41 = vsub.f32 %v2974_v32, %v8298_v35  ;;  %v2981_v58 = vadd.f32 %v2880_v38, %v2709_v23 }
 0x651   : > { %v2882_v36 = vpop.f32.mrf.mxu0 }
 0x652   : > { %3722 = vst [vmem:[%s8301_s20 + $0x30] sm:$0xff] %v2998_v41  ;;  %3721 = vst [vmem:[%s8301_s20 + $0x28] sm:$0xff] %v2981_v58  ;;  %v2982_v31 = vadd.f32 %v2882_v36, %v2711_v53 }
 0x654   : > { %3723 = vst [vmem:[%s8301_s20 + $0x38] sm:$0xff] %v2982_v31 }
 0x684   : > { %v2919_v56 = vpop.f32.mrf.mxu1 }
 0x685   : > { %v2975_v43 = vadd.f32 %v2919_v56, %v2748_v63 }
 0x686   : > { %v2921_v49 = vpop.f32.mrf.mxu1 }
 0x687   : > { %v3002_v62 = vsub.f32 %v2975_v43, %v8298_v35  ;;  %v2976_v10 = vadd.f32 %v2921_v49, %v2750_v26 }
 0x688   : > { %v2923_v59 = vpop.f32.mrf.mxu1 }
 0x689   : > { %3724 = vst [vmem:[%s8301_s20 + $0x40] sm:$0xff] %v3002_v62  ;;  %v3006_v57 = vsub.f32 %v2976_v10, %v8298_v35  ;;  %v2983_v18 = vadd.f32 %v2923_v59, %v2752_v8 }
 0x68a   : > { %v2925_v11 = vpop.f32.mrf.mxu1 }
 0x68b   : > { %v2962_v46 = vpop.f32.mrf.mxu0  ;;  %3726 = vst [vmem:[%s8301_s20 + $0x50] sm:$0xff] %v3006_v57  ;;  %3725 = vst [vmem:[%s8301_s20 + $0x48] sm:$0xff] %v2983_v18  ;;  %v2984_v5 = vadd.f32 %v2925_v11, %v2754_v4 }
 0x68c   : > { %v2977_v13 = vadd.f32 %v2962_v46, %v2791_v0 }
 0x68d   : > { %v2964_v24 = vpop.f32.mrf.mxu0  ;;  %3727 = vst [vmem:[%s8301_s20 + $0x58] sm:$0xff] %v2984_v5 }
 0x68e   : > { %v3010_v30 = vsub.f32 %v2977_v13, %v8298_v35  ;;  %v2978_v52 = vadd.f32 %v2964_v24, %v2793_v44 }
 0x68f   : > { %v2966_v20 = vpop.f32.mrf.mxu0 }
 0x690   : > { %3728 = vst [vmem:[%s8301_s20 + $0x60] sm:$0xff] %v3010_v30  ;;  %v3014_v27 = vsub.f32 %v2978_v52, %v8298_v35  ;;  %v2985_v22 = vadd.f32 %v2966_v20, %v2795_v21 }
 0x691   : > { %v2968_v14 = vpop.f32.mrf.mxu0 }
 0x692   : > { %3730 = vst [vmem:[%s8301_s20 + $0x70] sm:$0xff] %v3014_v27  ;;  %3729 = vst [vmem:[%s8301_s20 + $0x68] sm:$0xff] %v2985_v22  ;;  %v2986_v34 = vadd.f32 %v2968_v14, %v2797_v16 }
 0x694   : > { %3731 = vst [vmem:[%s8301_s20 + $0x78] sm:$0xff] %v2986_v34 }
 0x695   : > { %4476 = shalt.err (!%p4473_p11)
}
 0x696   : > { %s4477_s6 = scalar_lea.hbm %s8336_s30, 2048  ;;  %s4481_s21 = scalar_lea.hbm %s8391_s2, 4096 }
 0x697   : > { %p4478_p13 = scmp.ne.s32.totalorder %s8336_s30, %s4477_s6  ;;  %p4482_p7 = scmp.lt.s32.totalorder %s8336_s30, %s8391_s2 }
 0x698   : > { %p4483_p10 = scmp.lt.s32.totalorder %s4481_s21, %s4477_s6 }
 0x699   : > { %p4479_p4 = pnand %p4478_p13, %p4672_p2 }
 0x69a   : > { %p4484_p12 = por %p4483_p10, %p4482_p7 }
 0x69b   : > { %p4480_p6 = pneg %p4479_p4 }
 0x69d   : > { %p4485_p0 = pnand %p4484_p12, %p4480_p6 }
 0x69f   : > { %4488 = shalt.err (!%p4485_p0)
}
 0x6a0   : > { %s4560_s17 = smov 128   ;;  %s4561_s20 = smov 8  }
 0x6a1   : > { %4007 = dma.vmem_to_hbm [thread:$0]  (%p4672_p2), %s8338_s27, 2048, %s8336_s30, %s3019_s12, %s4560_s17, %s4560_s17, %s4561_s20  }
 0x6a2 PF: > { %s3048_s26 = sand.u32 1, %s4527_s9   ;;  %p9711_p1 = scmp.ne.s32.totalorder %s8741_s18, 0 }
 0x6a3   : > { %p9712_p9 = scmp.ge.s32.totalorder %s4547_s14, 2  ;;  %s3049_s28 = scalar_lea.sflag [#allocation4], %s3048_s26 }
 0x6a5   : > { %p4018_p3 = pnand %p9712_p9, %p9711_p1 }
 0x6a7   : > { %p4019_p5 = pneg %p4018_p3 }
 0x6a9   : > { %4522 = dma.done.wait (%p4019_p5), %s3049_s28, 2048  }
 0x6aa   : > { %4524 = vsyncadd (%p4019_p5), %s3049_s28, 4294965248  ;;  %s19_s14 = sadd.s32 1, %s4547_s14   ;;  %s9713_s9 = smov %s4531_s10 }
 0x6ab   : > { %p16_p8 = scmp.ge.s32.totalorder %s19_s14, 4   ;;  %s9714_s10 = smov %s4535_s11 }
 0x6ac   : > { %s9715_s11 = smov %s4679_s25  ;;  %s9716_s12 = smov %s4543_s13 }
 0x6ad   : > { %s9717_s13 = smov %s9719_s8  ;;  %18 = sbr.rel (!%p16_p8) target bundleno = 7 (0x7), region = 86 }
 0x6b2   :  { %3054 = vsyncpa [#allocation3], 1 }
 0x6b3   :  { %3056 = vsyncpa [#allocation3 + $0x1], 1 }
 0x6b4   :  { %3057 = vsyncpa [#allocation6], 1 }
 0x6b5   :  { %3059 = vsyncpa [#allocation6 + $0x1], 1 }
 0x6b6   :  { %3060 = vsyncpa [#allocation4], 1 }
 0x6b7   :  { %3062 = vsyncpa [#allocation4 + $0x1], 1 }

// kernel: tpu_custom_call.1
= control target key start
LH: loop header
LB: loop body
LE: loop exit
PB: predicated region body
PF: predicated region fallthrough
CT: control target
= control target key end

     0   :  { %7 = vsyncpa [#allocation3], 0  ;;  %s8410_s0 = inlined_call_operand.hbm [shape: f32[2,16,128], index: 0, kind: input, shape index: {}]   ;;  %s8411_s1 = inlined_call_operand.hbm [shape: f32[2,8,128], index: 1, kind: input, shape index: {}]   ;;  %s8412_s2 = inlined_call_operand.hbm [shape: f32[2,8,16,128], index: 2, kind: output, shape index: {}]  }
   0x1   :  { %9 = vsyncpa [#allocation3 + $0x1], 0 }
   0x2   :  { %10 = vsyncpa [#allocation6], 0 }
   0x3   :  { %12 = vsyncpa [#allocation6 + $0x1], 0 }
   0x4   :  { %13 = vsyncpa [#allocation4], 0 }
   0x5   :  { %15 = vsyncpa [#allocation4 + $0x1], 0  ;;  %s4603_s9 = smov 0   ;;  %s4605_s10 = smov 0  }
   0x6   :  { %s4607_s11 = smov 0   ;;  %s4609_s12 = smov 0  }
   0x7   :  { %s4611_s13 = smov 0   ;;  %s4613_s14 = smov 0  }
   0x8 LB: > { %s3157_s15 = sadd.s32 4294967295, %s4573_s14   ;;  %s3158_s16 = sadd.s32 4294967294, %s4573_s14   ;;  %s4573_s14 = sphi %s4613_s14, %s21_s14   ;;  %s4569_s13 = sphi %s4611_s13, %s9730_s13   ;;  %s4565_s12 = sphi %s4609_s12, %s9729_s12   ;;  %s4561_s11 = sphi %s4607_s11, %s9728_s11   ;;  %s4557_s10 = sphi %s4605_s10, %s9727_s10   ;;  %s4553_s9 = sphi %s4603_s9, %s9726_s9  }
   0x9   : > { %s33_s17 = sadd.s32 1, %s4569_s13  ;;  %s40_s18 = sadd.s32 1, %s4561_s11 }
   0xa   : > { %p35_p0 = scmp.ge.s32.totalorder %s33_s17, 2  ;;  %p47_p1 = scmp.ne.s32.totalorder %s4561_s11, %s4557_s10 }
   0xb   : > { %p48_p2 = scmp.eq.s32.totalorder %s4573_s14, 0  ;;  %p53_p3 = scmp.ne.s32.totalorder %s4557_s10, %s4553_s9 }
   0xc   : > { %s9732_s17 = smov (%p35_p0, %s33_s17), 0  ;;  %p54_p5 = scmp.eq.s32.totalorder %s3157_s15, 0 }
   0xd   : > { %p4644_p4 = por %p48_p2, %p47_p1  ;;  %s37_s20 = ssub.s32 %s4569_s13, %s9732_s17 }
   0xe   : > { %p107_p6 = scmp.eq.s32.totalorder %s3157_s15, 1  ;;  %p38_p7 = scmp.eq.s32.totalorder %s37_s20, 0 }
   0xf   : > { %p4650_p8 = por %p54_p5, %p53_p3  ;;  %p113_p10 = scmp.eq.s32.totalorder %s3158_s16, 1 }
  0x10   : > { %p4654_p9 = por %p107_p6, %p47_p1  ;;  %p3160_p12 = scmp.ge.s32.totalorder %s4573_s14, 2 }
  0x11   : > { %s4659_s23 = scalar_select %p38_p7, %s4561_s11, %s40_s18  }
  0x12   : > { %p4661_p11 = por %p113_p10, %p53_p3  ;;  %p4048_p13 = scmp.lt.s32.totalorder %s4573_s14, 2 }
  0x13   : > { %s4668_s25 = sand.u32 1, %s4561_s11   ;;  %s3765_s27 = sshll.u32 %s4569_s13, 8 }
  0x14   : > { %s3161_s26 = sshll.u32 %s4668_s25, 4  ;;  %s143_s30 = scalar_lea.hbm %s8410_s0, %s3765_s27 }
  0x15   : > { %s137_s3 = scalar_lea.vmem [#allocation2], %s3161_s26  ;;  %p4677_p0 = pnand %p4048_p13, %p4644_p4 }
  0x16   : > { %s144_s4 = sshll.u32 %s137_s3, 4  ;;  %p3166_p1 = scmp.ge.s32.totalorder %s4573_s14, 1  ;;  %s145_s4 = int_to_ptr.vmem [resolvable:$true] %s144_s4 }
  0x17   : > { %s134_s6 = scalar_lea.sflag [#allocation3], %s4668_s25  ;;  %p4435_p2 = pneg %p4677_p0 }
  0x18   : > { %s4446_s7 = scalar_lea.vmem %s145_s4, 256  ;;  %s4575_s8 = smov [#allocation2]  }
  0x19   : > { %p4447_p3 = scmp.ne.s32.totalorder %s145_s4, %s4446_s7  ;;  %s4451_s15 = sshll.u32 %s4575_s8, 4  ;;  %s4452_s15 = int_to_ptr.vmem [resolvable:$false] %s4451_s15 }
  0x1a   : > { %s4453_s16 = scalar_lea.vmem %s4452_s15, 512  ;;  %p4454_p4 = scmp.lt.s32.totalorder %s145_s4, %s4452_s15 }
  0x1b   : > { %p4449_p5 = pnand %p4447_p3, %p4435_p2  ;;  %p4455_p7 = scmp.lt.s32.totalorder %s4453_s16, %s4446_s7 }
  0x1d   : > { %p4450_p6 = pneg %p4449_p5  ;;  %p4456_p10 = por %p4455_p7, %p4454_p4 }
  0x1f   : > { %p4457_p13 = pnand %p4456_p10, %p4450_p6 }
  0x21   : > { %4460 = shalt.err (!%p4457_p13)
}
  0x22   : > { %s4576_s18 = smov 128   ;;  %s4577_s19 = smov 8  }
  0x23   : > { %4040 = dma.hbm_to_vmem [thread:$0]  (!%p4677_p0), %s143_s30, 256, %s145_s4, %s134_s6, %s4576_s18, %s4576_s18, %s4577_s19  }
  0x24   : > { %p171_p3 = scmp.lt.s32.totalorder %s4573_s14, 3  ;;  %s3164_s20 = sshll.u32 %s4668_s25, 3 }
  0x25   : > { %s3165_s26 = sshll.u32 %s4569_s13, 7  ;;  %s158_s7 = scalar_lea.vmem [#allocation5], %s3164_s20 }
  0x26   : > { %p4695_p5 = pnand %p3166_p1, %p171_p3  ;;  %s164_s3 = scalar_lea.hbm %s8411_s1, %s3165_s26 }
  0x27   : > { %s166_s8 = sshll.u32 %s158_s7, 4  ;;  %s155_s15 = scalar_lea.sflag [#allocation6], %s4668_s25  ;;  %s167_s8 = int_to_ptr.vmem [resolvable:$true] %s166_s8 }
  0x28   : > { %s4474_s16 = scalar_lea.vmem %s167_s8, 128  ;;  %s4578_s30 = smov [#allocation5]  }
  0x29   : > { %p4475_p6 = scmp.ne.s32.totalorder %s167_s8, %s4474_s16  ;;  %s4479_s4 = sshll.u32 %s4578_s30, 4  ;;  %s4480_s4 = int_to_ptr.vmem [resolvable:$false] %s4479_s4 }
  0x2a   : > { %s4481_s6 = scalar_lea.vmem %s4480_s4, 256  ;;  %p4482_p1 = scmp.lt.s32.totalorder %s167_s8, %s4480_s4 }
  0x2b   : > { %p4477_p4 = pnand %p4475_p6, %p4435_p2  ;;  %p4483_p10 = scmp.lt.s32.totalorder %s4481_s6, %s4474_s16 }
  0x2d   : > { %p4478_p7 = pneg %p4477_p4  ;;  %p4484_p13 = por %p4483_p10, %p4482_p1 }
  0x2f   : > { %p4485_p3 = pnand %p4484_p13, %p4478_p7 }
  0x31   : > { %4488 = shalt.err (!%p4485_p3)
}
  0x32   : > { %4043 = dma.hbm_to_vmem [thread:$0]  (!%p4677_p0), %s164_s3, 128, %s167_s8, %s155_s15  }
  0x33   : > { %175 = sbr.rel (%p4695_p5) target bundleno = 1682 (0x692), region = 28 }
  0x38   : > { %s4711_s25 = sand.u32 1, %s4557_s10  }
  0x39   : > { %s3167_s18 = sshll.u32 %s4711_s25, 4  ;;  %s178_s19 = scalar_lea.sflag [#allocation3], %s4711_s25 }
  0x3a   : > { %s4715_s20 = scalar_lea.vmem [#allocation2], %s3167_s18 }
  0x3b   : > { %4540 = dma.done.wait (%p4650_p8), %s178_s19, 256  }
  0x3c   : > { %4542 = vsyncadd (%p4650_p8), %s178_s19, 4294967040  ;;  %s3168_s5 = sshll.u32 %s4711_s25, 3  ;;  %s187_s26 = scalar_lea.sflag [#allocation6], %s4711_s25 }
  0x3d   : > { %s4723_s27 = scalar_lea.vmem [#allocation5], %s3168_s5 }
  0x3e   : > { %4544 = dma.done.wait (%p4650_p8), %s187_s26, 128  }
  0x3f   : > { %4546 = vsyncadd (%p4650_p8), %s187_s26, 4294967168  ;;  %v4579_v0 = vmov 1   ;;  %v219_v1 = vld [vmem:[%s4723_s27] sm:$0xff]  ;;  %v8421_v2 = vmov 0   ;;  %v4581_v5 = vmov 2   ;;  %v332_v8 = vlaneseq  ;;  %s3169_s21 = sshll.u32 %s4711_s25, 7 }
  0x40   : > { %4109 = vset.pattern.permute.xlu1 %v4579_v0  ;;  %220 = vxpose.xlu0.b32.start.end [1/1] (short) %v219_v1, 128  ;;  %v8419_v15 = vmov 1.0|1.0   ;;  %v217_v43 = vld [vmem:[%s4715_s20] sm:$0xff]  ;;  %s8322_s28 = scalar_lea.vmem [#allocation7], %s3169_s21  ;;  %s3766_s29 = sshll.u32 %s4565_s12, 11 }
  0x41   : > { %v4740_v10 = vshrl.u32 %v332_v8, 7  ;;  %v4744_v13 = vand.u32 127, %v332_v8  ;;  %s3050_s3 = sshll.u32 %s8322_s28, 4  ;;  %s8357_s15 = scalar_lea.hbm %s8412_s2, %s3766_s29  ;;  %s8359_s3 = int_to_ptr.vmem [resolvable:$true] %s3050_s3 }
  0x42   : > { %s3036_s12 = scalar_lea.sflag [#allocation4], %s4711_s25  ;;  %s4489_s16 = scalar_lea.vmem %s8359_s3, 2048 }
  0x43   : > { %v679_v11 = vadd.s32 112, %v4740_v10  ;;  %v680_v12 = vadd.s32 120, %v4740_v10  ;;  %8764 = vst [vmem:[#allocation11_spill] sm:$0xff] %v4744_v13  ;;  %v677_v16 = vadd.s32 96, %v4740_v10  ;;  %v678_v17 = vadd.s32 104, %v4740_v10  ;;  %p4490_p8 = scmp.ne.s32.totalorder %s8359_s3, %s4489_s16  ;;  %s4585_s30 = smov [#allocation7]  }
  0x44   : > { %v675_v19 = vadd.s32 80, %v4740_v10  ;;  %v676_v20 = vadd.s32 88, %v4740_v10  ;;  %v673_v22 = vadd.s32 64, %v4740_v10  ;;  %v674_v23 = vadd.s32 72, %v4740_v10  ;;  %s4493_s4 = sshll.u32 %s4585_s30, 4  ;;  %s4494_s4 = int_to_ptr.vmem [resolvable:$false] %s4493_s4 }
  0x45   : > { %vm697_vm0 = vcmp.le.s32.totalorder %v679_v11, %v4744_v13  ;;  %vm698_vm1 = vcmp.le.s32.totalorder %v680_v12, %v4744_v13  ;;  %vm695_vm3 = vcmp.le.s32.totalorder %v677_v16, %v4744_v13  ;;  %vm696_vm4 = vcmp.le.s32.totalorder %v678_v17, %v4744_v13  ;;  %p4491_p0 = pnand %p4490_p8, %p4654_p9  ;;  %s4495_s6 = scalar_lea.vmem %s4494_s4, 4096 }
  0x46   : > { %vm3202_vm2 = vmpackc.low %vm698_vm1, %vm697_vm0  ;;  %vm693_vm6 = vcmp.le.s32.totalorder %v675_v19, %v4744_v13  ;;  %vm694_vm7 = vcmp.le.s32.totalorder %v676_v20, %v4744_v13  ;;  %vm691_vm9 = vcmp.le.s32.totalorder %v673_v22, %v4744_v13  ;;  %vm692_vm10 = vcmp.le.s32.totalorder %v674_v23, %v4744_v13  ;;  %p4496_p5 = scmp.lt.s32.totalorder %s8359_s3, %s4494_s4  ;;  %p4497_p6 = scmp.lt.s32.totalorder %s4495_s6, %s4489_s16 }
  0x47   : > { %3999 = vmatprep.subr.msk.bf16.mxu0 %vm3202_vm2, %v8419_v15  ;;  %vm3204_vm5 = vmpackc.low %vm696_vm4, %vm695_vm3  ;;  %v671_v25 = vadd.s32 48, %v4740_v10  ;;  %v672_v26 = vadd.s32 56, %v4740_v10  ;;  %v669_v28 = vadd.s32 32, %v4740_v10  ;;  %v670_v29 = vadd.s32 40, %v4740_v10  ;;  %p4492_p2 = pneg %p4491_p0 }
  0x48   : > { %4000 = vmatpush3.bf16.msk.msra.mxu0 %vm3202_vm2, %v8419_v15  ;;  %vm3206_vm8 = vmpackc.low %vm694_vm7, %vm693_vm6  ;;  %v667_v31 = vadd.s32 16, %v4740_v10  ;;  %v668_v32 = vadd.s32 24, %v4740_v10  ;;  %v666_v34 = vadd.s32 8, %v4740_v10  ;;  %v450_v40 = vsub.s32 1, %v4740_v10  ;;  %p4498_p4 = por %p4497_p6, %p4496_p5 }
  0x49   : > { %4001 = vmatprep.subr.msk.bf16.mxu0 %vm3204_vm5, %v8419_v15  ;;  %vm3208_vm11 = vmpackc.low %vm692_vm10, %vm691_vm9  ;;  %vm689_vm12 = vcmp.le.s32.totalorder %v671_v25, %v4744_v13  ;;  %vm690_vm13 = vcmp.le.s32.totalorder %v672_v26, %v4744_v13  ;;  %vm687_vm15 = vcmp.le.s32.totalorder %v669_v28, %v4744_v13  ;;  %vm688_vm0 = vcmp.le.s32.totalorder %v670_v29, %v4744_v13 }
  0x4a   : > { %vm3210_vm14 = vmpackc.low %vm690_vm13, %vm689_vm12  ;;  %vm685_vm2 = vcmp.le.s32.totalorder %v667_v31, %v4744_v13  ;;  %vm686_vm3 = vcmp.le.s32.totalorder %v668_v32, %v4744_v13  ;;  %vm684_vm6 = vcmp.le.s32.totalorder %v666_v34, %v4744_v13  ;;  %v334_v41 = vsub.s32 0, %v4740_v10  ;;  %p4499_p7 = pnand %p4498_p4, %p4492_p2 }
  0x4b   : > { %vm3212_vm1 = vmpackc.low %vm688_vm0, %vm687_vm15  ;;  %v566_v44 = vsub.s32 2, %v4740_v10  ;;  %v4871_v45 = vrot.slane %v217_v43, %v450_v40 }
  0x4c   : > { %4002 = vmatpush3.bf16.msk.msra.mxu0 %vm3204_vm5, %v8419_v15  ;;  %vm3214_vm4 = vmpackc.low %vm686_vm3, %vm685_vm2  ;;  %vm683_vm5 = vcmp.le.s32.totalorder %v4740_v10, %v4744_v13  ;;  %v4873_v46 = vrot.slane %v217_v43, %v334_v41 }
  0x4d   : > { %4003 = vmatprep.subr.msk.bf16.mxu0 %vm3206_vm8, %v8419_v15  ;;  %vm3216_vm7 = vmpackc.low %vm684_vm6, %vm683_vm5  ;;  %v4875_v49 = vrot.slane %v217_v43, %v566_v44 }
  0x50   : > { %4004 = vmatpush3.bf16.msk.msra.mxu0 %vm3206_vm8, %v8419_v15 }
  0x51   : > { %4005 = vmatprep.subr.msk.bf16.mxu0 %vm3208_vm11, %v8419_v15 }
  0x54   : > { %4006 = vmatpush3.bf16.msk.msra.mxu0 %vm3208_vm11, %v8419_v15 }
  0x55   : > { %4007 = vmatprep.subr.msk.bf16.mxu0 %vm3210_vm14, %v8419_v15 }
  0x58   : > { %4008 = vmatpush3.bf16.msk.msra.mxu0 %vm3210_vm14, %v8419_v15 }
  0x59   : > { %4009 = vmatprep.subr.msk.bf16.mxu0 %vm3212_vm1, %v8419_v15 }
  0x5c   : > { %4010 = vmatpush3.bf16.msk.msra.mxu0 %vm3212_vm1, %v8419_v15 }
  0x5d   : > { %4011 = vmatprep.subr.msk.bf16.mxu0 %vm3214_vm4, %v8419_v15 }
  0x60   : > { %4012 = vmatpush3.bf16.msk.msra.mxu0 %vm3214_vm4, %v8419_v15 }
  0x61   : > { %4013 = vmatprep.subr.msk.bf16.mxu0 %vm3216_vm7, %v8419_v15 }
  0x64   : > { %4014 = vmatpush3.bf16.msk.msra.mxu0 %vm3216_vm7, %v8419_v15 }
  0x69   : > { %4108 = vset.pattern.permute.xlu0 %v8421_v2 }
  0xbc   : > { %v236_v3 = vpop.trf.xlu0 }
  0xbd   : > { %385 = vperm.xlu1 %4109, %v236_v3   ;;  %254 = vperm.xlu0 %4108, %v236_v3  }
  0xc0   : > { %v237_v4 = vpop.trf.xlu0 }
  0xc1   : > { %4110 = vset.pattern.permute.xlu1 %v4581_v5  ;;  %4137 = vset.pattern.permute.xlu0 %v4581_v5 }
  0xc2   : > { %501 = vperm.xlu1 %4110, %v236_v3  }
  0xc4   : > { %v238_v6 = vpop.trf.xlu0 }
  0xc6   : > { %4111 = vset.pattern.permute.xlu1 %v8421_v2 }
  0xc7   : > { %259 = vperm.xlu1 %4111, %v237_v4  }
  0xc8   : > { %v4735_v7 = vpop.trf.xlu0 }
  0xcb   : > { %4112 = vset.pattern.permute.xlu1 %v4579_v0 }
  0xcc   : > { %389 = vperm.xlu1 %4112, %v237_v4   ;;  %v4738_v9 = vpop.trf.xlu0 }
  0xd0   : > { %4113 = vset.pattern.permute.xlu1 %v4581_v5  ;;  %v4747_v14 = vpop.trf.xlu0 }
  0xd1   : > { %505 = vperm.xlu1 %4113, %v237_v4  }
  0xd4   : > { %v4754_v18 = vpop.trf.xlu0 }
  0xd5   : > { %4114 = vset.pattern.permute.xlu1 %v8421_v2 }
  0xd6   : > { %264 = vperm.xlu1 %4114, %v238_v6  }
  0xd8   : > { %v4763_v21 = vpop.trf.xlu0 }
  0xda   : > { %4115 = vset.pattern.permute.xlu1 %v4579_v0 }
  0xdb   : > { %393 = vperm.xlu1 %4115, %v238_v6  }
  0xdc   : > { %v4772_v24 = vpop.trf.xlu0 }
  0xdf   : > { %4116 = vset.pattern.permute.xlu1 %v4581_v5 }
  0xe0   : > { %509 = vperm.xlu1 %4116, %v238_v6   ;;  %v4781_v27 = vpop.trf.xlu0 }
  0xe1   : > { %537 = vperm.xlu0 %4137, %v4781_v27  }
  0xe4   : > { %4117 = vset.pattern.permute.xlu1 %v8421_v2  ;;  %v4791_v30 = vpop.trf.xlu0 }
  0xe5   : > { %269 = vperm.xlu1 %4117, %v4735_v7   ;;  %4138 = vset.pattern.permute.xlu0 %v8421_v2 }
  0xe6   : > { %304 = vperm.xlu0 %4138, %v4791_v30  }
  0xe8   : > { %v4802_v33 = vpop.trf.xlu0 }
  0xe9   : > { %4118 = vset.pattern.permute.xlu1 %v4579_v0 }
  0xea   : > { %397 = vperm.xlu1 %4118, %v4735_v7  }
  0xec   : > { %v4811_v35 = vpop.trf.xlu0 }
  0xed   : > { %314 = vperm.xlu0 %4138, %v4811_v35  }
  0xee   : > { %4119 = vset.pattern.permute.xlu1 %v4581_v5 }
  0xef   : > { %513 = vperm.xlu1 %4119, %v4735_v7  }
  0xf0   : > { %v4825_v36 = vpop.trf.xlu0 }
  0xf1   : > { %4142 = vset.pattern.permute.xlu0 %v4579_v0 }
  0xf2   : > { %425 = vperm.xlu0 %4142, %v4791_v30  }
  0xf3   : > { %4120 = vset.pattern.permute.xlu1 %v8421_v2 }
  0xf4   : > { %274 = vperm.xlu1 %4120, %v4738_v9   ;;  %v4831_v37 = vpop.trf.xlu0 }
  0xf6   : > { %437 = vperm.xlu0 %4142, %v4825_v36  }
  0xf8   : > { %4121 = vset.pattern.permute.xlu1 %v4579_v0  ;;  %v4839_v38 = vpop.trf.xlu0 }
  0xf9   : > { %401 = vperm.xlu1 %4121, %v4738_v9  }
  0xfa   : > { %441 = vperm.xlu0 %4142, %v4831_v37  }
  0xfd   : > { %4122 = vset.pattern.permute.xlu1 %v4581_v5 }
  0xfe   : > { %517 = vperm.xlu1 %4122, %v4738_v9   ;;  %4147 = vset.pattern.permute.xlu0 %v4581_v5 }
  0xff   : > { %549 = vperm.xlu0 %4147, %v4811_v35  }
 0x102   : > { %4123 = vset.pattern.permute.xlu1 %v8421_v2 }
 0x103   : > { %279 = vperm.xlu1 %4123, %v4747_v14   ;;  %561 = vperm.xlu0 %4147, %v4839_v38  }
 0x107   : > { %4124 = vset.pattern.permute.xlu1 %v4579_v0 }
 0x108   : > { %405 = vperm.xlu1 %4124, %v4747_v14  }
 0x10c   : > { %4125 = vset.pattern.permute.xlu1 %v4581_v5 }
 0x10d   : > { %521 = vperm.xlu1 %4125, %v4747_v14  }
 0x111   : > { %4126 = vset.pattern.permute.xlu1 %v8421_v2 }
 0x112   : > { %284 = vperm.xlu1 %4126, %v4754_v18  }
 0x116   : > { %4127 = vset.pattern.permute.xlu1 %v4579_v0 }
 0x117   : > { %409 = vperm.xlu1 %4127, %v4754_v18  }
 0x11b   : > { %4128 = vset.pattern.permute.xlu1 %v4581_v5 }
 0x11c   : > { %525 = vperm.xlu1 %4128, %v4754_v18  }
 0x120   : > { %4129 = vset.pattern.permute.xlu1 %v8421_v2 }
 0x121   : > { %289 = vperm.xlu1 %4129, %v4763_v21  }
 0x125   : > { %4130 = vset.pattern.permute.xlu1 %v4579_v0 }
 0x126   : > { %413 = vperm.xlu1 %4130, %v4763_v21  }
 0x12a   : > { %4131 = vset.pattern.permute.xlu1 %v4581_v5 }
 0x12b   : > { %529 = vperm.xlu1 %4131, %v4763_v21  }
 0x12f   : > { %4132 = vset.pattern.permute.xlu1 %v8421_v2 }
 0x130   : > { %294 = vperm.xlu1 %4132, %v4772_v24  }
 0x134   : > { %4133 = vset.pattern.permute.xlu1 %v4579_v0 }
 0x135   : > { %417 = vperm.xlu1 %4133, %v4772_v24  }
 0x138   : > { %v386_v39 = vpop.permute.xlu1 %385  ;;  %v255_v47 = vpop.permute.xlu0 %254 }
 0x139   : > { %4134 = vset.pattern.permute.xlu1 %v4581_v5  ;;  %v452_v50 = vsub.f32 %v386_v39, %v4871_v45  ;;  %v336_v51 = vsub.f32 %v255_v47, %v4873_v46 }
 0x13a   : > { %533 = vperm.xlu1 %4134, %v4772_v24  }
 0x13b   : > { %v468_v55 = vmul.f32 %v452_v50, %v452_v50  ;;  %v352_v56 = vmul.f32 %v336_v51, %v336_v51 }
 0x13d   : > { %v502_v42 = vpop.permute.xlu1 %501  ;;  %v484_v61 = vadd.f32 %v468_v55, %v352_v56 }
 0x13e   : > { %4135 = vset.pattern.permute.xlu1 %v8421_v2  ;;  %v568_v52 = vsub.f32 %v502_v42, %v4875_v49 }
 0x13f   : > { %299 = vperm.xlu1 %4135, %v4781_v27  }
 0x140   : > { %v584_v58 = vmul.f32 %v568_v52, %v568_v52 }
 0x142   : > { %v260_v48 = vpop.permute.xlu1 %259  ;;  %v4889_v1 = vadd.f32 %v584_v58, %v484_v61 }
 0x143   : > { %4136 = vset.pattern.permute.xlu1 %v4579_v0  ;;  %v337_v57 = vsub.f32 %v260_v48, %v4873_v46 }
 0x144   : > { %421 = vperm.xlu1 %4136, %v4781_v27   ;;  %8765 = vst [vmem:[#allocation12_spill] sm:$0xff] %v4889_v1  ;;  %vm8413_vm8 = vcmp.lt.f32.partialorder %v4889_v1, 0.09 }
 0x145   : > { %v353_v62 = vmul.f32 %v337_v57, %v337_v57 }
 0x147   : > { %v390_v53 = vpop.permute.xlu1 %389 }
 0x148   : > { %v453_v54 = vsub.f32 %v390_v53, %v4871_v45  ;;  %4139 = vset.pattern.permute.xlu1 %v8421_v2 }
 0x149   : > { %309 = vperm.xlu1 %4139, %v4802_v33  }
 0x14a   : > { %v469_v59 = vmul.f32 %v453_v54, %v453_v54 }
 0x14c   : > { %v506_v60 = vpop.permute.xlu1 %505  ;;  %v485_v3 = vadd.f32 %v469_v59, %v353_v62 }
 0x14d   : > { %v569_v63 = vsub.f32 %v506_v60, %v4875_v49  ;;  %4140 = vset.pattern.permute.xlu1 %v4579_v0 }
 0x14e   : > { %429 = vperm.xlu1 %4140, %v4802_v33  }
 0x14f   : > { %v585_v4 = vmul.f32 %v569_v63, %v569_v63 }
 0x151   : > { %v4891_v6 = vadd.f32 %v585_v4, %v485_v3  ;;  %v265_v7 = vpop.permute.xlu1 %264 }
 0x152   : > { %4141 = vset.pattern.permute.xlu1 %v4581_v5  ;;  %v338_v12 = vsub.f32 %v265_v7, %v4873_v46 }
 0x153   : > { %8766 = vst [vmem:[#allocation13_spill] sm:$0xff] %v4891_v6  ;;  %vm8414_vm9 = vcmp.lt.f32.partialorder %v4891_v6, 0.09  ;;  %541 = vperm.xlu1 %4141, %v4791_v30  }
 0x154   : > { %vm3218_vm10 = vmpackc.low %vm8414_vm9, %vm8413_vm8  ;;  %v354_v20 = vmul.f32 %v338_v12, %v338_v12 }
 0x155   : > { %4015 = vmatprep.mubr.msk.bf16.mxu0 %vm3218_vm10, %v8419_v15 }
 0x156   : > { %v394_v8 = vpop.permute.xlu1 %393 }
 0x157   : > { %545 = vperm.xlu1 %4141, %v4802_v33   ;;  %v454_v11 = vsub.f32 %v394_v8, %v4871_v45 }
 0x159   : > { %v470_v18 = vmul.f32 %v454_v11, %v454_v11 }
 0x15b   : > { %v510_v9 = vpop.permute.xlu1 %509  ;;  %4143 = vset.pattern.permute.xlu1 %v8421_v2  ;;  %v486_v24 = vadd.f32 %v470_v18, %v354_v20 }
 0x15c   : > { %319 = vperm.xlu1 %4143, %v4825_v36   ;;  %v570_v14 = vsub.f32 %v510_v9, %v4875_v49 }
 0x15e   : > { %v586_v21 = vmul.f32 %v570_v14, %v570_v14 }
 0x160   : > { %v270_v10 = vpop.permute.xlu1 %269  ;;  %4144 = vset.pattern.permute.xlu1 %v4579_v0  ;;  %v4916_v27 = vadd.f32 %v586_v21, %v486_v24 }
 0x161   : > { %433 = vperm.xlu1 %4144, %v4811_v35   ;;  %v339_v19 = vsub.f32 %v270_v10, %v4873_v46 }
 0x162   : > { %8767 = vst [vmem:[#allocation14_spill] sm:$0xff] %v4916_v27  ;;  %vm8415_vm11 = vcmp.lt.f32.partialorder %v4916_v27, 0.09 }
 0x163   : > { %v355_v25 = vmul.f32 %v339_v19, %v339_v19 }
 0x165   : > { %v398_v16 = vpop.permute.xlu1 %397  ;;  %4145 = vset.pattern.permute.xlu1 %v8421_v2 }
 0x166   : > { %v455_v17 = vsub.f32 %v398_v16, %v4871_v45  ;;  %324 = vperm.xlu1 %4145, %v4831_v37  }
 0x168   : > { %v471_v22 = vmul.f32 %v455_v17, %v455_v17 }
 0x16a   : > { %v514_v23 = vpop.permute.xlu1 %513  ;;  %329 = vperm.xlu1 %4145, %v4839_v38   ;;  %v487_v28 = vadd.f32 %v471_v22, %v355_v25  ;;  %v538_v22 = vpop.permute.xlu0 %537 }
 0x16b   : > { %v571_v26 = vsub.f32 %v514_v23, %v4875_v49 }
 0x16d   : > { %v587_v29 = vmul.f32 %v571_v26, %v571_v26 }
 0x16e   : > { %4146 = vset.pattern.permute.xlu1 %v4579_v0 }
 0x16f   : > { %v4919_v30 = vadd.f32 %v587_v29, %v487_v28  ;;  %v275_v31 = vpop.permute.xlu1 %274  ;;  %445 = vperm.xlu1 %4146, %v4839_v38   ;;  %v305_v28 = vpop.permute.xlu0 %304 }
 0x170   : > { %v340_v35 = vsub.f32 %v275_v31, %v4873_v46 }
 0x171   : > { %8768 = vst [vmem:[#allocation15_spill] sm:$0xff] %v4919_v30  ;;  %vm8416_vm12 = vcmp.lt.f32.partialorder %v4919_v30, 0.09 }
 0x172   : > { %vm3220_vm13 = vmpackc.low %vm8416_vm12, %vm8415_vm11  ;;  %v356_v42 = vmul.f32 %v340_v35, %v340_v35 }
 0x173   : > { %4148 = vset.pattern.permute.xlu1 %v4581_v5  ;;  %4016 = vmatmul.mubr.msk.bf16.vlgmr.msra.gmra.mxu0 %vm3220_vm13, %v8419_v15 }
 0x174   : > { %v402_v32 = vpop.permute.xlu1 %401  ;;  %553 = vperm.xlu1 %4148, %v4825_v36  }
 0x175   : > { %v456_v34 = vsub.f32 %v402_v32, %v4871_v45 }
 0x177   : > { %v472_v41 = vmul.f32 %v456_v34, %v456_v34 }
 0x178   : > { %557 = vperm.xlu1 %4148, %v4831_v37  }
 0x179   : > { %v518_v0 = vpop.permute.xlu1 %517  ;;  %v488_v47 = vadd.f32 %v472_v41, %v356_v42 }
 0x17a   : > { %v572_v38 = vsub.f32 %v518_v0, %v4875_v49 }
 0x17c   : > { %v588_v43 = vmul.f32 %v572_v38, %v572_v38 }
 0x17e   : > { %v280_v33 = vpop.permute.xlu1 %279  ;;  %v4938_v50 = vadd.f32 %v588_v43, %v488_v47 }
 0x17f   : > { %v341_v5 = vsub.f32 %v280_v33, %v4873_v46  ;;  %v577_v33 = vsub.f32 %v538_v22, %v4875_v49 }
 0x180   : > { %8769 = vst [vmem:[#allocation16_spill] sm:$0xff] %v4938_v50  ;;  %vm8417_vm14 = vcmp.lt.f32.partialorder %v4938_v50, 0.09 }
 0x181   : > { %v357_v37 = vmul.f32 %v341_v5, %v341_v5  ;;  %v593_v5 = vmul.f32 %v577_v33, %v577_v33 }
 0x183   : > { %v406_v39 = vpop.permute.xlu1 %405 }
 0x184   : > { %v457_v40 = vsub.f32 %v406_v39, %v4871_v45 }
 0x186   : > { %v473_v44 = vmul.f32 %v457_v40, %v457_v40  ;;  %v315_v40 = vpop.permute.xlu0 %314 }
 0x188   : > { %v522_v36 = vpop.permute.xlu1 %521  ;;  %v489_v51 = vadd.f32 %v473_v44, %v357_v37 }
 0x189   : > { %v573_v48 = vsub.f32 %v522_v36, %v4875_v49 }
 0x18a   : > { %v426_v47 = vpop.permute.xlu0 %425 }
 0x18b   : > { %v589_v52 = vmul.f32 %v573_v48, %v573_v48  ;;  %v346_v48 = vsub.f32 %v305_v28, %v4873_v46 }
 0x18d   : > { %v4940_v53 = vadd.f32 %v589_v52, %v489_v51  ;;  %v285_v54 = vpop.permute.xlu1 %284  ;;  %v462_v51 = vsub.f32 %v426_v47, %v4871_v45 }
 0x18e   : > { %v342_v59 = vsub.f32 %v285_v54, %v4873_v46 }
 0x18f   : > { %8770 = vst [vmem:[#allocation17_spill] sm:$0xff] %v4940_v53  ;;  %vm8418_vm15 = vcmp.lt.f32.partialorder %v4940_v53, 0.09 }
 0x190   : > { %vm3222_vm0 = vmpackc.low %vm8418_vm15, %vm8417_vm14  ;;  %v358_v4 = vmul.f32 %v342_v59, %v342_v59 }
 0x191   : > { %4019 = vmatprep.mubr.msk.bf16.mxu0 %vm3222_vm0, %v8419_v15 }
 0x192   : > { %v410_v55 = vpop.permute.xlu1 %409 }
 0x193   : > { %v458_v58 = vsub.f32 %v410_v55, %v4871_v45  ;;  %v362_v55 = vmul.f32 %v346_v48, %v346_v48 }
 0x195   : > { %v474_v63 = vmul.f32 %v458_v58, %v458_v58 }
 0x197   : > { %v526_v56 = vpop.permute.xlu1 %525  ;;  %v490_v10 = vadd.f32 %v474_v63, %v358_v4 }
 0x198   : > { %v574_v60 = vsub.f32 %v526_v56, %v4875_v49  ;;  %v478_v56 = vmul.f32 %v462_v51, %v462_v51 }
 0x19a   : > { %v590_v7 = vmul.f32 %v574_v60, %v574_v60 }
 0x19c   : > { %v290_v57 = vpop.permute.xlu1 %289  ;;  %v4955_v14 = vadd.f32 %v590_v7, %v490_v10 }
 0x19d   : > { %v343_v3 = vsub.f32 %v290_v57, %v4873_v46 }
 0x19e   : > { %8771 = vst [vmem:[#allocation18_spill] sm:$0xff] %v4955_v14  ;;  %vm8467_vm1 = vcmp.lt.f32.partialorder %v4955_v14, 0.09 }
 0x19f   : > { %v359_v11 = vmul.f32 %v343_v3, %v343_v3 }
 0x1a1   : > { %v414_v61 = vpop.permute.xlu1 %413 }
 0x1a2   : > { %v459_v62 = vsub.f32 %v414_v61, %v4871_v45 }
 0x1a4   : > { %v475_v8 = vmul.f32 %v459_v62, %v459_v62  ;;  %v494_v62 = vadd.f32 %v478_v56, %v362_v55 }
 0x1a6   : > { %v530_v9 = vpop.permute.xlu1 %529  ;;  %v491_v16 = vadd.f32 %v475_v8, %v359_v11  ;;  %v438_v11 = vpop.permute.xlu0 %437 }
 0x1a7   : > { %v575_v12 = vsub.f32 %v530_v9, %v4875_v49 }
 0x1a9   : > { %v591_v17 = vmul.f32 %v575_v12, %v575_v12 }
 0x1ab   : > { %v4957_v18 = vadd.f32 %v591_v17, %v491_v16  ;;  %v295_v19 = vpop.permute.xlu1 %294  ;;  %v442_v17 = vpop.permute.xlu0 %441 }
 0x1ac   : > { %v344_v25 = vsub.f32 %v295_v19, %v4873_v46 }
 0x1ad   : > { %8772 = vst [vmem:[#allocation19_spill] sm:$0xff] %v4957_v18  ;;  %vm8495_vm2 = vcmp.lt.f32.partialorder %v4957_v18, 0.09 }
 0x1ae   : > { %vm3224_vm3 = vmpackc.low %vm8495_vm2, %vm8467_vm1  ;;  %v360_v0 = vmul.f32 %v344_v25, %v344_v25 }
 0x1af   : > { %4020 = vmatmul.mubr.msk.bf16.gmra.mxu0 %vm3224_vm3, %v8419_v15  ;;  %v550_v22 = vpop.permute.xlu0 %549 }
 0x1b0   : > { %v418_v20 = vpop.permute.xlu1 %417 }
 0x1b1   : > { %v460_v23 = vsub.f32 %v418_v20, %v4871_v45 }
 0x1b3   : > { %v476_v29 = vmul.f32 %v460_v23, %v460_v23 }
 0x1b5   : > { %v534_v21 = vpop.permute.xlu1 %533  ;;  %v492_v38 = vadd.f32 %v476_v29, %v360_v0  ;;  %v580_v29 = vsub.f32 %v550_v22, %v4875_v49  ;;  %v466_v0 = vsub.f32 %v442_v17, %v4871_v45 }
 0x1b6   : > { %v576_v26 = vsub.f32 %v534_v21, %v4875_v49  ;;  %v348_v21 = vsub.f32 %v315_v40, %v4873_v46 }
 0x1b8   : > { %v592_v34 = vmul.f32 %v576_v26, %v576_v26  ;;  %v364_v28 = vmul.f32 %v348_v21, %v348_v21 }
 0x1ba   : > { %v300_v24 = vpop.permute.xlu1 %299  ;;  %v4972_v42 = vadd.f32 %v592_v34, %v492_v38  ;;  %v562_v34 = vpop.permute.xlu0 %561 }
 0x1bb   : > { %v345_v31 = vsub.f32 %v300_v24, %v4873_v46  ;;  %v465_v24 = vsub.f32 %v438_v11, %v4871_v45 }
 0x1bc   : > { %8773 = vst [vmem:[#allocation20_spill] sm:$0xff] %v4972_v42  ;;  %vm8496_vm4 = vcmp.lt.f32.partialorder %v4972_v42, 0.09 }
 0x1bd   : > { %v361_v39 = vmul.f32 %v345_v31, %v345_v31 }
 0x1bf   : > { %v422_v32 = vpop.permute.xlu1 %421 }
 0x1c0   : > { %v461_v35 = vsub.f32 %v422_v32, %v4871_v45 }
 0x1c2   : > { %v477_v41 = vmul.f32 %v461_v35, %v461_v35  ;;  %v481_v35 = vmul.f32 %v465_v24, %v465_v24 }
 0x1c4   : > { %v493_v43 = vadd.f32 %v477_v41, %v361_v39  ;;  %v310_v44 = vpop.permute.xlu1 %309  ;;  %v596_v41 = vmul.f32 %v580_v29, %v580_v29 }
 0x1c5   : > { %v347_v57 = vsub.f32 %v310_v44, %v4873_v46  ;;  %v583_v44 = vsub.f32 %v562_v34, %v4875_v49 }
 0x1c6   : > { %v4974_v36 = vadd.f32 %v593_v5, %v493_v43 }
 0x1c7   : > { %v363_v63 = vmul.f32 %v347_v57, %v347_v57  ;;  %v599_v56 = vmul.f32 %v583_v44, %v583_v44 }
 0x1c8   : > { %8774 = vst [vmem:[#allocation21_spill] sm:$0xff] %v4974_v36  ;;  %vm8504_vm5 = vcmp.lt.f32.partialorder %v4974_v36, 0.09 }
 0x1c9   : > { %v430_v37 = vpop.permute.xlu1 %429  ;;  %vm3226_vm6 = vmpackc.low %vm8504_vm5, %vm8496_vm4 }
 0x1ca   : > { %4023 = vmatprep.mubr.msk.bf16.mxu0 %vm3226_vm6, %v8419_v15  ;;  %v463_v52 = vsub.f32 %v430_v37, %v4871_v45  ;;  %v482_v37 = vmul.f32 %v466_v0, %v466_v0 }
 0x1cc   : > { %v479_v59 = vmul.f32 %v463_v52, %v463_v52 }
 0x1ce   : > { %v542_v54 = vpop.permute.xlu1 %541  ;;  %v495_v4 = vadd.f32 %v479_v59, %v363_v63 }
 0x1cf   : > { %v578_v58 = vsub.f32 %v542_v54, %v4875_v49 }
 0x1d1   : > { %v594_v60 = vmul.f32 %v578_v58, %v578_v58 }
 0x1d2   : > { %v546_v61 = vpop.permute.xlu1 %545 }
 0x1d3   : > { %v579_v3 = vsub.f32 %v546_v61, %v4875_v49  ;;  %v4989_v7 = vadd.f32 %v594_v60, %v494_v62 }
 0x1d5   : > { %8775 = vst [vmem:[#allocation22_spill] sm:$0xff] %v4989_v7  ;;  %v595_v8 = vmul.f32 %v579_v3, %v579_v3  ;;  %vm8508_vm7 = vcmp.lt.f32.partialorder %v4989_v7, 0.09 }
 0x1d7   : > { %v4991_v9 = vadd.f32 %v595_v8, %v495_v4  ;;  %v320_v10 = vpop.permute.xlu1 %319  ;;  %v8485_v4 = vmov 0.0  }
 0x1d8   : > { %v349_v25 = vsub.f32 %v320_v10, %v4873_v46 }
 0x1d9   : > { %8776 = vst [vmem:[#allocation23_spill] sm:$0xff] %v4991_v9  ;;  %vm8509_vm10 = vcmp.lt.f32.partialorder %v4991_v9, 0.09 }
 0x1da   : > { %vm3228_vm13 = vmpackc.low %vm8509_vm10, %vm8508_vm7  ;;  %v365_v38 = vmul.f32 %v349_v25, %v349_v25 }
 0x1db   : > { %4024 = vmatmul.mubr.msk.bf16.gmra.mxu0 %vm3228_vm13, %v8419_v15 }
 0x1dc   : > { %v434_v12 = vpop.permute.xlu1 %433  ;;  %v497_v51 = vadd.f32 %v481_v35, %v365_v38 }
 0x1dd   : > { %v464_v19 = vsub.f32 %v434_v12, %v4871_v45 }
 0x1df   : > { %v480_v23 = vmul.f32 %v464_v19, %v464_v19 }
 0x1e1   : > { %v325_v16 = vpop.permute.xlu1 %324  ;;  %v496_v33 = vadd.f32 %v480_v23, %v364_v28 }
 0x1e2   : > { %v350_v39 = vsub.f32 %v325_v16, %v4873_v46 }
 0x1e3   : > { %v5011_v48 = vadd.f32 %v596_v41, %v496_v33 }
 0x1e4   : > { %v366_v52 = vmul.f32 %v350_v39, %v350_v39 }
 0x1e5   : > { %v330_v20 = vpop.permute.xlu1 %329  ;;  %8777 = vst [vmem:[#allocation24_spill] sm:$0xff] %v5011_v48  ;;  %vm8507_vm0 = vcmp.lt.f32.partialorder %v5011_v48, 0.09 }
 0x1e6   : > { %v351_v32 = vsub.f32 %v330_v20, %v4873_v46  ;;  %v498_v58 = vadd.f32 %v482_v37, %v366_v52 }
 0x1e8   : > { %v367_v43 = vmul.f32 %v351_v32, %v351_v32 }
 0x1ea   : > { %v446_v26 = vpop.permute.xlu1 %445 }
 0x1eb   : > { %v467_v31 = vsub.f32 %v446_v26, %v4871_v45 }
 0x1ed   : > { %v483_v40 = vmul.f32 %v467_v31, %v467_v31 }
 0x1ef   : > { %v554_v5 = vpop.permute.xlu1 %553  ;;  %v499_v45 = vadd.f32 %v483_v40, %v367_v43 }
 0x1f0   : > { %v581_v47 = vsub.f32 %v554_v5, %v4875_v49 }
 0x1f1   : > { %v5017_v59 = vadd.f32 %v599_v56, %v499_v45 }
 0x1f2   : > { %v597_v54 = vmul.f32 %v581_v47, %v581_v47 }
 0x1f3   : > { %v558_v55 = vpop.permute.xlu1 %557  ;;  %8779 = vst [vmem:[#allocation26_spill] sm:$0xff] %v5017_v59  ;;  %vm8510_vm13 = vcmp.lt.f32.partialorder %v5017_v59, 0.09 }
 0x1f4   : > { %v5013_v57 = vadd.f32 %v597_v54, %v497_v51  ;;  %v582_v46 = vsub.f32 %v558_v55, %v4875_v49  ;;  %v4583_v49 = vmov 127  }
 0x1f5   : > { %4149 = vset.pattern.permute.xlu0 %v4583_v49  ;;  %4150 = vset.pattern.permute.xlu1 %v4583_v49 }
 0x1f6   : > { %8778 = vst [vmem:[#allocation25_spill] sm:$0xff] %v5013_v57  ;;  %vm8505_vm3 = vcmp.lt.f32.partialorder %v5013_v57, 0.09  ;;  %v598_v60 = vmul.f32 %v582_v46, %v582_v46 }
 0x1f7   : > { %vm3230_vm6 = vmpackc.low %vm8505_vm3, %vm8507_vm0 }
 0x1f8   : > { %v5024_v61 = vadd.f32 %v598_v60, %v498_v58  ;;  %4027 = vmatprep.mubr.msk.bf16.mxu0 %vm3230_vm6, %v8419_v15 }
 0x1fa   : > { %8780 = vst [vmem:[#allocation27_spill] sm:$0xff] %v5024_v61  ;;  %vm8512_vm8 = vcmp.lt.f32.partialorder %v5024_v61, 0.09 }
 0x1fb   : > { %vm3232_vm9 = vmpackc.low %vm8510_vm13, %vm8512_vm8 }
 0x1fc   : > { %4028 = vmatmul.mubr.msk.bf16.gmra.mxu0 %vm3232_vm9, %v8419_v15 }
 0x233   : > { %v5034_v62 = vpop.f32.mrf.mxu0 }
 0x234   : > { %vm1074_vm11 = vcmp.gt.f32.partialorder %v5034_v62, 1.0  ;;  %vm1274_vm6 = vcmp.gt.f32.partialorder %v5034_v62, 2.0  ;;  %vm1474_vm12 = vcmp.gt.f32.partialorder %v5034_v62, 3.0 }
 0x235   : > { %v5038_v63 = vpop.f32.mrf.mxu0  ;;  %v5044_v8 = vsel %vm1074_vm11, 1.0, %v8485_v4  ;;  %v5047_v10 = vsel %vm1274_vm6, 2.0, %v8485_v4  ;;  %v5052_v11 = vsel %vm1474_vm12, 3.0, %v8485_v4 }
 0x236   : > { %vm1472_vm15 = vcmp.gt.f32.partialorder %v5038_v63, 3.0  ;;  %vm1072_vm6 = vcmp.gt.f32.partialorder %v5038_v63, 1.0  ;;  %vm1272_vm12 = vcmp.gt.f32.partialorder %v5038_v63, 2.0 }
 0x237   : > { %v5041_v3 = vpop.f32.mrf.mxu0  ;;  %v5078_v23 = vsel %vm1472_vm15, 3.0, %v8485_v4  ;;  %v5084_v25 = vsel %vm1072_vm6, 1.0, %v8485_v4  ;;  %v5095_v31 = vsel %vm1272_vm12, 2.0, %v8485_v4  ;;  %vm1874_vm15 = vcmp.gt.f32.partialorder %v5034_v62, 5.0 }
 0x238   : > { %vm1075_vm9 = vcmp.gt.f32.partialorder %v5041_v3, 1.0  ;;  %vm1275_vm14 = vcmp.gt.f32.partialorder %v5041_v3, 2.0  ;;  %vm1475_vm11 = vcmp.gt.f32.partialorder %v5041_v3, 3.0  ;;  %vm1875_vm6 = vcmp.gt.f32.partialorder %v5041_v3, 5.0 }
 0x239   : > { %v5055_v12 = vpop.f32.mrf.mxu0  ;;  %v5058_v16 = vsel %vm1075_vm9, 1.0, %v8485_v4  ;;  %v5061_v17 = vsel %vm1275_vm14, 2.0, %v8485_v4  ;;  %v5070_v21 = vsel %vm1475_vm11, 3.0, %v8485_v4  ;;  %v5106_v33 = vsel %vm1874_vm15, 5.0, %v8485_v4 }
 0x23a   : > { %vm1473_vm14 = vcmp.gt.f32.partialorder %v5055_v12, 3.0  ;;  %vm1073_vm9 = vcmp.gt.f32.partialorder %v5055_v12, 1.0  ;;  %vm1273_vm11 = vcmp.gt.f32.partialorder %v5055_v12, 2.0  ;;  %8781 = vst [vmem:[#allocation28_spill] sm:$0xff] %v5106_v33  ;;  %v5109_v34 = vsel %vm1875_vm6, 5.0, %v8485_v4 }
 0x23b   : > { %v5081_v24 = vsel %vm1473_vm14, 3.0, %v8485_v4  ;;  %v5087_v26 = vsel %vm1073_vm9, 1.0, %v8485_v4  ;;  %v5098_v32 = vsel %vm1273_vm11, 2.0, %v8485_v4  ;;  %vm1674_vm14 = vcmp.gt.f32.partialorder %v5034_v62, 4.0  ;;  %8782 = vst [vmem:[#allocation29_spill] sm:$0xff] %v5109_v34 }
 0x23c   : > { %vm1675_vm12 = vcmp.gt.f32.partialorder %v5041_v3, 4.0  ;;  %v5115_v38 = vsel %vm1674_vm14, 4.0, %v8485_v4  ;;  %vm2274_vm9 = vcmp.gt.f32.partialorder %v5034_v62, 7.0  ;;  %vm2275_vm11 = vcmp.gt.f32.partialorder %v5041_v3, 7.0 }
 0x23d   : > { %8783 = vst [vmem:[#allocation30_spill] sm:$0xff] %v5115_v38  ;;  %v5118_v39 = vsel %vm1675_vm12, 4.0, %v8485_v4  ;;  %v5125_v41 = vsel %vm2274_vm9, 7.0, %v8485_v4  ;;  %vm1872_vm15 = vcmp.gt.f32.partialorder %v5038_v63, 5.0  ;;  %v5129_v5 = vsel %vm2275_vm11, 7.0, %v8485_v4 }
 0x23e   : > { %8784 = vst [vmem:[#allocation31_spill] sm:$0xff] %v5118_v39  ;;  %8785 = vst [vmem:[#allocation32_spill] sm:$0xff] %v5125_v41  ;;  %vm1873_vm6 = vcmp.gt.f32.partialorder %v5055_v12, 5.0  ;;  %v5133_v43 = vsel %vm1872_vm15, 5.0, %v8485_v4  ;;  %vm2074_vm14 = vcmp.gt.f32.partialorder %v5034_v62, 6.0  ;;  %vm2075_vm12 = vcmp.gt.f32.partialorder %v5041_v3, 6.0 }
 0x23f   : > { %8786 = vst [vmem:[#allocation33_spill] sm:$0xff] %v5129_v5  ;;  %8787 = vst [vmem:[#allocation34_spill] sm:$0xff] %v5133_v43  ;;  %v5139_v47 = vsel %vm1873_vm6, 5.0, %v8485_v4  ;;  %v5143_v37 = vsel %vm2074_vm14, 6.0, %v8485_v4  ;;  %v5148_v52 = vsel %vm2075_vm12, 6.0, %v8485_v4  ;;  %vm1672_vm9 = vcmp.gt.f32.partialorder %v5038_v63, 4.0 }
 0x240   : > { %8788 = vst [vmem:[#allocation35_spill] sm:$0xff] %v5139_v47  ;;  %8789 = vst [vmem:[#allocation36_spill] sm:$0xff] %v5143_v37  ;;  %vm1673_vm11 = vcmp.gt.f32.partialorder %v5055_v12, 4.0  ;;  %v5155_v54 = vsel %vm1672_vm9, 4.0, %v8485_v4  ;;  %vm2272_vm15 = vcmp.gt.f32.partialorder %v5038_v63, 7.0  ;;  %vm2273_vm6 = vcmp.gt.f32.partialorder %v5055_v12, 7.0 }
 0x241   : > { %8790 = vst [vmem:[#allocation37_spill] sm:$0xff] %v5148_v52  ;;  %8791 = vst [vmem:[#allocation38_spill] sm:$0xff] %v5155_v54  ;;  %v5158_v55 = vsel %vm1673_vm11, 4.0, %v8485_v4  ;;  %vm2072_vm14 = vcmp.gt.f32.partialorder %v5038_v63, 6.0  ;;  %v5166_v46 = vsel %vm2272_vm15, 7.0, %v8485_v4  ;;  %v5169_v58 = vsel %vm2273_vm6, 7.0, %v8485_v4 }
 0x242   : > { %8792 = vst [vmem:[#allocation39_spill] sm:$0xff] %v5158_v55  ;;  %8793 = vst [vmem:[#allocation40_spill] sm:$0xff] %v5166_v46  ;;  %vm2073_vm12 = vcmp.gt.f32.partialorder %v5055_v12, 6.0  ;;  %v5175_v49 = vsel %vm2072_vm14, 6.0, %v8485_v4  ;;  %v8814_v52 = vmov 0  }
 0x243   : > { %8794 = vst [vmem:[#allocation41_spill] sm:$0xff] %v5169_v58  ;;  %8795 = vst [vmem:[#allocation42_spill] sm:$0xff] %v5175_v49  ;;  %v5178_v15 = vsel %vm2073_vm12, 6.0, %v8485_v4 }
 0x244   : > { %8796 = vst [vmem:[#allocation43_spill] sm:$0xff] %v5178_v15 }
 0x26f   : > { %v5182_v45 = vpop.f32.mrf.mxu0 }
 0x270   : > { %vm1078_vm9 = vcmp.gt.f32.partialorder %v5182_v45, 1.0  ;;  %vm1278_vm11 = vcmp.gt.f32.partialorder %v5182_v45, 2.0  ;;  %vm1478_vm15 = vcmp.gt.f32.partialorder %v5182_v45, 3.0 }
 0x271   : > { %v5186_v51 = vpop.f32.mrf.mxu0  ;;  %v5192_v44 = vsel %vm1078_vm9, 1.0, %v8485_v4  ;;  %v5195_v40 = vsel %vm1278_vm11, 2.0, %v8485_v4  ;;  %v5200_v56 = vsel %vm1478_vm15, 3.0, %v8485_v4 }
 0x272   : > { %vm1476_vm12 = vcmp.gt.f32.partialorder %v5186_v51, 3.0  ;;  %vm1076_vm11 = vcmp.gt.f32.partialorder %v5186_v51, 1.0  ;;  %vm1276_vm15 = vcmp.gt.f32.partialorder %v5186_v51, 2.0 }
 0x273   : > { %v5189_v60 = vpop.f32.mrf.mxu0  ;;  %v5226_v2 = vsel %vm1476_vm12, 3.0, %v8485_v4  ;;  %v5232_v22 = vsel %vm1076_vm11, 1.0, %v8485_v4  ;;  %v5243_v27 = vsel %vm1276_vm15, 2.0, %v8485_v4  ;;  %vm1878_vm12 = vcmp.gt.f32.partialorder %v5182_v45, 5.0 }
 0x274   : > { %vm1079_vm6 = vcmp.gt.f32.partialorder %v5189_v60, 1.0  ;;  %vm1279_vm14 = vcmp.gt.f32.partialorder %v5189_v60, 2.0  ;;  %vm1479_vm9 = vcmp.gt.f32.partialorder %v5189_v60, 3.0  ;;  %vm1879_vm11 = vcmp.gt.f32.partialorder %v5189_v60, 5.0 }
 0x275   : > { %v5203_v35 = vpop.f32.mrf.mxu0  ;;  %v5206_v0 = vsel %vm1079_vm6, 1.0, %v8485_v4  ;;  %v5209_v29 = vsel %vm1279_vm14, 2.0, %v8485_v4  ;;  %v5218_v20 = vsel %vm1479_vm9, 3.0, %v8485_v4  ;;  %v5254_v50 = vsel %vm1878_vm12, 5.0, %v8485_v4 }
 0x276   : > { %vm1477_vm6 = vcmp.gt.f32.partialorder %v5203_v35, 3.0  ;;  %vm1077_vm14 = vcmp.gt.f32.partialorder %v5203_v35, 1.0  ;;  %vm1277_vm9 = vcmp.gt.f32.partialorder %v5203_v35, 2.0  ;;  %8797 = vst [vmem:[#allocation44_spill] sm:$0xff] %v5254_v50  ;;  %v5257_v19 = vsel %vm1879_vm11, 5.0, %v8485_v4 }
 0x277   : > { %v5229_v28 = vsel %vm1477_vm6, 3.0, %v8485_v4  ;;  %v5235_v1 = vsel %vm1077_vm14, 1.0, %v8485_v4  ;;  %v5246_v30 = vsel %vm1277_vm9, 2.0, %v8485_v4  ;;  %vm1678_vm6 = vcmp.gt.f32.partialorder %v5182_v45, 4.0  ;;  %8798 = vst [vmem:[#allocation45_spill] sm:$0xff] %v5257_v19 }
 0x278   : > { %vm1679_vm15 = vcmp.gt.f32.partialorder %v5189_v60, 4.0  ;;  %v5263_v14 = vsel %vm1678_vm6, 4.0, %v8485_v4  ;;  %vm2278_vm14 = vcmp.gt.f32.partialorder %v5182_v45, 7.0  ;;  %vm2279_vm9 = vcmp.gt.f32.partialorder %v5189_v60, 7.0 }
 0x279   : > { %8799 = vst [vmem:[#allocation46_spill] sm:$0xff] %v5263_v14  ;;  %v5266_v18 = vsel %vm1679_vm15, 4.0, %v8485_v4  ;;  %v5273_v42 = vsel %vm2278_vm14, 7.0, %v8485_v4  ;;  %vm1876_vm12 = vcmp.gt.f32.partialorder %v5186_v51, 5.0  ;;  %v5277_v53 = vsel %vm2279_vm9, 7.0, %v8485_v4 }
 0x27a   : > { %8800 = vst [vmem:[#allocation47_spill] sm:$0xff] %v5266_v18  ;;  %8801 = vst [vmem:[#allocation48_spill] sm:$0xff] %v5273_v42  ;;  %vm1877_vm11 = vcmp.gt.f32.partialorder %v5203_v35, 5.0  ;;  %v5281_v36 = vsel %vm1876_vm12, 5.0, %v8485_v4  ;;  %vm2078_vm6 = vcmp.gt.f32.partialorder %v5182_v45, 6.0  ;;  %vm2079_vm15 = vcmp.gt.f32.partialorder %v5189_v60, 6.0 }
 0x27b   : > { %8802 = vst [vmem:[#allocation49_spill] sm:$0xff] %v5277_v53  ;;  %8803 = vst [vmem:[#allocation50_spill] sm:$0xff] %v5281_v36  ;;  %v5287_v57 = vsel %vm1877_vm11, 5.0, %v8485_v4  ;;  %v5291_v48 = vsel %vm2078_vm6, 6.0, %v8485_v4  ;;  %v5296_v7 = vsel %vm2079_vm15, 6.0, %v8485_v4  ;;  %vm1676_vm14 = vcmp.gt.f32.partialorder %v5186_v51, 4.0 }
 0x27c   : > { %8804 = vst [vmem:[#allocation51_spill] sm:$0xff] %v5287_v57  ;;  %8805 = vst [vmem:[#allocation52_spill] sm:$0xff] %v5291_v48  ;;  %vm1677_vm9 = vcmp.gt.f32.partialorder %v5203_v35, 4.0  ;;  %v5303_v49 = vsel %vm1676_vm14, 4.0, %v8485_v4  ;;  %vm2276_vm12 = vcmp.gt.f32.partialorder %v5186_v51, 7.0  ;;  %vm2277_vm11 = vcmp.gt.f32.partialorder %v5203_v35, 7.0 }
 0x27d   : > { %8806 = vst [vmem:[#allocation53_spill] sm:$0xff] %v5296_v7  ;;  %8807 = vst [vmem:[#allocation54_spill] sm:$0xff] %v5303_v49  ;;  %v5306_v15 = vsel %vm1677_vm9, 4.0, %v8485_v4  ;;  %vm2076_vm6 = vcmp.gt.f32.partialorder %v5186_v51, 6.0  ;;  %v5314_v13 = vsel %vm2276_vm12, 7.0, %v8485_v4  ;;  %v5317_v6 = vsel %vm2277_vm11, 7.0, %v8485_v4 }
 0x27e   : > { %8808 = vst [vmem:[#allocation55_spill] sm:$0xff] %v5306_v15  ;;  %8809 = vst [vmem:[#allocation56_spill] sm:$0xff] %v5314_v13  ;;  %vm2077_vm15 = vcmp.gt.f32.partialorder %v5203_v35, 6.0  ;;  %v5323_v58 = vsel %vm2076_vm6, 6.0, %v8485_v4  ;;  %v8824_v57 = vmov 0.0  }
 0x27f   : > { %8810 = vst [vmem:[#allocation57_spill] sm:$0xff] %v5317_v6  ;;  %8811 = vst [vmem:[#allocation58_spill] sm:$0xff] %v5323_v58  ;;  %v5326_v9 = vsel %vm2077_vm15, 6.0, %v8485_v4 }
 0x280   : > { %8812 = vst [vmem:[#allocation59_spill] sm:$0xff] %v5326_v9 }
 0x29b   : > { %v5330_v55 = vpop.f32.mrf.mxu0 }
 0x29c   : > { %8813 = vst [vmem:[#allocation60_spill] sm:$0xff] %v5330_v55  ;;  %vm870_vm14 = vcmp.eq.f32.partialorder %v5330_v55, 0.0  ;;  %vm1082_vm9 = vcmp.gt.f32.partialorder %v5330_v55, 1.0  ;;  %vm1482_vm12 = vcmp.gt.f32.partialorder %v5330_v55, 3.0  ;;  %vm1282_vm1 = vcmp.gt.f32.partialorder %v5330_v55, 2.0 }
 0x29d   : > { %v5333_v37 = vpop.f32.mrf.mxu0  ;;  %v887_v59 = vsel %vm870_vm14, 1, %v8814_v52  ;;  %v1098_v54 = vsel %vm1082_vm9, 1.0, %v8485_v4  ;;  %v1498_v41 = vsel %vm1482_vm12, 3.0, %v8485_v4  ;;  %v1298_v39 = vsel %vm1282_vm1, 2.0, %v8485_v4 }
 0x29e   : > { %924 = vperm.xlu0 %4149, %v887_v59   ;;  %vm1882_vm9 = vcmp.gt.f32.partialorder %v5330_v55, 5.0  ;;  %vm2282_vm1 = vcmp.gt.f32.partialorder %v5330_v55, 7.0 }
 0x29f   : > { %v5337_v46 = vpop.f32.mrf.mxu0 }
 0x2a0   : > { %8815 = vst [vmem:[#allocation61_spill] sm:$0xff] %v5337_v46  ;;  %vm871_vm11 = vcmp.eq.f32.partialorder %v5337_v46, 0.0  ;;  %vm1083_vm6 = vcmp.gt.f32.partialorder %v5337_v46, 1.0  ;;  %vm1483_vm15 = vcmp.gt.f32.partialorder %v5337_v46, 3.0  ;;  %vm1283_vm14 = vcmp.gt.f32.partialorder %v5337_v46, 2.0 }
 0x2a1   : > { %v888_v61 = vsel %vm871_vm11, 1, %v8814_v52  ;;  %v1099_v43 = vsel %vm1083_vm6, 1.0, %v8485_v4  ;;  %v1499_v47 = vsel %vm1483_vm15, 3.0, %v8485_v4  ;;  %v1299_v5 = vsel %vm1283_vm14, 2.0, %v8485_v4 }
 0x2a2   : > { %927 = vperm.xlu1 %4150, %v888_v61   ;;  %v4151_v59 = vpack.i.bf16 %v1099_v43, %v1098_v54  ;;  %v4156_v38 = vpack.i.bf16 %v1499_v47, %v1498_v41  ;;  %v4161_v58 = vpack.i.bf16 %v1299_v5, %v1298_v39  ;;  %vm1883_vm11 = vcmp.gt.f32.partialorder %v5337_v46, 5.0  ;;  %v5355_v61 = vpop.f32.mrf.mxu0 }
 0x2a3   : > { %vm1682_vm6 = vcmp.gt.f32.partialorder %v5330_v55, 4.0  ;;  %v5358_v43 = vsel %vm1882_vm9, 5.0, %v8485_v4  ;;  %v5361_v54 = vsel %vm1883_vm11, 5.0, %v8485_v4  ;;  %vm1683_vm12 = vcmp.gt.f32.partialorder %v5337_v46, 4.0 }
 0x2a4   : > { %4152 = vperm.xlu0 %4149, %v4151_v59   ;;  %v5367_v39 = vsel %vm1682_vm6, 4.0, %v8485_v4  ;;  %v5370_v41 = vsel %vm1683_vm12, 4.0, %v8485_v4  ;;  %vm2283_vm15 = vcmp.gt.f32.partialorder %v5337_v46, 7.0  ;;  %v5377_v47 = vsel %vm2282_vm1, 7.0, %v8485_v4 }
 0x2a5   : > { %vm1880_vm14 = vcmp.gt.f32.partialorder %v5333_v37, 5.0  ;;  %vm1881_vm9 = vcmp.gt.f32.partialorder %v5355_v61, 5.0  ;;  %vm2082_vm11 = vcmp.gt.f32.partialorder %v5330_v55, 6.0  ;;  %vm2083_vm6 = vcmp.gt.f32.partialorder %v5337_v46, 6.0 }
 0x2a6   : > { %4157 = vperm.xlu1 %4150, %v4156_v38   ;;  %v5385_v59 = vsel %vm1880_vm14, 5.0, %v8485_v4  ;;  %v5391_v38 = vsel %vm1881_vm9, 5.0, %v8485_v4  ;;  %v5395_v9 = vsel %vm2082_vm11, 6.0, %v8485_v4  ;;  %v5400_v34 = vsel %vm2083_vm6, 6.0, %v8485_v4 }
 0x2a7   : > { %8816 = vst [vmem:[#allocation62_spill] sm:$0xff] %v5395_v9  ;;  %8817 = vst [vmem:[#allocation63_spill] sm:$0xff] %v5400_v34  ;;  %vm1680_vm12 = vcmp.gt.f32.partialorder %v5333_v37, 4.0  ;;  %vm1681_vm1 = vcmp.gt.f32.partialorder %v5355_v61, 4.0  ;;  %vm2281_vm14 = vcmp.gt.f32.partialorder %v5355_v61, 7.0  ;;  %vm2080_vm9 = vcmp.gt.f32.partialorder %v5333_v37, 6.0 }
 0x2a8   : > { %4162 = vperm.xlu0 %4149, %v4161_v58   ;;  %v5381_v58 = vsel %vm2283_vm15, 7.0, %v8485_v4  ;;  %v5407_v55 = vsel %vm1680_vm12, 4.0, %v8485_v4  ;;  %v5410_v46 = vsel %vm1681_vm1, 4.0, %v8485_v4  ;;  %vm2280_vm15 = vcmp.gt.f32.partialorder %v5333_v37, 7.0 }
 0x2a9   : > { %8818 = vst [vmem:[#allocation64_spill] sm:$0xff] %v5407_v55  ;;  %8819 = vst [vmem:[#allocation65_spill] sm:$0xff] %v5410_v46  ;;  %v5418_v13 = vsel %vm2280_vm15, 7.0, %v8485_v4  ;;  %v5421_v5 = vsel %vm2281_vm14, 7.0, %v8485_v4  ;;  %vm2081_vm11 = vcmp.gt.f32.partialorder %v5355_v61, 6.0  ;;  %v5427_v49 = vsel %vm2080_vm9, 6.0, %v8485_v4 }
 0x2aa   : > { %8820 = vst [vmem:[#allocation66_spill] sm:$0xff] %v5418_v13  ;;  %8821 = vst [vmem:[#allocation67_spill] sm:$0xff] %v5421_v5  ;;  %v5430_v33 = vsel %vm2081_vm11, 6.0, %v8485_v4 }
 0x2ab   : > { %8822 = vst [vmem:[#allocation68_spill] sm:$0xff] %v5427_v49  ;;  %8823 = vst [vmem:[#allocation69_spill] sm:$0xff] %v5430_v33 }
 0x2bc   : > { %v5434_v48 = vpop.f32.mrf.mxu0 }
 0x2bd   : > { %vm874_vm6 = vcmp.eq.f32.partialorder %v5434_v48, 0.0  ;;  %vm1086_vm1 = vcmp.gt.f32.partialorder %v5434_v48, 1.0  ;;  %vm1286_vm9 = vcmp.gt.f32.partialorder %v5434_v48, 2.0 }
 0x2be   : > { %v5437_v7 = vpop.f32.mrf.mxu0  ;;  %v891_v36 = vsel %vm874_vm6, 1, %v8814_v52  ;;  %v1102_v14 = vsel %vm1086_vm1, 1.0, %v8824_v57  ;;  %v1302_v18 = vsel %vm1286_vm9, 2.0, %v8824_v57  ;;  %vm868_vm1 = vcmp.eq.f32.partialorder %v5333_v37, 0.0 }
 0x2bf   : > { %936 = vperm.xlu1 %4150, %v891_v36   ;;  %vm872_vm12 = vcmp.eq.f32.partialorder %v5437_v7, 0.0  ;;  %vm1484_vm9 = vcmp.gt.f32.partialorder %v5437_v7, 3.0  ;;  %v885_v13 = vsel %vm868_vm1, 1, %v8814_v52  ;;  %vm1480_vm1 = vcmp.gt.f32.partialorder %v5333_v37, 3.0 }
 0x2c0   : > { %v5441_v6 = vpop.f32.mrf.mxu0  ;;  %v889_v15 = vsel %vm872_vm12, 1, %v8814_v52  ;;  %vm1486_vm12 = vcmp.gt.f32.partialorder %v5434_v48, 3.0 }
 0x2c1   : > { %vm875_vm15 = vcmp.eq.f32.partialorder %v5441_v6, 0.0  ;;  %vm1087_vm14 = vcmp.gt.f32.partialorder %v5441_v6, 1.0  ;;  %vm1287_vm11 = vcmp.gt.f32.partialorder %v5441_v6, 2.0  ;;  %vm1487_vm6 = vcmp.gt.f32.partialorder %v5441_v6, 3.0 }
 0x2c2   : > { %v892_v4 = vsel %vm875_vm15, 1, %v8814_v52  ;;  %v1103_v36 = vsel %vm1087_vm14, 1.0, %v8824_v57  ;;  %v1303_v42 = vsel %vm1287_vm11, 2.0, %v8824_v57  ;;  %v5453_v53 = vpop.f32.mrf.mxu0  ;;  %v1503_v50 = vsel %vm1487_vm6, 3.0, %v8824_v57 }
 0x2c3   : > { %930 = vperm.xlu1 %4150, %v889_v15   ;;  %939 = vperm.xlu0 %4149, %v892_v4   ;;  %v4166_v49 = vpack.i.bf16 %v1103_v36, %v1102_v14  ;;  %v4176_v33 = vpack.i.bf16 %v1303_v42, %v1302_v18  ;;  %vm873_vm15 = vcmp.eq.f32.partialorder %v5453_v53, 0.0  ;;  %vm1485_vm14 = vcmp.gt.f32.partialorder %v5453_v53, 3.0 }
 0x2c4   : > { %vm1686_vm11 = vcmp.gt.f32.partialorder %v5434_v48, 4.0  ;;  %v1502_v15 = vsel %vm1486_vm12, 3.0, %v8824_v57  ;;  %vm1687_vm2 = vcmp.gt.f32.partialorder %v5441_v6, 4.0  ;;  %vm2286_vm6 = vcmp.gt.f32.partialorder %v5434_v48, 7.0 }
 0x2c5   : > { %v4171_v14 = vpack.i.bf16 %v1503_v50, %v1502_v15  ;;  %v5467_v18 = vsel %vm1686_vm11, 4.0, %v8824_v57  ;;  %v5470_v42 = vsel %vm1687_vm2, 4.0, %v8824_v57  ;;  %v890_v4 = vsel %vm873_vm15, 1, %v8814_v52 }
 0x2c6   : > { %vm2287_vm12 = vcmp.gt.f32.partialorder %v5441_v6, 7.0  ;;  %vm1085_vm4 = vcmp.gt.f32.partialorder %v5453_v53, 1.0  ;;  %v5480_v50 = vsel %vm2286_vm6, 7.0, %v8824_v57  ;;  %vm2086_vm2 = vcmp.gt.f32.partialorder %v5434_v48, 6.0 }
 0x2c7   : > { %4167 = vperm.xlu1 %4150, %v4166_v49   ;;  %4177 = vperm.xlu0 %4149, %v4176_v33   ;;  %v1501_v33 = vsel %vm1485_vm14, 3.0, %v8824_v57  ;;  %v5483_v36 = vsel %vm2287_vm12, 7.0, %v8824_v57  ;;  %v1500_v15 = vsel %vm1484_vm9, 3.0, %v8824_v57  ;;  %vm2087_vm15 = vcmp.gt.f32.partialorder %v5441_v6, 6.0 }
 0x2c8   : > { %vm1084_vm14 = vcmp.gt.f32.partialorder %v5437_v7, 1.0  ;;  %v5497_v19 = vsel %vm2087_vm15, 6.0, %v8824_v57  ;;  %v1101_v5 = vsel %vm1085_vm4, 1.0, %v8824_v57  ;;  %vm869_vm11 = vcmp.eq.f32.partialorder %v5355_v61, 0.0 }
 0x2c9   : > { %vm1285_vm9 = vcmp.gt.f32.partialorder %v5453_v53, 2.0  ;;  %vm1481_vm6 = vcmp.gt.f32.partialorder %v5355_v61, 3.0  ;;  %vm1284_vm12 = vcmp.gt.f32.partialorder %v5437_v7, 2.0  ;;  %v886_v55 = vsel %vm869_vm11, 1, %v8814_v52 }
 0x2ca   : > { %v1301_v46 = vsel %vm1285_vm9, 2.0, %v8824_v57  ;;  %vm1081_vm4 = vcmp.gt.f32.partialorder %v5355_v61, 1.0  ;;  %v1496_v49 = vsel %vm1480_vm1, 3.0, %v8824_v57  ;;  %vm866_vm15 = vcmp.eq.f32.partialorder %v5182_v45, 0.0 }
 0x2cb   : > { %4172 = vperm.xlu1 %4150, %v4171_v14   ;;  %933 = vperm.xlu0 %4149, %v890_v4   ;;  %v4186_v14 = vpack.i.bf16 %v1501_v33, %v1500_v15  ;;  %v5494_v4 = vsel %vm2086_vm2, 6.0, %v8824_v57  ;;  %v1100_v33 = vsel %vm1084_vm14, 1.0, %v8824_v57  ;;  %vm1080_vm2 = vcmp.gt.f32.partialorder %v5333_v37, 1.0 }
 0x2cc   : > { %v4181_v15 = vpack.i.bf16 %v1101_v5, %v1100_v33  ;;  %v1097_v33 = vsel %vm1081_vm4, 1.0, %v8824_v57  ;;  %vm1281_vm14 = vcmp.gt.f32.partialorder %v5355_v61, 2.0  ;;  %vm1280_vm11 = vcmp.gt.f32.partialorder %v5333_v37, 2.0 }
 0x2cd   : > { %v883_v34 = vsel %vm866_vm15, 1, %v8814_v52  ;;  %vm867_vm9 = vcmp.eq.f32.partialorder %v5189_v60, 0.0  ;;  %vm862_vm1 = vcmp.eq.f32.partialorder %v5034_v62, 0.0  ;;  %vm863_vm4 = vcmp.eq.f32.partialorder %v5041_v3, 0.0 }
 0x2ce   : > { %vm860_vm15 = vcmp.eq.f32.partialorder %v5038_v63, 0.0 }
 0x2cf   : > { %918 = vperm.xlu1 %4150, %v885_v13   ;;  %4187 = vperm.xlu0 %4149, %v4186_v14   ;;  %v1497_v13 = vsel %vm1481_vm6, 3.0, %v8824_v57  ;;  %v1300_v14 = vsel %vm1284_vm12, 2.0, %v8824_v57  ;;  %vm865_vm6 = vcmp.eq.f32.partialorder %v5203_v35, 0.0  ;;  %vm864_vm12 = vcmp.eq.f32.partialorder %v5186_v51, 0.0 }
 0x2d0   : > { %v4191_v9 = vpack.i.bf16 %v1301_v46, %v1300_v14  ;;  %v4201_v5 = vpack.i.bf16 %v1497_v13, %v1496_v49  ;;  %v1297_v46 = vsel %vm1281_vm14, 2.0, %v8824_v57  ;;  %v1296_v49 = vsel %vm1280_vm11, 2.0, %v8824_v57 }
 0x2d1   : > { %v4206_v13 = vpack.i.bf16 %v1297_v46, %v1296_v49  ;;  %v884_v14 = vsel %vm867_vm9, 1, %v8814_v52  ;;  %vm1887_vm14 = vcmp.gt.f32.partialorder %v5441_v6, 5.0  ;;  %vm1886_vm11 = vcmp.gt.f32.partialorder %v5434_v48, 5.0 }
 0x2d2   : > { %vm1885_vm9 = vcmp.gt.f32.partialorder %v5453_v53, 5.0 }
 0x2d3   : > { %4182 = vperm.xlu1 %4150, %v4181_v15   ;;  %921 = vperm.xlu0 %4149, %v886_v55   ;;  %v1096_v55 = vsel %vm1080_vm2, 1.0, %v8824_v57  ;;  %vm861_vm2 = vcmp.eq.f32.partialorder %v5055_v12, 0.0 }
 0x2d4   : > { %v4196_v15 = vpack.i.bf16 %v1097_v33, %v1096_v55  ;;  %v8827_v33 = vpack.i.bf16 %v5218_v20, %v5200_v56  ;;  %v8830_v20 = vpack.i.bf16 %v5246_v30, %v5243_v27  ;;  %v8831_v56 = vpack.i.bf16 %v5058_v16, %v5044_v8 }
 0x2d5   : > { %v8833_v27 = vpack.i.bf16 %v5070_v21, %v5052_v11  ;;  %v877_v30 = vsel %vm860_vm15, 1, %v8814_v52  ;;  %v1903_v8 = vsel %vm1887_vm14, 5.0, %v8824_v57  ;;  %v1902_v16 = vsel %vm1886_vm11, 5.0, %v8824_v57 }
 0x2d6   : > { %v4271_v11 = vpack.i.bf16 %v1903_v8, %v1902_v16  ;;  %v1901_v21 = vsel %vm1885_vm9, 5.0, %v8824_v57  ;;  %vm2085_vm15 = vcmp.gt.f32.partialorder %v5453_v53, 6.0  ;;  %vm2084_vm14 = vcmp.gt.f32.partialorder %v5437_v7, 6.0  ;;  %v8868_v8 = vld [vmem:[#allocation53_spill] sm:$0xff] }
 0x2d7   : > { %4192 = vperm.xlu1 %4150, %v4191_v9   ;;  %4202 = vperm.xlu0 %4149, %v4201_v5   ;;  %v8825_v9 = vpack.i.bf16 %v5206_v0, %v5192_v44  ;;  %v8826_v5 = vpack.i.bf16 %v5209_v29, %v5195_v40  ;;  %v881_v0 = vsel %vm864_vm12, 1, %v8814_v52  ;;  %v8828_v44 = vpack.i.bf16 %v5229_v28, %v5226_v2 }
 0x2d8   : > { %v879_v29 = vsel %vm862_vm1, 1, %v8814_v52  ;;  %v8829_v40 = vpack.i.bf16 %v5235_v1, %v5232_v22  ;;  %v880_v2 = vsel %vm863_vm4, 1, %v8814_v52  ;;  %v8832_v28 = vpack.i.bf16 %v5061_v17, %v5047_v10 }
 0x2d9   : > { %v878_v1 = vsel %vm861_vm2, 1, %v8814_v52  ;;  %v8834_v10 = vpack.i.bf16 %v5081_v24, %v5078_v23  ;;  %v8835_v17 = vpack.i.bf16 %v5087_v26, %v5084_v25  ;;  %v8836_v22 = vpack.i.bf16 %v5098_v32, %v5095_v31 }
 0x2da   : > { %v8837_v23 = vpack.i.bf16 %v5470_v42, %v5467_v18  ;;  %vm1685_vm12 = vcmp.gt.f32.partialorder %v5453_v53, 4.0  ;;  %vm1684_vm1 = vcmp.gt.f32.partialorder %v5437_v7, 4.0  ;;  %vm2285_vm4 = vcmp.gt.f32.partialorder %v5453_v53, 7.0 }
 0x2db   : > { %4197 = vperm.xlu1 %4150, %v4196_v15   ;;  %912 = vperm.xlu0 %4149, %v883_v34   ;;  %v882_v34 = vsel %vm865_vm6, 1, %v8814_v52  ;;  %vm1884_vm6 = vcmp.gt.f32.partialorder %v5437_v7, 5.0  ;;  %v1701_v26 = vsel %vm1685_vm12, 4.0, %v8824_v57  ;;  %v8838_v52 = vpack.i.bf16 %v5483_v36, %v5480_v50 }
 0x2dc   : > { %v1900_v24 = vsel %vm1884_vm6, 5.0, %v8824_v57  ;;  %v1700_v31 = vsel %vm1684_vm1, 4.0, %v8824_v57  ;;  %vm2284_vm2 = vcmp.gt.f32.partialorder %v5437_v7, 7.0  ;;  %v2301_v18 = vsel %vm2285_vm4, 7.0, %v8824_v57 }
 0x2dd   : > { %v4291_v25 = vpack.i.bf16 %v1901_v21, %v1900_v24  ;;  %v4301_v32 = vpack.i.bf16 %v1701_v26, %v1700_v31  ;;  %v8839_v42 = vpack.i.bf16 %v5497_v19, %v5494_v4  ;;  %v2300_v50 = vsel %vm2284_vm2, 7.0, %v8824_v57  ;;  %v8874_v24 = vld [vmem:[#allocation57_spill] sm:$0xff]  ;;  %v8878_v31 = vld [vmem:[#allocation28_spill] sm:$0xff] }
 0x2de   : > { %v4296_v36 = vpack.i.bf16 %v2301_v18, %v2300_v50  ;;  %v2101_v55 = vsel %vm2085_vm15, 6.0, %v8824_v57  ;;  %v8840_v15 = vpack.i.bf16 %v5361_v54, %v5358_v43  ;;  %v2100_v46 = vsel %vm2084_vm14, 6.0, %v8824_v57  ;;  %v8847_v54 = vld [vmem:[#allocation65_spill] sm:$0xff]  ;;  %v8880_v50 = vld [vmem:[#allocation59_spill] sm:$0xff] }
 0x2df   : > { %4207 = vperm.xlu1 %4150, %v4206_v13   ;;  %4212 = vperm.xlu0 %4149, %v8825_v9   ;;  %v4311_v49 = vpack.i.bf16 %v2101_v55, %v2100_v46  ;;  %v8841_v19 = vpack.i.bf16 %v5370_v41, %v5367_v39  ;;  %v8842_v4 = vpack.i.bf16 %v5381_v58, %v5377_v47  ;;  %v8844_v9 = vld [vmem:[#allocation63_spill] sm:$0xff]  ;;  %v8853_v41 = vld [vmem:[#allocation45_spill] sm:$0xff]  ;;  %v8884_v46 = vld [vmem:[#allocation30_spill] sm:$0xff] }
 0x2e0   : > { %v8843_v13 = vpack.i.bf16 %v5391_v38, %v5385_v59  ;;  %v8856_v58 = vld [vmem:[#allocation69_spill] sm:$0xff]  ;;  %v8859_v59 = vld [vmem:[#allocation47_spill] sm:$0xff] }
 0x2e3   : > { %915 = vperm.xlu1 %4150, %v884_v14   ;;  %4222 = vperm.xlu0 %4149, %v8826_v5   ;;  %v8845_v14 = vld [vmem:[#allocation62_spill] sm:$0xff]  ;;  %v8848_v5 = vld [vmem:[#allocation64_spill] sm:$0xff] }
 0x2e4   : > { %v8846_v43 = vpack.i.bf16 %v8844_v9, %v8845_v14  ;;  %v8887_v9 = vld [vmem:[#allocation32_spill] sm:$0xff] }
 0x2e7   : > { %4217 = vperm.xlu1 %4150, %v8827_v33   ;;  %909 = vperm.xlu0 %4149, %v882_v34   ;;  %v8849_v34 = vpack.i.bf16 %v8847_v54, %v8848_v5  ;;  %v8850_v33 = vld [vmem:[#allocation67_spill] sm:$0xff]  ;;  %v8890_v54 = vld [vmem:[#allocation34_spill] sm:$0xff] }
 0x2eb   : > { %906 = vperm.xlu1 %4150, %v881_v0   ;;  %4232 = vperm.xlu0 %4149, %v8828_v44   ;;  %v8851_v0 = vld [vmem:[#allocation66_spill] sm:$0xff]  ;;  %v8854_v44 = vld [vmem:[#allocation44_spill] sm:$0xff] }
 0x2ec   : > { %v8852_v39 = vpack.i.bf16 %v8850_v33, %v8851_v0  ;;  %v8855_v47 = vpack.i.bf16 %v8853_v41, %v8854_v44  ;;  %v3184_v33 = vsel %vm8512_vm8, 1.0, %v8824_v57  ;;  %v8893_v44 = vld [vmem:[#allocation26_spill] sm:$0xff] }
 0x2ed   : > { %v5679_v0 = vsub.f32 %v5434_v48, %v3184_v33  ;;  %v3181_v33 = vsel %vm8509_vm10, 1.0, %v8824_v57 }
 0x2ef   : > { %4227 = vperm.xlu1 %4150, %v8829_v40   ;;  %900 = vperm.xlu0 %4149, %v879_v29   ;;  %v8857_v29 = vld [vmem:[#allocation68_spill] sm:$0xff]  ;;  %v8860_v40 = vld [vmem:[#allocation46_spill] sm:$0xff]  ;;  %vm998_vm11 = vcmp.eq.f32.partialorder %v5679_v0, 0.0 }
 0x2f0   : > { %v8858_v38 = vpack.i.bf16 %v8856_v58, %v8857_v29  ;;  %v8894_v58 = vld [vmem:[#allocation37_spill] sm:$0xff]  ;;  %v8895_v29 = vld [vmem:[#allocation36_spill] sm:$0xff]  ;;  %vm5701_vm4 = vmand %vm8512_vm8, %vm998_vm11 }
 0x2f3   : > { %4237 = vperm.xlu1 %4150, %v8830_v20   ;;  %4242 = vperm.xlu0 %4149, %v8831_v56   ;;  %v8861_v20 = vpack.i.bf16 %v8859_v59, %v8860_v40  ;;  %v8862_v56 = vld [vmem:[#allocation49_spill] sm:$0xff]  ;;  %v8897_v59 = vld [vmem:[#allocation39_spill] sm:$0xff]  ;;  %v8898_v40 = vld [vmem:[#allocation38_spill] sm:$0xff] }
 0x2f7   : > { %903 = vperm.xlu1 %4150, %v880_v2   ;;  %4252 = vperm.xlu0 %4149, %v8832_v28   ;;  %v8863_v2 = vld [vmem:[#allocation48_spill] sm:$0xff] }
 0x2f8   : > { %v8864_v28 = vpack.i.bf16 %v8862_v56, %v8863_v2 }
 0x2fb   : > { %4247 = vperm.xlu1 %4150, %v8833_v27   ;;  %897 = vperm.xlu0 %4149, %v878_v1   ;;  %v8865_v1 = vld [vmem:[#allocation51_spill] sm:$0xff]  ;;  %v8866_v27 = vld [vmem:[#allocation50_spill] sm:$0xff] }
 0x2ff   : > { %894 = vperm.xlu1 %4150, %v877_v30   ;;  %4262 = vperm.xlu0 %4149, %v8834_v10   ;;  %v8867_v30 = vpack.i.bf16 %v8865_v1, %v8866_v27  ;;  %v8869_v10 = vld [vmem:[#allocation52_spill] sm:$0xff]  ;;  %v8900_v1 = vld [vmem:[#allocation41_spill] sm:$0xff] }
 0x300   : > { %v8870_v16 = vpack.i.bf16 %v8868_v8, %v8869_v10  ;;  %v8901_v27 = vld [vmem:[#allocation40_spill] sm:$0xff]  ;;  %v8903_v8 = vld [vmem:[#allocation11_spill] sm:$0xff]  ;;  %v8906_v10 = vmov 0 }
 0x301   : > { %vm8506_vm12 = vcmp.eq.s32.totalorder %v8903_v8, 0 }
 0x303   : > { %4257 = vperm.xlu1 %4150, %v8835_v17   ;;  %4272 = vperm.xlu0 %4149, %v4271_v11   ;;  %v8871_v11 = vld [vmem:[#allocation55_spill] sm:$0xff]  ;;  %v8872_v17 = vld [vmem:[#allocation54_spill] sm:$0xff] }
 0x304   : > { %v8873_v21 = vpack.i.bf16 %v8871_v11, %v8872_v17  ;;  %v8908_v11 = vmov 0 }
 0x307   : > { %4267 = vperm.xlu1 %4150, %v8836_v22   ;;  %4282 = vperm.xlu0 %4149, %v8837_v23  }
 0x30b   : > { %4277 = vperm.xlu1 %4150, %v8838_v52   ;;  %4292 = vperm.xlu0 %4149, %v4291_v25   ;;  %v8875_v25 = vld [vmem:[#allocation56_spill] sm:$0xff]  ;;  %v8877_v52 = vld [vmem:[#allocation29_spill] sm:$0xff] }
 0x30c   : > { %v8876_v26 = vpack.i.bf16 %v8874_v24, %v8875_v25  ;;  %v8910_v25 = vld [vmem:[#allocation43_spill] sm:$0xff] }
 0x30f   : > { %4287 = vperm.xlu1 %4150, %v8839_v42   ;;  %4302 = vperm.xlu0 %4149, %v4301_v32   ;;  %v8879_v32 = vpack.i.bf16 %v8877_v52, %v8878_v31 }
 0x313   : > { %4297 = vperm.xlu1 %4150, %v4296_v36   ;;  %4307 = vperm.xlu0 %4149, %v8840_v15   ;;  %v8881_v36 = vld [vmem:[#allocation58_spill] sm:$0xff]  ;;  %v8883_v15 = vld [vmem:[#allocation31_spill] sm:$0xff] }
 0x314   : > { %v8882_v55 = vpack.i.bf16 %v8880_v50, %v8881_v36  ;;  %v8915_v36 = vmov 0 }
 0x317   : > { %4312 = vperm.xlu1 %4150, %v4311_v49   ;;  %4322 = vperm.xlu0 %4149, %v8841_v19   ;;  %v8885_v49 = vpack.i.bf16 %v8883_v15, %v8884_v46 }
 0x319   : > { %v5647_v22 = vpop.permute.xlu0 %924 }
 0x31b   : > { %4317 = vperm.xlu1 %4150, %v8842_v4   ;;  %4332 = vperm.xlu0 %4149, %v8843_v13   ;;  %v8886_v13 = vld [vmem:[#allocation33_spill] sm:$0xff] }
 0x31c   : > { %v8888_v14 = vpack.i.bf16 %v8886_v13, %v8887_v9  ;;  %v8922_v13 = vld [vmem:[#allocation22_spill] sm:$0xff]  ;;  %v3180_v9 = vsel %vm8508_vm7, 1.0, %v8824_v57 }
 0x31d   : > { %v5649_v23 = vpop.permute.xlu1 %927 }
 0x31f   : > { %4327 = vperm.xlu1 %4150, %v8846_v43   ;;  %4342 = vperm.xlu0 %4149, %v8849_v34   ;;  %v5657_v18 = vpop.permute.xlu0 %4152  ;;  %v8889_v43 = vld [vmem:[#allocation35_spill] sm:$0xff] }
 0x320   : > { %v8891_v5 = vpack.i.bf16 %v8889_v43, %v8890_v54  ;;  %v8892_v34 = vld [vmem:[#allocation27_spill] sm:$0xff]  ;;  %v4154_v46 = vunpack.i.l.bf16 %v5657_v18  ;;  %v8923_v43 = vld [vmem:[#allocation60_spill] sm:$0xff] }
 0x321   : > { %v5659_v42 = vpop.permute.xlu1 %4157  ;;  %v5770_v54 = vsub.f32 %v8923_v43, %v3180_v9  ;;  %v8985_v9 = vmov 0  ;;  %v218_v43 = vld [vmem:[%s4715_s20 + $0x8] sm:$0xff] }
 0x323   : > { %4337 = vperm.xlu1 %4150, %v8852_v39   ;;  %4352 = vperm.xlu0 %4149, %v8855_v47   ;;  %v5667_v19 = vpop.permute.xlu0 %4162  ;;  %v3185_v47 = vsel %vm8510_vm13, 1.0, %v8824_v57  ;;  %vm5787_vm7 = vcmp.eq.f32.partialorder %v5770_v54, %v4154_v46  ;;  %v8982_v46 = vmov 0 }
 0x324   : > { %v5691_v56 = vsub.f32 %v5441_v6, %v3185_v47  ;;  %v8925_v47 = vld [vmem:[#allocation61_spill] sm:$0xff] }
 0x326   : > { %vm999_vm1 = vcmp.eq.f32.partialorder %v5691_v56, 0.0 }
 0x327   : > { %4347 = vperm.xlu1 %4150, %v8858_v38   ;;  %4362 = vperm.xlu0 %4149, %v8861_v20   ;;  %v8896_v38 = vpack.i.bf16 %v8894_v58, %v8895_v29  ;;  %v8899_v20 = vpack.i.bf16 %v8897_v59, %v8898_v40  ;;  %vm1015_vm11 = vmand %vm8510_vm13, %vm999_vm1  ;;  %v4160_v29 = vunpack.i.h.bf16 %v5659_v42  ;;  %v8928_v59 = vmov 0 }
 0x328   : > { %v8991_v58 = vmov 0 }
 0x32b   : > { %4357 = vperm.xlu1 %4150, %v8864_v28   ;;  %4372 = vperm.xlu0 %4149, %v8867_v30   ;;  %v8902_v30 = vpack.i.bf16 %v8900_v1, %v8901_v27  ;;  %v9007_v1 = vmov 0 }
 0x32f   : > { %4367 = vperm.xlu1 %4150, %v8870_v16   ;;  %4382 = vperm.xlu0 %4149, %v8873_v21  }
 0x333   : > { %4377 = vperm.xlu1 %4150, %v8876_v26   ;;  %4392 = vperm.xlu0 %4149, %v8879_v32   ;;  %v8911_v26 = vld [vmem:[#allocation42_spill] sm:$0xff]  ;;  %v8913_v32 = vmov 0 }
 0x334   : > { %v8912_v52 = vpack.i.bf16 %v8910_v25, %v8911_v26  ;;  %v8957_v25 = vmov 0  ;;  %v8963_v26 = vmov 0 }
 0x337   : > { %4387 = vperm.xlu1 %4150, %v8882_v55   ;;  %4402 = vperm.xlu0 %4149, %v8885_v49   ;;  %v8918_v55 = vmov 0 }
 0x33a   : > { %v937_v4 = vpop.permute.xlu1 %936 }
 0x33b   : > { %4397 = vperm.xlu1 %4150, %v8888_v14   ;;  %4412 = vperm.xlu0 %4149, %v8891_v5   ;;  %vm955_vm6 = vcmp.eq.s32.totalorder %v937_v4, 1  ;;  %v4155_v14 = vunpack.i.h.bf16 %v5657_v18  ;;  %v8924_v5 = vld [vmem:[#allocation23_spill] sm:$0xff]  ;;  %v5781_v18 = vsub.f32 %v8925_v47, %v3181_v33  ;;  %v4165_v33 = vunpack.i.h.bf16 %v5667_v19 }
 0x33c   : > { %vm5713_vm15 = vmand %vm955_vm6, %vm8506_vm12  ;;  %v8989_v47 = vmov 0 }
 0x33d   : > { %v8909_v11 = vsel %vm5713_vm15, 4294967295, %v8908_v11  ;;  %vm1030_vm5 = vmor %vm5701_vm4, %vm5713_vm15  ;;  %vm5798_vm10 = vcmp.eq.f32.partialorder %v5781_v18, %v4155_v14 }
 0x33e   : > { %v931_v39 = vpop.permute.xlu1 %930  ;;  %v940_v41 = vpop.permute.xlu0 %939 }
 0x33f   : > { %4407 = vperm.xlu1 %4150, %v8896_v38   ;;  %4422 = vperm.xlu0 %4149, %v8899_v20   ;;  %vm956_vm9 = vcmp.eq.s32.totalorder %v940_v41, 1  ;;  %v4159_v38 = vunpack.i.l.bf16 %v5659_v42  ;;  %v8935_v20 = vmov 1.0|1.0  }
 0x340   : > { %vm5707_vm2 = vmand %vm956_vm9, %vm8506_vm12 }
 0x341   : > { %v8907_v10 = vsel %vm5707_vm2, 4294967295, %v8906_v10  ;;  %vm1031_vm9 = vmor %vm1015_vm11, %vm5707_vm2 }
 0x342   : > { %v4168_v48 = vpop.permute.xlu1 %4167  ;;  %v4178_v2 = vpop.permute.xlu0 %4177  ;;  %vm5740_vm11 = vmpackc.low %vm1031_vm9, %vm1030_vm5 }
 0x343   : > { %v4179_v28 = vunpack.i.l.bf16 %v4178_v2  ;;  %4417 = vperm.xlu1 %4150, %v8902_v30   ;;  %v4180_v16 = vunpack.i.h.bf16 %v4178_v2  ;;  %v4169_v17 = vunpack.i.l.bf16 %v4168_v48  ;;  %v4170_v21 = vunpack.i.h.bf16 %v4168_v48  ;;  %v8936_v48 = vld [vmem:[#allocation24_spill] sm:$0xff] }
 0x344   : > { %v8916_v36 = vsel %vm5740_vm11, 4294967295, %v8915_v36 }
 0x345   : > { %vm1398_vm14 = vcmp.eq.f32.partialorder %v5679_v0, %v4179_v28  ;;  %vm1399_vm6 = vcmp.eq.f32.partialorder %v5691_v56, %v4180_v16  ;;  %vm1198_vm3 = vcmp.eq.f32.partialorder %v5679_v0, %v4169_v17  ;;  %vm1199_vm1 = vcmp.eq.f32.partialorder %v5691_v56, %v4170_v21  ;;  %8917 = vst [vmem:[#allocation63_spill] sm:$0xff] %v8916_v36  ;;  %v8944_v16 = vld [vmem:[#allocation25_spill] sm:$0xff] }
 0x346   : > { %v4173_v24 = vpop.permute.xlu1 %4172  ;;  %v5726_v31 = vpop.permute.xlu0 %933  ;;  %vm5735_vm12 = vmand %vm8512_vm8, %vm1398_vm14  ;;  %v8939_v28 = vmov 0  ;;  %v8947_v21 = vmov 0 }
 0x347   : > { %4427 = vperm.xlu1 %4150, %v8912_v52   ;;  %v8914_v32 = vsel %vm5735_vm12, 4294967295, %v8913_v32  ;;  %v4174_v50 = vunpack.i.l.bf16 %v4173_v24  ;;  %vm5746_vm0 = vmand %vm8510_vm13, %vm1399_vm6  ;;  %v4175_v15 = vunpack.i.h.bf16 %v4173_v24  ;;  %vm953_vm6 = vcmp.eq.s32.totalorder %v931_v39, 1 }
 0x348   : > { %v8919_v55 = vsel %vm5746_vm0, 4294967295, %v8918_v55  ;;  %vm5757_vm5 = vmand %vm8512_vm8, %vm1198_vm3  ;;  %v4164_v24 = vunpack.i.l.bf16 %v5667_v19  ;;  %v8966_v52 = vmov 0 }
 0x349   : > { %vm1215_vm14 = vmand %vm8510_vm13, %vm1199_vm1  ;;  %vm1598_vm3 = vcmp.eq.f32.partialorder %v5679_v0, %v4174_v50  ;;  %vm1599_vm1 = vcmp.eq.f32.partialorder %v5691_v56, %v4175_v15  ;;  %vm8938_vm13 = vcmp.eq.s32.totalorder %v8903_v8, 0  ;;  %v8972_v50 = vmov 0 }
 0x34a   : > { %v5761_v4 = vpop.permute.xlu1 %918  ;;  %vm1230_vm9 = vmor %vm5757_vm5, %vm5713_vm15  ;;  %v4188_v41 = vpop.permute.xlu0 %4187 }
 0x34b   : > { %vm1231_vm4 = vmor %vm1215_vm14, %vm5707_vm2  ;;  %v4189_v42 = vunpack.i.l.bf16 %v4188_v41  ;;  %v4190_v27 = vunpack.i.h.bf16 %v4188_v41 }
 0x34c   : > { %vm5793_vm5 = vmpackc.low %vm1231_vm4, %vm1230_vm9  ;;  %vm8937_vm4 = vcmp.lt.f32.partialorder %v8936_v48, 0.09 }
 0x34d   : > { %v8929_v59 = vsel %vm5793_vm5, 4294967295, %v8928_v59  ;;  %vm5804_vm14 = vmand %vm8512_vm8, %vm1598_vm3  ;;  %3783 = vmatprep.subr.msk.bf16.mxu1 %vm5793_vm5, %v8935_v20  ;;  %v3182_v2 = vsel %vm8937_vm4, 1.0, %v8824_v57  ;;  %vm8941_vm3 = vcmp.lt.f32.partialorder %v8893_v44, 0.09  ;;  %vm8953_vm5 = vcmp.eq.s32.totalorder %v5647_v22, 1 }
 0x34e   : > { %8930 = vst [vmem:[#allocation62_spill] sm:$0xff] %v8929_v59  ;;  %vm5817_vm12 = vmand %vm953_vm6, %vm8938_vm13  ;;  %3784 = vmatpush3.bf16.xpose.msk.msra.mxu1 %vm5740_vm11, %v8935_v20  ;;  %v4183_v30 = vpop.permute.xlu1 %4182  ;;  %v5831_v6 = vsub.f32 %v5437_v7, %v3182_v2  ;;  %vm8945_vm13 = vcmp.lt.f32.partialorder %v8944_v16, 0.09  ;;  %vm952_vm6 = vcmp.eq.s32.totalorder %v5649_v23, 1  ;;  %v8950_v23 = vmov 0 }
 0x34f   : > { %v8940_v28 = vsel %vm5817_vm12, 4294967295, %v8939_v28  ;;  %vm5823_vm8 = vmand %vm8941_vm3, %vm1599_vm1  ;;  %v3183_v17 = vsel %vm8945_vm13, 1.0, %v8824_v57  ;;  %vm8946_vm1 = vcmp.lt.f32.partialorder %v8922_v13, 0.09  ;;  %vm8949_vm13 = vcmp.lt.f32.partialorder %v8924_v5, 0.09 }
 0x350   : > { %vm5841_vm4 = vmand %vm8946_vm1, %vm5787_vm7  ;;  %v5850_v7 = vsub.f32 %v5453_v53, %v3183_v17  ;;  %vm1594_vm7 = vcmp.eq.f32.partialorder %v5770_v54, %v4159_v38  ;;  %vm1595_vm1 = vcmp.eq.f32.partialorder %v5781_v18, %v4160_v29  ;;  %vm8952_vm11 = vcmp.eq.s32.totalorder %v8903_v8, 0  ;;  %v4431_v29 = vld [vmem:[%s4715_s20] sm:$0xff] }
 0x351   : > { %v8948_v21 = vsel %vm5841_vm4, 4294967295, %v8947_v21  ;;  %vm5856_vm9 = vmand %vm8949_vm13, %vm5798_vm10  ;;  %v8954_v53 = vmov 0  ;;  %vm1596_vm10 = vcmp.eq.f32.partialorder %v5831_v6, %v4189_v42  ;;  %v8959_v22 = vmov 0 }
 0x352   : > { %v8951_v23 = vsel %vm5856_vm9, 4294967295, %v8950_v23  ;;  %vm1630_vm3 = vmor %vm5804_vm14, %vm5713_vm15  ;;  %vm1597_vm14 = vcmp.eq.f32.partialorder %v5850_v7, %v4190_v27  ;;  %v4184_v15 = vunpack.i.l.bf16 %v4183_v30  ;;  %v4185_v49 = vunpack.i.h.bf16 %v4183_v30 }
 0x353   : > { %vm5871_vm4 = vmand %vm8953_vm5, %vm8952_vm11  ;;  %v5973_v19 = vpack.c.bf16 %v218_v43, %v4431_v29  ;;  %v8996_v38 = vmov 0  ;;  %v9012_v17 = vmov 0 }
 0x354   : > { %v8955_v53 = vsel %vm5871_vm4, 4294967295, %v8954_v53  ;;  %vm1631_vm13 = vmor %vm5823_vm8, %vm5707_vm2  ;;  %vm8965_vm8 = vcmp.lt.f32.partialorder %v8924_v5, 0.09 }
 0x355   : > { %vm8956_vm9 = vmmov %vm8952_vm11  ;;  %vm8962_vm11 = vcmp.lt.f32.partialorder %v8922_v13, 0.09  ;;  %8994 = vst [vmem:[#allocation66_spill] sm:$0xff] %v5973_v19  ;;  %v974_v39 = vunpack.c.l.bf16 %v5973_v19  ;;  %v975_v40 = vunpack.c.h.bf16 %v5973_v19  ;;  %v9243_v19 = vld [vmem:[#allocation12_spill] sm:$0xff] }
 0x356   : > { %vm5882_vm12 = vmand %vm952_vm6, %vm8956_vm9  ;;  %vm954_vm9 = vcmp.eq.s32.totalorder %v5726_v31, 1  ;;  %vm8968_vm6 = vnez %v8914_v32  ;;  %v4193_v32 = vpop.permute.xlu1 %4192 }
 0x357   : > { %v8958_v25 = vsel %vm5882_vm12, 4294967295, %v8957_v25  ;;  %vm5887_vm0 = vmpackc.low %vm1631_vm13, %vm1630_vm3  ;;  %v4194_v14 = vunpack.i.l.bf16 %v4193_v32  ;;  %v4195_v41 = vunpack.i.h.bf16 %v4193_v32  ;;  %v6017_v27 = vsub.f32 %v4431_v29, %v974_v39 }
 0x358   : > { %v8960_v22 = vsel %vm5887_vm0, 4294967295, %v8959_v22  ;;  %vm5893_vm5 = vmand %vm8962_vm11, %vm1594_vm7  ;;  %3801 = vmatprep.subr.msk.bf16.mxu0 %vm5887_vm0, %v8935_v20  ;;  %vm8970_vm7 = vnez %v8919_v55  ;;  %vm1394_vm11 = vcmp.eq.f32.partialorder %v5770_v54, %v4164_v24  ;;  %vm996_vm0 = vcmp.eq.f32.partialorder %v5831_v6, 0.0  ;;  %v922_v55 = vpop.permute.xlu0 %921 }
 0x359   : > { %8961 = vst [vmem:[#allocation65_spill] sm:$0xff] %v8960_v22  ;;  %v8964_v26 = vsel %vm5893_vm5, 4294967295, %v8963_v26  ;;  %vm5899_vm4 = vmand %vm8965_vm8, %vm1595_vm1  ;;  %vm8975_vm8 = vcmp.lt.f32.partialorder %v8936_v48, 0.09  ;;  %v6019_v30 = vsub.f32 %v218_v43, %v975_v40  ;;  %v9016_v24 = vmov 0 }
 0x35a   : > { %v8967_v52 = vsel %vm5899_vm4, 4294967295, %v8966_v52  ;;  %vm8969_vm3 = vmor %vm8968_vm6, %vm5713_vm15  ;;  %vm8978_vm6 = vcmp.lt.f32.partialorder %v8944_v16, 0.09  ;;  %vm1397_vm15 = vcmp.eq.f32.partialorder %v5850_v7, %v4195_v41  ;;  %9009 = vst [vmem:[#allocation45_spill] sm:$0xff] %v6017_v27  ;;  %v9040_v43 = vmov 0 }
 0x35b   : > { %vm8971_vm1 = vmor %vm8970_vm7, %vm5707_vm2  ;;  %vm1197_vm2 = vcmp.eq.f32.partialorder %v5850_v7, %v4185_v49  ;;  %9010 = vst [vmem:[#allocation44_spill] sm:$0xff] %v6019_v30  ;;  %v6050_v32 = vpack.c.bf16 %v6019_v30, %v6017_v27  ;;  %v9050_v29 = vmov 0 }
 0x35c   : > { %vm5917_vm13 = vmpackc.low %vm8971_vm1, %vm8969_vm3  ;;  %vm995_vm3 = vcmp.eq.f32.partialorder %v5781_v18, 0.0  ;;  %v4203_v49 = vpop.permute.xlu0 %4202 }
 0x35d   : > { %v8973_v50 = vsel %vm5917_vm13, 4294967295, %v8972_v50  ;;  %vm5924_vm4 = vmand %vm8975_vm8, %vm1596_vm10  ;;  %3802 = vmatpush3.bf16.xpose.msk.msra.mxu0 %vm5917_vm13, %v8935_v20  ;;  %vm8981_vm10 = vcmp.eq.s32.totalorder %v8903_v8, 0  ;;  %vm8984_vm8 = vcmp.lt.f32.partialorder %v8922_v13, 0.09  ;;  %3799 = vmatprep.mubr.bf16.mxu1 %v6050_v32  ;;  %v4205_v41 = vunpack.i.h.bf16 %v4203_v49 }
 0x35e   : > { %8974 = vst [vmem:[#allocation64_spill] sm:$0xff] %v8973_v50  ;;  %vm5933_vm7 = vmand %vm8978_vm6, %vm1597_vm14  ;;  %vm8987_vm14 = vnez %v8940_v28  ;;  %3817 = vmatprep.mubr.bf16.mxu0 %v6050_v32  ;;  %v9216_v50 = vmov 0 }
 0x35f   : > { %vm5940_vm1 = vmand %vm954_vm9, %vm8981_vm10 }
 0x360   : > { %v8983_v46 = vsel %vm5940_vm1, 4294967295, %v8982_v46  ;;  %vm5946_vm13 = vmand %vm8984_vm8, %vm1394_vm11  ;;  %vm8988_vm11 = vcmp.lt.f32.partialorder %v8924_v5, 0.09 }
 0x361   : > { %v8986_v9 = vsel %vm5946_vm13, 4294967295, %v8985_v9  ;;  %vm1628_vm6 = vmor %vm5924_vm4, %vm8987_vm14  ;;  %vm1196_vm4 = vcmp.eq.f32.partialorder %v5831_v6, %v4184_v15  ;;  %vm1396_vm13 = vcmp.eq.f32.partialorder %v5831_v6, %v4194_v14  ;;  %v9025_v15 = vmov 0  ;;  %v4198_v14 = vpop.permute.xlu1 %4197 }
 0x362   : > { %vm1629_vm9 = vmor %vm5933_vm7, %vm5940_vm1  ;;  %vm997_vm7 = vcmp.eq.f32.partialorder %v5850_v7, 0.0  ;;  %vm9003_vm1 = vcmp.lt.f32.partialorder %v8944_v16, 0.09  ;;  %v4200_v2 = vunpack.i.h.bf16 %v4198_v14 }
 0x363   : > { %vm5963_vm10 = vmand %vm8988_vm11, %vm995_vm3  ;;  %vm8995_vm3 = vcmp.lt.f32.partialorder %v8936_v48, 0.09 }
 0x364   : > { %v8990_v47 = vsel %vm5963_vm10, 4294967295, %v8989_v47  ;;  %vm5968_vm8 = vmpackc.low %vm1629_vm9, %vm1628_vm6  ;;  %vm8998_vm6 = vnez %v8955_v53 }
 0x365   : > { %v8992_v58 = vsel %vm5968_vm8, 4294967295, %v8991_v58  ;;  %3803 = vmatprep.subr.msk.bf16.mxu0 %vm5968_vm8, %v8935_v20  ;;  %vm5982_vm11 = vmand %vm8995_vm3, %vm996_vm0  ;;  %vm1395_vm0 = vcmp.eq.f32.partialorder %v5781_v18, %v4165_v33  ;;  %v9043_v33 = vmov 0  ;;  %v4208_v31 = vpop.permute.xlu1 %4207 }
 0x366   : > { %8993 = vst [vmem:[#allocation67_spill] sm:$0xff] %v8992_v58  ;;  %v8997_v38 = vsel %vm5982_vm11, 4294967295, %v8996_v38  ;;  %vm6000_vm11 = vmand %vm8995_vm3, %vm1196_vm4 }
 0x367   : > { %vm6007_vm9 = vmand %vm9003_vm1, %vm1197_vm2  ;;  %vm9037_vm5 = vnez %v8997_v38  ;;  %v9053_v38 = vld [vmem:[#allocation21_spill] sm:$0xff] }
 0x368   : > { %vm9006_vm8 = vmmov %vm9003_vm1 }
 0x369   : > { %vm6013_vm10 = vmand %vm9006_vm8, %vm997_vm7  ;;  %vm9015_vm7 = vcmp.lt.f32.partialorder %v8924_v5, 0.09 }
 0x36a   : > { %v9008_v1 = vsel %vm6013_vm10, 4294967295, %v9007_v1  ;;  %vm9011_vm4 = vmmov %vm8995_vm3 }
 0x36b   : > { %vm6023_vm3 = vmand %vm9011_vm4, %vm1396_vm13 }
 0x36c   : > { %v9013_v17 = vsel %vm6023_vm3, 4294967295, %v9012_v17  ;;  %vm6037_vm10 = vmand %vm9015_vm7, %vm1395_vm0  ;;  %vm994_vm3 = vcmp.eq.f32.partialorder %v5770_v54, 0.0  ;;  %vm9021_vm7 = vnez %v8948_v21  ;;  %v9031_v21 = vmov 0 }
 0x36d   : > { %v9017_v24 = vsel %vm6037_vm10, 4294967295, %v9016_v24  ;;  %vm9018_vm13 = vmmov %vm9006_vm8  ;;  %vm9028_vm10 = vnez %v8983_v46 }
 0x36e   : > { %vm6043_vm4 = vmand %vm9018_vm13, %vm1397_vm15  ;;  %vm9023_vm13 = vnez %v8951_v23  ;;  %v4209_v23 = vunpack.i.l.bf16 %v4208_v31 }
 0x36f   : > { %vm1228_vm0 = vmor %vm6000_vm11, %vm8987_vm14 }
 0x370   : > { %vm9022_vm15 = vmor %vm9021_vm7, %vm8998_vm6 }
 0x371   : > { %vm9024_vm8 = vmor %vm9023_vm13, %vm5882_vm12 }
 0x372   : > { %vm6066_vm2 = vmpackc.low %vm9024_vm8, %vm9022_vm15  ;;  %vm9030_vm8 = vnez %v8986_v9  ;;  %v9072_v9 = vmov 0 }
 0x373   : > { %v9026_v15 = vsel %vm6066_vm2, 4294967295, %v9025_v15  ;;  %vm1229_vm1 = vmor %vm6007_vm9, %vm9028_vm10  ;;  %vm9034_vm9 = vcmp.lt.f32.partialorder %v8922_v13, 0.09 }
 0x374   : > { %9027 = vst [vmem:[#allocation69_spill] sm:$0xff] %v9026_v15  ;;  %vm6084_vm15 = vmpackc.low %vm1229_vm1, %vm1228_vm0  ;;  %vm9038_vm1 = vnez %v9013_v17  ;;  %v4204_v17 = vunpack.i.l.bf16 %v4203_v49 }
 0x375   : > { %v9032_v21 = vsel %vm6084_vm15, 4294967295, %v9031_v21  ;;  %vm6090_vm13 = vmand %vm9034_vm9, %vm994_vm3  ;;  %3785 = vmatprep.subr.msk.bf16.mxu1 %vm6084_vm15, %v8935_v20  ;;  %vm9039_vm9 = vnez %v9008_v1 }
 0x376   : > { %9033 = vst [vmem:[#allocation68_spill] sm:$0xff] %v9032_v21  ;;  %vm1028_vm11 = vmor %vm9037_vm5, %vm8987_vm14  ;;  %v9212_v21 = vmov 0 }
 0x377   : > { %vm1428_vm0 = vmor %vm9038_vm1, %vm8987_vm14 }
 0x378   : > { %vm1429_vm3 = vmor %vm6043_vm4, %vm9028_vm10  ;;  %vm9046_vm4 = vnez %v8964_v26  ;;  %v4199_v26 = vunpack.i.l.bf16 %v4198_v14 }
 0x379   : > { %vm1029_vm7 = vmor %vm9039_vm9, %vm9028_vm10  ;;  %vm9055_vm9 = vnez %v9017_v24  ;;  %v9142_v24 = vld [vmem:[#allocation17_spill] sm:$0xff] }
 0x37a   : > { %vm6113_vm15 = vmpackc.low %vm1029_vm7, %vm1028_vm11  ;;  %vm9048_vm7 = vnez %v8967_v52  ;;  %v9056_v52 = vld [vmem:[#allocation20_spill] sm:$0xff] }
 0x37b   : > { %v9041_v43 = vsel %vm6113_vm15, 4294967295, %v9040_v43  ;;  %3786 = vmatpush3.bf16.xpose.msk.msra.mxu1 %vm6113_vm15, %v8935_v20  ;;  %vm6120_vm5 = vmpackc.low %vm1429_vm3, %vm1428_vm0  ;;  %vm9054_vm3 = vcmp.lt.f32.partialorder %v9053_v38, 0.09 }
 0x37c   : > { %9042 = vst [vmem:[#allocation47_spill] sm:$0xff] %v9041_v43  ;;  %v9044_v33 = vsel %vm6120_vm5, 4294967295, %v9043_v33  ;;  %3787 = vmatprep.subr.msk.bf16.mxu1 %vm6066_vm2, %v8935_v20  ;;  %3804 = vmatpush3.bf16.xpose.msk.msra.mxu0 %vm6120_vm5, %v8935_v20  ;;  %vm9047_vm11 = vmor %vm9046_vm4, %vm8998_vm6  ;;  %v3179_v39 = vsel %vm9054_vm3, 1.0, %v8824_v57  ;;  %vm9057_vm4 = vcmp.lt.f32.partialorder %v9056_v52, 0.09  ;;  %vm9058_vm3 = vnez %v8990_v47 }
 0x37d   : > { %9045 = vst [vmem:[#allocation46_spill] sm:$0xff] %v9044_v33  ;;  %vm9049_vm1 = vmor %vm9048_vm7, %vm5882_vm12  ;;  %v3178_v40 = vsel %vm9057_vm4, 1.0, %v8824_v57  ;;  %v6158_v42 = vsub.f32 %v5355_v61, %v3179_v39  ;;  %v9060_v61 = vmov 0  ;;  %v9069_v47 = vmov 0 }
 0x37e   : > { %vm6140_vm0 = vmpackc.low %vm9049_vm1, %vm9047_vm11  ;;  %vm949_vm11 = vcmp.eq.s32.totalorder %v5761_v4, 1  ;;  %v6166_v1 = vsub.f32 %v5333_v37, %v3178_v40  ;;  %vm950_vm1 = vcmp.eq.s32.totalorder %v922_v55, 1  ;;  %v913_v4 = vpop.permute.xlu0 %912  ;;  %v9065_v37 = vmov 0  ;;  %v9085_v40 = vld [vmem:[#allocation19_spill] sm:$0xff] }
 0x37f   : > { %v9051_v29 = vsel %vm6140_vm0, 4294967295, %v9050_v29  ;;  %3805 = vmatprep.subr.msk.bf16.mxu0 %vm6140_vm0, %v8935_v20  ;;  %vm1026_vm7 = vmor %vm6090_vm13, %vm8998_vm6  ;;  %vm1593_vm0 = vcmp.eq.f32.partialorder %v6158_v42, %v4205_v41  ;;  %v4210_v55 = vunpack.i.h.bf16 %v4208_v31  ;;  %v916_v41 = vpop.permute.xlu1 %915  ;;  %v9146_v33 = vmov 0 }
 0x380   : > { %9052 = vst [vmem:[#allocation49_spill] sm:$0xff] %v9051_v29  ;;  %vm9059_vm4 = vmor %vm9058_vm3, %vm5882_vm12  ;;  %v9116_v29 = vmov 0  ;;  %v9164_v43 = vmov 0 }
 0x381   : > { %vm6173_vm5 = vmpackc.low %vm9059_vm4, %vm1026_vm7  ;;  %vm9068_vm7 = vcmp.eq.s32.totalorder %v8903_v8, 0  ;;  %vm1192_vm4 = vcmp.eq.f32.partialorder %v6166_v1, %v4199_v26  ;;  %v9082_v26 = vmov 0 }
 0x382   : > { %v9061_v61 = vsel %vm6173_vm5, 4294967295, %v9060_v61  ;;  %vm9063_vm13 = vmor %vm9030_vm8, %vm8998_vm6  ;;  %v4213_v14 = vpop.permute.xlu0 %4212  ;;  %vm1392_vm6 = vcmp.eq.f32.partialorder %v6166_v1, %v4209_v23  ;;  %v9093_v23 = vld [vmem:[#allocation18_spill] sm:$0xff] }
 0x383   : > { %9062 = vst [vmem:[#allocation48_spill] sm:$0xff] %v9061_v61  ;;  %vm9064_vm2 = vmor %vm9055_vm9, %vm5882_vm12  ;;  %vm1193_vm9 = vcmp.eq.f32.partialorder %v6158_v42, %v4200_v2  ;;  %3788 = vmatpush3.bf16.xpose.msk.msra.mxu1 %vm6173_vm5, %v8935_v20  ;;  %vm1393_vm5 = vcmp.eq.f32.partialorder %v6158_v42, %v4210_v55  ;;  %v4215_v39 = vunpack.i.h.bf16 %v4213_v14  ;;  %v4214_v31 = vunpack.i.l.bf16 %v4213_v14 }
 0x384   : > { %vm6188_vm15 = vmpackc.low %vm9064_vm2, %vm9063_vm13  ;;  %vm9074_vm2 = vcmp.lt.f32.partialorder %v9053_v38, 0.09  ;;  %v9096_v14 = vmov 0  ;;  %v9129_v55 = vmov 0 }
 0x385   : > { %v9066_v37 = vsel %vm6188_vm15, 4294967295, %v9065_v37  ;;  %vm6194_vm3 = vmand %vm949_vm11, %vm9068_vm7  ;;  %vm1592_vm11 = vcmp.eq.f32.partialorder %v6166_v1, %v4204_v17  ;;  %3806 = vmatpush3.bf16.xpose.msk.msra.mxu0 %vm6188_vm15, %v8935_v20  ;;  %vm9087_vm15 = vcmp.lt.f32.partialorder %v9053_v38, 0.09  ;;  %v9088_v17 = vmov 0 }
 0x386   : > { %9067 = vst [vmem:[#allocation51_spill] sm:$0xff] %v9066_v37  ;;  %v9070_v47 = vsel %vm6194_vm3, 4294967295, %v9069_v47  ;;  %vm9071_vm10 = vmmov %vm9068_vm7  ;;  %v4223_v37 = vpop.permute.xlu0 %4222 }
 0x387   : > { %vm6201_vm8 = vmand %vm950_vm1, %vm9071_vm10  ;;  %vm9077_vm10 = vcmp.lt.f32.partialorder %v9056_v52, 0.09  ;;  %v4225_v49 = vunpack.i.h.bf16 %v4223_v37  ;;  %v4224_v61 = vunpack.i.l.bf16 %v4223_v37  ;;  %v9122_v37 = vmov 0 }
 0x388   : > { %v9073_v9 = vsel %vm6201_vm8, 4294967295, %v9072_v9  ;;  %vm6208_vm13 = vmand %vm9074_vm2, %vm1593_vm0 }
 0x389   : > { %vm1208_vm1 = vmand %vm9077_vm10, %vm1192_vm4 }
 0x38a   : > { %vm9078_vm0 = vmmov %vm9074_vm2 }
 0x38b   : > { %vm1209_vm7 = vmand %vm9078_vm0, %vm1193_vm9 }
 0x38c   : > { %vm9079_vm2 = vmmov %vm9077_vm10  ;;  %vm992_vm10 = vcmp.eq.f32.partialorder %v6166_v1, 0.0 }
 0x38d   : > { %vm6225_vm12 = vmand %vm9079_vm2, %vm1592_vm11  ;;  %vm993_vm11 = vcmp.eq.f32.partialorder %v6158_v42, 0.0  ;;  %vm9086_vm2 = vcmp.lt.f32.partialorder %v9085_v40, 0.09 }
 0x38e   : > { %vm1224_vm4 = vmor %vm1208_vm1, %vm6194_vm3  ;;  %v3177_v2 = vsel %vm9086_vm2, 1.0, %v8824_v57  ;;  %vm947_vm1 = vcmp.eq.s32.totalorder %v913_v4, 1 }
 0x38f   : > { %vm1225_vm9 = vmor %vm1209_vm7, %vm6201_vm8  ;;  %vm9090_vm7 = vcmp.lt.f32.partialorder %v9056_v52, 0.09  ;;  %v6263_v30 = vsub.f32 %v5189_v60, %v3177_v2  ;;  %v9102_v60 = vmov 0  ;;  %v9167_v2 = vmov 0 }
 0x390   : > { %vm6236_vm0 = vmpackc.low %vm1225_vm9, %vm1224_vm4  ;;  %vm9094_vm9 = vcmp.lt.f32.partialorder %v9093_v23, 0.09 }
 0x391   : > { %v9083_v26 = vsel %vm6236_vm0, 4294967295, %v9082_v26  ;;  %vm6246_vm14 = vmand %vm9087_vm15, %vm1393_vm5  ;;  %3789 = vmatprep.subr.msk.bf16.mxu1 %vm6236_vm0, %v8935_v20  ;;  %v3176_v4 = vsel %vm9094_vm9, 1.0, %v8824_v57  ;;  %vm948_vm0 = vcmp.eq.s32.totalorder %v916_v41, 1  ;;  %v9114_v41 = vmov 0 }
 0x392   : > { %9084 = vst [vmem:[#allocation50_spill] sm:$0xff] %v9083_v26  ;;  %v9089_v17 = vsel %vm6246_vm14, 4294967295, %v9088_v17  ;;  %vm6255_vm4 = vmand %vm9090_vm7, %vm992_vm10  ;;  %v6272_v27 = vsub.f32 %v5182_v45, %v3176_v4  ;;  %vm9098_vm10 = vcmp.lt.f32.partialorder %v9053_v38, 0.09  ;;  %v4218_v45 = vpop.permute.xlu1 %4217  ;;  %v910_v26 = vpop.permute.xlu0 %909 }
 0x393   : > { %vm9095_vm15 = vmmov %vm9090_vm7  ;;  %vm9101_vm7 = vcmp.eq.s32.totalorder %v8903_v8, 0  ;;  %v4220_v4 = vunpack.i.h.bf16 %v4218_v45 }
 0x394   : > { %vm6267_vm5 = vmand %vm9095_vm15, %vm1392_vm6  ;;  %vm1191_vm6 = vcmp.eq.f32.partialorder %v6263_v30, %v4215_v39  ;;  %v9104_v39 = vmov 0 }
 0x395   : > { %v9097_v14 = vsel %vm6267_vm5, 4294967295, %v9096_v14  ;;  %vm6276_vm2 = vmand %vm9098_vm10, %vm993_vm11  ;;  %vm1190_vm10 = vcmp.eq.f32.partialorder %v6272_v27, %v4214_v31  ;;  %vm9107_vm11 = vcmp.lt.f32.partialorder %v9085_v40, 0.09  ;;  %v4219_v31 = vunpack.i.l.bf16 %v4218_v45 }
 0x396   : > { %vm6282_vm9 = vmand %vm947_vm1, %vm9101_vm7  ;;  %vm9110_vm1 = vcmp.lt.f32.partialorder %v9093_v23, 0.09 }
 0x397   : > { %v9103_v60 = vsel %vm6282_vm9, 4294967295, %v9102_v60  ;;  %vm1624_vm15 = vmor %vm6225_vm12, %vm6194_vm3 }
 0x398   : > { %vm1625_vm7 = vmor %vm6208_vm13, %vm6201_vm8  ;;  %vm9113_vm13 = vcmp.eq.s32.totalorder %v8903_v8, 0 }
 0x399   : > { %vm6304_vm12 = vmpackc.low %vm1625_vm7, %vm1624_vm15 }
 0x39a   : > { %v9105_v39 = vsel %vm6304_vm12, 4294967295, %v9104_v39  ;;  %vm6310_vm5 = vmand %vm9107_vm11, %vm1191_vm6  ;;  %3807 = vmatprep.subr.msk.bf16.mxu0 %vm6304_vm12, %v8935_v20  ;;  %vm1391_vm6 = vcmp.eq.f32.partialorder %v6263_v30, %v4225_v49  ;;  %v9120_v49 = vmov 0 }
 0x39b   : > { %9106 = vst [vmem:[#allocation53_spill] sm:$0xff] %v9105_v39  ;;  %vm6319_vm14 = vmand %vm9110_vm1, %vm1190_vm10  ;;  %v907_v39 = vpop.permute.xlu1 %906  ;;  %vm9119_vm10 = vcmp.lt.f32.partialorder %v9085_v40, 0.09 }
 0x39c   : > { %vm6325_vm15 = vmand %vm948_vm0, %vm9113_vm13 }
 0x39d   : > { %v9115_v41 = vsel %vm6325_vm15, 4294967295, %v9114_v41  ;;  %vm1024_vm11 = vmor %vm6255_vm4, %vm6194_vm3 }
 0x39e   : > { %vm1025_vm1 = vmor %vm6276_vm2, %vm6201_vm8  ;;  %vm1590_vm2 = vcmp.eq.f32.partialorder %v6272_v27, %v4219_v31 }
 0x39f   : > { %vm6338_vm0 = vmpackc.low %vm1025_vm1, %vm1024_vm11  ;;  %vm1390_vm1 = vcmp.eq.f32.partialorder %v6272_v27, %v4224_v61 }
 0x3a0   : > { %v9117_v29 = vsel %vm6338_vm0, 4294967295, %v9116_v29  ;;  %vm6344_vm7 = vmand %vm9119_vm10, %vm1391_vm6  ;;  %3790 = vmatpush3.bf16.xpose.msk.msra.mxu1 %vm6338_vm0, %v8935_v20  ;;  %vm1591_vm6 = vcmp.eq.f32.partialorder %v6263_v30, %v4220_v4  ;;  %vm9132_vm0 = vcmp.lt.f32.partialorder %v9093_v23, 0.09 }
 0x3a1   : > { %9118 = vst [vmem:[#allocation52_spill] sm:$0xff] %v9117_v29  ;;  %v9121_v49 = vsel %vm6344_vm7, 4294967295, %v9120_v49  ;;  %vm1222_vm4 = vmor %vm6319_vm14, %vm6282_vm9  ;;  %vm9125_vm14 = vnez %v9097_v14  ;;  %v4228_v14 = vpop.permute.xlu1 %4227  ;;  %v4233_v29 = vpop.permute.xlu0 %4232 }
 0x3a2   : > { %vm1223_vm13 = vmor %vm6310_vm5, %vm6325_vm15  ;;  %vm9127_vm5 = vnez %v9089_v17  ;;  %v4230_v45 = vunpack.i.h.bf16 %v4228_v14  ;;  %v4229_v4 = vunpack.i.l.bf16 %v4228_v14  ;;  %v9173_v14 = vmov 0 }
 0x3a3   : > { %vm6361_vm11 = vmpackc.low %vm1223_vm13, %vm1222_vm4 }
 0x3a4   : > { %v9123_v37 = vsel %vm6361_vm11, 4294967295, %v9122_v37  ;;  %3791 = vmatprep.subr.msk.bf16.mxu1 %vm6361_vm11, %v8935_v20  ;;  %vm9126_vm10 = vmor %vm9125_vm14, %vm6194_vm3  ;;  %vm990_vm14 = vcmp.eq.f32.partialorder %v6272_v27, 0.0  ;;  %vm9135_vm11 = vcmp.lt.f32.partialorder %v9085_v40, 0.09 }
 0x3a5   : > { %9124 = vst [vmem:[#allocation55_spill] sm:$0xff] %v9123_v37  ;;  %vm9128_vm4 = vmor %vm9127_vm5, %vm6201_vm8 }
 0x3a6   : > { %vm6379_vm13 = vmpackc.low %vm9128_vm4, %vm9126_vm10 }
 0x3a7   : > { %v9130_v55 = vsel %vm6379_vm13, 4294967295, %v9129_v55  ;;  %vm6385_vm12 = vmand %vm9132_vm0, %vm1590_vm2  ;;  %3808 = vmatpush3.bf16.xpose.msk.msra.mxu0 %vm6379_vm13, %v8935_v20  ;;  %vm991_vm2 = vcmp.eq.f32.partialorder %v6263_v30, 0.0 }
 0x3a8   : > { %9131 = vst [vmem:[#allocation54_spill] sm:$0xff] %v9130_v55  ;;  %vm1607_vm5 = vmand %vm9135_vm11, %vm1591_vm6  ;;  %vm9143_vm6 = vcmp.lt.f32.partialorder %v9142_v24, 0.09  ;;  %v9144_v55 = vld [vmem:[#allocation16_spill] sm:$0xff] }
 0x3a9   : > { %vm9136_vm10 = vmmov %vm9132_vm0  ;;  %v3175_v31 = vsel %vm9143_vm6, 1.0, %v8824_v57 }
 0x3aa   : > { %vm6397_vm4 = vmand %vm9136_vm10, %vm1390_vm1  ;;  %vm9145_vm1 = vcmp.lt.f32.partialorder %v9144_v55, 0.09  ;;  %v6421_v37 = vsub.f32 %v5203_v35, %v3175_v31  ;;  %v9153_v35 = vmov 0  ;;  %v4238_v31 = vpop.permute.xlu1 %4237 }
 0x3ab   : > { %vm1622_vm0 = vmor %vm6385_vm12, %vm6282_vm9  ;;  %v3174_v61 = vsel %vm9145_vm1, 1.0, %v8824_v57  ;;  %vm946_vm12 = vcmp.eq.s32.totalorder %v910_v26, 1  ;;  %vm9152_vm1 = vcmp.eq.s32.totalorder %v8903_v8, 0  ;;  %v4239_v58 = vunpack.i.l.bf16 %v4238_v31 }
 0x3ac   : > { %vm9139_vm13 = vmmov %vm9136_vm10  ;;  %v6428_v15 = vsub.f32 %v5186_v51, %v3174_v61  ;;  %v9156_v51 = vmov 0  ;;  %v4234_v61 = vunpack.i.l.bf16 %v4233_v29 }
 0x3ad   : > { %vm6408_vm8 = vmand %vm9139_vm13, %vm990_vm14  ;;  %vm945_vm14 = vcmp.eq.s32.totalorder %v907_v39, 1  ;;  %v9182_v39 = vld [vmem:[#allocation15_spill] sm:$0xff] }
 0x3ae   : > { %vm1623_vm11 = vmor %vm1607_vm5, %vm6325_vm15  ;;  %vm9149_vm5 = vcmp.lt.f32.partialorder %v9085_v40, 0.09 }
 0x3af   : > { %vm6423_vm13 = vmpackc.low %vm1623_vm11, %vm1622_vm0  ;;  %vm1189_vm11 = vcmp.eq.f32.partialorder %v6421_v37, %v4230_v45  ;;  %v901_v45 = vpop.permute.xlu0 %900 }
 0x3b0   : > { %v9147_v33 = vsel %vm6423_vm13, 4294967295, %v9146_v33  ;;  %3809 = vmatprep.subr.msk.bf16.mxu0 %vm6423_vm13, %v8935_v20  ;;  %vm6435_vm10 = vmand %vm9149_vm5, %vm991_vm2  ;;  %vm1188_vm2 = vcmp.eq.f32.partialorder %v6428_v15, %v4229_v4  ;;  %v4235_v4 = vunpack.i.h.bf16 %v4233_v29 }
 0x3b1   : > { %9148 = vst [vmem:[#allocation57_spill] sm:$0xff] %v9147_v33  ;;  %vm6450_vm13 = vmand %vm946_vm12, %vm9152_vm1  ;;  %v4240_v33 = vunpack.i.h.bf16 %v4238_v31 }
 0x3b2   : > { %v9154_v35 = vsel %vm6450_vm13, 4294967295, %v9153_v35  ;;  %vm9155_vm5 = vmmov %vm9152_vm1  ;;  %vm1588_vm1 = vcmp.eq.f32.partialorder %v6428_v15, %v4234_v61 }
 0x3b3   : > { %vm6457_vm3 = vmand %vm945_vm14, %vm9155_vm5  ;;  %v4243_v29 = vpop.permute.xlu0 %4242  ;;  %vm1389_vm5 = vcmp.eq.f32.partialorder %v6421_v37, %v4240_v33  ;;  %v9234_v33 = vmov 0 }
 0x3b4   : > { %v9157_v51 = vsel %vm6457_vm3, 4294967295, %v9156_v51  ;;  %vm9158_vm0 = vmmov %vm9143_vm6  ;;  %vm9161_vm6 = vcmp.lt.f32.partialorder %v9144_v55, 0.09  ;;  %v4245_v17 = vunpack.i.h.bf16 %v4243_v29  ;;  %v4244_v31 = vunpack.i.l.bf16 %v4243_v29 }
 0x3b5   : > { %vm6463_vm7 = vmand %vm9158_vm0, %vm1189_vm11 }
 0x3b6   : > { %vm6469_vm12 = vmand %vm9161_vm6, %vm1188_vm2  ;;  %vm1589_vm6 = vcmp.eq.f32.partialorder %v6421_v37, %v4235_v4  ;;  %v904_v4 = vpop.permute.xlu1 %903 }
 0x3b7   : > { %vm1022_vm14 = vmor %vm6408_vm8, %vm6282_vm9 }
 0x3b8   : > { %vm1023_vm0 = vmor %vm6435_vm10, %vm6325_vm15 }
 0x3b9   : > { %vm6481_vm11 = vmpackc.low %vm1023_vm0, %vm1022_vm14 }
 0x3ba   : > { %v9165_v43 = vsel %vm6481_vm11, 4294967295, %v9164_v43  ;;  %3792 = vmatpush3.bf16.xpose.msk.msra.mxu1 %vm6481_vm11, %v8935_v20  ;;  %vm1220_vm8 = vmor %vm6469_vm12, %vm6457_vm3 }
 0x3bb   : > { %9166 = vst [vmem:[#allocation56_spill] sm:$0xff] %v9165_v43  ;;  %vm1221_vm10 = vmor %vm6463_vm7, %vm6450_vm13  ;;  %vm9171_vm7 = vnez %v9121_v49  ;;  %v4248_v49 = vpop.permute.xlu1 %4247 }
 0x3bc   : > { %vm6498_vm2 = vmpackc.low %vm1221_vm10, %vm1220_vm8  ;;  %vm988_vm8 = vcmp.eq.f32.partialorder %v6428_v15, 0.0  ;;  %vm9176_vm10 = vcmp.lt.f32.partialorder %v9142_v24, 0.09 }
 0x3bd   : > { %v9168_v2 = vsel %vm6498_vm2, 4294967295, %v9167_v2  ;;  %3793 = vmatprep.subr.msk.bf16.mxu1 %vm6498_vm2, %v8935_v20  ;;  %vm9170_vm12 = vmor %vm6397_vm4, %vm6282_vm9  ;;  %vm1388_vm2 = vcmp.eq.f32.partialorder %v6428_v15, %v4239_v58  ;;  %vm9179_vm4 = vcmp.lt.f32.partialorder %v9144_v55, 0.09  ;;  %v9184_v58 = vmov 0 }
 0x3be   : > { %9169 = vst [vmem:[#allocation29_spill] sm:$0xff] %v9168_v2  ;;  %vm9172_vm14 = vmor %vm9171_vm7, %vm6325_vm15  ;;  %vm989_vm7 = vcmp.eq.f32.partialorder %v6421_v37, 0.0  ;;  %vm944_vm9 = vcmp.eq.s32.totalorder %v904_v4, 1  ;;  %v4250_v4 = vunpack.i.h.bf16 %v4248_v49 }
 0x3bf   : > { %vm6516_vm0 = vmpackc.low %vm9172_vm14, %vm9170_vm12  ;;  %vm943_vm14 = vcmp.eq.s32.totalorder %v901_v45, 1 }
 0x3c0   : > { %v9174_v14 = vsel %vm6516_vm0, 4294967295, %v9173_v14  ;;  %vm6523_vm11 = vmand %vm9176_vm10, %vm1589_vm6  ;;  %3810 = vmatpush3.bf16.xpose.msk.msra.mxu0 %vm6516_vm0, %v8935_v20  ;;  %vm9183_vm6 = vcmp.lt.f32.partialorder %v9182_v39, 0.09 }
 0x3c1   : > { %9175 = vst [vmem:[#allocation28_spill] sm:$0xff] %v9174_v14  ;;  %vm6533_vm12 = vmand %vm9179_vm4, %vm1588_vm1  ;;  %v3173_v26 = vsel %vm9183_vm6, 1.0, %v8824_v57  ;;  %v9189_v14 = vld [vmem:[#allocation14_spill] sm:$0xff] }
 0x3c2   : > { %vm6543_vm15 = vmand %vm9176_vm10, %vm1389_vm5  ;;  %vm9190_vm0 = vcmp.lt.f32.partialorder %v9189_v14, 0.09  ;;  %v6557_v45 = vsub.f32 %v5041_v3, %v3173_v26  ;;  %v9198_v3 = vmov 0  ;;  %v4253_v26 = vpop.permute.xlu0 %4252 }
 0x3c3   : > { %v9185_v58 = vsel %vm6543_vm15, 4294967295, %v9184_v58  ;;  %vm9186_vm1 = vmmov %vm9179_vm4  ;;  %v3172_v2 = vsel %vm9190_vm0, 1.0, %v8824_v57  ;;  %vm9197_vm0 = vcmp.eq.s32.totalorder %v8903_v8, 0  ;;  %v4254_v61 = vunpack.i.l.bf16 %v4253_v26 }
 0x3c4   : > { %vm6549_vm4 = vmand %vm9186_vm1, %vm988_vm8  ;;  %v6566_v29 = vsub.f32 %v5034_v62, %v3172_v2  ;;  %v9200_v62 = vmov 0  ;;  %v9222_v2 = vmov 0 }
 0x3c5   : > { %vm9191_vm5 = vmmov %vm9186_vm1 }
 0x3c6   : > { %vm6561_vm6 = vmand %vm9191_vm5, %vm1388_vm2  ;;  %vm1187_vm2 = vcmp.eq.f32.partialorder %v6557_v45, %v4245_v17  ;;  %v9210_v17 = vmov 0  ;;  %v898_v43 = vpop.permute.xlu0 %897 }
 0x3c7   : > { %vm9194_vm8 = vmmov %vm9176_vm10 }
 0x3c8   : > { %vm6570_vm10 = vmand %vm9194_vm8, %vm989_vm7  ;;  %vm1186_vm8 = vcmp.eq.f32.partialorder %v6566_v29, %v4244_v31  ;;  %v4249_v31 = vunpack.i.l.bf16 %v4248_v49 }
 0x3c9   : > { %vm6576_vm1 = vmand %vm943_vm14, %vm9197_vm0  ;;  %vm9206_vm14 = vcmp.lt.f32.partialorder %v9189_v14, 0.09 }
 0x3ca   : > { %v9199_v3 = vsel %vm6576_vm1, 4294967295, %v9198_v3  ;;  %vm1620_vm5 = vmor %vm6533_vm12, %vm6457_vm3  ;;  %vm9203_vm12 = vcmp.lt.f32.partialorder %v9182_v39, 0.09 }
 0x3cb   : > { %vm1621_vm0 = vmor %vm6523_vm11, %vm6450_vm13  ;;  %vm9209_vm11 = vcmp.eq.s32.totalorder %v8903_v8, 0 }
 0x3cc   : > { %vm6598_vm1 = vmpackc.low %vm1621_vm0, %vm1620_vm5  ;;  %vm1586_vm0 = vcmp.eq.f32.partialorder %v6566_v29, %v4249_v31 }
 0x3cd   : > { %v9201_v62 = vsel %vm6598_vm1, 4294967295, %v9200_v62  ;;  %vm6604_vm7 = vmand %vm9203_vm12, %vm1187_vm2  ;;  %3811 = vmatprep.subr.msk.bf16.mxu0 %vm6598_vm1, %v8935_v20  ;;  %vm1587_vm12 = vcmp.eq.f32.partialorder %v6557_v45, %v4250_v4  ;;  %v4263_v4 = vpop.permute.xlu0 %4262 }
 0x3ce   : > { %9202 = vst [vmem:[#allocation59_spill] sm:$0xff] %v9201_v62  ;;  %vm6613_vm15 = vmand %vm9206_vm14, %vm1186_vm8  ;;  %v4255_v62 = vunpack.i.h.bf16 %v4253_v26 }
 0x3cf   : > { %vm6619_vm5 = vmand %vm944_vm9, %vm9209_vm11  ;;  %vm9215_vm9 = vnez %v9199_v3 }
 0x3d0   : > { %v9211_v17 = vsel %vm6619_vm5, 4294967295, %v9210_v17  ;;  %vm1020_vm2 = vmor %vm6549_vm4, %vm6457_vm3 }
 0x3d1   : > { %vm1021_vm14 = vmor %vm6570_vm10, %vm6450_vm13 }
 0x3d2   : > { %vm6631_vm8 = vmpackc.low %vm1021_vm14, %vm1020_vm2  ;;  %vm986_vm2 = vcmp.eq.f32.partialorder %v6566_v29, 0.0  ;;  %vm1387_vm14 = vcmp.eq.f32.partialorder %v6557_v45, %v4255_v62  ;;  %v895_v62 = vpop.permute.xlu1 %894 }
 0x3d3   : > { %v9213_v21 = vsel %vm6631_vm8, 4294967295, %v9212_v21  ;;  %3794 = vmatpush3.bf16.xpose.msk.msra.mxu1 %vm6631_vm8, %v8935_v20  ;;  %vm1218_vm4 = vmor %vm6613_vm15, %vm9215_vm9  ;;  %vm9225_vm8 = vcmp.lt.f32.partialorder %v9189_v14, 0.09 }
 0x3d4   : > { %9214 = vst [vmem:[#allocation58_spill] sm:$0xff] %v9213_v21  ;;  %vm1219_vm10 = vmor %vm6604_vm7, %vm6619_vm5  ;;  %vm9220_vm7 = vnez %v9185_v58  ;;  %v9245_v58 = vmov 0 }
 0x3d5   : > { %vm6648_vm11 = vmpackc.low %vm1219_vm10, %vm1218_vm4 }
 0x3d6   : > { %v9217_v50 = vsel %vm6648_vm11, 4294967295, %v9216_v50  ;;  %3795 = vmatprep.subr.msk.bf16.mxu1 %vm6648_vm11, %v8935_v20  ;;  %vm9219_vm15 = vmor %vm6561_vm6, %vm6457_vm3  ;;  %vm9226_vm11 = vcmp.lt.f32.partialorder %v9182_v39, 0.09  ;;  %v4258_v26 = vpop.permute.xlu1 %4257 }
 0x3d7   : > { %9218 = vst [vmem:[#allocation31_spill] sm:$0xff] %v9217_v50  ;;  %vm9221_vm4 = vmor %vm9220_vm7, %vm6450_vm13  ;;  %v4264_v50 = vunpack.i.l.bf16 %v4263_v4  ;;  %v4260_v59 = vunpack.i.h.bf16 %v4258_v26 }
 0x3d8   : > { %vm6667_vm10 = vmpackc.low %vm9221_vm4, %vm9219_vm15  ;;  %vm987_vm4 = vcmp.eq.f32.partialorder %v6557_v45, 0.0 }
 0x3d9   : > { %v9223_v2 = vsel %vm6667_vm10, 4294967295, %v9222_v2  ;;  %vm1602_vm1 = vmand %vm9225_vm8, %vm1586_vm0  ;;  %3812 = vmatpush3.bf16.xpose.msk.msra.mxu0 %vm6667_vm10, %v8935_v20 }
 0x3da   : > { %9224 = vst [vmem:[#allocation30_spill] sm:$0xff] %v9223_v2  ;;  %vm1603_vm6 = vmand %vm9226_vm11, %vm1587_vm12  ;;  %vm9233_vm12 = vnez %v9211_v17  ;;  %v4268_v21 = vpop.permute.xlu1 %4267 }
 0x3db   : > { %vm9227_vm3 = vmmov %vm9225_vm8  ;;  %vm1386_vm8 = vcmp.eq.f32.partialorder %v6566_v29, %v4254_v61  ;;  %v4265_v61 = vunpack.i.h.bf16 %v4263_v4  ;;  %v4259_v4 = vunpack.i.l.bf16 %v4258_v26  ;;  %v4270_v49 = vunpack.i.h.bf16 %v4268_v21 }
 0x3dc   : > { %vm6680_vm5 = vmand %vm9227_vm3, %vm986_vm2  ;;  %vm9237_vm2 = vcmp.lt.f32.partialorder %v9189_v14, 0.09  ;;  %v9270_v26 = vmov 0 }
 0x3dd   : > { %vm9230_vm15 = vmmov %vm9226_vm11 }
 0x3de   : > { %vm6686_vm7 = vmand %vm9230_vm15, %vm1387_vm14 }
 0x3df   : > { %vm1618_vm0 = vmor %vm1602_vm1, %vm9215_vm9 }
 0x3e0   : > { %vm1619_vm11 = vmor %vm1603_vm6, %vm9233_vm12 }
 0x3e1   : > { %vm6696_vm3 = vmpackc.low %vm1619_vm11, %vm1618_vm0 }
 0x3e2   : > { %v9235_v33 = vsel %vm6696_vm3, 4294967295, %v9234_v33  ;;  %vm6702_vm14 = vmand %vm9237_vm2, %vm1386_vm8  ;;  %3813 = vmatprep.subr.msk.bf16.mxu0 %vm6696_vm3, %v8935_v20  ;;  %vm9244_vm2 = vcmp.lt.f32.partialorder %v9243_v19, 0.09 }
 0x3e3   : > { %9236 = vst [vmem:[#allocation33_spill] sm:$0xff] %v9235_v33  ;;  %vm9240_vm1 = vmmov %vm9230_vm15  ;;  %v9241_v33 = vld [vmem:[#allocation13_spill] sm:$0xff]  ;;  %v3170_v36 = vsel %vm9244_vm2, 1.0, %v8824_v57 }
 0x3e4   : > { %vm1003_vm6 = vmand %vm9240_vm1, %vm987_vm4  ;;  %vm9242_vm11 = vcmp.lt.f32.partialorder %v9241_v33, 0.09  ;;  %vm942_vm1 = vcmp.eq.s32.totalorder %v898_v43, 1  ;;  %v6739_v14 = vsub.f32 %v5038_v63, %v3170_v36  ;;  %v4269_v63 = vunpack.i.l.bf16 %v4268_v21  ;;  %v4273_v36 = vpop.permute.xlu0 %4272 }
 0x3e5   : > { %vm1418_vm8 = vmor %vm6702_vm14, %vm9215_vm9  ;;  %v3171_v2 = vsel %vm9242_vm11, 1.0, %v8824_v57  ;;  %v9248_v57 = vmov 0  ;;  %v4274_v31 = vunpack.i.l.bf16 %v4273_v36  ;;  %vm9278_vm13 = vcmp.lt.f32.partialorder %v9241_v33, 0.09 }
 0x3e6   : > { %vm1018_vm0 = vmor %vm6680_vm5, %vm9215_vm9  ;;  %v6732_v22 = vsub.f32 %v5055_v12, %v3171_v2  ;;  %vm941_vm5 = vcmp.eq.s32.totalorder %v895_v62, 1  ;;  %v9252_v12 = vmov 0  ;;  %vm1584_vm14 = vcmp.eq.f32.partialorder %v6739_v14, %v4264_v50 }
 0x3e7   : > { %vm1019_vm4 = vmor %vm1003_vm6, %vm9233_vm12  ;;  %v9255_v2 = vmov 0 }
 0x3e8   : > { %vm6734_vm15 = vmpackc.low %vm1019_vm4, %vm1018_vm0  ;;  %vm1585_vm11 = vcmp.eq.f32.partialorder %v6732_v22, %v4265_v61  ;;  %vm9251_vm4 = vcmp.eq.s32.totalorder %v8903_v8, 0  ;;  %v4275_v8 = vunpack.i.h.bf16 %v4273_v36  ;;  %v9275_v61 = vmov 0 }
 0x3e9   : > { %v9246_v58 = vsel %vm6734_vm15, 4294967295, %v9245_v58  ;;  %3796 = vmatpush3.bf16.xpose.msk.msra.mxu1 %vm6734_vm15, %v8935_v20  ;;  %vm9247_vm6 = vmor %vm6686_vm7, %vm9233_vm12  ;;  %v9285_v36 = vmov 0 }
 0x3ea   : > { %vm6754_vm0 = vmpackc.low %vm9247_vm6, %vm1418_vm8  ;;  %vm1185_vm6 = vcmp.eq.f32.partialorder %v6732_v22, %v4260_v59  ;;  %v9264_v59 = vmov 0 }
 0x3eb   : > { %v9249_v57 = vsel %vm6754_vm0, 4294967295, %v9248_v57  ;;  %3814 = vmatpush3.bf16.xpose.msk.msra.mxu0 %vm6754_vm0, %v8935_v20  ;;  %vm6764_vm2 = vmand %vm942_vm1, %vm9251_vm4  ;;  %vm9257_vm0 = vcmp.lt.f32.partialorder %v9241_v33, 0.09  ;;  %vm1184_vm1 = vcmp.eq.f32.partialorder %v6739_v14, %v4259_v4 }
 0x3ec   : > { %9250 = vst [vmem:[#allocation32_spill] sm:$0xff] %v9249_v57  ;;  %v9253_v12 = vsel %vm6764_vm2, 4294967295, %v9252_v12  ;;  %vm9254_vm7 = vmmov %vm9251_vm4  ;;  %vm9260_vm4 = vcmp.lt.f32.partialorder %v9243_v19, 0.09 }
 0x3ed   : > { %vm6771_vm8 = vmand %vm941_vm5, %vm9254_vm7  ;;  %vm1384_vm5 = vcmp.eq.f32.partialorder %v6739_v14, %v4269_v63  ;;  %v9303_v63 = vmov 0 }
 0x3ee   : > { %v9256_v2 = vsel %vm6771_vm8, 4294967295, %v9255_v2  ;;  %vm6778_vm15 = vmand %vm9257_vm0, %vm1585_vm11 }
 0x3ef   : > { %vm6785_vm3 = vmand %vm9260_vm4, %vm1584_vm14  ;;  %vm984_vm14 = vcmp.eq.f32.partialorder %v6739_v14, 0.0 }
 0x3f0   : > { %vm9263_vm7 = vmmov %vm9257_vm0 }
 0x3f1   : > { %vm6792_vm10 = vmand %vm9263_vm7, %vm1185_vm6  ;;  %vm985_vm6 = vcmp.eq.f32.partialorder %v6732_v22, 0.0  ;;  %vm1999_vm7 = vcmp.eq.f32.partialorder %v5691_v56, %v4275_v8  ;;  %v4283_v8 = vpop.permute.xlu0 %4282 }
 0x3f2   : > { %v9265_v59 = vsel %vm6792_vm10, 4294967295, %v9264_v59  ;;  %vm9266_vm0 = vmmov %vm9260_vm4  ;;  %v4285_v43 = vunpack.i.h.bf16 %v4283_v8 }
 0x3f3   : > { %vm6798_vm11 = vmand %vm9266_vm0, %vm1184_vm1 }
 0x3f4   : > { %vm9269_vm4 = vmmov %vm9266_vm0 }
 0x3f5   : > { %vm6805_vm12 = vmand %vm9269_vm4, %vm1384_vm5 }
 0x3f6   : > { %v9271_v26 = vsel %vm6805_vm12, 4294967295, %v9270_v26  ;;  %vm1616_vm1 = vmor %vm6785_vm3, %vm6771_vm8  ;;  %vm9281_vm3 = vcmp.lt.f32.partialorder %v8893_v44, 0.09 }
 0x3f7   : > { %vm1617_vm0 = vmor %vm6778_vm15, %vm6764_vm2  ;;  %vm1385_vm15 = vcmp.eq.f32.partialorder %v6732_v22, %v4270_v49  ;;  %v4284_v49 = vunpack.i.l.bf16 %v4283_v8 }
 0x3f8   : > { %vm9272_vm5 = vmmov %vm9269_vm4 }
 0x3f9   : > { %vm6821_vm4 = vmand %vm9272_vm5, %vm984_vm14  ;;  %vm1998_vm14 = vcmp.eq.f32.partialorder %v5679_v0, %v4274_v31  ;;  %v9294_v31 = vmov 0 }
 0x3fa   : > { %vm6825_vm9 = vmpackc.low %vm1617_vm0, %vm1616_vm1  ;;  %vm9287_vm0 = vcmp.lt.f32.partialorder %v9241_v33, 0.09 }
 0x3fb   : > { %v9276_v61 = vsel %vm6825_vm9, 4294967295, %v9275_v61  ;;  %vm6831_vm12 = vmand %vm9278_vm13, %vm985_vm6  ;;  %3815 = vmatprep.subr.msk.bf16.mxu0 %vm6825_vm9, %v8935_v20  ;;  %vm9284_vm6 = vnez %v9265_v59  ;;  %v4278_v59 = vpop.permute.xlu1 %4277  ;;  %vm9313_vm9 = vcmp.lt.f32.partialorder %v8892_v34, 0.09 }
 0x3fc   : > { %9277 = vst [vmem:[#allocation35_spill] sm:$0xff] %v9276_v61  ;;  %vm6837_vm10 = vmand %vm9281_vm3, %vm1999_vm7  ;;  %v4293_v61 = vpop.permute.xlu0 %4292  ;;  %v4280_v21 = vunpack.i.h.bf16 %v4278_v59  ;;  %v4279_v8 = vunpack.i.l.bf16 %v4278_v59 }
 0x3fd   : > { %vm1216_vm13 = vmor %vm6798_vm11, %vm6771_vm8  ;;  %vm9290_vm11 = vcmp.lt.f32.partialorder %v8892_v34, 0.09  ;;  %v4294_v57 = vunpack.i.l.bf16 %v4293_v61 }
 0x3fe   : > { %vm1217_vm7 = vmor %vm9284_vm6, %vm6764_vm2  ;;  %vm9298_vm6 = vnez %v8907_v10  ;;  %v9367_v10 = vmov 0 }
 0x3ff   : > { %vm6854_vm1 = vmpackc.low %vm1217_vm7, %vm1216_vm13  ;;  %vm9293_vm13 = vnez %v9271_v26  ;;  %v4288_v4 = vpop.permute.xlu1 %4287 }
 0x400   : > { %v9286_v36 = vsel %vm6854_vm1, 4294967295, %v9285_v36  ;;  %vm6860_vm5 = vmand %vm9287_vm0, %vm1385_vm15  ;;  %3797 = vmatprep.subr.msk.bf16.mxu1 %vm6854_vm1, %v8935_v20  ;;  %vm1799_vm15 = vcmp.eq.f32.partialorder %v5691_v56, %v4285_v43  ;;  %v4290_v26 = vunpack.i.h.bf16 %v4288_v4  ;;  %v4295_v43 = vunpack.i.h.bf16 %v4293_v61 }
 0x401   : > { %vm6869_vm3 = vmand %vm9290_vm11, %vm1998_vm14  ;;  %vm9297_vm11 = vnez %v8909_v11 }
 0x402   : > { %vm1016_vm14 = vmor %vm6821_vm4, %vm6771_vm8 }
 0x403   : > { %vm1017_vm7 = vmor %vm6831_vm12, %vm6764_vm2  ;;  %v4298_v61 = vpop.permute.xlu1 %4297 }
 0x404   : > { %vm6889_vm0 = vmpackc.low %vm1017_vm7, %vm1016_vm14  ;;  %vm1798_vm14 = vcmp.eq.f32.partialorder %v5679_v0, %v4284_v49  ;;  %v4299_v50 = vunpack.i.l.bf16 %v4298_v61  ;;  %v9337_v49 = vmov 0 }
 0x405   : > { %v9295_v31 = vsel %vm6889_vm0, 4294967295, %v9294_v31  ;;  %3798 = vmatpush3.bf16.xpose.msk.msra.mxu1 %vm6889_vm0, %v8935_v20  ;;  %vm2030_vm4 = vmor %vm6869_vm3, %vm9297_vm11 }
 0x406   : > { %9296 = vst [vmem:[#allocation34_spill] sm:$0xff] %v9295_v31  ;;  %vm2031_vm12 = vmor %vm6837_vm10, %vm9298_vm6  ;;  %v9299_v31 = vmov 0 }
 0x407   : > { %vm6906_vm7 = vmpackc.low %vm2031_vm12, %vm2030_vm4  ;;  %vm9305_vm4 = vcmp.lt.f32.partialorder %v8893_v44, 0.09  ;;  %v4303_v44 = vpop.permute.xlu0 %4302  ;;  %v4313_v62 = vpop.permute.xlu1 %4312 }
 0x408   : > { %v9300_v31 = vsel %vm6906_vm7, 4294967295, %v9299_v31  ;;  %3819 = vmatprep.subr.msk.bf16.mxu1 %vm6906_vm7, %v8935_v20  ;;  %vm9301_vm3 = vmor %vm9293_vm13, %vm6771_vm8  ;;  %vm9308_vm13 = vcmp.lt.f32.partialorder %v8892_v34, 0.09  ;;  %v4314_v11 = vunpack.i.l.bf16 %v4313_v62 }
 0x409   : > { %vm9302_vm10 = vmor %vm6860_vm5, %vm6764_vm2  ;;  %vm2399_vm5 = vcmp.eq.f32.partialorder %v5691_v56, %v4280_v21  ;;  %v4315_v21 = vunpack.i.h.bf16 %v4313_v62  ;;  %v9363_v62 = vmov 0 }
 0x40a   : > { %vm6923_vm0 = vmpackc.low %vm9302_vm10, %vm9301_vm3  ;;  %vm2398_vm3 = vcmp.eq.f32.partialorder %v5679_v0, %v4279_v8  ;;  %vm9314_vm10 = vcmp.lt.f32.partialorder %v8936_v48, 0.09  ;;  %v4305_v8 = vunpack.i.h.bf16 %v4303_v44 }
 0x40b   : > { %v9304_v63 = vsel %vm6923_vm0, 4294967295, %v9303_v63  ;;  %vm6929_vm12 = vmand %vm9305_vm4, %vm1799_vm15  ;;  %3816 = vmatpush3.bf16.xpose.msk.msra.mxu0 %vm6923_vm0, %v8935_v20  ;;  %vm1996_vm15 = vcmp.eq.f32.partialorder %v5831_v6, %v4294_v57  ;;  %vm2199_vm0 = vcmp.eq.f32.partialorder %v5691_v56, %v4290_v26  ;;  %v4289_v57 = vunpack.i.l.bf16 %v4288_v4  ;;  %v4308_v59 = vpop.permute.xlu0 %4307 }
 0x40c   : > { %vm6938_vm7 = vmand %vm9308_vm13, %vm1798_vm14  ;;  %3800 = vmatmul.mubr.bf16.vlgmr.msra.gmra.mxu1 %v6050_v32  ;;  %v9320_v56 = vmov 0  ;;  %v9330_v26 = vmov 0  ;;  %v9373_v4 = vmov 0 }
 0x40d   : > { %vm6956_vm13 = vmand %vm9305_vm4, %vm2399_vm5  ;;  %3835 = vmatprep.mubr.bf16.mxu1 %v6050_v32  ;;  %vm2198_vm14 = vcmp.eq.f32.partialorder %v5679_v0, %v4289_v57  ;;  %v4300_v57 = vunpack.i.h.bf16 %v4298_v61  ;;  %v9340_v61 = vmov 0  ;;  %v4309_v0 = vunpack.i.l.bf16 %v4308_v59 }
 0x40e   : > { %vm2414_vm1 = vmand %vm9313_vm9, %vm2398_vm3  ;;  %vm1997_vm3 = vcmp.eq.f32.partialorder %v5850_v7, %v4295_v43  ;;  %v9334_v43 = vmov 0 }
 0x40f   : > { %vm6966_vm8 = vmand %vm9314_vm10, %vm1996_vm15  ;;  %vm9322_vm10 = vcmp.lt.f32.partialorder %v8892_v34, 0.09  ;;  %v4304_v34 = vunpack.i.l.bf16 %v4303_v44  ;;  %v4310_v44 = vunpack.i.h.bf16 %v4308_v59  ;;  %v9386_v59 = vmov 0 }
 0x410   : > { %vm9317_vm5 = vmmov %vm9305_vm4 }
 0x411   : > { %vm6972_vm4 = vmand %vm9317_vm5, %vm2199_vm0 }
 0x412   : > { %3818 = vmatmul.mubr.bf16.vlgmr.msra.gmra.mxu0 %v6050_v32  ;;  %vm2430_vm9 = vmor %vm2414_vm1, %vm9297_vm11  ;;  %vm9325_vm1 = vcmp.lt.f32.partialorder %v8944_v16, 0.09 }
 0x413   : > { %3853 = vmatprep.mubr.bf16.mxu0 %v6050_v32  ;;  %vm2431_vm15 = vmor %vm6956_vm13, %vm9298_vm6  ;;  %vm9333_vm13 = vnez %v8983_v46  ;;  %v9403_v46 = vmov 0 }
 0x414   : > { %vm6986_vm0 = vmpackc.low %vm2431_vm15, %vm2430_vm9 }
 0x415   : > { %v9321_v56 = vsel %vm6986_vm0, 4294967295, %v9320_v56  ;;  %vm6992_vm5 = vmand %vm9322_vm10, %vm2198_vm14  ;;  %3837 = vmatprep.subr.msk.bf16.mxu0 %vm6986_vm0, %v8935_v20  ;;  %vm9332_vm10 = vnez %v8940_v28 }
 0x416   : > { %vm7001_vm2 = vmand %vm9325_vm1, %vm1997_vm3 }
 0x417   : > { %vm2230_vm14 = vmor %vm6992_vm5, %vm9297_vm11 }
 0x418   : > { %vm9328_vm9 = vmor %vm6938_vm7, %vm9297_vm11  ;;  %vm1796_vm7 = vcmp.eq.f32.partialorder %v5831_v6, %v4304_v34  ;;  %vm9342_vm11 = vcmp.lt.f32.partialorder %v8944_v16, 0.09 }
 0x419   : > { %vm9329_vm3 = vmor %vm6929_vm12, %vm9298_vm6 }
 0x41a   : > { %vm7023_vm15 = vmpackc.low %vm9329_vm3, %vm9328_vm9  ;;  %vm1797_vm9 = vcmp.eq.f32.partialorder %v5850_v7, %v4305_v8  ;;  %v9353_v8 = vmov 0 }
 0x41b   : > { %v9331_v26 = vsel %vm7023_vm15, 4294967295, %v9330_v26  ;;  %3820 = vmatpush3.bf16.xpose.msk.msra.mxu1 %vm7023_vm15, %v8935_v20  ;;  %vm2028_vm1 = vmor %vm6966_vm8, %vm9332_vm10  ;;  %vm9347_vm15 = vcmp.lt.f32.partialorder %v8924_v5, 0.09 }
 0x41c   : > { %vm2029_vm12 = vmor %vm7001_vm2, %vm9333_vm13 }
 0x41d   : > { %vm7040_vm3 = vmpackc.low %vm2029_vm12, %vm2028_vm1  ;;  %vm9339_vm1 = vcmp.lt.f32.partialorder %v8936_v48, 0.09 }
 0x41e   : > { %v9335_v43 = vsel %vm7040_vm3, 4294967295, %v9334_v43  ;;  %3821 = vmatprep.subr.msk.bf16.mxu1 %vm7040_vm3, %v8935_v20  ;;  %vm9336_vm2 = vmor %vm6972_vm4, %vm9298_vm6  ;;  %vm2396_vm6 = vcmp.eq.f32.partialorder %v5831_v6, %v4299_v50  ;;  %vm2397_vm4 = vcmp.eq.f32.partialorder %v5850_v7, %v4300_v57 }
 0x41f   : > { %vm7057_vm8 = vmpackc.low %vm9336_vm2, %vm2230_vm14  ;;  %vm1995_vm14 = vcmp.eq.f32.partialorder %v5781_v18, %v4310_v44 }
 0x420   : > { %v9338_v49 = vsel %vm7057_vm8, 4294967295, %v9337_v49  ;;  %vm7063_vm12 = vmand %vm9339_vm1, %vm1796_vm7  ;;  %3838 = vmatpush3.bf16.xpose.msk.msra.mxu0 %vm7057_vm8, %v8935_v20  ;;  %vm9346_vm8 = vcmp.lt.f32.partialorder %v8944_v16, 0.09 }
 0x421   : > { %v9341_v61 = vsel %vm7063_vm12, 4294967295, %v9340_v61  ;;  %vm7072_vm5 = vmand %vm9342_vm11, %vm1797_vm9  ;;  %vm2196_vm11 = vcmp.eq.f32.partialorder %v5831_v6, %v4314_v11  ;;  %v4323_v6 = vpop.permute.xlu0 %4322 }
 0x422   : > { %vm1829_vm2 = vmor %vm7072_vm5, %vm9333_vm13  ;;  %v4324_v50 = vunpack.i.l.bf16 %v4323_v6 }
 0x423   : > { %vm9345_vm9 = vmmov %vm9339_vm1 }
 0x424   : > { %vm2412_vm1 = vmand %vm9345_vm9, %vm2396_vm6  ;;  %vm2197_vm6 = vcmp.eq.f32.partialorder %v5850_v7, %v4315_v21  ;;  %v4318_v7 = vpop.permute.xlu1 %4317 }
 0x425   : > { %vm2413_vm3 = vmand %vm9346_vm8, %vm2397_vm4  ;;  %vm1994_vm8 = vcmp.eq.f32.partialorder %v5770_v54, %v4309_v0  ;;  %v4333_v57 = vpop.permute.xlu0 %4332  ;;  %v4320_v44 = vunpack.i.h.bf16 %v4318_v7  ;;  %v4319_v11 = vunpack.i.l.bf16 %v4318_v7  ;;  %v9370_v0 = vmov 0 }
 0x426   : > { %vm7094_vm0 = vmand %vm9347_vm15, %vm1995_vm14  ;;  %vm9355_vm14 = vcmp.lt.f32.partialorder %v8944_v16, 0.09  ;;  %v4325_v16 = vunpack.i.h.bf16 %v4323_v6  ;;  %v4335_v21 = vunpack.i.h.bf16 %v4333_v57  ;;  %v4334_v6 = vunpack.i.l.bf16 %v4333_v57 }
 0x427   : > { %vm9350_vm7 = vmmov %vm9345_vm9  ;;  %v9396_v57 = vmov 0 }
 0x428   : > { %vm7100_vm12 = vmand %vm9350_vm7, %vm2196_vm11 }
 0x429   : > { %vm2428_vm9 = vmor %vm2412_vm1, %vm9332_vm10  ;;  %vm9358_vm1 = vcmp.lt.f32.partialorder %v8922_v13, 0.09 }
 0x42a   : > { %vm2429_vm4 = vmor %vm2413_vm3, %vm9333_vm13 }
 0x42b   : > { %vm7110_vm15 = vmpackc.low %vm2429_vm4, %vm2428_vm9  ;;  %vm9361_vm9 = vnez %v9341_v61  ;;  %v4328_v61 = vpop.permute.xlu1 %4327 }
 0x42c   : > { %v9354_v8 = vsel %vm7110_vm15, 4294967295, %v9353_v8  ;;  %vm7116_vm7 = vmand %vm9355_vm14, %vm2197_vm6  ;;  %3839 = vmatprep.subr.msk.bf16.mxu0 %vm7110_vm15, %v8935_v20  ;;  %vm9365_vm14 = vnez %v8955_v53  ;;  %vm9366_vm6 = vnez %v8958_v25  ;;  %v4330_v28 = vunpack.i.h.bf16 %v4328_v61 }
 0x42d   : > { %vm7125_vm11 = vmand %vm9358_vm1, %vm1994_vm8  ;;  %v4329_v34 = vunpack.i.l.bf16 %v4328_v61 }
 0x42e   : > { %vm2228_vm3 = vmor %vm7100_vm12, %vm9332_vm10 }
 0x42f   : > { %vm9362_vm8 = vmor %vm9361_vm9, %vm9332_vm10  ;;  %vm1795_vm9 = vcmp.eq.f32.partialorder %v5781_v18, %v4325_v16  ;;  %vm9375_vm10 = vcmp.lt.f32.partialorder %v8922_v13, 0.09 }
 0x430   : > { %vm7147_vm4 = vmpackc.low %vm1829_vm2, %vm9362_vm8  ;;  %vm1794_vm2 = vcmp.eq.f32.partialorder %v5770_v54, %v4324_v50 }
 0x431   : > { %v9364_v62 = vsel %vm7147_vm4, 4294967295, %v9363_v62  ;;  %3822 = vmatpush3.bf16.xpose.msk.msra.mxu1 %vm7147_vm4, %v8935_v20  ;;  %vm2026_vm1 = vmor %vm7125_vm11, %vm9365_vm14  ;;  %vm9380_vm4 = vcmp.lt.f32.partialorder %v9053_v38, 0.09 }
 0x432   : > { %vm2027_vm5 = vmor %vm7094_vm0, %vm9366_vm6 }
 0x433   : > { %vm7164_vm8 = vmpackc.low %vm2027_vm5, %vm2026_vm1  ;;  %vm9372_vm1 = vcmp.lt.f32.partialorder %v8924_v5, 0.09  ;;  %v9419_v5 = vmov 0 }
 0x434   : > { %v9368_v10 = vsel %vm7164_vm8, 4294967295, %v9367_v10  ;;  %3823 = vmatprep.subr.msk.bf16.mxu1 %vm7164_vm8, %v8935_v20  ;;  %vm9369_vm0 = vmor %vm7116_vm7, %vm9333_vm13  ;;  %vm2395_vm13 = vcmp.eq.f32.partialorder %v5781_v18, %v4320_v44  ;;  %vm2394_vm7 = vcmp.eq.f32.partialorder %v5770_v54, %v4319_v11 }
 0x435   : > { %vm7181_vm11 = vmpackc.low %vm9369_vm0, %vm2228_vm3  ;;  %vm1993_vm3 = vcmp.eq.f32.partialorder %v6158_v42, %v4335_v21 }
 0x436   : > { %v9371_v0 = vsel %vm7181_vm11, 4294967295, %v9370_v0  ;;  %vm7187_vm5 = vmand %vm9372_vm1, %vm1795_vm9  ;;  %3840 = vmatpush3.bf16.xpose.msk.msra.mxu0 %vm7181_vm11, %v8935_v20  ;;  %vm9379_vm11 = vcmp.lt.f32.partialorder %v8922_v13, 0.09 }
 0x437   : > { %v9374_v4 = vsel %vm7187_vm5, 4294967295, %v9373_v4  ;;  %vm7196_vm12 = vmand %vm9375_vm10, %vm1794_vm2  ;;  %vm2195_vm10 = vcmp.eq.f32.partialorder %v5781_v18, %v4330_v28  ;;  %v4343_v18 = vpop.permute.xlu0 %4342 }
 0x438   : > { %vm1826_vm0 = vmor %vm7196_vm12, %vm9365_vm14  ;;  %v4344_v50 = vunpack.i.l.bf16 %v4343_v18 }
 0x439   : > { %vm9378_vm2 = vmmov %vm9372_vm1 }
 0x43a   : > { %vm2411_vm1 = vmand %vm9378_vm2, %vm2395_vm13  ;;  %vm2194_vm13 = vcmp.eq.f32.partialorder %v5770_v54, %v4329_v34  ;;  %v4338_v54 = vpop.permute.xlu1 %4337  ;;  %v9406_v34 = vmov 0 }
 0x43b   : > { %vm2410_vm8 = vmand %vm9379_vm11, %vm2394_vm7  ;;  %vm1992_vm11 = vcmp.eq.f32.partialorder %v6166_v1, %v4334_v6  ;;  %v4353_v44 = vpop.permute.xlu0 %4352  ;;  %v4340_v61 = vunpack.i.h.bf16 %v4338_v54  ;;  %v4339_v21 = vunpack.i.l.bf16 %v4338_v54 }
 0x43c   : > { %vm7218_vm15 = vmand %vm9380_vm4, %vm1993_vm3  ;;  %vm9388_vm3 = vcmp.lt.f32.partialorder %v8922_v13, 0.09  ;;  %v4345_v13 = vunpack.i.h.bf16 %v4343_v18  ;;  %v4355_v28 = vunpack.i.h.bf16 %v4353_v44  ;;  %v4354_v48 = vunpack.i.l.bf16 %v4353_v44 }
 0x43d   : > { %vm9383_vm9 = vmmov %vm9378_vm2  ;;  %v9452_v18 = vmov 0 }
 0x43e   : > { %vm7224_vm5 = vmand %vm9383_vm9, %vm2195_vm10  ;;  %vm1793_vm12 = vcmp.eq.f32.partialorder %v6158_v42, %v4345_v13  ;;  %v4348_v11 = vpop.permute.xlu1 %4347  ;;  %v9429_v13 = vmov 0 }
 0x43f   : > { %vm2426_vm2 = vmor %vm2410_vm8, %vm9365_vm14  ;;  %vm9391_vm8 = vcmp.lt.f32.partialorder %v9056_v52, 0.09  ;;  %v4349_v53 = vunpack.i.l.bf16 %v4348_v11  ;;  %v4350_v6 = vunpack.i.h.bf16 %v4348_v11 }
 0x440   : > { %vm2427_vm7 = vmor %vm2411_vm1, %vm9366_vm6  ;;  %vm9399_vm1 = vnez %v9073_v9 }
 0x441   : > { %vm7234_vm4 = vmpackc.low %vm2427_vm7, %vm2426_vm2  ;;  %vm9394_vm2 = vnez %v9374_v4  ;;  %v9400_v4 = vmov 0 }
 0x442   : > { %v9387_v59 = vsel %vm7234_vm4, 4294967295, %v9386_v59  ;;  %vm7240_vm9 = vmand %vm9388_vm3, %vm2194_vm13  ;;  %3841 = vmatprep.subr.msk.bf16.mxu0 %vm7234_vm4, %v8935_v20  ;;  %vm9398_vm3 = vnez %v9070_v47 }
 0x443   : > { %vm7249_vm10 = vmand %vm9391_vm8, %vm1992_vm11 }
 0x444   : > { %vm2226_vm13 = vmor %vm7240_vm9, %vm9365_vm14  ;;  %vm9408_vm14 = vcmp.lt.f32.partialorder %v9056_v52, 0.09 }
 0x445   : > { %vm9395_vm11 = vmor %vm9394_vm2, %vm9366_vm6  ;;  %vm1792_vm2 = vcmp.eq.f32.partialorder %v6166_v1, %v4344_v50 }
 0x446   : > { %vm7271_vm7 = vmpackc.low %vm9395_vm11, %vm1826_vm0 }
 0x447   : > { %v9397_v57 = vsel %vm7271_vm7, 4294967295, %v9396_v57  ;;  %3824 = vmatpush3.bf16.xpose.msk.msra.mxu1 %vm7271_vm7, %v8935_v20  ;;  %vm2024_vm8 = vmor %vm7249_vm10, %vm9398_vm3  ;;  %vm9413_vm7 = vcmp.lt.f32.partialorder %v9085_v40, 0.09 }
 0x448   : > { %vm2025_vm0 = vmor %vm7218_vm15, %vm9399_vm1 }
 0x449   : > { %vm7288_vm11 = vmpackc.low %vm2025_vm0, %vm2024_vm8  ;;  %vm9405_vm8 = vcmp.lt.f32.partialorder %v9053_v38, 0.09 }
 0x44a   : > { %v9401_v4 = vsel %vm7288_vm11, 4294967295, %v9400_v4  ;;  %3825 = vmatprep.subr.msk.bf16.mxu1 %vm7288_vm11, %v8935_v20  ;;  %vm9402_vm15 = vmor %vm7224_vm5, %vm9366_vm6  ;;  %vm2393_vm6 = vcmp.eq.f32.partialorder %v6158_v42, %v4340_v61  ;;  %vm2392_vm5 = vcmp.eq.f32.partialorder %v6166_v1, %v4339_v21  ;;  %v9433_v21 = vmov 0 }
 0x44b   : > { %vm7305_vm10 = vmpackc.low %vm9402_vm15, %vm2226_vm13  ;;  %vm1991_vm13 = vcmp.eq.f32.partialorder %v6263_v30, %v4355_v28 }
 0x44c   : > { %v9404_v46 = vsel %vm7305_vm10, 4294967295, %v9403_v46  ;;  %vm7311_vm0 = vmand %vm9405_vm8, %vm1793_vm12  ;;  %3842 = vmatpush3.bf16.xpose.msk.msra.mxu0 %vm7305_vm10, %v8935_v20  ;;  %vm9412_vm10 = vcmp.lt.f32.partialorder %v9056_v52, 0.09 }
 0x44d   : > { %v9407_v34 = vsel %vm7311_vm0, 4294967295, %v9406_v34  ;;  %vm7320_vm9 = vmand %vm9408_vm14, %vm1792_vm2  ;;  %vm2192_vm14 = vcmp.eq.f32.partialorder %v6166_v1, %v4349_v53  ;;  %v4363_v1 = vpop.permute.xlu0 %4362  ;;  %v9439_v53 = vmov 0 }
 0x44e   : > { %vm1824_vm15 = vmor %vm7320_vm9, %vm9398_vm3  ;;  %v4364_v16 = vunpack.i.l.bf16 %v4363_v1 }
 0x44f   : > { %vm9411_vm2 = vmmov %vm9405_vm8 }
 0x450   : > { %vm2409_vm8 = vmand %vm9411_vm2, %vm2393_vm6  ;;  %vm2193_vm6 = vcmp.eq.f32.partialorder %v6158_v42, %v4350_v6  ;;  %v4358_v42 = vpop.permute.xlu1 %4357 }
 0x451   : > { %vm2408_vm11 = vmand %vm9412_vm10, %vm2392_vm5  ;;  %v4373_v50 = vpop.permute.xlu0 %4372  ;;  %v4360_v44 = vunpack.i.h.bf16 %v4358_v42  ;;  %v4359_v11 = vunpack.i.l.bf16 %v4358_v42  ;;  %v9462_v42 = vmov 0 }
 0x452   : > { %vm7342_vm4 = vmand %vm9413_vm7, %vm1991_vm13  ;;  %vm9421_vm13 = vcmp.lt.f32.partialorder %v9053_v38, 0.09  ;;  %v4365_v38 = vunpack.i.h.bf16 %v4363_v1  ;;  %v4375_v28 = vunpack.i.h.bf16 %v4373_v50  ;;  %v4374_v6 = vunpack.i.l.bf16 %v4373_v50 }
 0x453   : > { %vm9416_vm12 = vmmov %vm9412_vm10  ;;  %vm1990_vm10 = vcmp.eq.f32.partialorder %v6272_v27, %v4354_v48 }
 0x454   : > { %vm7348_vm0 = vmand %vm9416_vm12, %vm2192_vm14  ;;  %vm1791_vm9 = vcmp.eq.f32.partialorder %v6263_v30, %v4365_v38  ;;  %v4368_v61 = vpop.permute.xlu1 %4367 }
 0x455   : > { %vm2424_vm2 = vmor %vm2408_vm11, %vm9398_vm3  ;;  %vm9424_vm11 = vcmp.lt.f32.partialorder %v9093_v23, 0.09  ;;  %v4370_v47 = vunpack.i.h.bf16 %v4368_v61  ;;  %v4369_v25 = vunpack.i.l.bf16 %v4368_v61 }
 0x456   : > { %vm2425_vm5 = vmor %vm2409_vm8, %vm9399_vm1 }
 0x457   : > { %vm7358_vm7 = vmpackc.low %vm2425_vm5, %vm2424_vm2  ;;  %vm9427_vm2 = vnez %v9407_v34  ;;  %v9436_v34 = vmov 0 }
 0x458   : > { %v9420_v5 = vsel %vm7358_vm7, 4294967295, %v9419_v5  ;;  %vm7364_vm12 = vmand %vm9421_vm13, %vm2193_vm6  ;;  %3843 = vmatprep.subr.msk.bf16.mxu0 %vm7358_vm7, %v8935_v20  ;;  %vm9431_vm13 = vnez %v9103_v60  ;;  %vm9432_vm6 = vnez %v9115_v41  ;;  %v9509_v41 = vmov 0 }
 0x459   : > { %vm7373_vm14 = vmand %vm9424_vm11, %vm1990_vm10 }
 0x45a   : > { %vm2224_vm8 = vmor %vm7348_vm0, %vm9398_vm3  ;;  %vm9441_vm3 = vcmp.lt.f32.partialorder %v9093_v23, 0.09 }
 0x45b   : > { %vm9428_vm10 = vmor %vm9427_vm2, %vm9399_vm1  ;;  %vm1790_vm2 = vcmp.eq.f32.partialorder %v6272_v27, %v4364_v16 }
 0x45c   : > { %vm7395_vm5 = vmpackc.low %vm9428_vm10, %vm1824_vm15 }
 0x45d   : > { %v9430_v13 = vsel %vm7395_vm5, 4294967295, %v9429_v13  ;;  %3826 = vmatpush3.bf16.xpose.msk.msra.mxu1 %vm7395_vm5, %v8935_v20  ;;  %vm2022_vm11 = vmor %vm7373_vm14, %vm9431_vm13  ;;  %vm9446_vm5 = vcmp.lt.f32.partialorder %v9142_v24, 0.09 }
 0x45e   : > { %vm2023_vm15 = vmor %vm7342_vm4, %vm9432_vm6 }
 0x45f   : > { %vm7412_vm10 = vmpackc.low %vm2023_vm15, %vm2022_vm11  ;;  %vm9438_vm11 = vcmp.lt.f32.partialorder %v9085_v40, 0.09  ;;  %v4378_v40 = vpop.permute.xlu1 %4377 }
 0x460   : > { %v9434_v21 = vsel %vm7412_vm10, 4294967295, %v9433_v21  ;;  %3827 = vmatprep.subr.msk.bf16.mxu1 %vm7412_vm10, %v8935_v20  ;;  %vm9435_vm4 = vmor %vm7364_vm12, %vm9399_vm1  ;;  %vm2391_vm1 = vcmp.eq.f32.partialorder %v6263_v30, %v4360_v44  ;;  %vm2390_vm12 = vcmp.eq.f32.partialorder %v6272_v27, %v4359_v11  ;;  %v4380_v16 = vunpack.i.h.bf16 %v4378_v40 }
 0x461   : > { %vm7429_vm14 = vmpackc.low %vm9435_vm4, %vm2224_vm8  ;;  %vm1989_vm8 = vcmp.eq.f32.partialorder %v6421_v37, %v4375_v28  ;;  %v4379_v50 = vunpack.i.l.bf16 %v4378_v40  ;;  %v9466_v44 = vmov 0  ;;  %v9469_v11 = vmov 0 }
 0x462   : > { %v9437_v34 = vsel %vm7429_vm14, 4294967295, %v9436_v34  ;;  %vm7435_vm15 = vmand %vm9438_vm11, %vm1791_vm9  ;;  %3844 = vmatpush3.bf16.xpose.msk.msra.mxu0 %vm7429_vm14, %v8935_v20  ;;  %vm9445_vm14 = vcmp.lt.f32.partialorder %v9093_v23, 0.09 }
 0x463   : > { %v9440_v53 = vsel %vm7435_vm15, 4294967295, %v9439_v53  ;;  %vm7444_vm0 = vmand %vm9441_vm3, %vm1790_vm2  ;;  %vm2191_vm3 = vcmp.eq.f32.partialorder %v6263_v30, %v4370_v47  ;;  %v4383_v30 = vpop.permute.xlu0 %4382  ;;  %v4388_v38 = vpop.permute.xlu1 %4387 }
 0x464   : > { %vm1822_vm4 = vmor %vm7444_vm0, %vm9431_vm13  ;;  %v4384_v52 = vunpack.i.l.bf16 %v4383_v30  ;;  %v4390_v28 = vunpack.i.h.bf16 %v4388_v38  ;;  %v4389_v60 = vunpack.i.l.bf16 %v4388_v38  ;;  %v9499_v38 = vmov 0 }
 0x465   : > { %vm9444_vm2 = vmmov %vm9438_vm11 }
 0x466   : > { %vm2407_vm11 = vmand %vm9444_vm2, %vm2391_vm1  ;;  %vm2190_vm1 = vcmp.eq.f32.partialorder %v6272_v27, %v4369_v25  ;;  %v9495_v27 = vmov 0  ;;  %v9608_v25 = vld [vmem:[#allocation55_spill] sm:$0xff] }
 0x467   : > { %vm2406_vm10 = vmand %vm9445_vm14, %vm2390_vm12  ;;  %vm1988_vm14 = vcmp.eq.f32.partialorder %v6428_v15, %v4374_v6  ;;  %v4393_v54 = vpop.permute.xlu0 %4392  ;;  %v4398_v48 = vpop.permute.xlu1 %4397  ;;  %v9612_v6 = vld [vmem:[#allocation57_spill] sm:$0xff] }
 0x468   : > { %vm7466_vm7 = vmand %vm9446_vm5, %vm1989_vm8  ;;  %vm9454_vm8 = vcmp.lt.f32.partialorder %v9093_v23, 0.09  ;;  %v4385_v23 = vunpack.i.h.bf16 %v4383_v30  ;;  %v4395_v61 = vunpack.i.h.bf16 %v4393_v54  ;;  %v4394_v9 = vunpack.i.l.bf16 %v4393_v54 }
 0x469   : > { %vm9449_vm9 = vmmov %vm9444_vm2  ;;  %v4399_v54 = vunpack.i.l.bf16 %v4398_v48  ;;  %v9541_v30 = vmov 0 }
 0x46a   : > { %vm7472_vm15 = vmand %vm9449_vm9, %vm2191_vm3  ;;  %vm1789_vm0 = vcmp.eq.f32.partialorder %v6421_v37, %v4385_v23  ;;  %v4400_v23 = vunpack.i.h.bf16 %v4398_v48 }
 0x46b   : > { %vm2422_vm2 = vmor %vm2406_vm10, %vm9431_vm13  ;;  %vm9457_vm10 = vcmp.lt.f32.partialorder %v9144_v55, 0.09  ;;  %v4403_v47 = vpop.permute.xlu0 %4402  ;;  %v4408_v1 = vpop.permute.xlu1 %4407 }
 0x46c   : > { %vm2423_vm12 = vmor %vm2407_vm11, %vm9432_vm6  ;;  %v4404_v40 = vunpack.i.l.bf16 %v4403_v47 }
 0x46d   : > { %vm7482_vm5 = vmpackc.low %vm2423_vm12, %vm2422_vm2  ;;  %vm9460_vm2 = vnez %v9440_v53  ;;  %v9472_v53 = vmov 0 }
 0x46e   : > { %v9453_v18 = vsel %vm7482_vm5, 4294967295, %v9452_v18  ;;  %vm7488_vm9 = vmand %vm9454_vm8, %vm2190_vm1  ;;  %3845 = vmatprep.subr.msk.bf16.mxu0 %vm7482_vm5, %v8935_v20  ;;  %vm9464_vm8 = vnez %v9157_v51  ;;  %vm9478_vm5 = vcmp.lt.f32.partialorder %v9182_v39, 0.09  ;;  %v9518_v51 = vmov 0 }
 0x46f   : > { %vm7497_vm3 = vmand %vm9457_vm10, %vm1988_vm14  ;;  %v4413_v7 = vpop.permute.xlu0 %4412 }
 0x470   : > { %vm2222_vm1 = vmor %vm7488_vm9, %vm9431_vm13  ;;  %vm9474_vm13 = vcmp.lt.f32.partialorder %v9144_v55, 0.09 }
 0x471   : > { %vm9461_vm14 = vmor %vm9460_vm2, %vm9432_vm6  ;;  %vm9465_vm2 = vnez %v9154_v35 }
 0x472   : > { %vm7519_vm12 = vmpackc.low %vm9461_vm14, %vm1822_vm4  ;;  %vm1788_vm14 = vcmp.eq.f32.partialorder %v6428_v15, %v4384_v52 }
 0x473   : > { %v9463_v42 = vsel %vm7519_vm12, 4294967295, %v9462_v42  ;;  %3828 = vmatpush3.bf16.xpose.msk.msra.mxu1 %vm7519_vm12, %v8935_v20  ;;  %vm2020_vm10 = vmor %vm7497_vm3, %vm9464_vm8  ;;  %v4423_v52 = vpop.permute.xlu0 %4422 }
 0x474   : > { %vm2021_vm4 = vmor %vm7466_vm7, %vm9465_vm2 }
 0x475   : > { %vm7536_vm11 = vmpackc.low %vm2021_vm4, %vm2020_vm10  ;;  %vm9471_vm10 = vcmp.lt.f32.partialorder %v9142_v24, 0.09  ;;  %v9488_v24 = vmov 0 }
 0x476   : > { %v9467_v44 = vsel %vm7536_vm11, 4294967295, %v9466_v44  ;;  %3829 = vmatprep.subr.msk.bf16.mxu1 %vm7536_vm11, %v8935_v20  ;;  %vm9468_vm7 = vmor %vm7472_vm15, %vm9432_vm6  ;;  %vm2389_vm6 = vcmp.eq.f32.partialorder %v6421_v37, %v4380_v16  ;;  %vm2388_vm15 = vcmp.eq.f32.partialorder %v6428_v15, %v4379_v50  ;;  %vm9477_vm11 = vcmp.lt.f32.partialorder %v9144_v55, 0.09  ;;  %v9490_v55 = vld [vmem:[#allocation14_spill] sm:$0xff] }
 0x477   : > { %vm7553_vm3 = vmpackc.low %vm9468_vm7, %vm2222_vm1  ;;  %vm1987_vm1 = vcmp.eq.f32.partialorder %v6557_v45, %v4395_v61  ;;  %v4410_v16 = vunpack.i.h.bf16 %v4408_v1  ;;  %v4414_v50 = vunpack.i.l.bf16 %v4413_v7  ;;  %v4425_v61 = vunpack.i.h.bf16 %v4423_v52 }
 0x478   : > { %v9470_v11 = vsel %vm7553_vm3, 4294967295, %v9469_v11  ;;  %vm7559_vm4 = vmand %vm9471_vm10, %vm1789_vm0  ;;  %3846 = vmatpush3.bf16.xpose.msk.msra.mxu0 %vm7553_vm3, %v8935_v20  ;;  %vm2189_vm0 = vcmp.eq.f32.partialorder %v6421_v37, %v4390_v28  ;;  %vm2188_vm3 = vcmp.eq.f32.partialorder %v6428_v15, %v4389_v60  ;;  %v4405_v15 = vunpack.i.h.bf16 %v4403_v47  ;;  %v4418_v37 = vpop.permute.xlu1 %4417 }
 0x479   : > { %v9473_v53 = vsel %vm7559_vm4, 4294967295, %v9472_v53  ;;  %vm7568_vm9 = vmand %vm9474_vm13, %vm1788_vm14  ;;  %v4415_v28 = vunpack.i.h.bf16 %v4413_v7  ;;  %v4409_v60 = vunpack.i.l.bf16 %v4408_v1  ;;  %v4424_v47 = vunpack.i.l.bf16 %v4423_v52 }
 0x47a   : > { %vm1820_vm14 = vmor %vm7568_vm9, %vm9464_vm8  ;;  %vm1786_vm9 = vcmp.eq.f32.partialorder %v6566_v29, %v4404_v40  ;;  %v4419_v48 = vunpack.i.l.bf16 %v4418_v37  ;;  %v4420_v7 = vunpack.i.h.bf16 %v4418_v37  ;;  %v9545_v1 = vmov 0  ;;  %v9604_v37 = vld [vmem:[#allocation53_spill] sm:$0xff] }
 0x47b   : > { %vm2405_vm13 = vmand %vm9471_vm10, %vm2389_vm6 }
 0x47c   : > { %vm2404_vm12 = vmand %vm9477_vm11, %vm2388_vm15  ;;  %vm9487_vm15 = vnez %v9154_v35  ;;  %v9516_v35 = vmov 0 }
 0x47d   : > { %vm7591_vm2 = vmand %vm9478_vm5, %vm1987_vm1 }
 0x47e   : > { %vm9481_vm7 = vmmov %vm9471_vm10 }
 0x47f   : > { %vm7597_vm4 = vmand %vm9481_vm7, %vm2189_vm0 }
 0x480   : > { %vm9484_vm6 = vmmov %vm9477_vm11  ;;  %vm1986_vm11 = vcmp.eq.f32.partialorder %v6566_v29, %v4394_v9  ;;  %v9513_v9 = vmov 0 }
 0x481   : > { %vm7603_vm10 = vmand %vm9484_vm6, %vm2188_vm3  ;;  %vm9491_vm3 = vcmp.lt.f32.partialorder %v9490_v55, 0.09  ;;  %vm1787_vm6 = vcmp.eq.f32.partialorder %v6557_v45, %v4405_v15  ;;  %v9614_v15 = vld [vmem:[#allocation56_spill] sm:$0xff] }
 0x482   : > { %vm2420_vm5 = vmor %vm2404_vm12, %vm9464_vm8  ;;  %vm9503_vm12 = vnez %v9211_v17  ;;  %v9579_v17 = vld [vmem:[#allocation65_spill] sm:$0xff] }
 0x483   : > { %vm2421_vm1 = vmor %vm2405_vm13, %vm9487_vm15 }
 0x484   : > { %vm7612_vm0 = vmpackc.low %vm2421_vm1, %vm2420_vm5  ;;  %vm9497_vm1 = vnez %v9473_v53  ;;  %v9504_v53 = vmov 0 }
 0x485   : > { %v9489_v24 = vsel %vm7612_vm0, 4294967295, %v9488_v24  ;;  %vm7618_vm7 = vmand %vm9491_vm3, %vm1986_vm11  ;;  %3847 = vmatprep.subr.msk.bf16.mxu0 %vm7612_vm0, %v8935_v20  ;;  %vm9494_vm11 = vcmp.lt.f32.partialorder %v9182_v39, 0.09 }
 0x486   : > { %vm7636_vm5 = vmand %vm9494_vm11, %vm1787_vm6  ;;  %vm9502_vm6 = vnez %v9199_v3 }
 0x487   : > { %v9496_v27 = vsel %vm7636_vm5, 4294967295, %v9495_v27  ;;  %vm9498_vm3 = vmor %vm9497_vm1, %vm9487_vm15  ;;  %vm2387_vm1 = vcmp.eq.f32.partialorder %v6557_v45, %v4400_v23 }
 0x488   : > { %vm7650_vm13 = vmpackc.low %vm9498_vm3, %vm1820_vm14 }
 0x489   : > { %v9500_v38 = vsel %vm7650_vm13, 4294967295, %v9499_v38  ;;  %3830 = vmatpush3.bf16.xpose.msk.msra.mxu1 %vm7650_vm13, %v8935_v20  ;;  %vm2018_vm11 = vmor %vm7618_vm7, %vm9502_vm6  ;;  %vm2386_vm7 = vcmp.eq.f32.partialorder %v6566_v29, %v4399_v54  ;;  %vm9512_vm13 = vcmp.lt.f32.partialorder %v9490_v55, 0.09  ;;  %v9550_v54 = vmov 0 }
 0x48a   : > { %9501 = vst [vmem:[#allocation27_spill] sm:$0xff] %v9500_v38  ;;  %vm2019_vm14 = vmor %vm7591_vm2, %vm9503_vm12 }
 0x48b   : > { %vm7667_vm3 = vmpackc.low %vm2019_vm14, %vm2018_vm11 }
 0x48c   : > { %v9505_v53 = vsel %vm7667_vm3, 4294967295, %v9504_v53  ;;  %3831 = vmatprep.subr.msk.bf16.mxu1 %vm7667_vm3, %v8935_v20  ;;  %vm9507_vm2 = vmor %vm7603_vm10, %vm9464_vm8  ;;  %vm2187_vm8 = vcmp.eq.f32.partialorder %v6557_v45, %v4410_v16  ;;  %vm9515_vm10 = vcmp.lt.f32.partialorder %v9182_v39, 0.09  ;;  %v9521_v45 = vmov 0 }
 0x48d   : > { %9506 = vst [vmem:[#allocation26_spill] sm:$0xff] %v9505_v53  ;;  %vm9508_vm11 = vmor %vm7597_vm4, %vm9487_vm15  ;;  %vm1984_vm15 = vcmp.eq.f32.partialorder %v6739_v14, %v4414_v50  ;;  %v9530_v39 = vmov 0  ;;  %v9556_v16 = vmov 0  ;;  %v9586_v50 = vld [vmem:[#allocation64_spill] sm:$0xff] }
 0x48e   : > { %vm7685_vm14 = vmpackc.low %vm9508_vm11, %vm9507_vm2  ;;  %vm1785_vm2 = vcmp.eq.f32.partialorder %v6732_v22, %v4425_v61  ;;  %vm1985_vm11 = vcmp.eq.f32.partialorder %v6732_v22, %v4415_v28  ;;  %v9588_v61 = vld [vmem:[#allocation67_spill] sm:$0xff] }
 0x48f   : > { %v9510_v41 = vsel %vm7685_vm14, 4294967295, %v9509_v41  ;;  %vm7691_vm0 = vmand %vm9512_vm13, %vm1786_vm9  ;;  %3848 = vmatpush3.bf16.xpose.msk.msra.mxu0 %vm7685_vm14, %v8935_v20  ;;  %vm2186_vm14 = vcmp.eq.f32.partialorder %v6566_v29, %v4409_v60  ;;  %v9590_v28 = vld [vmem:[#allocation47_spill] sm:$0xff]  ;;  %v9592_v60 = vld [vmem:[#allocation69_spill] sm:$0xff] }
 0x490   : > { %9511 = vst [vmem:[#allocation37_spill] sm:$0xff] %v9510_v41  ;;  %v9514_v9 = vsel %vm7691_vm0, 4294967295, %v9513_v9  ;;  %vm7701_vm4 = vmand %vm9515_vm10, %vm2387_vm1  ;;  %vm9526_vm1 = vcmp.lt.f32.partialorder %v9241_v33, 0.09  ;;  %v9606_v29 = vld [vmem:[#allocation52_spill] sm:$0xff] }
 0x491   : > { %v9517_v35 = vsel %vm7701_vm4, 4294967295, %v9516_v35  ;;  %vm7709_vm9 = vmand %vm9512_vm13, %vm2386_vm7  ;;  %vm1784_vm13 = vcmp.eq.f32.partialorder %v6739_v14, %v4424_v47  ;;  %vm9523_vm4 = vcmp.lt.f32.partialorder %v9243_v19, 0.09  ;;  %v9594_v47 = vld [vmem:[#allocation46_spill] sm:$0xff] }
 0x492   : > { %v9519_v51 = vsel %vm7709_vm9, 4294967295, %v9518_v51  ;;  %vm9520_vm3 = vmmov %vm9515_vm10  ;;  %vm9532_vm10 = vcmp.lt.f32.partialorder %v9490_v55, 0.09  ;;  %v4428_v55 = vpop.permute.xlu1 %4427 }
 0x493   : > { %vm7725_vm7 = vmand %vm9520_vm3, %vm2187_vm8  ;;  %v4430_v40 = vunpack.i.h.bf16 %v4428_v55  ;;  %v4429_v23 = vunpack.i.l.bf16 %v4428_v55  ;;  %v9620_v55 = vld [vmem:[#allocation59_spill] sm:$0xff] }
 0x494   : > { %v9522_v45 = vsel %vm7725_vm7, 4294967295, %v9521_v45  ;;  %vm7732_vm9 = vmand %vm9523_vm4, %vm1984_vm15  ;;  %vm2384_vm7 = vcmp.eq.f32.partialorder %v6739_v14, %v4419_v48  ;;  %v9616_v48 = vld [vmem:[#allocation29_spill] sm:$0xff] }
 0x495   : > { %vm7738_vm5 = vmand %vm9526_vm1, %vm1785_vm2 }
 0x496   : > { %vm9529_vm3 = vmmov %vm9526_vm1  ;;  %vm9538_vm1 = vnez %v9256_v2  ;;  %v9584_v2 = vld [vmem:[#allocation68_spill] sm:$0xff] }
 0x497   : > { %vm7744_vm8 = vmand %vm9529_vm3, %vm1985_vm11  ;;  %vm9537_vm11 = vnez %v9253_v12 }
 0x498   : > { %v9531_v39 = vsel %vm7744_vm8, 4294967295, %v9530_v39  ;;  %vm7750_vm0 = vmand %vm9532_vm10, %vm2186_vm14  ;;  %vm2385_vm8 = vcmp.eq.f32.partialorder %v6732_v22, %v4420_v7  ;;  %v9618_v7 = vld [vmem:[#allocation28_spill] sm:$0xff] }
 0x499   : > { %vm7756_vm15 = vmand %vm9523_vm4, %vm1784_vm13  ;;  %vm9539_vm13 = vnez %v9519_v51  ;;  %vm9540_vm4 = vnez %v9517_v35  ;;  %v9598_v35 = vld [vmem:[#allocation48_spill] sm:$0xff]  ;;  %v9600_v51 = vld [vmem:[#allocation50_spill] sm:$0xff] }
 0x49a   : > { %vm1817_vm14 = vmor %vm7738_vm5, %vm9537_vm11 }
 0x49b   : > { %vm1816_vm10 = vmor %vm7756_vm15, %vm9538_vm1  ;;  %vm9552_vm15 = vnez %v9514_v9  ;;  %v9596_v9 = vld [vmem:[#allocation49_spill] sm:$0xff] }
 0x49c   : > { %vm2418_vm3 = vmor %vm9539_vm13, %vm9502_vm6  ;;  %vm9544_vm13 = vcmp.lt.f32.partialorder %v9243_v19, 0.09 }
 0x49d   : > { %vm2419_vm2 = vmor %vm9540_vm4, %vm9503_vm12 }
 0x49e   : > { %vm7781_vm5 = vmpackc.low %vm2419_vm2, %vm2418_vm3  ;;  %vm9549_vm3 = vcmp.lt.f32.partialorder %v9241_v33, 0.09 }
 0x49f   : > { %v9542_v30 = vsel %vm7781_vm5, 4294967295, %v9541_v30  ;;  %3849 = vmatprep.subr.msk.bf16.mxu0 %vm7781_vm5, %v8935_v20  ;;  %vm7795_vm4 = vmand %vm9544_vm13, %vm2384_vm7  ;;  %vm9554_vm7 = vnez %v9496_v27  ;;  %v9561_v27 = vmov 0 }
 0x4a0   : > { %9543 = vst [vmem:[#allocation36_spill] sm:$0xff] %v9542_v30  ;;  %v9546_v1 = vsel %vm7795_vm4, 4294967295, %v9545_v1  ;;  %vm7799_vm2 = vmpackc.low %vm1817_vm14, %vm1816_vm10  ;;  %vm9559_vm10 = vnez %v9253_v12  ;;  %v9583_v12 = vld [vmem:[#allocation66_spill] sm:$0xff] }
 0x4a1   : > { %vm7805_vm11 = vmand %vm9549_vm3, %vm2385_vm8 }
 0x4a2   : > { %v9551_v54 = vsel %vm7805_vm11, 4294967295, %v9550_v54  ;;  %vm9553_vm5 = vmor %vm9552_vm15, %vm9502_vm6  ;;  %vm9560_vm15 = vnez %v9531_v39  ;;  %vm9570_vm11 = vcmp.lt.f32.partialorder %v9243_v19, 0.09  ;;  %v9574_v19 = vld [vmem:[#allocation62_spill] sm:$0xff] }
 0x4a3   : > { %vm9555_vm13 = vmor %vm9554_vm7, %vm9503_vm12  ;;  %vm2185_vm7 = vcmp.eq.f32.partialorder %v6732_v22, %v4430_v40  ;;  %v9610_v39 = vld [vmem:[#allocation54_spill] sm:$0xff] }
 0x4a4   : > { %vm7819_vm14 = vmpackc.low %vm9555_vm13, %vm9553_vm5  ;;  %vm2184_vm13 = vcmp.eq.f32.partialorder %v6739_v14, %v4429_v23  ;;  %v9622_v40 = vld [vmem:[#allocation58_spill] sm:$0xff] }
 0x4a5   : > { %v9557_v16 = vsel %vm7819_vm14, 4294967295, %v9556_v16  ;;  %3832 = vmatpush3.bf16.xpose.msk.msra.mxu1 %vm7819_vm14, %v8935_v20  ;;  %vm2016_vm8 = vmor %vm7732_vm9, %vm9538_vm1  ;;  %vm9565_vm14 = vnez %v9522_v45  ;;  %v9602_v45 = vld [vmem:[#allocation51_spill] sm:$0xff]  ;;  %v9626_v23 = vld [vmem:[#allocation30_spill] sm:$0xff] }
 0x4a6   : > { %9558 = vst [vmem:[#allocation39_spill] sm:$0xff] %v9557_v16  ;;  %vm2017_vm3 = vmor %vm9560_vm15, %vm9559_vm10 }
 0x4a7   : > { %vm7835_vm5 = vmpackc.low %vm2017_vm3, %vm2016_vm8  ;;  %vm9569_vm3 = vcmp.lt.f32.partialorder %v9241_v33, 0.09  ;;  %v9581_v33 = vld [vmem:[#allocation63_spill] sm:$0xff] }
 0x4a8   : > { %v9562_v27 = vsel %vm7835_vm5, 4294967295, %v9561_v27  ;;  %3833 = vmatprep.subr.msk.bf16.mxu1 %vm7835_vm5, %v8935_v20  ;;  %vm9564_vm9 = vmor %vm7750_vm0, %vm9502_vm6 }
 0x4a9   : > { %9563 = vst [vmem:[#allocation38_spill] sm:$0xff] %v9562_v27  ;;  %vm9566_vm15 = vmor %vm9565_vm14, %vm9503_vm12  ;;  %vm9573_vm14 = vnez %v9546_v1  ;;  %v9624_v1 = vld [vmem:[#allocation31_spill] sm:$0xff] }
 0x4aa   : > { %vm7853_vm8 = vmpackc.low %vm9566_vm15, %vm9564_vm9  ;;  %vm9585_vm9 = vnez %v9584_v2  ;;  %vm9587_vm15 = vnez %v9586_v50 }
 0x4ab   : > { %3850 = vmatpush3.bf16.xpose.msk.msra.mxu0 %vm7853_vm8, %v8935_v20  ;;  %vm2201_vm5 = vmand %vm9569_vm3, %vm2185_vm7  ;;  %vm9589_vm3 = vnez %v9588_v61 }
 0x4ac   : > { %vm2200_vm4 = vmand %vm9570_vm11, %vm2184_vm13  ;;  %vm9575_vm11 = vnez %v9574_v19 }
 0x4ad   : > { %vm2216_vm0 = vmor %vm2200_vm4, %vm9538_vm1  ;;  %3834 = vmatpush3.bf16.xpose.msk.msra.mxu1 %vm7799_vm2, %v8935_v20  ;;  %vm9576_vm4 = vnez %v9551_v54  ;;  %v9628_v54 = vld [vmem:[#allocation33_spill] sm:$0xff] }
 0x4ae   : > { %vm2217_vm12 = vmor %vm2201_vm5, %vm9559_vm10  ;;  %3855 = vmatprep.subr.msk.bf16.mxu1 %vm9575_vm11, %v8935_v20 }
 0x4af   : > { %vm7868_vm6 = vmpackc.low %vm2217_vm12, %vm2216_vm0  ;;  %vm9591_vm0 = vnez %v9590_v28  ;;  %vm9593_vm12 = vnez %v9592_v60 }
 0x4b0   : > { %vm2416_vm7 = vmor %vm9573_vm14, %vm9538_vm1  ;;  %vm9580_vm1 = vnez %v9579_v17  ;;  %vm9595_vm14 = vnez %v9594_v47 }
 0x4b1   : > { %vm2417_vm5 = vmor %vm9576_vm4, %vm9559_vm10  ;;  %vm9582_vm10 = vnez %v9581_v33  ;;  %vm9599_vm4 = vnez %v9598_v35 }
 0x4b2   : > { %vm7886_vm13 = vmpackc.low %vm2417_vm5, %vm2416_vm7  ;;  %vm9597_vm7 = vnez %v9596_v9  ;;  %vm9601_vm5 = vnez %v9600_v51 }
 0x4b3   : > { %3851 = vmatprep.subr.msk.bf16.mxu0 %vm7886_vm13, %v8935_v20 }
 0x4b4   : > { %3852 = vmatpush3.bf16.xpose.msk.msra.mxu0 %vm7868_vm6, %v8935_v20  ;;  %3836 = vmatmul.mubr.bf16.vlgmr.msra.gmra.mxu1 %v6050_v32 }
 0x4b5   : > { %3873 = vmatprep.subr.msk.bf16.mxu0 %vm9580_vm1, %v8935_v20  ;;  %3856 = vmatpush3.bf16.xpose.msk.msra.mxu1 %vm9582_vm10, %v8935_v20 }
 0x4b6   : > { %3871 = vmatprep.mubr.bf16.mxu1 %v9583_v12  ;;  %3857 = vmatprep.subr.msk.bf16.mxu1 %vm9585_vm9, %v8935_v20 }
 0x4bb   : > { %3854 = vmatmul.mubr.bf16.vlgmr.msra.gmra.mxu0 %v6050_v32 }
 0x4bc   : > { %3874 = vmatpush3.bf16.xpose.msk.msra.mxu0 %vm9587_vm15, %v8935_v20  ;;  %3889 = vmatprep.mubr.bf16.mxu0 %v9583_v12 }
 0x4bd   : > { %3875 = vmatprep.subr.msk.bf16.mxu0 %vm9589_vm3, %v8935_v20  ;;  %3858 = vmatpush3.bf16.xpose.msk.msra.mxu1 %vm9591_vm0, %v8935_v20  ;;  %vm9603_vm0 = vnez %v9602_v45 }
 0x4be   : > { %3859 = vmatprep.subr.msk.bf16.mxu1 %vm9593_vm12, %v8935_v20  ;;  %vm9605_vm12 = vnez %v9604_v37 }
 0x4c4   : > { %3876 = vmatpush3.bf16.xpose.msk.msra.mxu0 %vm9595_vm14, %v8935_v20  ;;  %vm9607_vm14 = vnez %v9606_v29 }
 0x4c5   : > { %3877 = vmatprep.subr.msk.bf16.mxu0 %vm9597_vm7, %v8935_v20  ;;  %3860 = vmatpush3.bf16.xpose.msk.msra.mxu1 %vm9599_vm4, %v8935_v20  ;;  %vm9609_vm7 = vnez %v9608_v25  ;;  %vm9611_vm4 = vnez %v9610_v39 }
 0x4c6   : > { %3861 = vmatprep.subr.msk.bf16.mxu1 %vm9601_vm5, %v8935_v20  ;;  %vm9613_vm5 = vnez %v9612_v6 }
 0x4cc   : > { %3878 = vmatpush3.bf16.xpose.msk.msra.mxu0 %vm9603_vm0, %v8935_v20  ;;  %vm9615_vm0 = vnez %v9614_v15 }
 0x4cd   : > { %3879 = vmatprep.subr.msk.bf16.mxu0 %vm9605_vm12, %v8935_v20  ;;  %3862 = vmatpush3.bf16.xpose.msk.msra.mxu1 %vm9607_vm14, %v8935_v20  ;;  %vm9617_vm12 = vnez %v9616_v48  ;;  %vm9619_vm14 = vnez %v9618_v7 }
 0x4ce   : > { %3863 = vmatprep.subr.msk.bf16.mxu1 %vm9609_vm7, %v8935_v20  ;;  %vm9621_vm7 = vnez %v9620_v55 }
 0x4d4   : > { %3880 = vmatpush3.bf16.xpose.msk.msra.mxu0 %vm9611_vm4, %v8935_v20  ;;  %vm9623_vm4 = vnez %v9622_v40  ;;  %v9632_v40 = vld [vmem:[#allocation32_spill] sm:$0xff] }
 0x4d5   : > { %3881 = vmatprep.subr.msk.bf16.mxu0 %vm9613_vm5, %v8935_v20  ;;  %3864 = vmatpush3.bf16.xpose.msk.msra.mxu1 %vm9615_vm0, %v8935_v20  ;;  %vm9625_vm5 = vnez %v9624_v1  ;;  %vm9627_vm0 = vnez %v9626_v23  ;;  %v9634_v1 = vld [vmem:[#allocation35_spill] sm:$0xff]  ;;  %v9636_v23 = vld [vmem:[#allocation34_spill] sm:$0xff] }
 0x4d6   : > { %3865 = vmatprep.subr.msk.bf16.mxu1 %vm9617_vm12, %v8935_v20  ;;  %vm9629_vm12 = vnez %v9628_v54 }
 0x4dc   : > { %3882 = vmatpush3.bf16.xpose.msk.msra.mxu0 %vm9619_vm14, %v8935_v20  ;;  %vm9630_vm14 = vnez %v9246_v58 }
 0x4dd   : > { %3883 = vmatprep.subr.msk.bf16.mxu0 %vm9621_vm7, %v8935_v20  ;;  %3866 = vmatpush3.bf16.xpose.msk.msra.mxu1 %vm9623_vm4, %v8935_v20  ;;  %vm9631_vm7 = vnez %v9286_v36  ;;  %vm9633_vm4 = vnez %v9632_v40 }
 0x4de   : > { %3867 = vmatprep.subr.msk.bf16.mxu1 %vm9625_vm5, %v8935_v20  ;;  %vm9635_vm5 = vnez %v9634_v1 }
 0x4e4   : > { %3884 = vmatpush3.bf16.xpose.msk.msra.mxu0 %vm9627_vm0, %v8935_v20  ;;  %vm9637_vm0 = vnez %v9636_v23 }
 0x4e5   : > { %3885 = vmatprep.subr.msk.bf16.mxu0 %vm9629_vm12, %v8935_v20  ;;  %3868 = vmatpush3.bf16.xpose.msk.msra.mxu1 %vm9630_vm14, %v8935_v20  ;;  %vm9638_vm12 = vnez %v9300_v31  ;;  %vm9639_vm14 = vnez %v9304_v63 }
 0x4e6   : > { %3869 = vmatprep.subr.msk.bf16.mxu1 %vm9631_vm7, %v8935_v20  ;;  %vm9640_vm7 = vnez %v9321_v56 }
 0x4ec   : > { %3886 = vmatpush3.bf16.xpose.msk.msra.mxu0 %vm9633_vm4, %v8935_v20  ;;  %vm9649_vm4 = vnez %v9397_v57 }
 0x4ed   : > { %3887 = vmatprep.subr.msk.bf16.mxu0 %vm9635_vm5, %v8935_v20  ;;  %3870 = vmatpush3.bf16.xpose.msk.msra.mxu1 %vm9637_vm0, %v8935_v20  ;;  %vm9641_vm5 = vnez %v9331_v26  ;;  %vm9642_vm0 = vnez %v9335_v43 }
 0x4ee   : > { %3891 = vmatprep.subr.msk.bf16.mxu1 %vm9638_vm12, %v8935_v20  ;;  %vm9646_vm12 = vnez %v9368_v10 }
 0x4f4   : > { %3888 = vmatpush3.bf16.xpose.msk.msra.mxu0 %vm9639_vm14, %v8935_v20  ;;  %3872 = vmatmul.mubr.bf16.vlgmr.msra.gmra.mxu1 %v9583_v12  ;;  %vm9643_vm14 = vnez %v9338_v49 }
 0x4f5   : > { %3909 = vmatprep.subr.msk.bf16.mxu0 %vm9640_vm7, %v8935_v20  ;;  %3892 = vmatpush3.bf16.xpose.msk.msra.mxu1 %vm9641_vm5, %v8935_v20  ;;  %vm9644_vm7 = vnez %v9354_v8  ;;  %vm9645_vm5 = vnez %v9364_v62 }
 0x4f6   : > { %3907 = vmatprep.mubr.bf16.mxu1 %v9583_v12  ;;  %3893 = vmatprep.subr.msk.bf16.mxu1 %vm9642_vm0, %v8935_v20  ;;  %vm9647_vm0 = vnez %v9371_v0 }
 0x4fb   : > { %3890 = vmatmul.mubr.bf16.vlgmr.msra.gmra.mxu0 %v9583_v12 }
 0x4fc   : > { %3910 = vmatpush3.bf16.xpose.msk.msra.mxu0 %vm9643_vm14, %v8935_v20  ;;  %3925 = vmatprep.mubr.bf16.mxu0 %v9583_v12  ;;  %vm9648_vm14 = vnez %v9387_v59 }
 0x4fd   : > { %3911 = vmatprep.subr.msk.bf16.mxu0 %vm9644_vm7, %v8935_v20  ;;  %3894 = vmatpush3.bf16.xpose.msk.msra.mxu1 %vm9645_vm5, %v8935_v20  ;;  %vm9650_vm7 = vnez %v9401_v4  ;;  %vm9651_vm5 = vnez %v9404_v46 }
 0x4fe   : > { %3895 = vmatprep.subr.msk.bf16.mxu1 %vm9646_vm12, %v8935_v20  ;;  %vm9652_vm12 = vnez %v9420_v5 }
 0x504   : > { %3912 = vmatpush3.bf16.xpose.msk.msra.mxu0 %vm9647_vm0, %v8935_v20  ;;  %vm9653_vm0 = vnez %v9430_v13 }
 0x505   : > { %3913 = vmatprep.subr.msk.bf16.mxu0 %vm9648_vm14, %v8935_v20  ;;  %3896 = vmatpush3.bf16.xpose.msk.msra.mxu1 %vm9649_vm4, %v8935_v20  ;;  %vm9654_vm14 = vnez %v9434_v21  ;;  %vm9655_vm4 = vnez %v9437_v34 }
 0x506   : > { %3897 = vmatprep.subr.msk.bf16.mxu1 %vm9650_vm7, %v8935_v20  ;;  %vm9656_vm7 = vnez %v9453_v18 }
 0x50c   : > { %3914 = vmatpush3.bf16.xpose.msk.msra.mxu0 %vm9651_vm5, %v8935_v20  ;;  %vm9657_vm5 = vnez %v9463_v42 }
 0x50d   : > { %3915 = vmatprep.subr.msk.bf16.mxu0 %vm9652_vm12, %v8935_v20  ;;  %3898 = vmatpush3.bf16.xpose.msk.msra.mxu1 %vm9653_vm0, %v8935_v20  ;;  %vm9658_vm12 = vnez %v9467_v44  ;;  %vm9659_vm0 = vnez %v9470_v11 }
 0x50e   : > { %3899 = vmatprep.subr.msk.bf16.mxu1 %vm9654_vm14, %v8935_v20  ;;  %vm9660_vm14 = vnez %v9489_v24 }
 0x514   : > { %3916 = vmatpush3.bf16.xpose.msk.msra.mxu0 %vm9655_vm4, %v8935_v20  ;;  %vm9661_vm4 = vnez %v9500_v38  ;;  %v979_v38 = vunpack.c.l.bf16 %v6050_v32 }
 0x515   : > { %3917 = vmatprep.subr.msk.bf16.mxu0 %vm9656_vm7, %v8935_v20  ;;  %3900 = vmatpush3.bf16.xpose.msk.msra.mxu1 %vm9657_vm5, %v8935_v20  ;;  %vm9662_vm7 = vnez %v9505_v53  ;;  %vm9663_vm5 = vnez %v9510_v41  ;;  %v980_v53 = vunpack.c.h.bf16 %v6050_v32 }
 0x516   : > { %3901 = vmatprep.subr.msk.bf16.mxu1 %vm9658_vm12, %v8935_v20  ;;  %vm9664_vm12 = vnez %v9542_v30 }
 0x51c   : > { %3918 = vmatpush3.bf16.xpose.msk.msra.mxu0 %vm9659_vm0, %v8935_v20  ;;  %vm9665_vm0 = vnez %v9557_v16  ;;  %v9667_v16 = vld [vmem:[#allocation45_spill] sm:$0xff] }
 0x51d   : > { %3919 = vmatprep.subr.msk.bf16.mxu0 %vm9660_vm14, %v8935_v20  ;;  %3902 = vmatpush3.bf16.xpose.msk.msra.mxu1 %vm9661_vm4, %v8935_v20  ;;  %vm9666_vm14 = vnez %v9562_v27  ;;  %v981_v30 = vsub.f32 %v9667_v16, %v979_v38  ;;  %v9668_v27 = vld [vmem:[#allocation44_spill] sm:$0xff]  ;;  %v9685_v38 = vld [vmem:[#allocation58_spill] sm:$0xff] }
 0x51e   : > { %3903 = vmatprep.subr.msk.bf16.mxu1 %vm9662_vm7, %v8935_v20  ;;  %v982_v41 = vsub.f32 %v9668_v27, %v980_v53  ;;  %v9687_v53 = vld [vmem:[#allocation31_spill] sm:$0xff] }
 0x520   : > { %v8097_v32 = vpack.c.bf16 %v982_v41, %v981_v30  ;;  %v9689_v41 = vld [vmem:[#allocation30_spill] sm:$0xff] }
 0x524   : > { %3920 = vmatpush3.bf16.xpose.msk.msra.mxu0 %vm9663_vm5, %v8935_v20 }
 0x525   : > { %3921 = vmatprep.subr.msk.bf16.mxu0 %vm9664_vm12, %v8935_v20  ;;  %3904 = vmatpush3.bf16.xpose.msk.msra.mxu1 %vm9665_vm0, %v8935_v20 }
 0x526   : > { %3905 = vmatprep.subr.msk.bf16.mxu1 %vm9666_vm14, %v8935_v20 }
 0x52c   : > { %3922 = vmatpush3.bf16.xpose.msk.msra.mxu0 %vm7853_vm8, %v8935_v20 }
 0x52d   : > { %3923 = vmatprep.subr.msk.bf16.mxu0 %vm7886_vm13, %v8935_v20  ;;  %3906 = vmatpush3.bf16.xpose.msk.msra.mxu1 %vm7799_vm2, %v8935_v20 }
 0x52e   : > { %3927 = vmatprep.subr.msk.bf16.mxu1 %vm9575_vm11, %v8935_v20  ;;  %vm9669_vm11 = vnez %v9590_v28 }
 0x534   : > { %3924 = vmatpush3.bf16.xpose.msk.msra.mxu0 %vm7868_vm6, %v8935_v20  ;;  %3908 = vmatmul.mubr.bf16.vlgmr.msra.gmra.mxu1 %v9583_v12 }
 0x535   : > { %3945 = vmatprep.subr.msk.bf16.mxu0 %vm9580_vm1, %v8935_v20  ;;  %3928 = vmatpush3.bf16.xpose.msk.msra.mxu1 %vm9582_vm10, %v8935_v20  ;;  %vm9670_vm1 = vnez %v9592_v60  ;;  %vm9671_vm10 = vnez %v9594_v47 }
 0x536   : > { %3943 = vmatprep.mubr.bf16.mxu1 %v8097_v32  ;;  %3929 = vmatprep.subr.msk.bf16.mxu1 %vm9585_vm9, %v8935_v20  ;;  %vm9672_vm9 = vnez %v9596_v9 }
 0x53b   : > { %3926 = vmatmul.mubr.bf16.vlgmr.msra.gmra.mxu0 %v9583_v12 }
 0x53c   : > { %3946 = vmatpush3.bf16.xpose.msk.msra.mxu0 %vm9587_vm15, %v8935_v20  ;;  %3961 = vmatprep.mubr.bf16.mxu0 %v8097_v32  ;;  %vm9673_vm15 = vnez %v9598_v35  ;;  %v8319_v35 = vld [vmem:[%s4723_s27] sm:$0xff] }
 0x53d   : > { %3947 = vmatprep.subr.msk.bf16.mxu0 %vm9589_vm3, %v8935_v20  ;;  %3930 = vmatpush3.bf16.xpose.msk.msra.mxu1 %vm9669_vm11, %v8935_v20  ;;  %vm9674_vm3 = vnez %v9600_v51  ;;  %vm9675_vm11 = vnez %v9602_v45 }
 0x53e   : > { %3931 = vmatprep.subr.msk.bf16.mxu1 %vm9670_vm1, %v8935_v20  ;;  %vm9676_vm1 = vnez %v9604_v37 }
 0x544   : > { %3948 = vmatpush3.bf16.xpose.msk.msra.mxu0 %vm9671_vm10, %v8935_v20  ;;  %vm9677_vm10 = vnez %v9606_v29 }
 0x545   : > { %3949 = vmatprep.subr.msk.bf16.mxu0 %vm9672_vm9, %v8935_v20  ;;  %3932 = vmatpush3.bf16.xpose.msk.msra.mxu1 %vm9673_vm15, %v8935_v20  ;;  %vm9678_vm9 = vnez %v9608_v25  ;;  %vm9679_vm15 = vnez %v9610_v39 }
 0x546   : > { %3933 = vmatprep.subr.msk.bf16.mxu1 %vm9674_vm3, %v8935_v20  ;;  %vm9680_vm3 = vnez %v9612_v6 }
 0x54c   : > { %3950 = vmatpush3.bf16.xpose.msk.msra.mxu0 %vm9675_vm11, %v8935_v20  ;;  %vm9681_vm11 = vnez %v9614_v15 }
 0x54d   : > { %3951 = vmatprep.subr.msk.bf16.mxu0 %vm9676_vm1, %v8935_v20  ;;  %3934 = vmatpush3.bf16.xpose.msk.msra.mxu1 %vm9677_vm10, %v8935_v20  ;;  %vm9682_vm1 = vnez %v9616_v48  ;;  %vm9683_vm10 = vnez %v9618_v7 }
 0x54e   : > { %3935 = vmatprep.subr.msk.bf16.mxu1 %vm9678_vm9, %v8935_v20  ;;  %vm9684_vm9 = vnez %v9620_v55 }
 0x554   : > { %3952 = vmatpush3.bf16.xpose.msk.msra.mxu0 %vm9679_vm15, %v8935_v20  ;;  %vm9686_vm15 = vnez %v9685_v38 }
 0x555   : > { %3953 = vmatprep.subr.msk.bf16.mxu0 %vm9680_vm3, %v8935_v20  ;;  %3936 = vmatpush3.bf16.xpose.msk.msra.mxu1 %vm9681_vm11, %v8935_v20  ;;  %vm9688_vm3 = vnez %v9687_v53  ;;  %vm9690_vm11 = vnez %v9689_v41 }
 0x556   : > { %3937 = vmatprep.subr.msk.bf16.mxu1 %vm9682_vm1, %v8935_v20  ;;  %vm9691_vm1 = vnez %v9628_v54 }
 0x55c   : > { %3954 = vmatpush3.bf16.xpose.msk.msra.mxu0 %vm9683_vm10, %v8935_v20  ;;  %vm9692_vm10 = vnez %v9246_v58 }
 0x55d   : > { %3955 = vmatprep.subr.msk.bf16.mxu0 %vm9684_vm9, %v8935_v20  ;;  %3938 = vmatpush3.bf16.xpose.msk.msra.mxu1 %vm9686_vm15, %v8935_v20  ;;  %vm9693_vm9 = vnez %v9286_v36  ;;  %vm9694_vm15 = vnez %v9632_v40 }
 0x55e   : > { %3939 = vmatprep.subr.msk.bf16.mxu1 %vm9688_vm3, %v8935_v20  ;;  %vm9695_vm3 = vnez %v9634_v1 }
 0x564   : > { %3956 = vmatpush3.bf16.xpose.msk.msra.mxu0 %vm9690_vm11, %v8935_v20  ;;  %vm9696_vm11 = vnez %v9636_v23 }
 0x565   : > { %3957 = vmatprep.subr.msk.bf16.mxu0 %vm9691_vm1, %v8935_v20  ;;  %3940 = vmatpush3.bf16.xpose.msk.msra.mxu1 %vm9692_vm10, %v8935_v20  ;;  %vm9697_vm1 = vnez %v9300_v31  ;;  %vm9698_vm10 = vnez %v9304_v63 }
 0x566   : > { %3941 = vmatprep.subr.msk.bf16.mxu1 %vm9693_vm9, %v8935_v20  ;;  %vm9699_vm9 = vnez %v9321_v56 }
 0x56c   : > { %3958 = vmatpush3.bf16.xpose.msk.msra.mxu0 %vm9694_vm15, %v8935_v20  ;;  %vm9700_vm15 = vnez %v9331_v26 }
 0x56d   : > { %3959 = vmatprep.subr.msk.bf16.mxu0 %vm9695_vm3, %v8935_v20  ;;  %3942 = vmatpush3.bf16.xpose.msk.msra.mxu1 %vm9696_vm11, %v8935_v20  ;;  %vm9701_vm3 = vnez %v9335_v43  ;;  %vm9702_vm11 = vnez %v9338_v49  ;;  %v2506_v43 = vpop.f32.mrf.mxu1 }
 0x56e   : > { %3963 = vmatprep.subr.msk.bf16.mxu1 %vm9697_vm1, %v8935_v20  ;;  %vm9703_vm1 = vnez %v9354_v8  ;;  %v2549_v8 = vpop.f32.mrf.mxu0 }
 0x56f   : > { %v2508_v49 = vpop.f32.mrf.mxu1 }
 0x574   : > { %3960 = vmatpush3.bf16.xpose.msk.msra.mxu0 %vm9698_vm10, %v8935_v20  ;;  %3944 = vmatmul.mubr.bf16.vlgmr.msra.gmra.mxu1 %v8097_v32  ;;  %vm9704_vm10 = vnez %v9364_v62  ;;  %v2510_v62 = vpop.f32.mrf.mxu1 }
 0x575   : > { %3981 = vmatprep.subr.msk.bf16.mxu0 %vm9699_vm9, %v8935_v20  ;;  %3964 = vmatpush3.bf16.xpose.msk.msra.mxu1 %vm9700_vm15, %v8935_v20  ;;  %vm9705_vm9 = vnez %v9368_v10  ;;  %vm9706_vm15 = vnez %v9371_v0  ;;  %v2551_v10 = vpop.f32.mrf.mxu0 }
 0x576   : > { %3979 = vmatprep.mubr.bf16.mxu1 %v8097_v32  ;;  %3965 = vmatprep.subr.msk.bf16.mxu1 %vm9701_vm3, %v8935_v20  ;;  %vm9707_vm3 = vnez %v9387_v59  ;;  %v2512_v0 = vpop.f32.mrf.mxu1 }
 0x577   : > { %v2553_v59 = vpop.f32.mrf.mxu0 }
 0x57b   : > { %3962 = vmatmul.mubr.bf16.vlgmr.msra.gmra.mxu0 %v8097_v32 }
 0x57c   : > { %3982 = vmatpush3.bf16.xpose.msk.msra.mxu0 %vm9702_vm11, %v8935_v20  ;;  %3997 = vmatprep.mubr.bf16.mxu0 %v8097_v32  ;;  %vm9708_vm11 = vnez %v9397_v57  ;;  %v8301_v57 = vpop.f32.mrf.mxu1 }
 0x57d   : > { %3983 = vmatprep.subr.msk.bf16.mxu0 %vm9703_vm1, %v8935_v20  ;;  %3966 = vmatpush3.bf16.xpose.msk.msra.mxu1 %vm9704_vm10, %v8935_v20  ;;  %vm9709_vm1 = vnez %v9401_v4  ;;  %vm9710_vm10 = vnez %v9404_v46  ;;  %v2555_v4 = vpop.f32.mrf.mxu0 }
 0x57e   : > { %3967 = vmatprep.subr.msk.bf16.mxu1 %vm9705_vm9, %v8935_v20  ;;  %vm9711_vm9 = vnez %v9420_v5  ;;  %v8303_v46 = vpop.f32.mrf.mxu1 }
 0x57f   : > { %v8305_v5 = vpop.f32.mrf.mxu0 }
 0x584   : > { %3984 = vmatpush3.bf16.xpose.msk.msra.mxu0 %vm9706_vm15, %v8935_v20  ;;  %vm9712_vm15 = vnez %v9430_v13  ;;  %v8307_v13 = vpop.f32.mrf.mxu1 }
 0x585   : > { %3985 = vmatprep.subr.msk.bf16.mxu0 %vm9707_vm3, %v8935_v20  ;;  %3968 = vmatpush3.bf16.xpose.msk.msra.mxu1 %vm9708_vm11, %v8935_v20  ;;  %vm9713_vm3 = vnez %v9434_v21  ;;  %vm9714_vm11 = vnez %v9437_v34 }
 0x586   : > { %3969 = vmatprep.subr.msk.bf16.mxu1 %vm9709_vm1, %v8935_v20  ;;  %vm9715_vm1 = vnez %v9453_v18  ;;  %v8311_v21 = vpop.f32.mrf.mxu1 }
 0x58c   : > { %3986 = vmatpush3.bf16.xpose.msk.msra.mxu0 %vm9710_vm10, %v8935_v20  ;;  %vm9716_vm10 = vnez %v9463_v42 }
 0x58d   : > { %3987 = vmatprep.subr.msk.bf16.mxu0 %vm9711_vm9, %v8935_v20  ;;  %3970 = vmatpush3.bf16.xpose.msk.msra.mxu1 %vm9712_vm15, %v8935_v20  ;;  %vm9717_vm9 = vnez %v9467_v44  ;;  %vm9718_vm15 = vnez %v9470_v11 }
 0x58e   : > { %3971 = vmatprep.subr.msk.bf16.mxu1 %vm9713_vm3, %v8935_v20  ;;  %vm9719_vm3 = vnez %v9489_v24 }
 0x594   : > { %3988 = vmatpush3.bf16.xpose.msk.msra.mxu0 %vm9714_vm11, %v8935_v20 }
 0x595   : > { %3989 = vmatprep.subr.msk.bf16.mxu0 %vm9715_vm1, %v8935_v20  ;;  %3972 = vmatpush3.bf16.xpose.msk.msra.mxu1 %vm9716_vm10, %v8935_v20 }
 0x596   : > { %3973 = vmatprep.subr.msk.bf16.mxu1 %vm9717_vm9, %v8935_v20 }
 0x59c   : > { %3990 = vmatpush3.bf16.xpose.msk.msra.mxu0 %vm9718_vm15, %v8935_v20 }
 0x59d   : > { %3991 = vmatprep.subr.msk.bf16.mxu0 %vm9719_vm3, %v8935_v20  ;;  %3974 = vmatpush3.bf16.xpose.msk.msra.mxu1 %vm9661_vm4, %v8935_v20 }
 0x59e   : > { %3975 = vmatprep.subr.msk.bf16.mxu1 %vm9662_vm7, %v8935_v20 }
 0x5a4   : > { %3992 = vmatpush3.bf16.xpose.msk.msra.mxu0 %vm9663_vm5, %v8935_v20 }
 0x5a5   : > { %3993 = vmatprep.subr.msk.bf16.mxu0 %vm9664_vm12, %v8935_v20  ;;  %3976 = vmatpush3.bf16.xpose.msk.msra.mxu1 %vm9665_vm0, %v8935_v20 }
 0x5a6   : > { %3977 = vmatprep.subr.msk.bf16.mxu1 %vm9666_vm14, %v8935_v20 }
 0x5ac   : > { %3994 = vmatpush3.bf16.xpose.msk.msra.mxu0 %vm7853_vm8, %v8935_v20 }
 0x5ad   : > { %3995 = vmatprep.subr.msk.bf16.mxu0 %vm7886_vm13, %v8935_v20  ;;  %3978 = vmatpush3.bf16.xpose.msk.msra.mxu1 %vm7799_vm2, %v8935_v20 }
 0x5b4   : > { %3996 = vmatpush3.bf16.xpose.msk.msra.mxu0 %vm7868_vm6, %v8935_v20  ;;  %3980 = vmatmul.mubr.bf16.vlgmr.msra.gmra.mxu1 %v8097_v32  ;;  %v8309_v20 = vpop.f32.mrf.mxu0  ;;  %v2678_v18 = vpop.f32.mrf.mxu1 }
 0x5b5   : > { %v2679_v12 = vadd.f32 %v2678_v18, %v2506_v43 }
 0x5b6   : > { %v8313_v34 = vpop.f32.mrf.mxu0  ;;  %v2680_v44 = vpop.f32.mrf.mxu1 }
 0x5b7   : > { %v2681_v61 = vadd.f32 %v2680_v44, %v2508_v49 }
 0x5b8   : > { %v8315_v42 = vpop.f32.mrf.mxu0  ;;  %v2682_v24 = vpop.f32.mrf.mxu1 }
 0x5b9   : > { %v2683_v47 = vadd.f32 %v2682_v24, %v2510_v62 }
 0x5ba   : > { %v2684_v52 = vpop.f32.mrf.mxu1 }
 0x5bb   : > { %3998 = vmatmul.mubr.bf16.vlgmr.msra.gmra.mxu0 %v8097_v32  ;;  %v2721_v11 = vpop.f32.mrf.mxu0  ;;  %v2685_v25 = vadd.f32 %v2684_v52, %v2512_v0 }
 0x5bc   : > { %v2722_v37 = vadd.f32 %v2721_v11, %v2549_v8 }
 0x5bd   : > { %v2723_v30 = vpop.f32.mrf.mxu0 }
 0x5be   : > { %v2724_v48 = vadd.f32 %v2723_v30, %v2551_v10 }
 0x5bf   : > { %v2725_v16 = vpop.f32.mrf.mxu0 }
 0x5c0   : > { %v2726_v23 = vadd.f32 %v2725_v16, %v2553_v59 }
 0x5c1   : > { %v2727_v22 = vpop.f32.mrf.mxu0 }
 0x5c2   : > { %v2728_v53 = vadd.f32 %v2727_v22, %v2555_v4 }
 0x5f4   : > { %v2764_v27 = vpop.f32.mrf.mxu1 }
 0x5f5   : > { %v2765_v63 = vadd.f32 %v2764_v27, %v8301_v57 }
 0x5f6   : > { %v2766_v14 = vpop.f32.mrf.mxu1 }
 0x5f7   : > { %v2767_v26 = vadd.f32 %v2766_v14, %v8303_v46 }
 0x5f8   : > { %v2768_v3 = vpop.f32.mrf.mxu1 }
 0x5f9   : > { %v2769_v8 = vadd.f32 %v2768_v3, %v8307_v13 }
 0x5fa   : > { %v2770_v33 = vpop.f32.mrf.mxu1 }
 0x5fb   : > { %v2807_v19 = vpop.f32.mrf.mxu0  ;;  %v2771_v4 = vadd.f32 %v2770_v33, %v8311_v21 }
 0x5fc   : > { %v2808_v0 = vadd.f32 %v2807_v19, %v8305_v5 }
 0x5fd   : > { %v2809_v17 = vpop.f32.mrf.mxu0 }
 0x5fe   : > { %v2810_v44 = vadd.f32 %v2809_v17, %v8309_v20 }
 0x5ff   : > { %v2811_v2 = vpop.f32.mrf.mxu0 }
 0x600   : > { %v2812_v21 = vadd.f32 %v2811_v2, %v8313_v34 }
 0x601   : > { %v2813_v9 = vpop.f32.mrf.mxu0 }
 0x602   : > { %v2814_v16 = vadd.f32 %v2813_v9, %v8315_v42 }
 0x634   : > { %v2850_v50 = vpop.f32.mrf.mxu1 }
 0x635   : > { %v2988_v28 = vadd.f32 %v2850_v50, %v2679_v12 }
 0x636   : > { %v2852_v60 = vpop.f32.mrf.mxu1 }
 0x637   : > { %v3004_v51 = vsub.f32 %v2988_v28, %v8319_v35  ;;  %v2989_v45 = vadd.f32 %v2852_v60, %v2681_v61 }
 0x638   : > { %v2854_v29 = vpop.f32.mrf.mxu1 }
 0x639   : > { %3005 = vst [vmem:[%s8322_s28] sm:$0xff] %v3004_v51  ;;  %v3007_v39 = vsub.f32 %v2989_v45, %v8319_v35  ;;  %v2996_v15 = vadd.f32 %v2854_v29, %v2683_v47 }
 0x63a   : > { %v2856_v55 = vpop.f32.mrf.mxu1 }
 0x63b   : > { %v2893_v6 = vpop.f32.mrf.mxu0  ;;  %3746 = vst [vmem:[%s8322_s28 + $0x10] sm:$0xff] %v3007_v39  ;;  %3006 = vst [vmem:[%s8322_s28 + $0x8] sm:$0xff] %v2996_v15  ;;  %v2997_v1 = vadd.f32 %v2856_v55, %v2685_v25 }
 0x63c   : > { %v2990_v7 = vadd.f32 %v2893_v6, %v2722_v37 }
 0x63d   : > { %v2895_v40 = vpop.f32.mrf.mxu0  ;;  %3747 = vst [vmem:[%s8322_s28 + $0x18] sm:$0xff] %v2997_v1 }
 0x63e   : > { %v3011_v54 = vsub.f32 %v2990_v7, %v8319_v35  ;;  %v2991_v32 = vadd.f32 %v2895_v40, %v2724_v48 }
 0x63f   : > { %v2897_v38 = vpop.f32.mrf.mxu0 }
 0x640   : > { %3748 = vst [vmem:[%s8322_s28 + $0x20] sm:$0xff] %v3011_v54  ;;  %v3015_v41 = vsub.f32 %v2991_v32, %v8319_v35  ;;  %v2998_v58 = vadd.f32 %v2897_v38, %v2726_v23 }
 0x641   : > { %v2899_v36 = vpop.f32.mrf.mxu0 }
 0x642   : > { %3750 = vst [vmem:[%s8322_s28 + $0x30] sm:$0xff] %v3015_v41  ;;  %3749 = vst [vmem:[%s8322_s28 + $0x28] sm:$0xff] %v2998_v58  ;;  %v2999_v31 = vadd.f32 %v2899_v36, %v2728_v53 }
 0x644   : > { %3751 = vst [vmem:[%s8322_s28 + $0x38] sm:$0xff] %v2999_v31 }
 0x674   : > { %v2936_v56 = vpop.f32.mrf.mxu1 }
 0x675   : > { %v2992_v43 = vadd.f32 %v2936_v56, %v2765_v63 }
 0x676   : > { %v2938_v49 = vpop.f32.mrf.mxu1 }
 0x677   : > { %v3019_v62 = vsub.f32 %v2992_v43, %v8319_v35  ;;  %v2993_v10 = vadd.f32 %v2938_v49, %v2767_v26 }
 0x678   : > { %v2940_v59 = vpop.f32.mrf.mxu1 }
 0x679   : > { %3752 = vst [vmem:[%s8322_s28 + $0x40] sm:$0xff] %v3019_v62  ;;  %v3023_v57 = vsub.f32 %v2993_v10, %v8319_v35  ;;  %v3000_v18 = vadd.f32 %v2940_v59, %v2769_v8 }
 0x67a   : > { %v2942_v11 = vpop.f32.mrf.mxu1 }
 0x67b   : > { %v2979_v46 = vpop.f32.mrf.mxu0  ;;  %3754 = vst [vmem:[%s8322_s28 + $0x50] sm:$0xff] %v3023_v57  ;;  %3753 = vst [vmem:[%s8322_s28 + $0x48] sm:$0xff] %v3000_v18  ;;  %v3001_v5 = vadd.f32 %v2942_v11, %v2771_v4 }
 0x67c   : > { %v2994_v13 = vadd.f32 %v2979_v46, %v2808_v0 }
 0x67d   : > { %v2981_v24 = vpop.f32.mrf.mxu0  ;;  %3755 = vst [vmem:[%s8322_s28 + $0x58] sm:$0xff] %v3001_v5 }
 0x67e   : > { %v3027_v30 = vsub.f32 %v2994_v13, %v8319_v35  ;;  %v2995_v52 = vadd.f32 %v2981_v24, %v2810_v44 }
 0x67f   : > { %v2983_v20 = vpop.f32.mrf.mxu0 }
 0x680   : > { %3756 = vst [vmem:[%s8322_s28 + $0x60] sm:$0xff] %v3027_v30  ;;  %v3031_v27 = vsub.f32 %v2995_v52, %v8319_v35  ;;  %v3002_v22 = vadd.f32 %v2983_v20, %v2812_v21 }
 0x681   : > { %v2985_v14 = vpop.f32.mrf.mxu0 }
 0x682   : > { %3758 = vst [vmem:[%s8322_s28 + $0x70] sm:$0xff] %v3031_v27  ;;  %3757 = vst [vmem:[%s8322_s28 + $0x68] sm:$0xff] %v3002_v22  ;;  %v3003_v34 = vadd.f32 %v2985_v14, %v2814_v16 }
 0x684   : > { %3759 = vst [vmem:[%s8322_s28 + $0x78] sm:$0xff] %v3003_v34 }
 0x685   : > { %4502 = shalt.err (!%p4499_p7)
}
 0x686   : > { %s4503_s18 = scalar_lea.hbm %s8357_s15, 2048  ;;  %s4507_s5 = scalar_lea.hbm %s8412_s2, 4096 }
 0x687   : > { %p4504_p1 = scmp.ne.s32.totalorder %s8357_s15, %s4503_s18  ;;  %p4508_p3 = scmp.lt.s32.totalorder %s8357_s15, %s8412_s2 }
 0x688   : > { %p4509_p8 = scmp.lt.s32.totalorder %s4507_s5, %s4503_s18 }
 0x689   : > { %p4505_p10 = pnand %p4504_p1, %p4654_p9 }
 0x68a   : > { %p4510_p0 = por %p4509_p8, %p4508_p3 }
 0x68b   : > { %p4506_p13 = pneg %p4505_p10 }
 0x68d   : > { %p4511_p2 = pnand %p4510_p0, %p4506_p13 }
 0x68f   : > { %4514 = shalt.err (!%p4511_p2)
}
 0x690   : > { %s4586_s21 = smov 128   ;;  %s4587_s28 = smov 8  }
 0x691   : > { %4035 = dma.vmem_to_hbm [thread:$0]  (%p4654_p9), %s8359_s3, 2048, %s8357_s15, %s3036_s12, %s4586_s21, %s4586_s21, %s4587_s28  }
 0x692 PF: > { %s3065_s29 = sand.u32 1, %s4553_s9   ;;  %p4045_p5 = pnand %p3160_p12, %p4661_p11 }
 0x693   : > { %s3066_s7 = scalar_lea.sflag [#allocation4], %s3065_s29 }
 0x694   : > { %p4046_p6 = pneg %p4045_p5 }
 0x696   : > { %4548 = dma.done.wait (%p4046_p6), %s3066_s7, 2048  }
 0x697   : > { %4550 = vsyncadd (%p4046_p6), %s3066_s7, 4294965248  ;;  %s21_s14 = sadd.s32 1, %s4573_s14   ;;  %s9726_s9 = smov %s4557_s10 }
 0x698   : > { %p18_p4 = scmp.ge.s32.totalorder %s21_s14, 4   ;;  %s9727_s10 = smov %s4561_s11 }
 0x699   : > { %s9728_s11 = smov %s4659_s23  ;;  %s9729_s12 = smov %s4569_s13 }
 0x69a   : > { %s9730_s13 = smov %s9732_s17  ;;  %20 = sbr.rel (!%p18_p4) target bundleno = 8 (0x8), region = 93 }
 0x69f   :  { %3071 = vsyncpa [#allocation3], 1 }
 0x6a0   :  { %3073 = vsyncpa [#allocation3 + $0x1], 1 }
 0x6a1   :  { %3074 = vsyncpa [#allocation6], 1 }
 0x6a2   :  { %3076 = vsyncpa [#allocation6 + $0x1], 1 }
 0x6a3   :  { %3077 = vsyncpa [#allocation4], 1 }
 0x6a4   :  { %3079 = vsyncpa [#allocation4 + $0x1], 1 }

</bundles_post_ra>
